<compile_context>
chip_gen: v7x
topology: tpu7x:2x2x1
jax: 0.10.0
libtpu: 0.0.40
codegen_flags: <defaults>
</compile_context>

<pallas_src>
import functools

import jax
import jax.numpy as jnp
from jax.experimental import pallas as pl
from jax.experimental.pallas import tpu as pltpu


def _round_up(v, m):
    return ((v + m - 1) // m) * m


@functools.partial(jax.jit, static_argnames=("eps", "t_hw", "n_par"))
def fused_mul_conv_bn(x, s, w, gamma, beta, eps=1e-5, t_hw=2048, n_par=1):
    # x: [N, Cin, H, W] (NCHW), s: [1, Cin, 1, 1], w: [Cout, Cin, 1, 1]
    N, Cin, H, W = x.shape
    Cout = w.shape[0]
    HW = H * W
    rows = N * HW                      # reduction size for batch statistics

    # --- Kernel 1 tiling: lane-dense spatial tiles, no padding of x. ---
    t = min(t_hw, _round_up(HW, 128))
    n_tiles = (HW + t - 1) // t
    # Only split the stats accumulation across TensorCores when the split is
    # exact (v7x, n_par=2); otherwise keep a single split (free to remove on
    # 1-TC parts).
    n_split = n_par if (n_par > 1 and n_tiles % n_par == 0) else 1
    tiles_per_split = n_tiles // n_split

    x3 = x.reshape(N, Cin, HW)         # free reshape, consumed NCHW-native

    # Fold the per-channel scale into the 1x1-conv weight:
    #   (x * s) conv W  ==  x conv (W * s)
    w_mat = (w.reshape(Cout, Cin).astype(jnp.float32)
             * s.reshape(1, Cin).astype(jnp.float32)).astype(jnp.bfloat16)

    def mul_conv_stats_kernel(x_ref, w_ref, y_ref, sum_ref, ssq_ref):
        # x_ref:  [1, Cin, t]   f32   (activation tile, NCHW-native)
        # w_ref:  [Cout, Cin]   bf16  (scale-folded conv weight)
        # y_ref:  [1, Cout, t]  bf16  (conv output tile, lane-dense)
        # sum_ref/ssq_ref: [1, Cout, 1] f32 (per TC-split stat accumulators)
        p = pl.program_id(0)
        i = pl.program_id(2)

        x_t = x_ref[0].astype(jnp.bfloat16)                           # [Cin, t]
        y = jnp.dot(w_ref[...], x_t, preferred_element_type=jnp.float32)
        yb = y.astype(jnp.bfloat16)
        y_ref[0] = yb

        @pl.when(jnp.logical_and(pl.program_id(1) == 0, i == 0))
        def _():
            sum_ref[...] = jnp.zeros_like(sum_ref)
            ssq_ref[...] = jnp.zeros_like(ssq_ref)

        # Mask lanes beyond the true spatial extent (ragged last tile): those
        # columns hold unspecified data and must not enter the statistics.
        start = (p * tiles_per_split + i) * t
        col = jax.lax.broadcasted_iota(jnp.int32, (1, t), 1)
        valid = col < (HW - start)
        # Stats from the bf16-rounded y (the tensor normalized in kernel 2).
        yf = jnp.where(valid, yb.astype(jnp.float32), 0.0)
        sum_ref[0] += jnp.sum(yf, axis=1, keepdims=True)
        ssq_ref[0] += jnp.sum(yf * yf, axis=1, keepdims=True)

    grid1 = (n_split, N, tiles_per_split)
    y, psum, pssq = pl.pallas_call(
        mul_conv_stats_kernel,
        out_shape=(
            jax.ShapeDtypeStruct((N, Cout, HW), jnp.bfloat16),
            jax.ShapeDtypeStruct((n_split, Cout, 1), jnp.float32),
            jax.ShapeDtypeStruct((n_split, Cout, 1), jnp.float32),
        ),
        grid_spec=pl.GridSpec(
            grid=grid1,
            in_specs=[
                pl.BlockSpec((1, Cin, t),
                             lambda p, n, i: (n, 0, p * tiles_per_split + i)),
                pl.BlockSpec((Cout, Cin), lambda p, n, i: (0, 0)),
            ],
            out_specs=(
                pl.BlockSpec((1, Cout, t),
                             lambda p, n, i: (n, 0, p * tiles_per_split + i)),
                pl.BlockSpec((1, Cout, 1), lambda p, n, i: (p, 0, 0)),
                pl.BlockSpec((1, Cout, 1), lambda p, n, i: (p, 0, 0)),
            ),
        ),
        compiler_params=pltpu.CompilerParams(
            dimension_semantics=("parallel", "arbitrary", "arbitrary")),
    )(x3, w_mat)

    # Combine per-TensorCore partial statistics (training-mode BatchNorm2d:
    # biased variance over N*H*W).
    sums = jnp.sum(psum, axis=0)                    # [Cout, 1]
    ssq = jnp.sum(pssq, axis=0)                     # [Cout, 1]
    mean = sums / rows
    # TODO(synk): E[y^2]-E[y]^2 can cancel for extremely large N*H*W; clamped
    # >= 0 here, adequate with f32 accumulation at these sizes.
    var = jnp.maximum(ssq / rows - mean * mean, 0.0)
    invstd = jax.lax.rsqrt(var + eps)
    scale = gamma.reshape(Cout, 1).astype(jnp.float32) * invstd
    shift = beta.reshape(Cout, 1).astype(jnp.float32) - mean * scale
    # TODO(synk): BatchNorm2d running_mean/running_var momentum updates are a
    # module-buffer side effect; not produced (forward output only).

    # --- Kernel 2: normalize + affine, writing the final f32 output. ---
    # Whole [Cout, HW] slab per step (Cout*HW*(2+4) bytes is small), so this
    # pass is bandwidth-bound rather than per-grid-step-overhead bound; the
    # output is written unpadded and in f32, so no wrapper slice/cast pass.
    t2 = HW if HW <= 16384 else 16384
    n_t2 = (HW + t2 - 1) // t2

    def bn_apply_kernel(y_ref, scale_ref, shift_ref, o_ref):
        # y_ref: [1, Cout, t2] bf16; scale/shift: [Cout, 1] f32; o_ref f32
        o_ref[0] = (y_ref[0].astype(jnp.float32) * scale_ref[...]
                    + shift_ref[...])

    out3 = pl.pallas_call(
        bn_apply_kernel,
        out_shape=jax.ShapeDtypeStruct((N, Cout, HW), jnp.float32),
        grid_spec=pl.GridSpec(
            grid=(N, n_t2),
            in_specs=[
                pl.BlockSpec((1, Cout, t2), lambda n, i: (n, 0, i)),
                pl.BlockSpec((Cout, 1), lambda n, i: (0, 0)),
                pl.BlockSpec((Cout, 1), lambda n, i: (0, 0)),
            ],
            out_specs=pl.BlockSpec((1, Cout, t2), lambda n, i: (n, 0, i)),
        ),
        compiler_params=pltpu.CompilerParams(
            dimension_semantics=("parallel", "parallel")),
    )(y, scale, shift)

    return out3.reshape(N, Cout, H, W)


def reference(x, s, w, gamma, beta, eps=1e-5):
    # Pure-JAX reference (training-mode batchnorm), all f32.
    xs = x * s
    y = jax.lax.conv_general_dilated(
        xs, w, window_strides=(1, 1), padding="VALID",
        dimension_numbers=("NCHW", "OIHW", "NCHW"))
    mean = jnp.mean(y, axis=(0, 2, 3), keepdims=True)
    var = jnp.mean((y - mean) ** 2, axis=(0, 2, 3), keepdims=True)
    g = gamma.reshape(1, -1, 1, 1)
    b = beta.reshape(1, -1, 1, 1)
    return (y - mean) * jax.lax.rsqrt(var + eps) * g + b


if __name__ == "__main__":
    # Channels are fixed by the module (Cin=288, Cout=48); spatial 56x56 as in
    # the spec (3136 positions -> one full 2048-wide tile plus a ragged tile,
    # exercising the in-kernel tail masking of the batch statistics).
    N, Cin, H, W = 1, 288, 56, 56
    Cout = 48

    key = jax.random.PRNGKey(0)
    k1, k2, k3, k4, k5 = jax.random.split(key, 5)

    x149 = jax.random.normal(k1, (N, Cin, H, W), dtype=jnp.float32)
    x154 = jax.random.normal(k2, (1, Cin, 1, 1), dtype=jnp.float32)
    # Conv2d(288, 48, 1x1, bias=False) weight, deterministic init
    w = jax.random.normal(k3, (Cout, Cin, 1, 1), dtype=jnp.float32) * (1.0 / Cin) ** 0.5
    # BatchNorm2d affine parameters (perturbed from default 1/0 to exercise affine)
    gamma = 1.0 + 0.1 * jax.random.normal(k4, (Cout,), dtype=jnp.float32)
    beta = 0.1 * jax.random.normal(k5, (Cout,), dtype=jnp.float32)

    out = fused_mul_conv_bn(x149, x154, w, gamma, beta)
    out = jax.block_until_ready(out)

    ref = reference(x149, x154, w, gamma, beta)
    assert out.shape == (N, Cout, H, W), out.shape
    max_err = float(jnp.max(jnp.abs(out - ref)))
    assert jnp.allclose(out, ref, atol=3e-2, rtol=2e-2), max_err

    print("KERNEL_OK")
</pallas_src>

<mosaic_0001>
module attributes {stable_mosaic.version = 11 : i64} {
  func.func @mul_conv_stats_kernel(%arg0: i32, %arg1: i32, %arg2: i32, %arg3: memref<1x288x2048xf32, #tpu.memory_space<vmem>>, %arg4: memref<48x288xbf16, #tpu.memory_space<vmem>>, %arg5: memref<1x48x2048xbf16, #tpu.memory_space<vmem>>, %arg6: memref<1x48x1xf32, #tpu.memory_space<vmem>>, %arg7: memref<1x48x1xf32, #tpu.memory_space<vmem>>) attributes {dimension_semantics = [#tpu.dimension_semantics<parallel>, #tpu.dimension_semantics<arbitrary>, #tpu.dimension_semantics<arbitrary>], iteration_bounds = array<i64: 1, 1, 2>, scalar_prefetch = 0 : i64, scratch_operands = 0 : i64, tpu.core_type = #tpu.core_type<tc>, window_params = [{transform_indices = @transform_0, window_bounds = array<i64: 1, 288, 2048>}, {pipeline_mode = #tpu.pipeline_mode<synchronous>, transform_indices = @transform_1, window_bounds = array<i64: 48, 288>}, {transform_indices = @transform_2, window_bounds = array<i64: 1, 48, 2048>}, {transform_indices = @transform_3, window_bounds = array<i64: 1, 48, 1>}, {transform_indices = @transform_4, window_bounds = array<i64: 1, 48, 1>}]} {
    %c0 = arith.constant 0 : index
    %c0_0 = arith.constant 0 : index
    %c0_1 = arith.constant 0 : index
    %0 = vector.load %arg3[%c0, %c0_0, %c0_1] : memref<1x288x2048xf32, #tpu.memory_space<vmem>>, vector<1x288x2048xf32>
    %1 = vector.shape_cast %0 : vector<1x288x2048xf32> to vector<288x2048xf32>
    %2 = arith.truncf %1 : vector<288x2048xf32> to vector<288x2048xbf16>
    %c0_2 = arith.constant 0 : index
    %c0_3 = arith.constant 0 : index
    %3 = vector.load %arg4[%c0_2, %c0_3] : memref<48x288xbf16, #tpu.memory_space<vmem>>, vector<48x288xbf16>
    %cst = arith.constant dense<0.000000e+00> : vector<48x2048xf32>
    %4 = tpu.matmul %3, %2, %cst {dimension_numbers = #tpu.dot_dimension_numbers<[1], [0], [0], [1], [0, 0, 1, 1], [], []>} : vector<48x288xbf16>, vector<288x2048xbf16>, vector<48x2048xf32> -> vector<48x2048xf32>
    %5 = arith.truncf %4 : vector<48x2048xf32> to vector<48x2048xbf16>
    %c0_4 = arith.constant 0 : index
    %c0_5 = arith.constant 0 : index
    %c0_6 = arith.constant 0 : index
    %6 = vector.load %arg5[%c0_4, %c0_5, %c0_6] : memref<1x48x2048xbf16, #tpu.memory_space<vmem>>, vector<1x48x2048xbf16>
    %7 = vector.shape_cast %6 : vector<1x48x2048xbf16> to vector<48x2048xbf16>
    %8 = vector.shape_cast %5 : vector<48x2048xbf16> to vector<1x48x2048xbf16>
    tpu.vector_store %arg5[%c0_4, %c0_5, %c0_6], %8 {strides = array<i32>} : memref<1x48x2048xbf16, #tpu.memory_space<vmem>>, vector<1x48x2048xbf16>,
    %c0_i32 = arith.constant 0 : i32
    %9 = arith.cmpi eq, %arg1, %c0_i32 : i32
    %c0_i32_7 = arith.constant 0 : i32
    %10 = arith.cmpi eq, %arg2, %c0_i32_7 : i32
    %11 = arith.andi %9, %10 : i1
    %12 = arith.extui %11 : i1 to i32
    %c0_i32_8 = arith.constant 0 : i32
    %13 = arith.cmpi ne, %12, %c0_i32_8 : i32
    scf.if %13 {
      %cst_24 = arith.constant 0.000000e+00 : f32
      %43 = vector.broadcast %cst_24 : f32 to vector<1x48x1xf32>
      %c0_25 = arith.constant 0 : index
      %c0_26 = arith.constant 0 : index
      %c0_27 = arith.constant 0 : index
      %44 = vector.load %arg6[%c0_25, %c0_26, %c0_27] : memref<1x48x1xf32, #tpu.memory_space<vmem>>, vector<1x48x1xf32>
      tpu.vector_store %arg6[%c0_25, %c0_26, %c0_27], %43 {strides = array<i32>} : memref<1x48x1xf32, #tpu.memory_space<vmem>>, vector<1x48x1xf32>,
      %cst_28 = arith.constant 0.000000e+00 : f32
      %45 = vector.broadcast %cst_28 : f32 to vector<1x48x1xf32>
      %c0_29 = arith.constant 0 : index
      %c0_30 = arith.constant 0 : index
      %c0_31 = arith.constant 0 : index
      %46 = vector.load %arg7[%c0_29, %c0_30, %c0_31] : memref<1x48x1xf32, #tpu.memory_space<vmem>>, vector<1x48x1xf32>
      tpu.vector_store %arg7[%c0_29, %c0_30, %c0_31], %45 {strides = array<i32>} : memref<1x48x1xf32, #tpu.memory_space<vmem>>, vector<1x48x1xf32>,
    } else {
    }
    %c2_i32 = arith.constant 2 : i32
    %14 = arith.muli %arg0, %c2_i32 : i32
    %15 = arith.addi %14, %arg2 : i32
    %c2048_i32 = arith.constant 2048 : i32
    %16 = arith.muli %15, %c2048_i32 : i32
    %17 = tpu.iota {dimensions = array<i32: 1>} : vector<1x2048xi32>
    %c3136_i32 = arith.constant 3136 : i32
    %18 = arith.subi %c3136_i32, %16 : i32
    %19 = vector.broadcast %18 : i32 to vector<1x2048xi32>
    %20 = arith.cmpi slt, %17, %19 : vector<1x2048xi32>
    %21 = arith.extf %5 : vector<48x2048xbf16> to vector<48x2048xf32>
    %cst_9 = arith.constant 0.000000e+00 : f32
    %22 = vector.shape_cast %20 : vector<1x2048xi1> to vector<1x2048xi1>
    %23 = vector.broadcast %22 : vector<1x2048xi1> to vector<48x2048xi1>
    %24 = vector.broadcast %cst_9 : f32 to vector<48x2048xf32>
    %25 = arith.select %23, %21, %24 : vector<48x2048xi1>, vector<48x2048xf32>
    %c0_10 = arith.constant 0 : index
    %c0_11 = arith.constant 0 : index
    %c0_12 = arith.constant 0 : index
    %26 = vector.load %arg6[%c0_10, %c0_11, %c0_12] : memref<1x48x1xf32, #tpu.memory_space<vmem>>, vector<1x48x1xf32>
    %27 = vector.shape_cast %26 : vector<1x48x1xf32> to vector<48x1xf32>
    %cst_13 = arith.constant dense<0.000000e+00> : vector<48xf32>
    %28 = vector.multi_reduction <add>, %25, %cst_13 [1] : vector<48x2048xf32> to vector<48xf32>
    %29 = vector.shape_cast %28 : vector<48xf32> to vector<48x1xf32>
    %30 = arith.addf %27, %29 : vector<48x1xf32>
    %c0_14 = arith.constant 0 : index
    %c0_15 = arith.constant 0 : index
    %c0_16 = arith.constant 0 : index
    %31 = vector.load %arg6[%c0_14, %c0_15, %c0_16] : memref<1x48x1xf32, #tpu.memory_space<vmem>>, vector<1x48x1xf32>
    %32 = vector.shape_cast %31 : vector<1x48x1xf32> to vector<48x1xf32>
    %33 = vector.shape_cast %30 : vector<48x1xf32> to vector<1x48x1xf32>
    tpu.vector_store %arg6[%c0_14, %c0_15, %c0_16], %33 {strides = array<i32>} : memref<1x48x1xf32, #tpu.memory_space<vmem>>, vector<1x48x1xf32>,
    %c0_17 = arith.constant 0 : index
    %c0_18 = arith.constant 0 : index
    %c0_19 = arith.constant 0 : index
    %34 = vector.load %arg7[%c0_17, %c0_18, %c0_19] : memref<1x48x1xf32, #tpu.memory_space<vmem>>, vector<1x48x1xf32>
    %35 = vector.shape_cast %34 : vector<1x48x1xf32> to vector<48x1xf32>
    %36 = arith.mulf %25, %25 : vector<48x2048xf32>
    %cst_20 = arith.constant dense<0.000000e+00> : vector<48xf32>
    %37 = vector.multi_reduction <add>, %36, %cst_20 [1] : vector<48x2048xf32> to vector<48xf32>
    %38 = vector.shape_cast %37 : vector<48xf32> to vector<48x1xf32>
    %39 = arith.addf %35, %38 : vector<48x1xf32>
    %c0_21 = arith.constant 0 : index
    %c0_22 = arith.constant 0 : index
    %c0_23 = arith.constant 0 : index
    %40 = vector.load %arg7[%c0_21, %c0_22, %c0_23] : memref<1x48x1xf32, #tpu.memory_space<vmem>>, vector<1x48x1xf32>
    %41 = vector.shape_cast %40 : vector<1x48x1xf32> to vector<48x1xf32>
    %42 = vector.shape_cast %39 : vector<48x1xf32> to vector<1x48x1xf32>
    tpu.vector_store %arg7[%c0_21, %c0_22, %c0_23], %42 {strides = array<i32>} : memref<1x48x1xf32, #tpu.memory_space<vmem>>, vector<1x48x1xf32>,
    return
  }
  func.func @transform_0(%arg0: i32, %arg1: i32, %arg2: i32) -> (i32, i32, i32) {
    %c2_i32 = arith.constant 2 : i32
    %0 = arith.muli %arg0, %c2_i32 : i32
    %1 = arith.addi %0, %arg2 : i32
    %c0_i32 = arith.constant 0 : i32
    %c0_i32_0 = arith.constant 0 : i32
    return %arg1, %c0_i32, %1 : i32, i32, i32
  }
  func.func @transform_1(%arg0: i32, %arg1: i32, %arg2: i32) -> (i32, i32) {
    %c0_i32 = arith.constant 0 : i32
    %c0_i32_0 = arith.constant 0 : i32
    %c0_i32_1 = arith.constant 0 : i32
    return %c0_i32, %c0_i32_0 : i32, i32
  }
  func.func @transform_2(%arg0: i32, %arg1: i32, %arg2: i32) -> (i32, i32, i32) {
    %c2_i32 = arith.constant 2 : i32
    %0 = arith.muli %arg0, %c2_i32 : i32
    %1 = arith.addi %0, %arg2 : i32
    %c0_i32 = arith.constant 0 : i32
    %c0_i32_0 = arith.constant 0 : i32
    return %arg1, %c0_i32, %1 : i32, i32, i32
  }
  func.func @transform_3(%arg0: i32, %arg1: i32, %arg2: i32) -> (i32, i32, i32) {
    %c0_i32 = arith.constant 0 : i32
    %c0_i32_0 = arith.constant 0 : i32
    %c0_i32_1 = arith.constant 0 : i32
    return %arg0, %c0_i32, %c0_i32_0 : i32, i32, i32
  }
  func.func @transform_4(%arg0: i32, %arg1: i32, %arg2: i32) -> (i32, i32, i32) {
    %c0_i32 = arith.constant 0 : i32
    %c0_i32_0 = arith.constant 0 : i32
    %c0_i32_1 = arith.constant 0 : i32
    return %arg0, %c0_i32, %c0_i32_0 : i32, i32, i32
  }
}

module attributes {stable_mosaic.version = 11 : i64} {
  func.func @bn_apply_kernel(%arg0: i32, %arg1: i32, %arg2: memref<1x48x3136xbf16, #tpu.memory_space<vmem>>, %arg3: memref<48x1xf32, #tpu.memory_space<vmem>>, %arg4: memref<48x1xf32, #tpu.memory_space<vmem>>, %arg5: memref<1x48x3136xf32, #tpu.memory_space<vmem>>) attributes {dimension_semantics = [#tpu.dimension_semantics<parallel>, #tpu.dimension_semantics<parallel>], iteration_bounds = array<i64: 1, 1>, scalar_prefetch = 0 : i64, scratch_operands = 0 : i64, tpu.core_type = #tpu.core_type<tc>, window_params = [{transform_indices = @transform_0, window_bounds = array<i64: 1, 48, 3136>}, {pipeline_mode = #tpu.pipeline_mode<synchronous>, transform_indices = @transform_1, window_bounds = array<i64: 48, 1>}, {pipeline_mode = #tpu.pipeline_mode<synchronous>, transform_indices = @transform_2, window_bounds = array<i64: 48, 1>}, {transform_indices = @transform_3, window_bounds = array<i64: 1, 48, 3136>}]} {
    %c0 = arith.constant 0 : index
    %c0_0 = arith.constant 0 : index
    %c0_1 = arith.constant 0 : index
    %0 = vector.load %arg2[%c0, %c0_0, %c0_1] : memref<1x48x3136xbf16, #tpu.memory_space<vmem>>, vector<1x48x3136xbf16>
    %1 = vector.shape_cast %0 : vector<1x48x3136xbf16> to vector<48x3136xbf16>
    %2 = arith.extf %1 : vector<48x3136xbf16> to vector<48x3136xf32>
    %c0_2 = arith.constant 0 : index
    %c0_3 = arith.constant 0 : index
    %3 = vector.load %arg3[%c0_2, %c0_3] : memref<48x1xf32, #tpu.memory_space<vmem>>, vector<48x1xf32>
    %4 = vector.broadcast %3 : vector<48x1xf32> to vector<48x3136xf32>
    %5 = arith.mulf %2, %4 : vector<48x3136xf32>
    %c0_4 = arith.constant 0 : index
    %c0_5 = arith.constant 0 : index
    %6 = vector.load %arg4[%c0_4, %c0_5] : memref<48x1xf32, #tpu.memory_space<vmem>>, vector<48x1xf32>
    %7 = vector.broadcast %6 : vector<48x1xf32> to vector<48x3136xf32>
    %8 = arith.addf %5, %7 : vector<48x3136xf32>
    %c0_6 = arith.constant 0 : index
    %c0_7 = arith.constant 0 : index
    %c0_8 = arith.constant 0 : index
    %9 = vector.load %arg5[%c0_6, %c0_7, %c0_8] : memref<1x48x3136xf32, #tpu.memory_space<vmem>>, vector<1x48x3136xf32>
    %10 = vector.shape_cast %9 : vector<1x48x3136xf32> to vector<48x3136xf32>
    %11 = vector.shape_cast %8 : vector<48x3136xf32> to vector<1x48x3136xf32>
    tpu.vector_store %arg5[%c0_6, %c0_7, %c0_8], %11 {strides = array<i32>} : memref<1x48x3136xf32, #tpu.memory_space<vmem>>, vector<1x48x3136xf32>,
    return
  }
  func.func @transform_0(%arg0: i32, %arg1: i32) -> (i32, i32, i32) {
    %c0_i32 = arith.constant 0 : i32
    %c0_i32_0 = arith.constant 0 : i32
    return %arg0, %c0_i32, %arg1 : i32, i32, i32
  }
  func.func @transform_1(%arg0: i32, %arg1: i32) -> (i32, i32) {
    %c0_i32 = arith.constant 0 : i32
    %c0_i32_0 = arith.constant 0 : i32
    %c0_i32_1 = arith.constant 0 : i32
    return %c0_i32, %c0_i32_0 : i32, i32
  }
  func.func @transform_2(%arg0: i32, %arg1: i32) -> (i32, i32) {
    %c0_i32 = arith.constant 0 : i32
    %c0_i32_0 = arith.constant 0 : i32
    %c0_i32_1 = arith.constant 0 : i32
    return %c0_i32, %c0_i32_0 : i32, i32
  }
  func.func @transform_3(%arg0: i32, %arg1: i32) -> (i32, i32, i32) {
    %c0_i32 = arith.constant 0 : i32
    %c0_i32_0 = arith.constant 0 : i32
    return %arg0, %c0_i32, %arg1 : i32, i32, i32
  }
}

</mosaic_0001>

<bundles_post_ra>
// kernel: fused_mul_conv_bn.3
= control target key start
LH: loop header
LB: loop body
LE: loop exit
PB: predicated region body
PF: predicated region fallthrough
CT: control target
= control target key end

     0   :  { %v772_v0 = vmov 0   ;;  %vm638_vm0 = vcmask 523264   ;;  %s2470_s1 = inlined_call_operand.vmem [shape: f32[48,1], index: 1, kind: input, shape index: {}]   ;;  %s2471_s2 = inlined_call_operand.vmem [shape: f32[48,1], index: 2, kind: input, shape index: {}]   ;;  %s2472_s0 = inlined_call_operand.vmem [shape: bf16[1,48,3136], index: 0, kind: input, shape index: {}]   ;;  %s2473_s3 = inlined_call_operand.vmem [shape: f32[1,48,3136], index: 3, kind: output, shape index: {}]  }
   0x1   :  { %771 = vset.pattern.permute.xlu1 %v772_v0  ;;  %770 = vset.pattern.permute.xlu0 %v772_v0  ;;  %v244_v1 = vld [vmem:[%s2470_s1 + $0x10] sm:$0xff]  ;;  %v242_v2 = vld [vmem:[%s2470_s1] sm:$0xff]  ;;  %v245_v3 = vld [vmem:[%s2470_s1 + $0x18] sm:$0xff] }
   0x2   :  { %260 = vperm.xlu1 %771, %v244_v1   ;;  %250 = vperm.xlu0 %770, %v242_v2   ;;  %v243_v4 = vld [vmem:[%s2470_s1 + $0x8] sm:$0xff]  ;;  %v246_v6 = vld [vmem:[%s2470_s1 + $0x20] sm:$0xff]  ;;  %v431_v9 = vld [vmem:[%s2471_s2 + $0x18] sm:$0xff] }
   0x3   :  { %v247_v5 = vld [vmem:[%s2470_s1 + $0x28] sm:$0xff]  ;;  %v428_v8 = vld [vmem:[%s2471_s2] sm:$0xff]  ;;  %v430_v10 = vld [vmem:[%s2471_s2 + $0x10] sm:$0xff] }
   0x4   :  { %v429_v7 = vld [vmem:[%s2471_s2 + $0x8] sm:$0xff]  ;;  %v432_v12 = vld [vmem:[%s2471_s2 + $0x20] sm:$0xff]  ;;  %v837_v14 = vld [vmem:[%s2472_s0 + $0xd0] sm:$0xff] }
   0x5   :  { %v433_v11 = vld [vmem:[%s2471_s2 + $0x28] sm:$0xff]  ;;  %v842_v15 = vld [vmem:[%s2472_s0 + $0xd8] sm:$0xff]  ;;  %v847_v16 = vld [vmem:[%s2472_s0 + $0xe0] sm:$0xff] }
   0x6   :  { %265 = vperm.xlu1 %771, %v245_v3   ;;  %255 = vperm.xlu0 %770, %v243_v4   ;;  %v832_v13 = vld [vmem:[%s2472_s0 + $0xc8] sm:$0xff]  ;;  %v857_v18 = vld [vmem:[%s2472_s0 + $0xf0] sm:$0xff]  ;;  %v862_v19 = vld [vmem:[%s2472_s0 + $0xf8] sm:$0xff]  ;;  %v2576_v24 = vunpack.c.h.bf16 %v842_v15 }
   0x7   :  { %v852_v17 = vld [vmem:[%s2472_s0 + $0xe8] sm:$0xff]  ;;  %v869_v22 = vld [vmem:[%s2472_s0 + $0x100] sm:$0xff]  ;;  %v883_v28 = vld [vmem:[%s2472_s0 + $0x110] sm:$0xff] }
   0x8   :  { %v874_v23 = vld [vmem:[%s2472_s0 + $0x108] sm:$0xff]  ;;  %v888_v29 = vld [vmem:[%s2472_s0 + $0x118] sm:$0xff]  ;;  %v897_v34 = vld [vmem:[%s2472_s0 + $0x120] sm:$0xff] }
   0x9   :  { %v902_v35 = vld [vmem:[%s2472_s0 + $0x60] ss:$200 sps:$4 sm:$0xff]   ;;  %v925_v46 = vld [vmem:[%s2472_s0 + $0x10] sm:$0xff]  ;;  %v934_v51 = vld [vmem:[%s2472_s0 + $0x18] sm:$0xff] }
   0xa   :  { %275 = vperm.xlu1 %771, %v247_v5   ;;  %270 = vperm.xlu0 %770, %v246_v6   ;;  %v911_v40 = vld [vmem:[%s2472_s0] sm:$0xff]  ;;  %v920_v45 = vld [vmem:[%s2472_s0 + $0x8] sm:$0xff]  ;;  %v952_v57 = vld [vmem:[%s2472_s0 + $0x30] sm:$0xff] }
   0xb   :  { %v939_v52 = vld [vmem:[%s2472_s0 + $0x20] sm:$0xff]  ;;  %v947_v56 = vld [vmem:[%s2472_s0 + $0x28] sm:$0xff]  ;;  %v958_v59 = vld [vmem:[%s2472_s0 + $0x38] sm:$0xff] }
   0xc   :  { %v963_v60 = vld [vmem:[%s2472_s0 + $0x40] sm:$0xff]  ;;  %v972_v1 = vld [vmem:[%s2472_s0 + $0x48] sm:$0xff]  ;;  %v977_v2 = vld [vmem:[%s2472_s0 + $0x50] sm:$0xff] }
   0xd   :  { %v999_v3 = vld [vmem:[%s2472_s0 + $0x12c] sm:$0xff]  ;;  %v1013_v6 = vld [vmem:[%s2472_s0 + $0x13c] sm:$0xff]  ;;  %v1032_v0 = vld [vmem:[%s2472_s0 + $0x154] sm:$0xff] }
   0xe   :  { %441 = vperm.xlu1 %771, %v429_v7   ;;  %436 = vperm.xlu0 %770, %v428_v8   ;;  %v986_v7 = vld [vmem:[%s2472_s0 + $0x58] sm:$0xff]  ;;  %v1027_v5 = vld [vmem:[%s2472_s0 + $0x14c] sm:$0xff]  ;;  %v1070_v54 = vld [vmem:[%s2472_s0 + $0x184] sm:$0xff] }
   0xf   :  { %v1037_v8 = vld [vmem:[%s2472_s0 + $0x15c] sm:$0xff]  ;;  %v1051_v61 = vld [vmem:[%s2472_s0 + $0x16c] sm:$0xff]  ;;  %v1056_v58 = vld [vmem:[%s2472_s0 + $0x174] sm:$0xff] }
  0x10   :  { %v1065_v62 = vld [vmem:[%s2472_s0 + $0x17c] sm:$0xff]  ;;  %v1079_v63 = vld [vmem:[%s2472_s0 + $0xc4] ss:$200 sps:$4 sm:$0xff]   ;;  %v1102_v47 = vld [vmem:[%s2472_s0 + $0x74] sm:$0xff] }
  0x11   :  { %v1088_v55 = vld [vmem:[%s2472_s0 + $0x64] sm:$0xff]  ;;  %v1107_v53 = vld [vmem:[%s2472_s0 + $0x7c] sm:$0xff]  ;;  %v1121_v43 = vld [vmem:[%s2472_s0 + $0x8c] sm:$0xff] }
  0x12   :  { %451 = vperm.xlu1 %771, %v431_v9   ;;  %446 = vperm.xlu0 %770, %v430_v10   ;;  %v1004_v9 = vld [vmem:[%s2472_s0 + $0x134] sm:$0xff]  ;;  %v1018_v10 = vld [vmem:[%s2472_s0 + $0x144] sm:$0xff]  ;;  %v1132_v49 = vld [vmem:[%s2472_s0 + $0x9c] sm:$0xff] }
  0x13   :  { %v1116_v48 = vld [vmem:[%s2472_s0 + $0x84] sm:$0xff]  ;;  %v1127_v4 = vld [vmem:[%s2472_s0 + $0x94] sm:$0xff]  ;;  %2536 = vst [vmem:[#allocation2_spill] sm:$0xff] %v1132_v49  ;;  %v1145_v39 = vld [vmem:[%s2472_s0 + $0xac] sm:$0xff] }
  0x14   :  { %v1140_v42 = vld [vmem:[%s2472_s0 + $0xa4] sm:$0xff]  ;;  %2538 = vst [vmem:[#allocation4_spill] sm:$0xff] %v1145_v39  ;;  %v1154_v41 = vld [vmem:[%s2472_s0 + $0xb4] sm:$0xff]  ;;  %v1159_v36 = vld [vmem:[%s2472_s0 + $0xbc] sm:$0xff] }
  0x15   :  { %2537 = vst [vmem:[#allocation3_spill] sm:$0xff] %v1140_v42  ;;  %2539 = vst [vmem:[#allocation5_spill] sm:$0xff] %v1154_v41  ;;  %v1172_v27 = vld [vmem:[%s2472_s0 + $0x1f4] sm:$0xff]  ;;  %v1181_v32 = vld [vmem:[%s2472_s0 + $0x1fc] sm:$0xff]  ;;  %v2572_v42 = vunpack.c.h.bf16 %v837_v14 }
  0x16   :  { %461 = vperm.xlu1 %771, %v433_v11   ;;  %456 = vperm.xlu0 %770, %v432_v12   ;;  %v1042_v12 = vld [vmem:[%s2472_s0 + $0x164] sm:$0xff]  ;;  %v1093_v11 = vld [vmem:[%s2472_s0 + $0x6c] sm:$0xff]  ;;  %2540 = vst [vmem:[#allocation6_spill] sm:$0xff] %v1159_v36  ;;  %2541 = vst [vmem:[#allocation7_spill] sm:$0xff] %v1172_v27 }
  0x17   :  { %2542 = vst [vmem:[#allocation8_spill] sm:$0xff] %v1181_v32  ;;  %v1186_v30 = vld [vmem:[%s2472_s0 + $0x204] sm:$0xff]  ;;  %v1195_v50 = vld [vmem:[%s2472_s0 + $0x20c] sm:$0xff]  ;;  %v1200_v44 = vld [vmem:[%s2472_s0 + $0x214] sm:$0xff] }
  0x18   :  { %2543 = vst [vmem:[#allocation9_spill] sm:$0xff] %v1186_v30  ;;  %2544 = vst [vmem:[#allocation10_spill] sm:$0xff] %v1195_v50  ;;  %v1207_v38 = vld [vmem:[%s2472_s0 + $0x21c] sm:$0xff]  ;;  %v1212_v37 = vld [vmem:[%s2472_s0 + $0x224] sm:$0xff] }
  0x19   :  { %2545 = vst [vmem:[#allocation11_spill] sm:$0xff] %v1200_v44  ;;  %2546 = vst [vmem:[#allocation12_spill] sm:$0xff] %v1207_v38  ;;  %v1219_v26 = vld [vmem:[%s2472_s0 + $0x22c] sm:$0xff]  ;;  %v1224_v31 = vld [vmem:[%s2472_s0 + $0x234] sm:$0xff]  ;;  %v2574_v38 = vunpack.c.l.bf16 %v842_v15  ;;  %v2586_v15 = vunpack.c.l.bf16 %v857_v18 }
  0x1a   :  { %2547 = vst [vmem:[#allocation13_spill] sm:$0xff] %v1212_v37  ;;  %2548 = vst [vmem:[#allocation14_spill] sm:$0xff] %v1219_v26  ;;  %v1233_v25 = vld [vmem:[%s2472_s0 + $0x23c] sm:$0xff]  ;;  %v1238_v27 = vld [vmem:[%s2472_s0 + $0x244] sm:$0xff] }
  0x1b   :  { %2549 = vst [vmem:[#allocation15_spill] sm:$0xff] %v1224_v31  ;;  %2550 = vst [vmem:[#allocation16_spill] sm:$0xff] %v1233_v25  ;;  %v1247_v33 = vld [vmem:[%s2472_s0 + $0x24c] sm:$0xff]  ;;  %v1270_v36 = vld [vmem:[%s2472_s0 + $0x198] sm:$0xff] }
  0x1c   :  { %2551 = vst [vmem:[#allocation17_spill] sm:$0xff] %v1238_v27  ;;  %2552 = vst [vmem:[#allocation18_spill] sm:$0xff] %v1247_v33  ;;  %v1252_v30 = vld [vmem:[%s2472_s0 + $0x1f0] ss:$100 sps:$4 sm:$0xff]   ;;  %v1275_v21 = vld [vmem:[%s2472_s0 + $0x1a0] sm:$0xff]  ;;  %v2566_v33 = vunpack.c.l.bf16 %v832_v13 }
  0x1d   :  { %2553 = vst [vmem:[#allocation19_spill] sm:$0xff] %v1252_v30  ;;  %v1261_v20 = vld [vmem:[%s2472_s0 + $0x190] sm:$0xff]  ;;  %2555 = vst [vmem:[#allocation21_spill] sm:$0xff] %v1270_v36  ;;  %v1284_v39 = vld [vmem:[%s2472_s0 + $0x1a8] sm:$0xff]  ;;  %v2570_v36 = vunpack.c.l.bf16 %v837_v14  ;;  %v2582_v14 = vunpack.c.l.bf16 %v852_v17 }
  0x1e   :  { %2554 = vst [vmem:[#allocation20_spill] sm:$0xff] %v1261_v20  ;;  %2556 = vst [vmem:[#allocation22_spill] sm:$0xff] %v1275_v21  ;;  %v1289_v32 = vld [vmem:[%s2472_s0 + $0x1b0] sm:$0xff]  ;;  %v1297_v41 = vld [vmem:[%s2472_s0 + $0x1b8] sm:$0xff] }
  0x1f   :  { %2557 = vst [vmem:[#allocation23_spill] sm:$0xff] %v1284_v39  ;;  %2558 = vst [vmem:[#allocation24_spill] sm:$0xff] %v1289_v32  ;;  %v1302_v50 = vld [vmem:[%s2472_s0 + $0x1c0] sm:$0xff]  ;;  %v1308_v31 = vld [vmem:[%s2472_s0 + $0x1c8] sm:$0xff]  ;;  %v2568_v39 = vunpack.c.h.bf16 %v832_v13  ;;  %v2578_v13 = vunpack.c.l.bf16 %v847_v16 }
  0x20   :  { %2559 = vst [vmem:[#allocation25_spill] sm:$0xff] %v1297_v41  ;;  %2560 = vst [vmem:[#allocation26_spill] sm:$0xff] %v1302_v50  ;;  %v1313_v44 = vld [vmem:[%s2472_s0 + $0x1d0] sm:$0xff]  ;;  %v1322_v27 = vld [vmem:[%s2472_s0 + $0x1d8] sm:$0xff]  ;;  %v2596_v50 = vunpack.c.h.bf16 %v869_v22 }
  0x21   :  { %2561 = vst [vmem:[#allocation27_spill] sm:$0xff] %v1308_v31  ;;  %2562 = vst [vmem:[#allocation28_spill] sm:$0xff] %v1313_v44  ;;  %v1327_v37 = vld [vmem:[%s2472_s0 + $0x1e0] sm:$0xff]  ;;  %v1336_v26 = vld [vmem:[%s2472_s0 + $0x1e8] sm:$0xff]  ;;  %v2588_v44 = vunpack.c.h.bf16 %v857_v18  ;;  %v2592_v31 = vunpack.c.h.bf16 %v862_v19  ;;  %v2598_v18 = vunpack.c.l.bf16 %v874_v23 }
  0x22   :  { %2563 = vst [vmem:[#allocation29_spill] sm:$0xff] %v1322_v27  ;;  %2564 = vst [vmem:[#allocation30_spill] sm:$0xff] %v1327_v37  ;;  %v2584_v27 = vunpack.c.h.bf16 %v852_v17  ;;  %v2594_v17 = vunpack.c.l.bf16 %v869_v22  ;;  %v2606_v22 = vunpack.c.l.bf16 %v888_v29 }
  0x23   :  { %2565 = vst [vmem:[#allocation31_spill] sm:$0xff] %v1336_v26  ;;  %v2580_v26 = vunpack.c.h.bf16 %v847_v16  ;;  %v2590_v16 = vunpack.c.l.bf16 %v862_v19  ;;  %v2602_v19 = vunpack.c.l.bf16 %v883_v28 }
  0x81   :  { %v261_v32 = vpop.permute.xlu1 %260  ;;  %v251_v41 = vpop.permute.xlu0 %250 }
  0x82   :  { %v1356_v25 = vmul.f32 %v261_v32, %v2566_v33  ;;  %v1360_v21 = vmul.f32 %v261_v32, %v2568_v39  ;;  %v1364_v20 = vmul.f32 %v261_v32, %v2570_v36  ;;  %v1368_v37 = vmul.f32 %v261_v32, %v2572_v42 }
  0x83   :  { %v1372_v49 = vmul.f32 %v261_v32, %v2574_v38  ;;  %v1376_v33 = vmul.f32 %v261_v32, %v2576_v24  ;;  %v1380_v39 = vmul.f32 %v261_v32, %v2578_v13  ;;  %v1384_v36 = vmul.f32 %v261_v32, %v2580_v26 }
  0x84   :  { %2567 = vst [vmem:[#allocation32_spill] sm:$0xff] %v1356_v25  ;;  %2569 = vst [vmem:[#allocation33_spill] sm:$0xff] %v1360_v21  ;;  %v1388_v42 = vmul.f32 %v261_v32, %v2582_v14  ;;  %v1392_v38 = vmul.f32 %v261_v32, %v2584_v27  ;;  %v1396_v24 = vmul.f32 %v261_v32, %v2586_v15 }
  0x85   :  { %2571 = vst [vmem:[#allocation34_spill] sm:$0xff] %v1364_v20  ;;  %2573 = vst [vmem:[#allocation35_spill] sm:$0xff] %v1368_v37  ;;  %v1400_v13 = vmul.f32 %v261_v32, %v2588_v44  ;;  %v1404_v26 = vmul.f32 %v261_v32, %v2590_v16  ;;  %v1408_v14 = vmul.f32 %v261_v32, %v2592_v31  ;;  %v2600_v16 = vunpack.c.h.bf16 %v874_v23  ;;  %v256_v20 = vpop.permute.xlu0 %255 }
  0x86   :  { %2575 = vst [vmem:[#allocation36_spill] sm:$0xff] %v1372_v49  ;;  %2577 = vst [vmem:[#allocation37_spill] sm:$0xff] %v1376_v33  ;;  %v1412_v27 = vmul.f32 %v261_v32, %v2594_v17  ;;  %v1416_v15 = vmul.f32 %v261_v32, %v2596_v50  ;;  %v1420_v44 = vmul.f32 %v261_v32, %v2598_v18  ;;  %v2604_v17 = vunpack.c.h.bf16 %v883_v28 }
  0x87   :  { %2579 = vst [vmem:[#allocation38_spill] sm:$0xff] %v1380_v39  ;;  %2581 = vst [vmem:[#allocation39_spill] sm:$0xff] %v1384_v36  ;;  %v1424_v30 = vmul.f32 %v261_v32, %v2600_v16  ;;  %v1428_v31 = vmul.f32 %v261_v32, %v2602_v19  ;;  %v1436_v50 = vmul.f32 %v261_v32, %v2606_v22  ;;  %v2610_v23 = vunpack.c.l.bf16 %v897_v34 }
  0x88   :  { %2583 = vst [vmem:[#allocation40_spill] sm:$0xff] %v1388_v42  ;;  %2585 = vst [vmem:[#allocation41_spill] sm:$0xff] %v1392_v38  ;;  %v2614_v28 = vunpack.c.h.bf16 %v902_v35  ;;  %v2642_v38 = vunpack.c.h.bf16 %v986_v7  ;;  %v2646_v42 = vunpack.c.l.bf16 %v999_v3  ;;  %v2650_v36 = vunpack.c.l.bf16 %v1004_v9 }
  0x89   :  { %2587 = vst [vmem:[#allocation42_spill] sm:$0xff] %v1396_v24  ;;  %2589 = vst [vmem:[#allocation43_spill] sm:$0xff] %v1400_v13  ;;  %v1444_v16 = vmul.f32 %v261_v32, %v2610_v23  ;;  %v2638_v24 = vunpack.c.h.bf16 %v977_v2  ;;  %v2660_v39 = vunpack.c.h.bf16 %v1018_v10  ;;  %v2664_v33 = vunpack.c.h.bf16 %v1027_v5 }
  0x8a   :  { %2591 = vst [vmem:[#allocation44_spill] sm:$0xff] %v1404_v26  ;;  %2593 = vst [vmem:[#allocation45_spill] sm:$0xff] %v1408_v14  ;;  %v2668_v49 = vunpack.c.h.bf16 %v1032_v0  ;;  %v2672_v37 = vunpack.c.h.bf16 %v1037_v8 }
  0x8b   :  { %2595 = vst [vmem:[#allocation46_spill] sm:$0xff] %v1412_v27  ;;  %2597 = vst [vmem:[#allocation47_spill] sm:$0xff] %v1416_v15  ;;  %v1432_v27 = vmul.f32 %v261_v32, %v2604_v17  ;;  %v2608_v15 = vunpack.c.h.bf16 %v888_v29  ;;  %v1452_v17 = vmul.f32 %v261_v32, %v2614_v28  ;;  %v2617_v29 = vunpack.c.h.bf16 %v911_v40 }
  0x8c   :  { %2599 = vst [vmem:[#allocation48_spill] sm:$0xff] %v1420_v44  ;;  %2601 = vst [vmem:[#allocation49_spill] sm:$0xff] %v1424_v30  ;;  %v2612_v30 = vunpack.c.h.bf16 %v897_v34  ;;  %v2619_v34 = vunpack.c.h.bf16 %v920_v45  ;;  %v2621_v28 = vunpack.c.h.bf16 %v925_v46  ;;  %v266_v44 = vpop.permute.xlu1 %265 }
  0x8d   :  { %2603 = vst [vmem:[#allocation50_spill] sm:$0xff] %v1428_v31  ;;  %2605 = vst [vmem:[#allocation51_spill] sm:$0xff] %v1432_v27  ;;  %v1440_v18 = vmul.f32 %v261_v32, %v2608_v15  ;;  %v2616_v27 = vunpack.c.l.bf16 %v911_v40  ;;  %v1460_v15 = vmul.f32 %v251_v41, %v2617_v29  ;;  %v2622_v40 = vunpack.c.l.bf16 %v934_v51 }
  0x8e   :  { %2607 = vst [vmem:[#allocation52_spill] sm:$0xff] %v1436_v50  ;;  %2611 = vst [vmem:[#allocation54_spill] sm:$0xff] %v1444_v16  ;;  %v1448_v19 = vmul.f32 %v261_v32, %v2612_v30  ;;  %v1468_v30 = vmul.f32 %v251_v41, %v2619_v34  ;;  %v2625_v16 = vunpack.c.h.bf16 %v939_v52  ;;  %v2627_v50 = vunpack.c.h.bf16 %v947_v56 }
  0x8f   :  { %2609 = vst [vmem:[#allocation53_spill] sm:$0xff] %v1440_v18  ;;  %2615 = vst [vmem:[#allocation56_spill] sm:$0xff] %v1452_v17  ;;  %v1456_v22 = vmul.f32 %v251_v41, %v2616_v27  ;;  %v2618_v18 = vunpack.c.l.bf16 %v920_v45  ;;  %v1476_v27 = vmul.f32 %v251_v41, %v2621_v28  ;;  %v1480_v29 = vmul.f32 %v251_v41, %v2622_v40 }
  0x90   :  { %2613 = vst [vmem:[#allocation55_spill] sm:$0xff] %v1448_v19  ;;  %v2620_v19 = vunpack.c.l.bf16 %v925_v46  ;;  %v2623_v17 = vunpack.c.h.bf16 %v934_v51  ;;  %v2624_v45 = vunpack.c.l.bf16 %v939_v52  ;;  %v2626_v46 = vunpack.c.l.bf16 %v947_v56 }
  0x91   :  { %v1464_v23 = vmul.f32 %v251_v41, %v2618_v18  ;;  %v1500_v40 = vmul.f32 %v251_v41, %v2627_v50  ;;  %v2628_v51 = vunpack.c.l.bf16 %v952_v57  ;;  %v2629_v31 = vunpack.c.h.bf16 %v952_v57 }
  0x92   :  { %v1472_v32 = vmul.f32 %v251_v41, %v2620_v19  ;;  %v1484_v18 = vmul.f32 %v251_v41, %v2623_v17  ;;  %v1488_v34 = vmul.f32 %v251_v41, %v2624_v45  ;;  %v1492_v19 = vmul.f32 %v251_v41, %v2625_v16 }
  0x93   :  { %v1496_v28 = vmul.f32 %v251_v41, %v2626_v46  ;;  %v1504_v17 = vmul.f32 %v251_v41, %v2628_v51  ;;  %v1508_v45 = vmul.f32 %v251_v41, %v2629_v31  ;;  %v2630_v52 = vunpack.c.l.bf16 %v958_v59 }
  0x94   :  { %v2631_v46 = vunpack.c.h.bf16 %v958_v59  ;;  %v2632_v56 = vunpack.c.l.bf16 %v963_v60  ;;  %v2633_v51 = vunpack.c.h.bf16 %v963_v60  ;;  %v2634_v57 = vunpack.c.l.bf16 %v972_v1 }
  0x95   :  { %v1512_v16 = vmul.f32 %v251_v41, %v2630_v52  ;;  %v2635_v52 = vunpack.c.h.bf16 %v972_v1  ;;  %v2636_v59 = vunpack.c.l.bf16 %v977_v2  ;;  %v2640_v60 = vunpack.c.l.bf16 %v986_v7 }
  0x96   :  { %v1516_v14 = vmul.f32 %v251_v41, %v2631_v46  ;;  %v1520_v50 = vmul.f32 %v251_v41, %v2632_v56  ;;  %v1524_v26 = vmul.f32 %v251_v41, %v2633_v51  ;;  %v1528_v31 = vmul.f32 %v251_v41, %v2634_v57 }
  0x97   :  { %v1532_v13 = vmul.f32 %v251_v41, %v2635_v52  ;;  %v1536_v46 = vmul.f32 %v251_v41, %v2636_v59  ;;  %v1540_v56 = vmul.f32 %v251_v41, %v2638_v24  ;;  %v1544_v51 = vmul.f32 %v251_v41, %v2640_v60 }
  0x98   :  { %v1548_v57 = vmul.f32 %v251_v41, %v2642_v38  ;;  %v2644_v1 = vunpack.c.l.bf16 %v902_v35  ;;  %v1556_v59 = vmul.f32 %v266_v44, %v2646_v42  ;;  %v2648_v2 = vunpack.c.h.bf16 %v999_v3 }
  0x99   :  { %2637 = vst [vmem:[#allocation57_spill] sm:$0xff] %v1536_v46  ;;  %2639 = vst [vmem:[#allocation58_spill] sm:$0xff] %v1540_v56  ;;  %v1564_v60 = vmul.f32 %v266_v44, %v2650_v36  ;;  %v2652_v7 = vunpack.c.h.bf16 %v1004_v9  ;;  %v2654_v35 = vunpack.c.l.bf16 %v1013_v6  ;;  %v2658_v3 = vunpack.c.l.bf16 %v1018_v10 }
  0x9a   :  { %2641 = vst [vmem:[#allocation59_spill] sm:$0xff] %v1544_v51  ;;  %2643 = vst [vmem:[#allocation60_spill] sm:$0xff] %v1548_v57  ;;  %v1552_v52 = vmul.f32 %v251_v41, %v2644_v1  ;;  %v1560_v24 = vmul.f32 %v266_v44, %v2648_v2  ;;  %v2656_v1 = vunpack.c.h.bf16 %v1013_v6  ;;  %v1584_v36 = vmul.f32 %v266_v44, %v2660_v39 }
  0x9b   :  { %2647 = vst [vmem:[#allocation62_spill] sm:$0xff] %v1556_v59  ;;  %2651 = vst [vmem:[#allocation64_spill] sm:$0xff] %v1564_v60  ;;  %v1568_v38 = vmul.f32 %v266_v44, %v2652_v7  ;;  %v1572_v41 = vmul.f32 %v266_v44, %v2654_v35  ;;  %v1580_v2 = vmul.f32 %v266_v44, %v2658_v3  ;;  %v2662_v9 = vunpack.c.l.bf16 %v1027_v5 }
  0x9c   :  { %2645 = vst [vmem:[#allocation61_spill] sm:$0xff] %v1552_v52  ;;  %2649 = vst [vmem:[#allocation63_spill] sm:$0xff] %v1560_v24  ;;  %v1576_v42 = vmul.f32 %v266_v44, %v2656_v1  ;;  %v1592_v35 = vmul.f32 %v266_v44, %v2664_v33  ;;  %v2666_v6 = vunpack.c.l.bf16 %v1032_v0  ;;  %v1600_v3 = vmul.f32 %v266_v44, %v2668_v49 }
  0x9d   :  { %2653 = vst [vmem:[#allocation65_spill] sm:$0xff] %v1568_v38  ;;  %2655 = vst [vmem:[#allocation66_spill] sm:$0xff] %v1572_v41  ;;  %v1588_v7 = vmul.f32 %v266_v44, %v2662_v9  ;;  %v2670_v10 = vunpack.c.l.bf16 %v1037_v8  ;;  %v1608_v9 = vmul.f32 %v266_v44, %v2672_v37  ;;  %v2674_v5 = vunpack.c.l.bf16 %v1042_v12  ;;  %v1626_v8 = vpop.permute.xlu1 %275 }
  0x9e   :  { %2657 = vst [vmem:[#allocation67_spill] sm:$0xff] %v1576_v42  ;;  %2659 = vst [vmem:[#allocation68_spill] sm:$0xff] %v1580_v2  ;;  %v1596_v1 = vmul.f32 %v266_v44, %v2666_v6  ;;  %v2676_v6 = vunpack.c.h.bf16 %v1042_v12  ;;  %v2678_v49 = vunpack.c.l.bf16 %v1051_v61  ;;  %v2683_v37 = vunpack.c.l.bf16 %v1056_v58 }
  0x9f   :  { %2661 = vst [vmem:[#allocation69_spill] sm:$0xff] %v1584_v36  ;;  %2663 = vst [vmem:[#allocation70_spill] sm:$0xff] %v1588_v7  ;;  %v1604_v39 = vmul.f32 %v266_v44, %v2670_v10  ;;  %v1612_v33 = vmul.f32 %v266_v44, %v2674_v5  ;;  %v2680_v10 = vunpack.c.h.bf16 %v1051_v61  ;;  %v2685_v5 = vunpack.c.h.bf16 %v1056_v58  ;;  %v1690_v7 = vpop.permute.xlu0 %270 }
  0xa0   :  { %2665 = vst [vmem:[#allocation71_spill] sm:$0xff] %v1592_v35  ;;  %2667 = vst [vmem:[#allocation72_spill] sm:$0xff] %v1596_v1  ;;  %v1616_v21 = vmul.f32 %v266_v44, %v2676_v6  ;;  %v1620_v0 = vmul.f32 %v266_v44, %v2678_v49  ;;  %v2687_v12 = vunpack.c.l.bf16 %v1065_v62  ;;  %v2689_v49 = vunpack.c.h.bf16 %v1065_v62 }
  0xa1   :  { %2669 = vst [vmem:[#allocation73_spill] sm:$0xff] %v1600_v3  ;;  %2671 = vst [vmem:[#allocation74_spill] sm:$0xff] %v1604_v39  ;;  %v1624_v25 = vmul.f32 %v266_v44, %v2680_v10  ;;  %v2691_v61 = vunpack.c.l.bf16 %v1070_v54  ;;  %v2695_v58 = vunpack.c.h.bf16 %v1079_v63 }
  0xa2   :  { %2673 = vst [vmem:[#allocation75_spill] sm:$0xff] %v1608_v9  ;;  %2675 = vst [vmem:[#allocation76_spill] sm:$0xff] %v1612_v33  ;;  %v1630_v9 = vmul.f32 %v266_v44, %v2683_v37  ;;  %v1634_v33 = vmul.f32 %v266_v44, %v2685_v5  ;;  %v1638_v6 = vmul.f32 %v266_v44, %v2687_v12 }
  0xa3   :  { %2677 = vst [vmem:[#allocation77_spill] sm:$0xff] %v1616_v21  ;;  %2679 = vst [vmem:[#allocation78_spill] sm:$0xff] %v1620_v0  ;;  %v1642_v0 = vmul.f32 %v266_v44, %v2689_v49  ;;  %v1646_v10 = vmul.f32 %v266_v44, %v2691_v61  ;;  %v1654_v5 = vmul.f32 %v266_v44, %v2695_v58  ;;  %v2699_v49 = vunpack.c.l.bf16 %v1093_v11 }
  0xa4   :  { %2681 = vst [vmem:[#allocation79_spill] sm:$0xff] %v1624_v25  ;;  %2682 = vst [vmem:[#allocation80_spill] sm:$0xff] %v1626_v8  ;;  %v2693_v8 = vunpack.c.h.bf16 %v1070_v54  ;;  %v2700_v61 = vunpack.c.h.bf16 %v1093_v11  ;;  %v2701_v54 = vunpack.c.l.bf16 %v1102_v47  ;;  %v2707_v11 = vunpack.c.l.bf16 %v1121_v43 }
  0xa5   :  { %2684 = vst [vmem:[#allocation81_spill] sm:$0xff] %v1630_v9  ;;  %2686 = vst [vmem:[#allocation82_spill] sm:$0xff] %v1634_v33  ;;  %v2697_v33 = vunpack.c.l.bf16 %v1088_v55 }
  0xa6   :  { %2688 = vst [vmem:[#allocation83_spill] sm:$0xff] %v1638_v6  ;;  %2690 = vst [vmem:[#allocation84_spill] sm:$0xff] %v1642_v0  ;;  %v1650_v37 = vmul.f32 %v266_v44, %v2693_v8  ;;  %v2698_v6 = vunpack.c.h.bf16 %v1088_v55  ;;  %v305_v0 = vmul.f32 %v256_v20, %v2699_v49  ;;  %v307_v8 = vmul.f32 %v256_v20, %v2701_v54 }
  0xa7   :  { %2692 = vst [vmem:[#allocation85_spill] sm:$0xff] %v1646_v10  ;;  %2696 = vst [vmem:[#allocation87_spill] sm:$0xff] %v1654_v5  ;;  %v303_v12 = vmul.f32 %v256_v20, %v2697_v33  ;;  %v306_v10 = vmul.f32 %v256_v20, %v2700_v61  ;;  %v2703_v44 = vunpack.c.l.bf16 %v1107_v53  ;;  %v2704_v33 = vunpack.c.h.bf16 %v1107_v53  ;;  %v2711_v53 = vld [vmem:[#allocation2_spill] sm:$0xff] }
  0xa8   :  { %2694 = vst [vmem:[#allocation86_spill] sm:$0xff] %v1650_v37  ;;  %v304_v62 = vmul.f32 %v256_v20, %v2698_v6  ;;  %v2702_v37 = vunpack.c.h.bf16 %v1102_v47  ;;  %v2705_v55 = vunpack.c.l.bf16 %v1116_v48  ;;  %v2706_v49 = vunpack.c.h.bf16 %v1116_v48  ;;  %v2714_v48 = vld [vmem:[#allocation3_spill] sm:$0xff]  ;;  %2716 = vst [vmem:[#allocation2_spill] sm:$0xff] %v1690_v7 }
  0xa9   :  { %v309_v58 = vmul.f32 %v256_v20, %v2703_v44  ;;  %v310_v5 = vmul.f32 %v256_v20, %v2704_v33  ;;  %v313_v61 = vmul.f32 %v256_v20, %v2707_v11  ;;  %v2708_v54 = vunpack.c.h.bf16 %v1121_v43  ;;  %v442_v11 = vpop.permute.xlu1 %441 }
  0xaa   :  { %v308_v9 = vmul.f32 %v256_v20, %v2702_v37  ;;  %v311_v6 = vmul.f32 %v256_v20, %v2705_v55  ;;  %v312_v25 = vmul.f32 %v256_v20, %v2706_v49  ;;  %v2709_v47 = vunpack.c.l.bf16 %v1127_v4 }
  0xab   :  { %v314_v21 = vmul.f32 %v256_v20, %v2708_v54  ;;  %v2710_v44 = vunpack.c.h.bf16 %v1127_v4  ;;  %v2712_v33 = vunpack.c.l.bf16 %v2711_v53  ;;  %v2713_v55 = vunpack.c.h.bf16 %v2711_v53 }
  0xac   :  { %v315_v37 = vmul.f32 %v256_v20, %v2709_v47  ;;  %v2715_v49 = vunpack.c.l.bf16 %v2714_v48  ;;  %v2717_v43 = vunpack.c.h.bf16 %v2714_v48  ;;  %v2718_v47 = vld [vmem:[#allocation4_spill] sm:$0xff]  ;;  %v2727_v48 = vunpack.c.l.bf16 %v1079_v63 }
  0xad   :  { %v316_v39 = vmul.f32 %v256_v20, %v2710_v44  ;;  %v317_v3 = vmul.f32 %v256_v20, %v2712_v33  ;;  %v318_v1 = vmul.f32 %v256_v20, %v2713_v55  ;;  %v2719_v36 = vunpack.c.l.bf16 %v2718_v47  ;;  %v2721_v33 = vld [vmem:[#allocation5_spill] sm:$0xff] }
  0xae   :  { %v319_v35 = vmul.f32 %v256_v20, %v2715_v49  ;;  %v320_v54 = vmul.f32 %v256_v20, %v2717_v43  ;;  %v2720_v44 = vunpack.c.h.bf16 %v2718_v47  ;;  %v2722_v42 = vunpack.c.l.bf16 %v2721_v33  ;;  %v2724_v49 = vld [vmem:[#allocation6_spill] sm:$0xff] }
  0xaf   :  { %v321_v4 = vmul.f32 %v256_v20, %v2719_v36  ;;  %v2723_v55 = vunpack.c.h.bf16 %v2721_v33  ;;  %v2725_v38 = vunpack.c.l.bf16 %v2724_v49  ;;  %v2726_v60 = vunpack.c.h.bf16 %v2724_v49  ;;  %v2738_v49 = vld [vmem:[#allocation67_spill] sm:$0xff] }
  0xb0   :  { %v322_v2 = vmul.f32 %v256_v20, %v2720_v44  ;;  %v323_v53 = vmul.f32 %v256_v20, %v2722_v42  ;;  %v327_v43 = vmul.f32 %v256_v20, %v2727_v48  ;;  %v489_v59 = vadd.f32 %v442_v11, %v303_v12 }
  0xb1   :  { %v324_v41 = vmul.f32 %v256_v20, %v2723_v55  ;;  %v325_v7 = vmul.f32 %v256_v20, %v2725_v38  ;;  %v326_v24 = vmul.f32 %v256_v20, %v2726_v60  ;;  %v490_v36 = vadd.f32 %v442_v11, %v304_v62  ;;  %v2733_v62 = vld [vmem:[#allocation62_spill] sm:$0xff] }
  0xb2   :  { %v491_v52 = vadd.f32 %v442_v11, %v305_v0  ;;  %v492_v47 = vadd.f32 %v442_v11, %v306_v10  ;;  %v493_v44 = vadd.f32 %v442_v11, %v307_v8  ;;  %v494_v57 = vadd.f32 %v442_v11, %v308_v9  ;;  %640 = vst [vmem:[%s2473_s3 + $0xc8] sm:$0xff] %v489_v59 }
  0xb3   :  { %v495_v51 = vadd.f32 %v442_v11, %v309_v58  ;;  %v496_v42 = vadd.f32 %v442_v11, %v310_v5  ;;  %v497_v56 = vadd.f32 %v442_v11, %v311_v6  ;;  %v498_v33 = vadd.f32 %v442_v11, %v312_v25  ;;  %641 = vst [vmem:[%s2473_s3 + $0xd0] sm:$0xff] %v490_v36  ;;  %v2732_v5 = vld [vmem:[#allocation61_spill] sm:$0xff]  ;;  %v2734_v58 = vld [vmem:[#allocation63_spill] sm:$0xff] }
  0xb4   :  { %v499_v55 = vadd.f32 %v442_v11, %v313_v61  ;;  %v500_v46 = vadd.f32 %v442_v11, %v314_v21  ;;  %642 = vst [vmem:[%s2473_s3 + $0xd8] sm:$0xff] %v491_v52  ;;  %643 = vst [vmem:[%s2473_s3 + $0xe0] sm:$0xff] %v492_v47  ;;  %v501_v20 = vadd.f32 %v442_v11, %v315_v37  ;;  %v1732_v52 = vpop.permute.xlu0 %436  ;;  %v2735_v61 = vld [vmem:[#allocation64_spill] sm:$0xff]  ;;  %v2740_v47 = vld [vmem:[#allocation69_spill] sm:$0xff] }
  0xb5   :  { %v502_v25 = vadd.f32 %v442_v11, %v316_v39  ;;  %v503_v63 = vadd.f32 %v442_v11, %v317_v3  ;;  %v504_v21 = vadd.f32 %v442_v11, %v318_v1  ;;  %644 = vst [vmem:[%s2473_s3 + $0xe8] sm:$0xff] %v493_v44  ;;  %645 = vst [vmem:[%s2473_s3 + $0xf0] sm:$0xff] %v494_v57 }
  0xb6   :  { %646 = vst [vmem:[%s2473_s3 + $0xf8] sm:$0xff] %v495_v51  ;;  %647 = vst [vmem:[%s2473_s3 + $0x100] sm:$0xff] %v496_v42  ;;  %v505_v59 = vadd.f32 %v442_v11, %v319_v35  ;;  %v506_v60 = vadd.f32 %v442_v11, %v320_v54  ;;  %v507_v38 = vadd.f32 %v442_v11, %v321_v4  ;;  %v2737_v4 = vld [vmem:[#allocation66_spill] sm:$0xff] }
  0xb7   :  { %v508_v1 = vadd.f32 %v442_v11, %v322_v2  ;;  %648 = vst [vmem:[%s2473_s3 + $0x108] sm:$0xff] %v497_v56  ;;  %649 = vst [vmem:[%s2473_s3 + $0x110] sm:$0xff] %v498_v33  ;;  %v509_v51 = vadd.f32 %v442_v11, %v323_v53  ;;  %v510_v57 = vadd.f32 %v442_v11, %v324_v41  ;;  %v2741_v42 = vld [vmem:[#allocation70_spill] sm:$0xff] }
  0xb8   :  { %650 = vst [vmem:[%s2473_s3 + $0x118] sm:$0xff] %v499_v55  ;;  %651 = vst [vmem:[%s2473_s3 + $0x120] sm:$0xff] %v500_v46  ;;  %v511_v35 = vadd.f32 %v442_v11, %v325_v7  ;;  %v512_v2 = vadd.f32 %v442_v11, %v326_v24  ;;  %v513_v46 = vadd.f32 %v442_v11, %v327_v43  ;;  %v2736_v11 = vld [vmem:[#allocation65_spill] sm:$0xff]  ;;  %v2739_v43 = vld [vmem:[#allocation68_spill] sm:$0xff] }
  0xb9   :  { %652 = vst [vmem:[%s2473_s3 + $0x128] sm:$0xff] %v501_v20  ;;  %653 = vst [vmem:[%s2473_s3 + $0x130] sm:$0xff] %v502_v25  ;;  %v464_v56 = vadd.f32 %v1732_v52, %v1456_v22  ;;  %v465_v24 = vadd.f32 %v1732_v52, %v1460_v15  ;;  %v466_v41 = vadd.f32 %v1732_v52, %v1464_v23  ;;  %v2742_v55 = vld [vmem:[#allocation71_spill] sm:$0xff]  ;;  %v2743_v25 = vld [vmem:[#allocation72_spill] sm:$0xff] }
  0xba   :  { %654 = vst [vmem:[%s2473_s3 + $0x138] sm:$0xff] %v503_v63  ;;  %655 = vst [vmem:[%s2473_s3 + $0x140] sm:$0xff] %v504_v21  ;;  %v467_v22 = vadd.f32 %v1732_v52, %v1468_v30  ;;  %v468_v15 = vadd.f32 %v1732_v52, %v1472_v32  ;;  %v469_v23 = vadd.f32 %v1732_v52, %v1476_v27  ;;  %v2744_v21 = vld [vmem:[#allocation73_spill] sm:$0xff] }
  0xbb   :  { %656 = vst [vmem:[%s2473_s3 + $0x148] sm:$0xff] %v505_v59  ;;  %657 = vst [vmem:[%s2473_s3 + $0x150] sm:$0xff] %v506_v60  ;;  %v470_v7 = vadd.f32 %v1732_v52, %v1480_v29  ;;  %v471_v3 = vadd.f32 %v1732_v52, %v1484_v18  ;;  %v472_v39 = vadd.f32 %v1732_v52, %v1488_v34  ;;  %v1837_v34 = vpop.permute.xlu1 %451  ;;  %v2745_v59 = vld [vmem:[#allocation74_spill] sm:$0xff] }
  0xbc   :  { %658 = vst [vmem:[%s2473_s3 + $0x158] sm:$0xff] %v507_v38  ;;  %659 = vst [vmem:[%s2473_s3 + $0x160] sm:$0xff] %v508_v1  ;;  %v473_v9 = vadd.f32 %v1732_v52, %v1492_v19  ;;  %v474_v30 = vadd.f32 %v1732_v52, %v1496_v28  ;;  %v475_v32 = vadd.f32 %v1732_v52, %v1500_v40  ;;  %v2746_v38 = vld [vmem:[#allocation75_spill] sm:$0xff] }
  0xbd   :  { %660 = vst [vmem:[%s2473_s3 + $0x168] sm:$0xff] %v509_v51  ;;  %661 = vst [vmem:[%s2473_s3 + $0x170] sm:$0xff] %v510_v57  ;;  %v476_v27 = vadd.f32 %v1732_v52, %v1504_v17  ;;  %v477_v29 = vadd.f32 %v1732_v52, %v1508_v45  ;;  %v478_v18 = vadd.f32 %v1732_v52, %v1512_v16  ;;  %v2729_v16 = vld [vmem:[#allocation58_spill] sm:$0xff]  ;;  %v1960_v51 = vpop.permute.xlu0 %446  ;;  %v2747_v57 = vld [vmem:[#allocation76_spill] sm:$0xff] }
  0xbe   :  { %662 = vst [vmem:[%s2473_s3 + $0x178] sm:$0xff] %v511_v35  ;;  %663 = vst [vmem:[%s2473_s3 + $0x180] sm:$0xff] %v512_v2  ;;  %v479_v19 = vadd.f32 %v1732_v52, %v1516_v14  ;;  %v480_v28 = vadd.f32 %v1732_v52, %v1520_v50  ;;  %v481_v40 = vadd.f32 %v1732_v52, %v1524_v26  ;;  %v2728_v14 = vld [vmem:[#allocation57_spill] sm:$0xff] }
  0xbf   :  { %614 = vst [vmem:[%s2473_s3] sm:$0xff] %v464_v56  ;;  %615 = vst [vmem:[%s2473_s3 + $0x8] sm:$0xff] %v465_v24  ;;  %v482_v17 = vadd.f32 %v1732_v52, %v1528_v31  ;;  %v483_v26 = vadd.f32 %v1732_v52, %v1532_v13  ;;  %v484_v45 = vadd.f32 %v1732_v52, %v2728_v14  ;;  %v2730_v31 = vld [vmem:[#allocation59_spill] sm:$0xff]  ;;  %v2731_v13 = vld [vmem:[#allocation60_spill] sm:$0xff] }
  0xc0   :  { %616 = vst [vmem:[%s2473_s3 + $0x10] sm:$0xff] %v466_v41  ;;  %664 = vst.msk [vmem:[%s2473_s3 + $0x188] sm:$0xff] %vm638_vm0, %v513_v46  ;;  %v485_v50 = vadd.f32 %v1732_v52, %v2729_v16  ;;  %v486_v0 = vadd.f32 %v1732_v52, %v2730_v31  ;;  %v487_v10 = vadd.f32 %v1732_v52, %v2731_v13  ;;  %v2748_v2 = vld [vmem:[#allocation77_spill] sm:$0xff]  ;;  %v2749_v56 = vld [vmem:[#allocation78_spill] sm:$0xff] }
  0xc1   :  { %617 = vst [vmem:[%s2473_s3 + $0x18] sm:$0xff] %v467_v22  ;;  %618 = vst [vmem:[%s2473_s3 + $0x20] sm:$0xff] %v468_v15  ;;  %v488_v12 = vadd.f32 %v1732_v52, %v2732_v5  ;;  %v539_v8 = vadd.f32 %v1837_v34, %v2733_v62  ;;  %v540_v6 = vadd.f32 %v1837_v34, %v2734_v58  ;;  %v2750_v41 = vld [vmem:[#allocation79_spill] sm:$0xff]  ;;  %v2751_v15 = vld [vmem:[#allocation81_spill] sm:$0xff] }
  0xc2   :  { %619 = vst [vmem:[%s2473_s3 + $0x28] sm:$0xff] %v469_v23  ;;  %620 = vst [vmem:[%s2473_s3 + $0x30] sm:$0xff] %v470_v7  ;;  %v541_v37 = vadd.f32 %v1837_v34, %v2735_v61  ;;  %v542_v54 = vadd.f32 %v1837_v34, %v2736_v11  ;;  %v543_v53 = vadd.f32 %v1837_v34, %v2737_v4  ;;  %v2752_v7 = vld [vmem:[#allocation82_spill] sm:$0xff] }
  0xc3   :  { %621 = vst [vmem:[%s2473_s3 + $0x38] sm:$0xff] %v471_v3  ;;  %622 = vst [vmem:[%s2473_s3 + $0x40] sm:$0xff] %v472_v39  ;;  %v544_v48 = vadd.f32 %v1837_v34, %v2738_v49  ;;  %v545_v36 = vadd.f32 %v1837_v34, %v2739_v43  ;;  %v546_v44 = vadd.f32 %v1837_v34, %v2740_v47  ;;  %v2753_v39 = vld [vmem:[#allocation83_spill] sm:$0xff] }
  0xc4   :  { %623 = vst [vmem:[%s2473_s3 + $0x48] sm:$0xff] %v473_v9  ;;  %624 = vst [vmem:[%s2473_s3 + $0x50] sm:$0xff] %v474_v30  ;;  %v547_v33 = vadd.f32 %v1837_v34, %v2741_v42  ;;  %v548_v20 = vadd.f32 %v1837_v34, %v2742_v55  ;;  %v549_v63 = vadd.f32 %v1837_v34, %v2743_v25  ;;  %v2754_v30 = vld [vmem:[#allocation84_spill] sm:$0xff] }
  0xc5   :  { %625 = vst [vmem:[%s2473_s3 + $0x58] sm:$0xff] %v475_v32  ;;  %626 = vst [vmem:[%s2473_s3 + $0x60] sm:$0xff] %v476_v27  ;;  %v550_v52 = vadd.f32 %v1837_v34, %v2744_v21  ;;  %v551_v60 = vadd.f32 %v1837_v34, %v2745_v59  ;;  %v552_v1 = vadd.f32 %v1837_v34, %v2746_v38  ;;  %v2755_v27 = vld [vmem:[#allocation85_spill] sm:$0xff] }
  0xc6   :  { %627 = vst [vmem:[%s2473_s3 + $0x68] sm:$0xff] %v477_v29  ;;  %628 = vst [vmem:[%s2473_s3 + $0x70] sm:$0xff] %v478_v18  ;;  %v553_v35 = vadd.f32 %v1837_v34, %v2747_v57  ;;  %v554_v46 = vadd.f32 %v1837_v34, %v2748_v2  ;;  %v555_v24 = vadd.f32 %v1837_v34, %v2749_v56  ;;  %v2756_v18 = vld [vmem:[#allocation86_spill] sm:$0xff] }
  0xc7   :  { %629 = vst [vmem:[%s2473_s3 + $0x78] sm:$0xff] %v479_v19  ;;  %630 = vst [vmem:[%s2473_s3 + $0x80] sm:$0xff] %v480_v28  ;;  %v556_v22 = vadd.f32 %v1837_v34, %v2750_v41  ;;  %v557_v23 = vadd.f32 %v1837_v34, %v2751_v15  ;;  %v558_v3 = vadd.f32 %v1837_v34, %v2752_v7  ;;  %v2757_v28 = vld [vmem:[#allocation87_spill] sm:$0xff]  ;;  %v2785_v7 = vld [vmem:[#allocation80_spill] sm:$0xff] }
  0xc8   :  { %631 = vst [vmem:[%s2473_s3 + $0x88] sm:$0xff] %v481_v40  ;;  %632 = vst [vmem:[%s2473_s3 + $0x90] sm:$0xff] %v482_v17  ;;  %v559_v9 = vadd.f32 %v1837_v34, %v2753_v39  ;;  %v560_v32 = vadd.f32 %v1837_v34, %v2754_v30  ;;  %v561_v29 = vadd.f32 %v1837_v34, %v2755_v27  ;;  %v2758_v17 = vld [vmem:[#allocation32_spill] sm:$0xff] }
  0xc9   :  { %633 = vst [vmem:[%s2473_s3 + $0x98] sm:$0xff] %v483_v26  ;;  %634 = vst [vmem:[%s2473_s3 + $0xa0] sm:$0xff] %v484_v45  ;;  %v562_v19 = vadd.f32 %v1837_v34, %v2756_v18  ;;  %v563_v40 = vadd.f32 %v1837_v34, %v2757_v28  ;;  %v514_v26 = vadd.f32 %v1960_v51, %v2758_v17  ;;  %v2759_v34 = vld [vmem:[#allocation33_spill] sm:$0xff]  ;;  %v2760_v45 = vld [vmem:[#allocation34_spill] sm:$0xff] }
  0xca   :  { %635 = vst [vmem:[%s2473_s3 + $0xa8] sm:$0xff] %v485_v50  ;;  %636 = vst [vmem:[%s2473_s3 + $0xb0] sm:$0xff] %v486_v0  ;;  %v515_v14 = vadd.f32 %v1960_v51, %v2759_v34  ;;  %v516_v16 = vadd.f32 %v1960_v51, %v2760_v45  ;;  %v2761_v50 = vld [vmem:[#allocation35_spill] sm:$0xff]  ;;  %v2762_v0 = vld [vmem:[#allocation36_spill] sm:$0xff] }
  0xcb   :  { %637 = vst [vmem:[%s2473_s3 + $0xb8] sm:$0xff] %v487_v10  ;;  %690 = vst [vmem:[%s2473_s3 + $0x258] sm:$0xff] %v539_v8  ;;  %v517_v31 = vadd.f32 %v1960_v51, %v2761_v50  ;;  %v518_v13 = vadd.f32 %v1960_v51, %v2762_v0  ;;  %v2763_v10 = vld [vmem:[#allocation37_spill] sm:$0xff]  ;;  %v2765_v8 = vld [vmem:[#allocation39_spill] sm:$0xff] }
  0xcc   :  { %691 = vst [vmem:[%s2473_s3 + $0x260] sm:$0xff] %v540_v6  ;;  %639 = vst.msk [vmem:[%s2473_s3 + $0xc0] sm:$0xff] %vm638_vm0, %v488_v12  ;;  %v519_v5 = vadd.f32 %v1960_v51, %v2763_v10  ;;  %v2764_v12 = vld [vmem:[#allocation38_spill] sm:$0xff]  ;;  %v521_v58 = vadd.f32 %v1960_v51, %v2765_v8  ;;  %v2766_v6 = vld [vmem:[#allocation40_spill] sm:$0xff] }
  0xcd   :  { %692 = vst [vmem:[%s2473_s3 + $0x268] sm:$0xff] %v541_v37  ;;  %693 = vst [vmem:[%s2473_s3 + $0x270] sm:$0xff] %v542_v54  ;;  %v520_v62 = vadd.f32 %v1960_v51, %v2764_v12  ;;  %v522_v61 = vadd.f32 %v1960_v51, %v2766_v6  ;;  %v2767_v37 = vld [vmem:[#allocation41_spill] sm:$0xff]  ;;  %v2768_v54 = vld [vmem:[#allocation42_spill] sm:$0xff] }
  0xce   :  { %694 = vst [vmem:[%s2473_s3 + $0x278] sm:$0xff] %v543_v53  ;;  %695 = vst [vmem:[%s2473_s3 + $0x280] sm:$0xff] %v544_v48  ;;  %v523_v11 = vadd.f32 %v1960_v51, %v2767_v37  ;;  %v524_v4 = vadd.f32 %v1960_v51, %v2768_v54  ;;  %v2769_v53 = vld [vmem:[#allocation43_spill] sm:$0xff]  ;;  %v2770_v48 = vld [vmem:[#allocation44_spill] sm:$0xff] }
  0xcf   :  { %696 = vst [vmem:[%s2473_s3 + $0x288] sm:$0xff] %v545_v36  ;;  %697 = vst [vmem:[%s2473_s3 + $0x290] sm:$0xff] %v546_v44  ;;  %v525_v49 = vadd.f32 %v1960_v51, %v2769_v53  ;;  %v526_v43 = vadd.f32 %v1960_v51, %v2770_v48  ;;  %v2771_v36 = vld [vmem:[#allocation45_spill] sm:$0xff]  ;;  %v2772_v44 = vld [vmem:[#allocation46_spill] sm:$0xff] }
  0xd0   :  { %698 = vst [vmem:[%s2473_s3 + $0x298] sm:$0xff] %v547_v33  ;;  %699 = vst [vmem:[%s2473_s3 + $0x2a0] sm:$0xff] %v548_v20  ;;  %v527_v47 = vadd.f32 %v1960_v51, %v2771_v36  ;;  %v528_v42 = vadd.f32 %v1960_v51, %v2772_v44  ;;  %v2773_v33 = vld [vmem:[#allocation47_spill] sm:$0xff]  ;;  %v2774_v20 = vld [vmem:[#allocation48_spill] sm:$0xff] }
  0xd1   :  { %700 = vst [vmem:[%s2473_s3 + $0x2a8] sm:$0xff] %v549_v63  ;;  %701 = vst [vmem:[%s2473_s3 + $0x2b0] sm:$0xff] %v550_v52  ;;  %v529_v55 = vadd.f32 %v1960_v51, %v2773_v33  ;;  %v530_v25 = vadd.f32 %v1960_v51, %v2774_v20  ;;  %v2775_v63 = vld [vmem:[#allocation49_spill] sm:$0xff]  ;;  %v2776_v52 = vld [vmem:[#allocation50_spill] sm:$0xff] }
  0xd2   :  { %702 = vst [vmem:[%s2473_s3 + $0x2b8] sm:$0xff] %v551_v60  ;;  %703 = vst [vmem:[%s2473_s3 + $0x2c0] sm:$0xff] %v552_v1  ;;  %v531_v21 = vadd.f32 %v1960_v51, %v2775_v63  ;;  %v532_v59 = vadd.f32 %v1960_v51, %v2776_v52  ;;  %v2777_v60 = vld [vmem:[#allocation51_spill] sm:$0xff]  ;;  %v2778_v1 = vld [vmem:[#allocation52_spill] sm:$0xff] }
  0xd3   :  { %704 = vst [vmem:[%s2473_s3 + $0x2c8] sm:$0xff] %v553_v35  ;;  %705 = vst [vmem:[%s2473_s3 + $0x2d0] sm:$0xff] %v554_v46  ;;  %v533_v38 = vadd.f32 %v1960_v51, %v2777_v60  ;;  %v534_v57 = vadd.f32 %v1960_v51, %v2778_v1  ;;  %v2779_v35 = vld [vmem:[#allocation53_spill] sm:$0xff]  ;;  %v2780_v46 = vld [vmem:[#allocation54_spill] sm:$0xff] }
  0xd4   :  { %706 = vst [vmem:[%s2473_s3 + $0x2d8] sm:$0xff] %v555_v24  ;;  %707 = vst [vmem:[%s2473_s3 + $0x2e0] sm:$0xff] %v556_v22  ;;  %v535_v2 = vadd.f32 %v1960_v51, %v2779_v35  ;;  %v536_v56 = vadd.f32 %v1960_v51, %v2780_v46  ;;  %v2781_v24 = vld [vmem:[#allocation55_spill] sm:$0xff]  ;;  %v2782_v22 = vld [vmem:[#allocation56_spill] sm:$0xff] }
  0xd5   :  { %708 = vst [vmem:[%s2473_s3 + $0x2e8] sm:$0xff] %v557_v23  ;;  %709 = vst [vmem:[%s2473_s3 + $0x2f0] sm:$0xff] %v558_v3  ;;  %v537_v41 = vadd.f32 %v1960_v51, %v2781_v24  ;;  %v538_v15 = vadd.f32 %v1960_v51, %v2782_v22  ;;  %v2783_v51 = vld [vmem:[#allocation7_spill] sm:$0xff]  ;;  %v2787_v30 = vld [vmem:[#allocation8_spill] sm:$0xff] }
  0xd6   :  { %710 = vst [vmem:[%s2473_s3 + $0x2f8] sm:$0xff] %v559_v9  ;;  %711 = vst [vmem:[%s2473_s3 + $0x300] sm:$0xff] %v560_v32  ;;  %v2784_v23 = vunpack.c.l.bf16 %v2783_v51  ;;  %v2786_v39 = vunpack.c.h.bf16 %v2783_v51  ;;  %v2788_v32 = vunpack.c.l.bf16 %v2787_v30  ;;  %v2793_v34 = vld [vmem:[#allocation10_spill] sm:$0xff]  ;;  %v2799_v12 = vld [vmem:[#allocation12_spill] sm:$0xff] }
  0xd7   :  { %712 = vst [vmem:[%s2473_s3 + $0x308] sm:$0xff] %v561_v29  ;;  %713 = vst [vmem:[%s2473_s3 + $0x310] sm:$0xff] %v562_v19  ;;  %v2789_v29 = vunpack.c.h.bf16 %v2787_v30  ;;  %v2790_v19 = vld [vmem:[#allocation9_spill] sm:$0xff]  ;;  %v2808_v44 = vld [vmem:[#allocation15_spill] sm:$0xff] }
  0xd8   :  { %665 = vst [vmem:[%s2473_s3 + $0x190] sm:$0xff] %v514_v26  ;;  %714 = vst.msk [vmem:[%s2473_s3 + $0x318] sm:$0xff] %vm638_vm0, %v563_v40  ;;  %v403_v3 = vmul.f32 %v2785_v7, %v2784_v23  ;;  %v404_v9 = vmul.f32 %v2785_v7, %v2786_v39  ;;  %v405_v27 = vmul.f32 %v2785_v7, %v2788_v32  ;;  %v2791_v28 = vunpack.c.l.bf16 %v2790_v19  ;;  %v2802_v37 = vld [vmem:[#allocation13_spill] sm:$0xff]  ;;  %v2820_v22 = vld [vmem:[#allocation19_spill] sm:$0xff] }
  0xd9   :  { %666 = vst [vmem:[%s2473_s3 + $0x198] sm:$0xff] %v515_v14  ;;  %667 = vst [vmem:[%s2473_s3 + $0x1a0] sm:$0xff] %v516_v16  ;;  %v406_v18 = vmul.f32 %v2785_v7, %v2789_v29  ;;  %v2792_v17 = vunpack.c.h.bf16 %v2790_v19  ;;  %v2794_v14 = vunpack.c.l.bf16 %v2793_v34  ;;  %v2795_v16 = vunpack.c.h.bf16 %v2793_v34  ;;  %v2814_v60 = vld [vmem:[#allocation17_spill] sm:$0xff] }
  0xda   :  { %668 = vst [vmem:[%s2473_s3 + $0x1a8] sm:$0xff] %v517_v31  ;;  %669 = vst [vmem:[%s2473_s3 + $0x1b0] sm:$0xff] %v518_v13  ;;  %v407_v40 = vmul.f32 %v2785_v7, %v2791_v28  ;;  %v2796_v31 = vld [vmem:[#allocation11_spill] sm:$0xff] }
  0xdb   :  { %670 = vst [vmem:[%s2473_s3 + $0x1b8] sm:$0xff] %v519_v5  ;;  %671 = vst [vmem:[%s2473_s3 + $0x1c0] sm:$0xff] %v520_v62  ;;  %v408_v26 = vmul.f32 %v2785_v7, %v2792_v17  ;;  %v409_v45 = vmul.f32 %v2785_v7, %v2794_v14  ;;  %v410_v50 = vmul.f32 %v2785_v7, %v2795_v16  ;;  %v2797_v0 = vunpack.c.l.bf16 %v2796_v31 }
  0xdc   :  { %672 = vst [vmem:[%s2473_s3 + $0x1c8] sm:$0xff] %v521_v58  ;;  %673 = vst [vmem:[%s2473_s3 + $0x1d0] sm:$0xff] %v522_v61  ;;  %v2798_v10 = vunpack.c.h.bf16 %v2796_v31  ;;  %v2800_v62 = vunpack.c.l.bf16 %v2799_v12  ;;  %v2801_v58 = vunpack.c.h.bf16 %v2799_v12  ;;  %v462_v61 = vpop.permute.xlu1 %461  ;;  %v2822_v12 = vld [vmem:[#allocation20_spill] sm:$0xff] }
  0xdd   :  { %674 = vst [vmem:[%s2473_s3 + $0x1d8] sm:$0xff] %v523_v11  ;;  %675 = vst [vmem:[%s2473_s3 + $0x1e0] sm:$0xff] %v524_v4  ;;  %v411_v13 = vmul.f32 %v2785_v7, %v2797_v0  ;;  %v2803_v11 = vunpack.c.l.bf16 %v2802_v37  ;;  %v2804_v4 = vunpack.c.h.bf16 %v2802_v37  ;;  %v589_v23 = vadd.f32 %v462_v61, %v403_v3  ;;  %v2826_v37 = vld [vmem:[#allocation21_spill] sm:$0xff] }
  0xde   :  { %676 = vst [vmem:[%s2473_s3 + $0x1e8] sm:$0xff] %v525_v49  ;;  %677 = vst [vmem:[%s2473_s3 + $0x1f0] sm:$0xff] %v526_v43  ;;  %v412_v5 = vmul.f32 %v2785_v7, %v2798_v10  ;;  %v413_v8 = vmul.f32 %v2785_v7, %v2800_v62  ;;  %v414_v6 = vmul.f32 %v2785_v7, %v2801_v58  ;;  %v2805_v49 = vld [vmem:[#allocation14_spill] sm:$0xff]  ;;  %v2823_v62 = vunpack.c.l.bf16 %v2822_v12 }
  0xdf   :  { %678 = vst [vmem:[%s2473_s3 + $0x1f8] sm:$0xff] %v527_v47  ;;  %679 = vst [vmem:[%s2473_s3 + $0x200] sm:$0xff] %v528_v42  ;;  %v415_v54 = vmul.f32 %v2785_v7, %v2803_v11  ;;  %v416_v53 = vmul.f32 %v2785_v7, %v2804_v4  ;;  %v2806_v48 = vunpack.c.l.bf16 %v2805_v49  ;;  %v2807_v36 = vunpack.c.h.bf16 %v2805_v49  ;;  %v2829_v49 = vld [vmem:[#allocation22_spill] sm:$0xff] }
  0xe0   :  { %680 = vst [vmem:[%s2473_s3 + $0x208] sm:$0xff] %v529_v55  ;;  %681 = vst [vmem:[%s2473_s3 + $0x210] sm:$0xff] %v530_v25  ;;  %v2809_v42 = vunpack.c.l.bf16 %v2808_v44  ;;  %v2810_v55 = vunpack.c.h.bf16 %v2808_v44  ;;  %v2811_v25 = vld [vmem:[#allocation16_spill] sm:$0xff]  ;;  %v590_v39 = vadd.f32 %v462_v61, %v404_v9  ;;  %v591_v30 = vadd.f32 %v462_v61, %v405_v27  ;;  %v2832_v44 = vld [vmem:[#allocation23_spill] sm:$0xff] }
  0xe1   :  { %682 = vst [vmem:[%s2473_s3 + $0x218] sm:$0xff] %v531_v21  ;;  %683 = vst [vmem:[%s2473_s3 + $0x220] sm:$0xff] %v532_v59  ;;  %v417_v43 = vmul.f32 %v2785_v7, %v2806_v48  ;;  %v418_v47 = vmul.f32 %v2785_v7, %v2807_v36  ;;  %v2812_v63 = vunpack.c.l.bf16 %v2811_v25  ;;  %v2813_v52 = vunpack.c.h.bf16 %v2811_v25  ;;  %v2835_v25 = vld [vmem:[#allocation24_spill] sm:$0xff] }
  0xe2   :  { %684 = vst [vmem:[%s2473_s3 + $0x228] sm:$0xff] %v533_v38  ;;  %685 = vst [vmem:[%s2473_s3 + $0x230] sm:$0xff] %v534_v57  ;;  %v419_v33 = vmul.f32 %v2785_v7, %v2809_v42  ;;  %v420_v20 = vmul.f32 %v2785_v7, %v2810_v55  ;;  %v2815_v38 = vunpack.c.l.bf16 %v2814_v60  ;;  %v2816_v57 = vunpack.c.h.bf16 %v2814_v60  ;;  %v457_v60 = vpop.permute.xlu0 %456 }
  0xe3   :  { %686 = vst [vmem:[%s2473_s3 + $0x238] sm:$0xff] %v535_v2  ;;  %687 = vst [vmem:[%s2473_s3 + $0x240] sm:$0xff] %v536_v56  ;;  %v421_v21 = vmul.f32 %v2785_v7, %v2812_v63  ;;  %v422_v59 = vmul.f32 %v2785_v7, %v2813_v52  ;;  %v2817_v2 = vld [vmem:[#allocation18_spill] sm:$0xff]  ;;  %v592_v32 = vadd.f32 %v462_v61, %v406_v18  ;;  %v2827_v11 = vunpack.c.l.bf16 %v2826_v37 }
  0xe4   :  { %688 = vst [vmem:[%s2473_s3 + $0x248] sm:$0xff] %v537_v41  ;;  %689 = vst.msk [vmem:[%s2473_s3 + $0x250] sm:$0xff] %vm638_vm0, %v538_v15  ;;  %v423_v1 = vmul.f32 %v2785_v7, %v2815_v38  ;;  %v424_v35 = vmul.f32 %v2785_v7, %v2816_v57  ;;  %v2818_v46 = vunpack.c.l.bf16 %v2817_v2  ;;  %v2819_v24 = vunpack.c.h.bf16 %v2817_v2  ;;  %v2838_v38 = vld [vmem:[#allocation25_spill] sm:$0xff] }
  0xe5   :  { %v2821_v15 = vunpack.c.h.bf16 %v2820_v22  ;;  %v593_v29 = vadd.f32 %v462_v61, %v407_v40  ;;  %v594_v19 = vadd.f32 %v462_v61, %v408_v26  ;;  %v595_v28 = vadd.f32 %v462_v61, %v409_v45  ;;  %740 = vst [vmem:[%s2473_s3 + $0x3e8] sm:$0xff] %v589_v23  ;;  %741 = vst [vmem:[%s2473_s3 + $0x3f0] sm:$0xff] %v590_v39 }
  0xe6   :  { %v425_v56 = vmul.f32 %v2785_v7, %v2818_v46  ;;  %v426_v41 = vmul.f32 %v2785_v7, %v2819_v24  ;;  %v596_v17 = vadd.f32 %v462_v61, %v410_v50  ;;  %v597_v34 = vadd.f32 %v462_v61, %v411_v13  ;;  %742 = vst [vmem:[%s2473_s3 + $0x3f8] sm:$0xff] %v591_v30  ;;  %v2841_v46 = vld [vmem:[#allocation26_spill] sm:$0xff] }
  0xe7   :  { %v427_v51 = vmul.f32 %v2785_v7, %v2821_v15  ;;  %v598_v14 = vadd.f32 %v462_v61, %v412_v5  ;;  %v599_v16 = vadd.f32 %v462_v61, %v413_v8  ;;  %v600_v7 = vadd.f32 %v462_v61, %v414_v6  ;;  %743 = vst [vmem:[%s2473_s3 + $0x400] sm:$0xff] %v592_v32  ;;  %v2824_v8 = vld [vmem:[#allocation2_spill] sm:$0xff] }
  0xe8   :  { %v601_v3 = vadd.f32 %v462_v61, %v415_v54  ;;  %v602_v9 = vadd.f32 %v462_v61, %v416_v53  ;;  %v603_v27 = vadd.f32 %v462_v61, %v417_v43  ;;  %744 = vst [vmem:[%s2473_s3 + $0x408] sm:$0xff] %v593_v29  ;;  %745 = vst [vmem:[%s2473_s3 + $0x410] sm:$0xff] %v594_v19  ;;  %v2825_v6 = vunpack.c.h.bf16 %v2822_v12  ;;  %v2847_v29 = vld [vmem:[#allocation28_spill] sm:$0xff] }
  0xe9   :  { %746 = vst [vmem:[%s2473_s3 + $0x418] sm:$0xff] %v595_v28  ;;  %v604_v18 = vadd.f32 %v462_v61, %v418_v47  ;;  %v605_v40 = vadd.f32 %v462_v61, %v419_v33  ;;  %v606_v26 = vadd.f32 %v462_v61, %v420_v20  ;;  %v607_v45 = vadd.f32 %v462_v61, %v421_v21 }
  0xea   :  { %747 = vst [vmem:[%s2473_s3 + $0x420] sm:$0xff] %v596_v17  ;;  %748 = vst [vmem:[%s2473_s3 + $0x428] sm:$0xff] %v597_v34  ;;  %v608_v50 = vadd.f32 %v462_v61, %v422_v59  ;;  %v609_v31 = vadd.f32 %v462_v61, %v423_v1  ;;  %v610_v0 = vadd.f32 %v462_v61, %v424_v35  ;;  %v2828_v4 = vunpack.c.h.bf16 %v2826_v37 }
  0xeb   :  { %749 = vst [vmem:[%s2473_s3 + $0x430] sm:$0xff] %v598_v14  ;;  %750 = vst [vmem:[%s2473_s3 + $0x438] sm:$0xff] %v599_v16  ;;  %v611_v13 = vadd.f32 %v462_v61, %v425_v56  ;;  %v612_v10 = vadd.f32 %v462_v61, %v426_v41  ;;  %v613_v5 = vadd.f32 %v462_v61, %v427_v51  ;;  %v2830_v48 = vunpack.c.l.bf16 %v2829_v49  ;;  %v2844_v51 = vld [vmem:[#allocation27_spill] sm:$0xff]  ;;  %v2850_v14 = vld [vmem:[#allocation29_spill] sm:$0xff] }
  0xec   :  { %751 = vst [vmem:[%s2473_s3 + $0x440] sm:$0xff] %v600_v7  ;;  %752 = vst [vmem:[%s2473_s3 + $0x448] sm:$0xff] %v601_v3  ;;  %v378_v58 = vmul.f32 %v2824_v8, %v2823_v62  ;;  %v379_v61 = vmul.f32 %v2824_v8, %v2825_v6  ;;  %v380_v54 = vmul.f32 %v2824_v8, %v2827_v11  ;;  %v2831_v36 = vunpack.c.h.bf16 %v2829_v49 }
  0xed   :  { %753 = vst [vmem:[%s2473_s3 + $0x450] sm:$0xff] %v602_v9  ;;  %754 = vst [vmem:[%s2473_s3 + $0x458] sm:$0xff] %v603_v27  ;;  %v381_v53 = vmul.f32 %v2824_v8, %v2828_v4  ;;  %v382_v43 = vmul.f32 %v2824_v8, %v2830_v48  ;;  %v2833_v42 = vunpack.c.l.bf16 %v2832_v44  ;;  %v2834_v55 = vunpack.c.h.bf16 %v2832_v44  ;;  %v2853_v27 = vld [vmem:[#allocation30_spill] sm:$0xff] }
  0xee   :  { %755 = vst [vmem:[%s2473_s3 + $0x460] sm:$0xff] %v604_v18  ;;  %756 = vst [vmem:[%s2473_s3 + $0x468] sm:$0xff] %v605_v40  ;;  %v383_v47 = vmul.f32 %v2824_v8, %v2831_v36  ;;  %v2836_v63 = vunpack.c.l.bf16 %v2835_v25  ;;  %v2837_v52 = vunpack.c.h.bf16 %v2835_v25  ;;  %v2839_v1 = vunpack.c.l.bf16 %v2838_v38 }
  0xef   :  { %757 = vst [vmem:[%s2473_s3 + $0x470] sm:$0xff] %v606_v26  ;;  %758 = vst [vmem:[%s2473_s3 + $0x478] sm:$0xff] %v607_v45  ;;  %v384_v33 = vmul.f32 %v2824_v8, %v2833_v42  ;;  %v385_v20 = vmul.f32 %v2824_v8, %v2834_v55  ;;  %v2840_v35 = vunpack.c.h.bf16 %v2838_v38  ;;  %v2842_v56 = vunpack.c.l.bf16 %v2841_v46 }
  0xf0   :  { %759 = vst [vmem:[%s2473_s3 + $0x480] sm:$0xff] %v608_v50  ;;  %760 = vst [vmem:[%s2473_s3 + $0x488] sm:$0xff] %v609_v31  ;;  %v386_v21 = vmul.f32 %v2824_v8, %v2836_v63  ;;  %v387_v59 = vmul.f32 %v2824_v8, %v2837_v52  ;;  %v388_v57 = vmul.f32 %v2824_v8, %v2839_v1  ;;  %v2843_v41 = vunpack.c.h.bf16 %v2841_v46  ;;  %v2856_v50 = vld [vmem:[#allocation31_spill] sm:$0xff] }
  0xf1   :  { %761 = vst [vmem:[%s2473_s3 + $0x490] sm:$0xff] %v610_v0  ;;  %762 = vst [vmem:[%s2473_s3 + $0x498] sm:$0xff] %v611_v13  ;;  %v389_v2 = vmul.f32 %v2824_v8, %v2840_v35  ;;  %v390_v24 = vmul.f32 %v2824_v8, %v2842_v56  ;;  %v2845_v23 = vunpack.c.l.bf16 %v2844_v51  ;;  %v2846_v30 = vunpack.c.h.bf16 %v2844_v51 }
  0xf2   :  { %763 = vst [vmem:[%s2473_s3 + $0x4a0] sm:$0xff] %v612_v10  ;;  %764 = vst.msk [vmem:[%s2473_s3 + $0x4a8] sm:$0xff] %vm638_vm0, %v613_v5  ;;  %v391_v15 = vmul.f32 %v2824_v8, %v2843_v41  ;;  %v2848_v19 = vunpack.c.l.bf16 %v2847_v29  ;;  %v2849_v17 = vunpack.c.h.bf16 %v2847_v29  ;;  %v2851_v16 = vunpack.c.l.bf16 %v2850_v14 }
  0xf3   :  { %v392_v39 = vmul.f32 %v2824_v8, %v2845_v23  ;;  %v393_v32 = vmul.f32 %v2824_v8, %v2846_v30  ;;  %v2852_v3 = vunpack.c.h.bf16 %v2850_v14  ;;  %v2854_v18 = vunpack.c.l.bf16 %v2853_v27 }
  0xf4   :  { %v394_v28 = vmul.f32 %v2824_v8, %v2848_v19  ;;  %v395_v34 = vmul.f32 %v2824_v8, %v2849_v17  ;;  %v396_v7 = vmul.f32 %v2824_v8, %v2851_v16  ;;  %v2855_v26 = vunpack.c.h.bf16 %v2853_v27 }
  0xf5   :  { %v397_v9 = vmul.f32 %v2824_v8, %v2852_v3  ;;  %v398_v40 = vmul.f32 %v2824_v8, %v2854_v18  ;;  %v2857_v31 = vunpack.c.l.bf16 %v2856_v50  ;;  %v2858_v13 = vunpack.c.h.bf16 %v2856_v50 }
  0xf6   :  { %v399_v45 = vmul.f32 %v2824_v8, %v2855_v26  ;;  %v2859_v5 = vunpack.c.l.bf16 %v2820_v22  ;;  %v564_v62 = vadd.f32 %v457_v60, %v378_v58  ;;  %v565_v6 = vadd.f32 %v457_v60, %v379_v61 }
  0xf7   :  { %v400_v0 = vmul.f32 %v2824_v8, %v2857_v31  ;;  %v401_v10 = vmul.f32 %v2824_v8, %v2858_v13  ;;  %v566_v37 = vadd.f32 %v457_v60, %v380_v54  ;;  %v567_v11 = vadd.f32 %v457_v60, %v381_v53 }
  0xf8   :  { %v402_v12 = vmul.f32 %v2824_v8, %v2859_v5  ;;  %v568_v4 = vadd.f32 %v457_v60, %v382_v43  ;;  %v569_v49 = vadd.f32 %v457_v60, %v383_v47  ;;  %v570_v48 = vadd.f32 %v457_v60, %v384_v33  ;;  %715 = vst [vmem:[%s2473_s3 + $0x320] sm:$0xff] %v564_v62 }
  0xf9   :  { %v571_v36 = vadd.f32 %v457_v60, %v385_v20  ;;  %v572_v44 = vadd.f32 %v457_v60, %v386_v21  ;;  %v573_v42 = vadd.f32 %v457_v60, %v387_v59  ;;  %v574_v55 = vadd.f32 %v457_v60, %v388_v57  ;;  %716 = vst [vmem:[%s2473_s3 + $0x328] sm:$0xff] %v565_v6 }
  0xfa   :  { %v575_v25 = vadd.f32 %v457_v60, %v389_v2  ;;  %v576_v63 = vadd.f32 %v457_v60, %v390_v24  ;;  %717 = vst [vmem:[%s2473_s3 + $0x330] sm:$0xff] %v566_v37  ;;  %718 = vst [vmem:[%s2473_s3 + $0x338] sm:$0xff] %v567_v11  ;;  %v577_v22 = vadd.f32 %v457_v60, %v391_v15 }
  0xfb   :  { %719 = vst [vmem:[%s2473_s3 + $0x340] sm:$0xff] %v568_v4  ;;  %v578_v8 = vadd.f32 %v457_v60, %v392_v39  ;;  %v579_v58 = vadd.f32 %v457_v60, %v393_v32  ;;  %v580_v61 = vadd.f32 %v457_v60, %v394_v28  ;;  %720 = vst [vmem:[%s2473_s3 + $0x348] sm:$0xff] %v569_v49 }
  0xfc   :  { %721 = vst [vmem:[%s2473_s3 + $0x350] sm:$0xff] %v570_v48  ;;  %722 = vst [vmem:[%s2473_s3 + $0x358] sm:$0xff] %v571_v36  ;;  %v581_v54 = vadd.f32 %v457_v60, %v395_v34  ;;  %v582_v53 = vadd.f32 %v457_v60, %v396_v7  ;;  %v583_v43 = vadd.f32 %v457_v60, %v397_v9 }
  0xfd   :  { %723 = vst [vmem:[%s2473_s3 + $0x360] sm:$0xff] %v572_v44  ;;  %v584_v47 = vadd.f32 %v457_v60, %v398_v40  ;;  %724 = vst [vmem:[%s2473_s3 + $0x368] sm:$0xff] %v573_v42  ;;  %v585_v33 = vadd.f32 %v457_v60, %v399_v45  ;;  %v586_v20 = vadd.f32 %v457_v60, %v400_v0 }
  0xfe   :  { %725 = vst [vmem:[%s2473_s3 + $0x370] sm:$0xff] %v574_v55  ;;  %726 = vst [vmem:[%s2473_s3 + $0x378] sm:$0xff] %v575_v25  ;;  %v587_v21 = vadd.f32 %v457_v60, %v401_v10  ;;  %v588_v52 = vadd.f32 %v457_v60, %v402_v12 }
  0xff   :  { %727 = vst [vmem:[%s2473_s3 + $0x380] sm:$0xff] %v576_v63  ;;  %728 = vst [vmem:[%s2473_s3 + $0x388] sm:$0xff] %v577_v22 }
 0x100   :  { %729 = vst [vmem:[%s2473_s3 + $0x390] sm:$0xff] %v578_v8  ;;  %730 = vst [vmem:[%s2473_s3 + $0x398] sm:$0xff] %v579_v58 }
 0x101   :  { %731 = vst [vmem:[%s2473_s3 + $0x3a0] sm:$0xff] %v580_v61  ;;  %732 = vst [vmem:[%s2473_s3 + $0x3a8] sm:$0xff] %v581_v54 }
 0x102   :  { %733 = vst [vmem:[%s2473_s3 + $0x3b0] sm:$0xff] %v582_v53  ;;  %734 = vst [vmem:[%s2473_s3 + $0x3b8] sm:$0xff] %v583_v43 }
 0x103   :  { %735 = vst [vmem:[%s2473_s3 + $0x3c0] sm:$0xff] %v584_v47  ;;  %736 = vst [vmem:[%s2473_s3 + $0x3c8] sm:$0xff] %v585_v33 }
 0x104   :  { %737 = vst [vmem:[%s2473_s3 + $0x3d0] sm:$0xff] %v586_v20  ;;  %738 = vst [vmem:[%s2473_s3 + $0x3d8] sm:$0xff] %v587_v21 }
 0x105   :  { %739 = vst.msk [vmem:[%s2473_s3 + $0x3e0] sm:$0xff] %vm638_vm0, %v588_v52 }

// kernel: fused_mul_conv_bn.2
= control target key start
LH: loop header
LB: loop body
LE: loop exit
PB: predicated region body
PF: predicated region fallthrough
CT: control target
= control target key end

     0   :  { %s9006_s0 = inlined_call_operand.vmem [shape: f32[1,288,3136], index: 0, kind: input, shape index: {}]   ;;  %s9007_s1 = inlined_call_operand.vmem [shape: bf16[48,288], index: 1, kind: input, shape index: {}]   ;;  %s9008_s2 = inlined_call_operand.vmem [shape: bf16[1,48,3136], index: 2, kind: output, shape index: {0}]   ;;  %s9009_s3 = inlined_call_operand.vmem [shape: f32[1,48,1], index: 3, kind: output, shape index: {1}]   ;;  %s9010_s4 = inlined_call_operand.vmem [shape: f32[1,48,1], index: 4, kind: output, shape index: {2}]  }
   0x1   :  { %9074 = sst [smem:[#allocation76_spill]] %s9006_s0 }
   0x2   :  { %s5629_s15 = smov 0   ;;  %s5631_s16 = smov 0  }
   0x3   :  { %s5633_s17 = smov 0   ;;  %s5635_s18 = smov 0  }
   0x4   :  { %s5637_s19 = smov 0  }
   0x5 LB: > { %s27_s20 = sadd.s32 1, %s5464_s18  ;;  %s4677_s21 = sadd.s32 4294967295, %s5468_s19   ;;  %s5468_s19 = sphi %s5637_s19, %s15_s19   ;;  %s5464_s18 = sphi %s5635_s18, %s9336_s18   ;;  %s5460_s17 = sphi %s5633_s17, %s9335_s17   ;;  %s5456_s16 = sphi %s5631_s16, %s9334_s16   ;;  %s5452_s15 = sphi %s5629_s15, %s9333_s15  }
   0x6   : > { %p28_p0 = scmp.ge.s32.totalorder %s27_s20, 2  ;;  %p54_p1 = scmp.ne.s32.totalorder %s5456_s16, %s5452_s15 }
   0x7   : > { %p55_p2 = scmp.eq.s32.totalorder %s5468_s19, 0  ;;  %p111_p4 = scmp.eq.s32.totalorder %s4677_s21, 1 }
   0x8   : > { %s9338_s20 = smov (%p28_p0, %s27_s20), 0  ;;  %s47_s23 = sadd.s32 1, %s5456_s16 }
   0x9   : > { %9075 = sst [smem:[#allocation4_spill]] %s9338_s20  ;;  %p56_p3 = por %p55_p2, %p54_p1 }
   0xa   : > { %s43_s22 = ssub.s32 %s5464_s18, %s9338_s20  ;;  %p5664_p6 = por %p111_p4, %p54_p1 }
   0xb   : > { %p45_p5 = scmp.eq.s32.totalorder %s43_s22, 0  ;;  %p4680_p7 = scmp.ge.s32.totalorder %s5468_s19, 2 }
   0xd   : > { %s5669_s25 = scalar_select %p45_p5, %s5456_s16, %s47_s23  }
   0xe   : > { %188 = sbr.rel (%p4680_p7) target bundleno = 264 (0x108), region = 20 }
  0x15   : > { %191 = sbr.rel (!%p56_p3) target bundleno = 264 (0x108), region = 24  ;;  %s193_s26 = sand.u32 (%p56_p3), 1, %s5456_s16  }
  0x16   : > { %s4681_s27 = sshll.u32 (%p56_p3), %s5464_s18, 4  ;;  %s4964_s28 = smul.u32 (%p56_p3), 4608, %s193_s26 }
  0x17   : > { %s199_s29 = ssub.s32 (%p56_p3), 25, %s4681_s27  ;;  %s4813_s30 = sshll.u32 (%p56_p3), %s5464_s18, 7 }
  0x18   : > { %p200_p8 = scmp.lt.s32.totalorder (%p56_p3), %s199_s29, 16  ;;  %s9077_s0 = sld [smem:[#allocation76_spill]] (%p56_p3) }
  0x19   : > { %s5682_s10 = scalar_lea.vmem (%p56_p3), [#allocation2], %s4964_s28  }
  0x1c   : > { %s9340_s29 = smov (!%p200_p8, %s199_s29), 16 }
  0x1d   : > { %s202_s8 = smul.u32 4608, %s9340_s29  ;;  %s5680_s9 = sshll.u32 %s9340_s29, 3 }
  0x1e   : > { %s5678_s7 = scalar_lea.vmem %s9077_s0, %s4813_s30  }
  0x1f   : > { %p4685_p9 = scmp.eq.s32.totalorder %s202_s8, 0 }
  0x20   : > { %p212_p10 = scmp.lt.u32.totalorder (!%p4685_p9), %s5680_s9, 8 }
  0x21   : > { %211 = sbr.rel (%p4685_p9) target bundleno = 264 (0x108), region = 28 }
  0x28   : > { %215 = sbr.rel (%p212_p10) target bundleno = 225 (0xe1), region = 32  ;;  %s5686_s11 = sand.u32 (!%p212_p10), 7, %s5680_s9  }
  0x29   : > { %p301_p11 = scmp.eq.s32.totalorder (!%p212_p10), %s5686_s11, 0  ;;  %p4686_p12 = scmp.ne.s32.totalorder (!%p212_p10), %s5686_s11, 0 }
  0x2f   : > { %304 = sbr.rel (%p4686_p12) target bundleno = 117 (0x75), region = 47  ;;  %s305_s12 = sshrl.u32 (!%p4686_p12), %s5680_s9, 3 }
  0x30   : > { %s5693_s13 = sshrl.u32 (!%p4686_p12), %s305_s12, 1  ;;  %s9078_s14 = smov (!%p4686_p12), %s5682_s10 }
  0x31   : > { %s9079_s21 = smov (!%p4686_p12), %s5678_s7  ;;  %s5701_s22 = smov (!%p4686_p12), 0  }
  0x32   : > { %s5703_s23 = smov (!%p4686_p12), 0  }
  0x36 LB: >> { %v318_v0 = vld [vmem:[%s5476_s21] sm:$0xff]  ;;  %v320_v1 = vld [vmem:[%s5476_s21 + $0x8] sm:$0xff]  ;;  %s462_s26 = sadd.s32 1, %s5480_s22  ;;  %v324_v3 = vld [vmem:[%s5476_s21 + $0xd0] sm:$0xff]  ;;  %s312_s23 = sadd.s32 1, %s5484_s23   ;;  %s5484_s23 = sphi %s5703_s23, %s312_s23   ;;  %s5480_s22 = sphi %s5701_s22, %s9082_s22   ;;  %s5476_s21 = sphi %s9079_s21, %s9081_s21   ;;  %s5472_s14 = sphi %s9078_s14, %s9080_s14  }
  0x37   : >> { %v322_v2 = vld [vmem:[%s5476_s21 + $0xc8] sm:$0xff]  ;;  %319 = vst [vmem:[%s5472_s14] sm:$0xff] %v318_v0  ;;  %321 = vst [vmem:[%s5472_s14 + $0x8] sm:$0xff] %v320_v1  ;;  %v326_v4 = vld [vmem:[%s5476_s21 + $0x190] sm:$0xff]  ;;  %p463_p13 = scmp.ge.s32.totalorder %s462_s26, %s5693_s13  ;;  %p311_p0 = scmp.ge.s32.totalorder %s312_s23, %s5693_s13 }
  0x38   : >> { %323 = vst [vmem:[%s5472_s14 + $0x80] sm:$0xff] %v322_v2  ;;  %v328_v5 = vld [vmem:[%s5476_s21 + $0x198] sm:$0xff]  ;;  %325 = vst [vmem:[%s5472_s14 + $0x88] sm:$0xff] %v324_v3  ;;  %v332_v7 = vld [vmem:[%s5476_s21 + $0x260] sm:$0xff]  ;;  %s5884_s30 = sand.u32 (%p311_p0), 1, %s305_s12   ;;  %s4814_s5 = sshll.u32 (%p311_p0), %s5693_s13, 8 }
  0x39   : >> { %327 = vst [vmem:[%s5472_s14 + $0x100] sm:$0xff] %v326_v4  ;;  %329 = vst [vmem:[%s5472_s14 + $0x108] sm:$0xff] %v328_v5  ;;  %v330_v6 = vld [vmem:[%s5476_s21 + $0x258] sm:$0xff]  ;;  %v334_v8 = vld [vmem:[%s5476_s21 + $0x320] sm:$0xff]  ;;  %s9342_s26 = smov (%p463_p13, %s462_s26), 0  ;;  %s473_s6 = sshra.s32 (%p311_p0), %s4814_s5, 4 }
  0x3a   : >> { %331 = vst [vmem:[%s5472_s14 + $0x180] sm:$0xff] %v330_v6  ;;  %333 = vst [vmem:[%s5472_s14 + $0x188] sm:$0xff] %v332_v7  ;;  %v336_v9 = vld [vmem:[%s5476_s21 + $0x328] sm:$0xff]  ;;  %v340_v11 = vld [vmem:[%s5476_s21 + $0x3f0] sm:$0xff]  ;;  %s4688_s27 = sshll.u32 %s9342_s26, 4  ;;  %s9082_s22 = smov %s9342_s26 }
  0x3b   : >> { %335 = vst [vmem:[%s5472_s14 + $0x200] sm:$0xff] %v334_v8  ;;  %v338_v10 = vld [vmem:[%s5476_s21 + $0x3e8] sm:$0xff]  ;;  %337 = vst [vmem:[%s5472_s14 + $0x208] sm:$0xff] %v336_v9  ;;  %v342_v12 = vld [vmem:[%s5476_s21 + $0x4b0] sm:$0xff]  ;;  %s5759_s28 = scalar_lea.vmem %s5678_s7, %s4688_s27   ;;  %s5762_s29 = scalar_lea.vmem %s5682_s10, %s4688_s27 [#allocation2]  }
  0x3c   : >> { %339 = vst [vmem:[%s5472_s14 + $0x280] sm:$0xff] %v338_v10  ;;  %341 = vst [vmem:[%s5472_s14 + $0x288] sm:$0xff] %v340_v11  ;;  %v344_v13 = vld [vmem:[%s5476_s21 + $0x4b8] sm:$0xff]  ;;  %v348_v15 = vld [vmem:[%s5476_s21 + $0x580] sm:$0xff]  ;;  %s5888_s8 = scalar_lea.vmem (%p311_p0), %s5678_s7, %s473_s6   ;;  %s5891_s27 = scalar_lea.vmem (%p311_p0), %s5682_s10, %s473_s6 [#allocation2]  }
  0x3d   : >> { %v346_v14 = vld [vmem:[%s5476_s21 + $0x578] sm:$0xff]  ;;  %343 = vst [vmem:[%s5472_s14 + $0x300] sm:$0xff] %v342_v12  ;;  %345 = vst [vmem:[%s5472_s14 + $0x308] sm:$0xff] %v344_v13  ;;  %v350_v16 = vld [vmem:[%s5476_s21 + $0x640] sm:$0xff]  ;;  %p4693_p1 = scmp.le.s32.totalorder (%p311_p0), %s5884_s30, 0 }
  0x3e   : >> { %347 = vst [vmem:[%s5472_s14 + $0x380] sm:$0xff] %v346_v14  ;;  %v352_v17 = vld [vmem:[%s5476_s21 + $0x648] sm:$0xff]  ;;  %349 = vst [vmem:[%s5472_s14 + $0x388] sm:$0xff] %v348_v15  ;;  %v356_v19 = vld [vmem:[%s5476_s21 + $0x710] sm:$0xff] }
  0x3f   : >> { %351 = vst [vmem:[%s5472_s14 + $0x400] sm:$0xff] %v350_v16  ;;  %353 = vst [vmem:[%s5472_s14 + $0x408] sm:$0xff] %v352_v17  ;;  %v354_v18 = vld [vmem:[%s5476_s21 + $0x708] sm:$0xff]  ;;  %v358_v20 = vld [vmem:[%s5476_s21 + $0x7d0] sm:$0xff] }
  0x40   : >> { %355 = vst [vmem:[%s5472_s14 + $0x480] sm:$0xff] %v354_v18  ;;  %357 = vst [vmem:[%s5472_s14 + $0x488] sm:$0xff] %v356_v19  ;;  %v360_v21 = vld [vmem:[%s5476_s21 + $0x7d8] sm:$0xff]  ;;  %v364_v23 = vld [vmem:[%s5476_s21 + $0x8a0] sm:$0xff] }
  0x41   : >> { %359 = vst [vmem:[%s5472_s14 + $0x500] sm:$0xff] %v358_v20  ;;  %v362_v22 = vld [vmem:[%s5476_s21 + $0x898] sm:$0xff]  ;;  %361 = vst [vmem:[%s5472_s14 + $0x508] sm:$0xff] %v360_v21  ;;  %v366_v24 = vld [vmem:[%s5476_s21 + $0x960] sm:$0xff] }
  0x42   : >> { %363 = vst [vmem:[%s5472_s14 + $0x580] sm:$0xff] %v362_v22  ;;  %365 = vst [vmem:[%s5472_s14 + $0x588] sm:$0xff] %v364_v23  ;;  %v368_v25 = vld [vmem:[%s5476_s21 + $0x968] sm:$0xff]  ;;  %v372_v27 = vld [vmem:[%s5476_s21 + $0xa30] sm:$0xff] }
  0x43   : >> { %v370_v26 = vld [vmem:[%s5476_s21 + $0xa28] sm:$0xff]  ;;  %367 = vst [vmem:[%s5472_s14 + $0x600] sm:$0xff] %v366_v24  ;;  %369 = vst [vmem:[%s5472_s14 + $0x608] sm:$0xff] %v368_v25  ;;  %v374_v28 = vld [vmem:[%s5476_s21 + $0xaf0] sm:$0xff] }
  0x44   : >> { %371 = vst [vmem:[%s5472_s14 + $0x680] sm:$0xff] %v370_v26  ;;  %v376_v29 = vld [vmem:[%s5476_s21 + $0xaf8] sm:$0xff]  ;;  %373 = vst [vmem:[%s5472_s14 + $0x688] sm:$0xff] %v372_v27  ;;  %v380_v31 = vld [vmem:[%s5476_s21 + $0xbc0] sm:$0xff] }
  0x45   : >> { %375 = vst [vmem:[%s5472_s14 + $0x700] sm:$0xff] %v374_v28  ;;  %377 = vst [vmem:[%s5472_s14 + $0x708] sm:$0xff] %v376_v29  ;;  %v378_v30 = vld [vmem:[%s5476_s21 + $0xbb8] sm:$0xff]  ;;  %v382_v32 = vld [vmem:[%s5476_s21 + $0xc80] sm:$0xff] }
  0x46   : >> { %379 = vst [vmem:[%s5472_s14 + $0x780] sm:$0xff] %v378_v30  ;;  %381 = vst [vmem:[%s5472_s14 + $0x788] sm:$0xff] %v380_v31  ;;  %v384_v33 = vld [vmem:[%s5476_s21 + $0xc88] sm:$0xff]  ;;  %v388_v35 = vld [vmem:[%s5476_s21 + $0xd50] sm:$0xff] }
  0x47   : >> { %383 = vst [vmem:[%s5472_s14 + $0x800] sm:$0xff] %v382_v32  ;;  %v386_v34 = vld [vmem:[%s5476_s21 + $0xd48] sm:$0xff]  ;;  %385 = vst [vmem:[%s5472_s14 + $0x808] sm:$0xff] %v384_v33  ;;  %v390_v36 = vld [vmem:[%s5476_s21 + $0xe10] sm:$0xff] }
  0x48   : >> { %387 = vst [vmem:[%s5472_s14 + $0x880] sm:$0xff] %v386_v34  ;;  %389 = vst [vmem:[%s5472_s14 + $0x888] sm:$0xff] %v388_v35  ;;  %v392_v37 = vld [vmem:[%s5476_s21 + $0xe18] sm:$0xff]  ;;  %v396_v39 = vld [vmem:[%s5476_s21 + $0xee0] sm:$0xff] }
  0x49   : >> { %v394_v38 = vld [vmem:[%s5476_s21 + $0xed8] sm:$0xff]  ;;  %391 = vst [vmem:[%s5472_s14 + $0x900] sm:$0xff] %v390_v36  ;;  %393 = vst [vmem:[%s5472_s14 + $0x908] sm:$0xff] %v392_v37  ;;  %v398_v40 = vld [vmem:[%s5476_s21 + $0xfa0] sm:$0xff] }
  0x4a   : >> { %395 = vst [vmem:[%s5472_s14 + $0x980] sm:$0xff] %v394_v38  ;;  %v400_v41 = vld [vmem:[%s5476_s21 + $0xfa8] sm:$0xff]  ;;  %397 = vst [vmem:[%s5472_s14 + $0x988] sm:$0xff] %v396_v39  ;;  %v404_v43 = vld [vmem:[%s5476_s21 + $0x1070] sm:$0xff] }
  0x4b   : >> { %399 = vst [vmem:[%s5472_s14 + $0xa00] sm:$0xff] %v398_v40  ;;  %401 = vst [vmem:[%s5472_s14 + $0xa08] sm:$0xff] %v400_v41  ;;  %v402_v42 = vld [vmem:[%s5476_s21 + $0x1068] sm:$0xff]  ;;  %v406_v44 = vld [vmem:[%s5476_s21 + $0x1130] sm:$0xff] }
  0x4c   : >> { %403 = vst [vmem:[%s5472_s14 + $0xa80] sm:$0xff] %v402_v42  ;;  %405 = vst [vmem:[%s5472_s14 + $0xa88] sm:$0xff] %v404_v43  ;;  %v408_v45 = vld [vmem:[%s5476_s21 + $0x1138] sm:$0xff]  ;;  %v412_v47 = vld [vmem:[%s5476_s21 + $0x1200] sm:$0xff] }
  0x4d   : >> { %407 = vst [vmem:[%s5472_s14 + $0xb00] sm:$0xff] %v406_v44  ;;  %v410_v46 = vld [vmem:[%s5476_s21 + $0x11f8] sm:$0xff]  ;;  %409 = vst [vmem:[%s5472_s14 + $0xb08] sm:$0xff] %v408_v45  ;;  %v414_v48 = vld [vmem:[%s5476_s21 + $0x12c0] sm:$0xff] }
  0x4e   : >> { %411 = vst [vmem:[%s5472_s14 + $0xb80] sm:$0xff] %v410_v46  ;;  %413 = vst [vmem:[%s5472_s14 + $0xb88] sm:$0xff] %v412_v47  ;;  %v416_v49 = vld [vmem:[%s5476_s21 + $0x12c8] sm:$0xff]  ;;  %v420_v51 = vld [vmem:[%s5476_s21 + $0x1390] sm:$0xff] }
  0x4f   : >> { %v418_v50 = vld [vmem:[%s5476_s21 + $0x1388] sm:$0xff]  ;;  %415 = vst [vmem:[%s5472_s14 + $0xc00] sm:$0xff] %v414_v48  ;;  %417 = vst [vmem:[%s5472_s14 + $0xc08] sm:$0xff] %v416_v49  ;;  %v422_v52 = vld [vmem:[%s5476_s21 + $0x1450] sm:$0xff] }
  0x50   : >> { %419 = vst [vmem:[%s5472_s14 + $0xc80] sm:$0xff] %v418_v50  ;;  %v424_v53 = vld [vmem:[%s5476_s21 + $0x1458] sm:$0xff]  ;;  %421 = vst [vmem:[%s5472_s14 + $0xc88] sm:$0xff] %v420_v51  ;;  %v428_v55 = vld [vmem:[%s5476_s21 + $0x1520] sm:$0xff] }
  0x51   : >> { %423 = vst [vmem:[%s5472_s14 + $0xd00] sm:$0xff] %v422_v52  ;;  %425 = vst [vmem:[%s5472_s14 + $0xd08] sm:$0xff] %v424_v53  ;;  %v426_v54 = vld [vmem:[%s5476_s21 + $0x1518] sm:$0xff]  ;;  %v430_v56 = vld [vmem:[%s5476_s21 + $0x15e0] sm:$0xff] }
  0x52   : >> { %427 = vst [vmem:[%s5472_s14 + $0xd80] sm:$0xff] %v426_v54  ;;  %429 = vst [vmem:[%s5472_s14 + $0xd88] sm:$0xff] %v428_v55  ;;  %v432_v57 = vld [vmem:[%s5476_s21 + $0x15e8] sm:$0xff]  ;;  %v436_v59 = vld [vmem:[%s5476_s21 + $0x16b0] sm:$0xff] }
  0x53   : >> { %431 = vst [vmem:[%s5472_s14 + $0xe00] sm:$0xff] %v430_v56  ;;  %v434_v58 = vld [vmem:[%s5476_s21 + $0x16a8] sm:$0xff]  ;;  %433 = vst [vmem:[%s5472_s14 + $0xe08] sm:$0xff] %v432_v57  ;;  %v438_v60 = vld [vmem:[%s5476_s21 + $0x1770] sm:$0xff] }
  0x54   : >> { %435 = vst [vmem:[%s5472_s14 + $0xe80] sm:$0xff] %v434_v58  ;;  %437 = vst [vmem:[%s5472_s14 + $0xe88] sm:$0xff] %v436_v59  ;;  %v440_v61 = vld [vmem:[%s5476_s21 + $0x1778] sm:$0xff]  ;;  %v444_v63 = vld [vmem:[%s5476_s21 + $0x1840] sm:$0xff]  ;;  %314 = sbr.rel (!%p311_p0) target bundleno = 54 (0x36), region = 259 }
  0x55   : >> { %v442_v62 = vld [vmem:[%s5476_s21 + $0x1838] sm:$0xff]  ;;  %439 = vst [vmem:[%s5472_s14 + $0xf00] sm:$0xff] %v438_v60  ;;  %441 = vst [vmem:[%s5472_s14 + $0xf08] sm:$0xff] %v440_v61  ;;  %v446_v0 = vld [vmem:[%s5476_s21 + $0x1900] sm:$0xff] }
  0x56   : >> { %443 = vst [vmem:[%s5472_s14 + $0xf80] sm:$0xff] %v442_v62  ;;  %v448_v1 = vld [vmem:[%s5476_s21 + $0x1908] sm:$0xff]  ;;  %445 = vst [vmem:[%s5472_s14 + $0xf88] sm:$0xff] %v444_v63  ;;  %v452_v3 = vld [vmem:[%s5476_s21 + $0x19d0] sm:$0xff] }
  0x57   : >> { %447 = vst [vmem:[%s5472_s14 + $0x1000] sm:$0xff] %v446_v0  ;;  %449 = vst [vmem:[%s5472_s14 + $0x1008] sm:$0xff] %v448_v1  ;;  %v450_v2 = vld [vmem:[%s5476_s21 + $0x19c8] sm:$0xff]  ;;  %v454_v4 = vld [vmem:[%s5476_s21 + $0x1a90] sm:$0xff] }
  0x58   : >> { %451 = vst [vmem:[%s5472_s14 + $0x1080] sm:$0xff] %v450_v2  ;;  %453 = vst [vmem:[%s5472_s14 + $0x1088] sm:$0xff] %v452_v3  ;;  %v456_v5 = vld [vmem:[%s5476_s21 + $0x1a98] sm:$0xff]  ;;  %v460_v7 = vld [vmem:[%s5476_s21 + $0x1b60] sm:$0xff] }
  0x59   : >> { %455 = vst [vmem:[%s5472_s14 + $0x1100] sm:$0xff] %v454_v4  ;;  %v458_v6 = vld [vmem:[%s5476_s21 + $0x1b58] sm:$0xff]  ;;  %457 = vst [vmem:[%s5472_s14 + $0x1108] sm:$0xff] %v456_v5  ;;  %s9081_s21 = smov %s5759_s28 }
  0x5a   : >> { %459 = vst [vmem:[%s5472_s14 + $0x1180] sm:$0xff] %v458_v6  ;;  %461 = vst [vmem:[%s5472_s14 + $0x1188] sm:$0xff] %v460_v7  ;;  %s9080_s14 = smov %s5762_s29 }
  0x5b   : > { %4540 = sbr.rel (%p4693_p1) target bundleno = 117 (0x75), region = 264  ;;  %s9083_s23 = smov (!%p4693_p1), %s5891_s27 }
  0x5c   : > { %s9084_s14 = smov (!%p4693_p1), %s5888_s8  ;;  %s5900_s21 = smov (!%p4693_p1), 0  }
  0x5d   : > { %s5902_s22 = smov (!%p4693_p1), 0  }
  0x62 LB: >> { %v489_v8 = vld [vmem:[%s5492_s14] sm:$0xff]  ;;  %v491_v9 = vld [vmem:[%s5492_s14 + $0xc8] sm:$0xff]  ;;  %v493_v10 = vld [vmem:[%s5492_s14 + $0x190] sm:$0xff]  ;;  %s561_s12 = sadd.s32 1, %s5496_s21  ;;  %s483_s22 = sadd.s32 1, %s5500_s22   ;;  %s5500_s22 = sphi %s5902_s22, %s483_s22   ;;  %s5496_s21 = sphi %s5900_s21, %s9087_s21   ;;  %s5492_s14 = sphi %s9084_s14, %s9086_s14   ;;  %s5488_s23 = sphi %s9083_s23, %s9085_s23  }
  0x63   : >> { %490 = vst [vmem:[%s5488_s23] sm:$0xff] %v489_v8  ;;  %492 = vst [vmem:[%s5488_s23 + $0x80] sm:$0xff] %v491_v9  ;;  %v495_v11 = vld [vmem:[%s5492_s14 + $0x258] sm:$0xff]  ;;  %v497_v12 = vld [vmem:[%s5492_s14 + $0x320] sm:$0xff]  ;;  %p562_p2 = scmp.ge.s32.totalorder %s561_s12, %s5884_s30  ;;  %p482_p3 = scmp.ge.s32.totalorder %s483_s22, %s5884_s30 }
  0x64   : >> { %494 = vst [vmem:[%s5488_s23 + $0x100] sm:$0xff] %v493_v10  ;;  %v499_v13 = vld [vmem:[%s5492_s14 + $0x3e8] sm:$0xff]  ;;  %496 = vst [vmem:[%s5488_s23 + $0x180] sm:$0xff] %v495_v11  ;;  %v501_v14 = vld [vmem:[%s5492_s14 + $0x4b0] sm:$0xff] }
  0x65   : >> { %498 = vst [vmem:[%s5488_s23 + $0x200] sm:$0xff] %v497_v12  ;;  %500 = vst [vmem:[%s5488_s23 + $0x280] sm:$0xff] %v499_v13  ;;  %v503_v15 = vld [vmem:[%s5492_s14 + $0x578] sm:$0xff]  ;;  %v505_v16 = vld [vmem:[%s5492_s14 + $0x640] sm:$0xff]  ;;  %s9344_s12 = smov (%p562_p2, %s561_s12), 0 }
  0x66   : >> { %502 = vst [vmem:[%s5488_s23 + $0x300] sm:$0xff] %v501_v14  ;;  %504 = vst [vmem:[%s5488_s23 + $0x380] sm:$0xff] %v503_v15  ;;  %v507_v17 = vld [vmem:[%s5492_s14 + $0x708] sm:$0xff]  ;;  %v509_v18 = vld [vmem:[%s5492_s14 + $0x7d0] sm:$0xff]  ;;  %s4694_s13 = sshll.u32 %s9344_s12, 3  ;;  %s9087_s21 = smov %s9344_s12 }
  0x67   : >> { %506 = vst [vmem:[%s5488_s23 + $0x400] sm:$0xff] %v505_v16  ;;  %v511_v19 = vld [vmem:[%s5492_s14 + $0x898] sm:$0xff]  ;;  %508 = vst [vmem:[%s5488_s23 + $0x480] sm:$0xff] %v507_v17  ;;  %v513_v20 = vld [vmem:[%s5492_s14 + $0x960] sm:$0xff]  ;;  %s5958_s26 = scalar_lea.vmem %s5888_s8, %s4694_s13   ;;  %s5961_s28 = scalar_lea.vmem %s5891_s27, %s4694_s13 [#allocation2]  }
  0x68   : >> { %510 = vst [vmem:[%s5488_s23 + $0x500] sm:$0xff] %v509_v18  ;;  %512 = vst [vmem:[%s5488_s23 + $0x580] sm:$0xff] %v511_v19  ;;  %v515_v21 = vld [vmem:[%s5492_s14 + $0xa28] sm:$0xff]  ;;  %v517_v22 = vld [vmem:[%s5492_s14 + $0xaf0] sm:$0xff] }
  0x69   : >> { %514 = vst [vmem:[%s5488_s23 + $0x600] sm:$0xff] %v513_v20  ;;  %516 = vst [vmem:[%s5488_s23 + $0x680] sm:$0xff] %v515_v21  ;;  %v519_v23 = vld [vmem:[%s5492_s14 + $0xbb8] sm:$0xff]  ;;  %v521_v24 = vld [vmem:[%s5492_s14 + $0xc80] sm:$0xff] }
  0x6a   : >> { %518 = vst [vmem:[%s5488_s23 + $0x700] sm:$0xff] %v517_v22  ;;  %v523_v25 = vld [vmem:[%s5492_s14 + $0xd48] sm:$0xff]  ;;  %520 = vst [vmem:[%s5488_s23 + $0x780] sm:$0xff] %v519_v23  ;;  %v525_v26 = vld [vmem:[%s5492_s14 + $0xe10] sm:$0xff] }
  0x6b   : >> { %522 = vst [vmem:[%s5488_s23 + $0x800] sm:$0xff] %v521_v24  ;;  %524 = vst [vmem:[%s5488_s23 + $0x880] sm:$0xff] %v523_v25  ;;  %v527_v27 = vld [vmem:[%s5492_s14 + $0xed8] sm:$0xff]  ;;  %v529_v28 = vld [vmem:[%s5492_s14 + $0xfa0] sm:$0xff] }
  0x6c   : >> { %526 = vst [vmem:[%s5488_s23 + $0x900] sm:$0xff] %v525_v26  ;;  %528 = vst [vmem:[%s5488_s23 + $0x980] sm:$0xff] %v527_v27  ;;  %v531_v29 = vld [vmem:[%s5492_s14 + $0x1068] sm:$0xff]  ;;  %v533_v30 = vld [vmem:[%s5492_s14 + $0x1130] sm:$0xff] }
  0x6d   : >> { %530 = vst [vmem:[%s5488_s23 + $0xa00] sm:$0xff] %v529_v28  ;;  %v535_v31 = vld [vmem:[%s5492_s14 + $0x11f8] sm:$0xff]  ;;  %532 = vst [vmem:[%s5488_s23 + $0xa80] sm:$0xff] %v531_v29  ;;  %v537_v32 = vld [vmem:[%s5492_s14 + $0x12c0] sm:$0xff] }
  0x6e   : >> { %534 = vst [vmem:[%s5488_s23 + $0xb00] sm:$0xff] %v533_v30  ;;  %536 = vst [vmem:[%s5488_s23 + $0xb80] sm:$0xff] %v535_v31  ;;  %v539_v33 = vld [vmem:[%s5492_s14 + $0x1388] sm:$0xff]  ;;  %v541_v34 = vld [vmem:[%s5492_s14 + $0x1450] sm:$0xff]  ;;  %485 = sbr.rel (!%p482_p3) target bundleno = 98 (0x62), region = 270 }
  0x6f   : >> { %538 = vst [vmem:[%s5488_s23 + $0xc00] sm:$0xff] %v537_v32  ;;  %540 = vst [vmem:[%s5488_s23 + $0xc80] sm:$0xff] %v539_v33  ;;  %v543_v35 = vld [vmem:[%s5492_s14 + $0x1518] sm:$0xff]  ;;  %v545_v36 = vld [vmem:[%s5492_s14 + $0x15e0] sm:$0xff] }
  0x70   : >> { %542 = vst [vmem:[%s5488_s23 + $0xd00] sm:$0xff] %v541_v34  ;;  %v547_v37 = vld [vmem:[%s5492_s14 + $0x16a8] sm:$0xff]  ;;  %544 = vst [vmem:[%s5488_s23 + $0xd80] sm:$0xff] %v543_v35  ;;  %v549_v38 = vld [vmem:[%s5492_s14 + $0x1770] sm:$0xff] }
  0x71   : >> { %546 = vst [vmem:[%s5488_s23 + $0xe00] sm:$0xff] %v545_v36  ;;  %548 = vst [vmem:[%s5488_s23 + $0xe80] sm:$0xff] %v547_v37  ;;  %v551_v39 = vld [vmem:[%s5492_s14 + $0x1838] sm:$0xff]  ;;  %v553_v40 = vld [vmem:[%s5492_s14 + $0x1900] sm:$0xff] }
  0x72   : >> { %550 = vst [vmem:[%s5488_s23 + $0xf00] sm:$0xff] %v549_v38  ;;  %552 = vst [vmem:[%s5488_s23 + $0xf80] sm:$0xff] %v551_v39  ;;  %v555_v41 = vld [vmem:[%s5492_s14 + $0x19c8] sm:$0xff]  ;;  %v557_v42 = vld [vmem:[%s5492_s14 + $0x1a90] sm:$0xff] }
  0x73   : >> { %554 = vst [vmem:[%s5488_s23 + $0x1000] sm:$0xff] %v553_v40  ;;  %v559_v43 = vld [vmem:[%s5492_s14 + $0x1b58] sm:$0xff]  ;;  %556 = vst [vmem:[%s5488_s23 + $0x1080] sm:$0xff] %v555_v41  ;;  %s9086_s14 = smov %s5958_s26 }
  0x74   : >> { %558 = vst [vmem:[%s5488_s23 + $0x1100] sm:$0xff] %v557_v42  ;;  %560 = vst [vmem:[%s5488_s23 + $0x1180] sm:$0xff] %v559_v43  ;;  %s9085_s23 = smov %s5961_s28 }
  0x75 PF: > { %570 = sbr.rel (%p301_p11) target bundleno = 225 (0xe1), region = 65  ;;  %s572_s29 = ssub.s32 (!%p301_p11), %s5680_s9, %s5686_s11 }
  0x76   : > { %s576_s5 = sshrl.u32 (!%p301_p11), %s5680_s9, 3  ;;  %s6015_s6 = scalar_lea.vmem (!%p301_p11), %s5678_s7, %s572_s29 }
  0x77   : > { %s6018_s13 = scalar_lea.vmem (!%p301_p11), %s5682_s10, %s572_s29 [#allocation2]  ;;  %s6022_s22 = sshrl.u32 (!%p301_p11), %s576_s5, 1 }
  0x78   : > { %s9088_s30 = smov (!%p301_p11), %s5682_s10  ;;  %s9089_s8 = smov (!%p301_p11), %s5678_s7 }
  0x79   : > { %s6030_s27 = smov (!%p301_p11), 0   ;;  %s6032_s23 = smov (!%p301_p11), 0  }
  0x7c LB: >> { %v589_v44 = vld [vmem:[%s5508_s8] sm:$0xff]  ;;  %v591_v45 = vld [vmem:[%s5508_s8 + $0x8] sm:$0xff]  ;;  %s733_s14 = sadd.s32 1, %s5512_s27  ;;  %v595_v47 = vld [vmem:[%s5508_s8 + $0xd0] sm:$0xff]  ;;  %s583_s23 = sadd.s32 1, %s5516_s23   ;;  %s5516_s23 = sphi %s6032_s23, %s583_s23   ;;  %s5512_s27 = sphi %s6030_s27, %s9092_s27   ;;  %s5508_s8 = sphi %s9089_s8, %s9091_s8   ;;  %s5504_s30 = sphi %s9088_s30, %s9090_s30  }
  0x7d   : >> { %v593_v46 = vld [vmem:[%s5508_s8 + $0xc8] sm:$0xff]  ;;  %590 = vst [vmem:[%s5504_s30] sm:$0xff] %v589_v44  ;;  %592 = vst [vmem:[%s5504_s30 + $0x8] sm:$0xff] %v591_v45  ;;  %v597_v48 = vld [vmem:[%s5508_s8 + $0x190] sm:$0xff]  ;;  %p734_p4 = scmp.ge.s32.totalorder %s733_s14, %s6022_s22  ;;  %p582_p5 = scmp.ge.s32.totalorder %s583_s23, %s6022_s22 }
  0x7e   : >> { %594 = vst [vmem:[%s5504_s30 + $0x80] sm:$0xff] %v593_v46  ;;  %v599_v49 = vld [vmem:[%s5508_s8 + $0x198] sm:$0xff]  ;;  %596 = vst [vmem:[%s5504_s30 + $0x88] sm:$0xff] %v595_v47  ;;  %v603_v51 = vld [vmem:[%s5508_s8 + $0x260] sm:$0xff]  ;;  %s6213_s28 = sand.u32 (%p582_p5), 1, %s576_s5   ;;  %s4816_s29 = sshll.u32 (%p582_p5), %s6022_s22, 8 }
  0x7f   : >> { %598 = vst [vmem:[%s5504_s30 + $0x100] sm:$0xff] %v597_v48  ;;  %600 = vst [vmem:[%s5504_s30 + $0x108] sm:$0xff] %v599_v49  ;;  %v601_v50 = vld [vmem:[%s5508_s8 + $0x258] sm:$0xff]  ;;  %v605_v52 = vld [vmem:[%s5508_s8 + $0x320] sm:$0xff]  ;;  %s9346_s14 = smov (%p734_p4, %s733_s14), 0  ;;  %p4702_p7 = scmp.le.s32.totalorder (%p582_p5), %s6213_s28, 0 }
  0x80   : >> { %602 = vst [vmem:[%s5504_s30 + $0x180] sm:$0xff] %v601_v50  ;;  %604 = vst [vmem:[%s5504_s30 + $0x188] sm:$0xff] %v603_v51  ;;  %v607_v53 = vld [vmem:[%s5508_s8 + $0x328] sm:$0xff]  ;;  %v611_v55 = vld [vmem:[%s5508_s8 + $0x3f0] sm:$0xff]  ;;  %s4697_s21 = sshll.u32 %s9346_s14, 4  ;;  %s9092_s27 = smov %s9346_s14 }
  0x81   : >> { %606 = vst [vmem:[%s5504_s30 + $0x200] sm:$0xff] %v605_v52  ;;  %v609_v54 = vld [vmem:[%s5508_s8 + $0x3e8] sm:$0xff]  ;;  %608 = vst [vmem:[%s5504_s30 + $0x208] sm:$0xff] %v607_v53  ;;  %v613_v56 = vld [vmem:[%s5508_s8 + $0x4b0] sm:$0xff]  ;;  %s6088_s12 = scalar_lea.vmem %s5678_s7, %s4697_s21   ;;  %s6091_s26 = scalar_lea.vmem %s5682_s10, %s4697_s21 [#allocation2]  }
  0x82   : >> { %610 = vst [vmem:[%s5504_s30 + $0x280] sm:$0xff] %v609_v54  ;;  %612 = vst [vmem:[%s5504_s30 + $0x288] sm:$0xff] %v611_v55  ;;  %v615_v57 = vld [vmem:[%s5508_s8 + $0x4b8] sm:$0xff]  ;;  %v619_v59 = vld [vmem:[%s5508_s8 + $0x580] sm:$0xff]  ;;  %s744_s21 = sshra.s32 (%p582_p5), %s4816_s29, 4 }
  0x83   : >> { %v617_v58 = vld [vmem:[%s5508_s8 + $0x578] sm:$0xff]  ;;  %614 = vst [vmem:[%s5504_s30 + $0x300] sm:$0xff] %v613_v56  ;;  %616 = vst [vmem:[%s5504_s30 + $0x308] sm:$0xff] %v615_v57  ;;  %v621_v60 = vld [vmem:[%s5508_s8 + $0x640] sm:$0xff]  ;;  %s6217_s0 = scalar_lea.vmem (%p582_p5), %s5678_s7, %s744_s21   ;;  %s6220_s20 = scalar_lea.vmem (%p582_p5), %s5682_s10, %s744_s21 [#allocation2]  }
  0x84   : >> { %618 = vst [vmem:[%s5504_s30 + $0x380] sm:$0xff] %v617_v58  ;;  %v623_v61 = vld [vmem:[%s5508_s8 + $0x648] sm:$0xff]  ;;  %620 = vst [vmem:[%s5504_s30 + $0x388] sm:$0xff] %v619_v59  ;;  %v627_v63 = vld [vmem:[%s5508_s8 + $0x710] sm:$0xff] }
  0x85   : >> { %622 = vst [vmem:[%s5504_s30 + $0x400] sm:$0xff] %v621_v60  ;;  %624 = vst [vmem:[%s5504_s30 + $0x408] sm:$0xff] %v623_v61  ;;  %v625_v62 = vld [vmem:[%s5508_s8 + $0x708] sm:$0xff]  ;;  %v629_v0 = vld [vmem:[%s5508_s8 + $0x7d0] sm:$0xff] }
  0x86   : >> { %626 = vst [vmem:[%s5504_s30 + $0x480] sm:$0xff] %v625_v62  ;;  %628 = vst [vmem:[%s5504_s30 + $0x488] sm:$0xff] %v627_v63  ;;  %v631_v1 = vld [vmem:[%s5508_s8 + $0x7d8] sm:$0xff]  ;;  %v635_v3 = vld [vmem:[%s5508_s8 + $0x8a0] sm:$0xff] }
  0x87   : >> { %630 = vst [vmem:[%s5504_s30 + $0x500] sm:$0xff] %v629_v0  ;;  %v633_v2 = vld [vmem:[%s5508_s8 + $0x898] sm:$0xff]  ;;  %632 = vst [vmem:[%s5504_s30 + $0x508] sm:$0xff] %v631_v1  ;;  %v637_v4 = vld [vmem:[%s5508_s8 + $0x960] sm:$0xff] }
  0x88   : >> { %634 = vst [vmem:[%s5504_s30 + $0x580] sm:$0xff] %v633_v2  ;;  %636 = vst [vmem:[%s5504_s30 + $0x588] sm:$0xff] %v635_v3  ;;  %v639_v5 = vld [vmem:[%s5508_s8 + $0x968] sm:$0xff]  ;;  %v643_v7 = vld [vmem:[%s5508_s8 + $0xa30] sm:$0xff] }
  0x89   : >> { %v641_v6 = vld [vmem:[%s5508_s8 + $0xa28] sm:$0xff]  ;;  %638 = vst [vmem:[%s5504_s30 + $0x600] sm:$0xff] %v637_v4  ;;  %640 = vst [vmem:[%s5504_s30 + $0x608] sm:$0xff] %v639_v5  ;;  %v645_v8 = vld [vmem:[%s5508_s8 + $0xaf0] sm:$0xff] }
  0x8a   : >> { %642 = vst [vmem:[%s5504_s30 + $0x680] sm:$0xff] %v641_v6  ;;  %v647_v9 = vld [vmem:[%s5508_s8 + $0xaf8] sm:$0xff]  ;;  %644 = vst [vmem:[%s5504_s30 + $0x688] sm:$0xff] %v643_v7  ;;  %v651_v11 = vld [vmem:[%s5508_s8 + $0xbc0] sm:$0xff] }
  0x8b   : >> { %646 = vst [vmem:[%s5504_s30 + $0x700] sm:$0xff] %v645_v8  ;;  %648 = vst [vmem:[%s5504_s30 + $0x708] sm:$0xff] %v647_v9  ;;  %v649_v10 = vld [vmem:[%s5508_s8 + $0xbb8] sm:$0xff]  ;;  %v653_v12 = vld [vmem:[%s5508_s8 + $0xc80] sm:$0xff] }
  0x8c   : >> { %650 = vst [vmem:[%s5504_s30 + $0x780] sm:$0xff] %v649_v10  ;;  %652 = vst [vmem:[%s5504_s30 + $0x788] sm:$0xff] %v651_v11  ;;  %v655_v13 = vld [vmem:[%s5508_s8 + $0xc88] sm:$0xff]  ;;  %v659_v15 = vld [vmem:[%s5508_s8 + $0xd50] sm:$0xff] }
  0x8d   : >> { %654 = vst [vmem:[%s5504_s30 + $0x800] sm:$0xff] %v653_v12  ;;  %v657_v14 = vld [vmem:[%s5508_s8 + $0xd48] sm:$0xff]  ;;  %656 = vst [vmem:[%s5504_s30 + $0x808] sm:$0xff] %v655_v13  ;;  %v661_v16 = vld [vmem:[%s5508_s8 + $0xe10] sm:$0xff] }
  0x8e   : >> { %658 = vst [vmem:[%s5504_s30 + $0x880] sm:$0xff] %v657_v14  ;;  %660 = vst [vmem:[%s5504_s30 + $0x888] sm:$0xff] %v659_v15  ;;  %v663_v17 = vld [vmem:[%s5508_s8 + $0xe18] sm:$0xff]  ;;  %v667_v19 = vld [vmem:[%s5508_s8 + $0xee0] sm:$0xff] }
  0x8f   : >> { %v665_v18 = vld [vmem:[%s5508_s8 + $0xed8] sm:$0xff]  ;;  %662 = vst [vmem:[%s5504_s30 + $0x900] sm:$0xff] %v661_v16  ;;  %664 = vst [vmem:[%s5504_s30 + $0x908] sm:$0xff] %v663_v17  ;;  %v669_v20 = vld [vmem:[%s5508_s8 + $0xfa0] sm:$0xff] }
  0x90   : >> { %666 = vst [vmem:[%s5504_s30 + $0x980] sm:$0xff] %v665_v18  ;;  %v671_v21 = vld [vmem:[%s5508_s8 + $0xfa8] sm:$0xff]  ;;  %668 = vst [vmem:[%s5504_s30 + $0x988] sm:$0xff] %v667_v19  ;;  %v675_v23 = vld [vmem:[%s5508_s8 + $0x1070] sm:$0xff] }
  0x91   : >> { %670 = vst [vmem:[%s5504_s30 + $0xa00] sm:$0xff] %v669_v20  ;;  %672 = vst [vmem:[%s5504_s30 + $0xa08] sm:$0xff] %v671_v21  ;;  %v673_v22 = vld [vmem:[%s5508_s8 + $0x1068] sm:$0xff]  ;;  %v677_v24 = vld [vmem:[%s5508_s8 + $0x1130] sm:$0xff] }
  0x92   : >> { %674 = vst [vmem:[%s5504_s30 + $0xa80] sm:$0xff] %v673_v22  ;;  %676 = vst [vmem:[%s5504_s30 + $0xa88] sm:$0xff] %v675_v23  ;;  %v679_v25 = vld [vmem:[%s5508_s8 + $0x1138] sm:$0xff]  ;;  %v683_v27 = vld [vmem:[%s5508_s8 + $0x1200] sm:$0xff] }
  0x93   : >> { %678 = vst [vmem:[%s5504_s30 + $0xb00] sm:$0xff] %v677_v24  ;;  %v681_v26 = vld [vmem:[%s5508_s8 + $0x11f8] sm:$0xff]  ;;  %680 = vst [vmem:[%s5504_s30 + $0xb08] sm:$0xff] %v679_v25  ;;  %v685_v28 = vld [vmem:[%s5508_s8 + $0x12c0] sm:$0xff] }
  0x94   : >> { %682 = vst [vmem:[%s5504_s30 + $0xb80] sm:$0xff] %v681_v26  ;;  %684 = vst [vmem:[%s5504_s30 + $0xb88] sm:$0xff] %v683_v27  ;;  %v687_v29 = vld [vmem:[%s5508_s8 + $0x12c8] sm:$0xff]  ;;  %v691_v31 = vld [vmem:[%s5508_s8 + $0x1390] sm:$0xff] }
  0x95   : >> { %v689_v30 = vld [vmem:[%s5508_s8 + $0x1388] sm:$0xff]  ;;  %686 = vst [vmem:[%s5504_s30 + $0xc00] sm:$0xff] %v685_v28  ;;  %688 = vst [vmem:[%s5504_s30 + $0xc08] sm:$0xff] %v687_v29  ;;  %v693_v32 = vld [vmem:[%s5508_s8 + $0x1450] sm:$0xff] }
  0x96   : >> { %690 = vst [vmem:[%s5504_s30 + $0xc80] sm:$0xff] %v689_v30  ;;  %v695_v33 = vld [vmem:[%s5508_s8 + $0x1458] sm:$0xff]  ;;  %692 = vst [vmem:[%s5504_s30 + $0xc88] sm:$0xff] %v691_v31  ;;  %v699_v35 = vld [vmem:[%s5508_s8 + $0x1520] sm:$0xff] }
  0x97   : >> { %694 = vst [vmem:[%s5504_s30 + $0xd00] sm:$0xff] %v693_v32  ;;  %696 = vst [vmem:[%s5504_s30 + $0xd08] sm:$0xff] %v695_v33  ;;  %v697_v34 = vld [vmem:[%s5508_s8 + $0x1518] sm:$0xff]  ;;  %v701_v36 = vld [vmem:[%s5508_s8 + $0x15e0] sm:$0xff] }
  0x98   : >> { %698 = vst [vmem:[%s5504_s30 + $0xd80] sm:$0xff] %v697_v34  ;;  %700 = vst [vmem:[%s5504_s30 + $0xd88] sm:$0xff] %v699_v35  ;;  %v703_v37 = vld [vmem:[%s5508_s8 + $0x15e8] sm:$0xff]  ;;  %v707_v39 = vld [vmem:[%s5508_s8 + $0x16b0] sm:$0xff] }
  0x99   : >> { %702 = vst [vmem:[%s5504_s30 + $0xe00] sm:$0xff] %v701_v36  ;;  %v705_v38 = vld [vmem:[%s5508_s8 + $0x16a8] sm:$0xff]  ;;  %704 = vst [vmem:[%s5504_s30 + $0xe08] sm:$0xff] %v703_v37  ;;  %v709_v40 = vld [vmem:[%s5508_s8 + $0x1770] sm:$0xff] }
  0x9a   : >> { %706 = vst [vmem:[%s5504_s30 + $0xe80] sm:$0xff] %v705_v38  ;;  %708 = vst [vmem:[%s5504_s30 + $0xe88] sm:$0xff] %v707_v39  ;;  %v711_v41 = vld [vmem:[%s5508_s8 + $0x1778] sm:$0xff]  ;;  %v715_v43 = vld [vmem:[%s5508_s8 + $0x1840] sm:$0xff]  ;;  %585 = sbr.rel (!%p582_p5) target bundleno = 124 (0x7c), region = 281 }
  0x9b   : >> { %v713_v42 = vld [vmem:[%s5508_s8 + $0x1838] sm:$0xff]  ;;  %710 = vst [vmem:[%s5504_s30 + $0xf00] sm:$0xff] %v709_v40  ;;  %712 = vst [vmem:[%s5504_s30 + $0xf08] sm:$0xff] %v711_v41  ;;  %v717_v44 = vld [vmem:[%s5508_s8 + $0x1900] sm:$0xff] }
  0x9c   : >> { %714 = vst [vmem:[%s5504_s30 + $0xf80] sm:$0xff] %v713_v42  ;;  %v719_v45 = vld [vmem:[%s5508_s8 + $0x1908] sm:$0xff]  ;;  %716 = vst [vmem:[%s5504_s30 + $0xf88] sm:$0xff] %v715_v43  ;;  %v723_v47 = vld [vmem:[%s5508_s8 + $0x19d0] sm:$0xff] }
  0x9d   : >> { %718 = vst [vmem:[%s5504_s30 + $0x1000] sm:$0xff] %v717_v44  ;;  %720 = vst [vmem:[%s5504_s30 + $0x1008] sm:$0xff] %v719_v45  ;;  %v721_v46 = vld [vmem:[%s5508_s8 + $0x19c8] sm:$0xff]  ;;  %v725_v48 = vld [vmem:[%s5508_s8 + $0x1a90] sm:$0xff] }
  0x9e   : >> { %722 = vst [vmem:[%s5504_s30 + $0x1080] sm:$0xff] %v721_v46  ;;  %724 = vst [vmem:[%s5504_s30 + $0x1088] sm:$0xff] %v723_v47  ;;  %v727_v49 = vld [vmem:[%s5508_s8 + $0x1a98] sm:$0xff]  ;;  %v731_v51 = vld [vmem:[%s5508_s8 + $0x1b60] sm:$0xff] }
  0x9f   : >> { %726 = vst [vmem:[%s5504_s30 + $0x1100] sm:$0xff] %v725_v48  ;;  %v729_v50 = vld [vmem:[%s5508_s8 + $0x1b58] sm:$0xff]  ;;  %728 = vst [vmem:[%s5504_s30 + $0x1108] sm:$0xff] %v727_v49  ;;  %s9091_s8 = smov %s6088_s12 }
  0xa0   : >> { %730 = vst [vmem:[%s5504_s30 + $0x1180] sm:$0xff] %v729_v50  ;;  %732 = vst [vmem:[%s5504_s30 + $0x1188] sm:$0xff] %v731_v51  ;;  %s9090_s30 = smov %s6091_s26 }
  0xa1   : > { %4568 = sbr.rel (%p4702_p7) target bundleno = 187 (0xbb), region = 286  ;;  %s9093_s23 = smov (!%p4702_p7), %s6220_s20 }
  0xa2   : > { %s9094_s30 = smov (!%p4702_p7), %s6217_s0  ;;  %s6229_s8 = smov (!%p4702_p7), 0  }
  0xa3   : > { %s6231_s27 = smov (!%p4702_p7), 0  }
  0xa8 LB: >> { %v760_v52 = vld [vmem:[%s5524_s30] sm:$0xff]  ;;  %v762_v53 = vld [vmem:[%s5524_s30 + $0xc8] sm:$0xff]  ;;  %v764_v54 = vld [vmem:[%s5524_s30 + $0x190] sm:$0xff]  ;;  %s832_s5 = sadd.s32 1, %s5528_s8  ;;  %s754_s27 = sadd.s32 1, %s5532_s27   ;;  %s5532_s27 = sphi %s6231_s27, %s754_s27   ;;  %s5528_s8 = sphi %s6229_s8, %s9097_s8   ;;  %s5524_s30 = sphi %s9094_s30, %s9096_s30   ;;  %s5520_s23 = sphi %s9093_s23, %s9095_s23  }
  0xa9   : >> { %761 = vst [vmem:[%s5520_s23] sm:$0xff] %v760_v52  ;;  %763 = vst [vmem:[%s5520_s23 + $0x80] sm:$0xff] %v762_v53  ;;  %v766_v55 = vld [vmem:[%s5524_s30 + $0x258] sm:$0xff]  ;;  %v768_v56 = vld [vmem:[%s5524_s30 + $0x320] sm:$0xff]  ;;  %p833_p8 = scmp.ge.s32.totalorder %s832_s5, %s6213_s28  ;;  %p753_p9 = scmp.ge.s32.totalorder %s754_s27, %s6213_s28 }
  0xaa   : >> { %765 = vst [vmem:[%s5520_s23 + $0x100] sm:$0xff] %v764_v54  ;;  %v770_v57 = vld [vmem:[%s5524_s30 + $0x3e8] sm:$0xff]  ;;  %767 = vst [vmem:[%s5520_s23 + $0x180] sm:$0xff] %v766_v55  ;;  %v772_v58 = vld [vmem:[%s5524_s30 + $0x4b0] sm:$0xff] }
  0xab   : >> { %769 = vst [vmem:[%s5520_s23 + $0x200] sm:$0xff] %v768_v56  ;;  %771 = vst [vmem:[%s5520_s23 + $0x280] sm:$0xff] %v770_v57  ;;  %v774_v59 = vld [vmem:[%s5524_s30 + $0x578] sm:$0xff]  ;;  %v776_v60 = vld [vmem:[%s5524_s30 + $0x640] sm:$0xff]  ;;  %s9348_s5 = smov (%p833_p8, %s832_s5), 0 }
  0xac   : >> { %773 = vst [vmem:[%s5520_s23 + $0x300] sm:$0xff] %v772_v58  ;;  %775 = vst [vmem:[%s5520_s23 + $0x380] sm:$0xff] %v774_v59  ;;  %v778_v61 = vld [vmem:[%s5524_s30 + $0x708] sm:$0xff]  ;;  %v780_v62 = vld [vmem:[%s5524_s30 + $0x7d0] sm:$0xff]  ;;  %s4703_s22 = sshll.u32 %s9348_s5, 3  ;;  %s9097_s8 = smov %s9348_s5 }
  0xad   : >> { %777 = vst [vmem:[%s5520_s23 + $0x400] sm:$0xff] %v776_v60  ;;  %v782_v63 = vld [vmem:[%s5524_s30 + $0x898] sm:$0xff]  ;;  %779 = vst [vmem:[%s5520_s23 + $0x480] sm:$0xff] %v778_v61  ;;  %v784_v0 = vld [vmem:[%s5524_s30 + $0x960] sm:$0xff]  ;;  %s6287_s14 = scalar_lea.vmem %s6217_s0, %s4703_s22   ;;  %s6290_s12 = scalar_lea.vmem %s6220_s20, %s4703_s22 [#allocation2]  }
  0xae   : >> { %781 = vst [vmem:[%s5520_s23 + $0x500] sm:$0xff] %v780_v62  ;;  %783 = vst [vmem:[%s5520_s23 + $0x580] sm:$0xff] %v782_v63  ;;  %v786_v1 = vld [vmem:[%s5524_s30 + $0xa28] sm:$0xff]  ;;  %v788_v2 = vld [vmem:[%s5524_s30 + $0xaf0] sm:$0xff] }
  0xaf   : >> { %785 = vst [vmem:[%s5520_s23 + $0x600] sm:$0xff] %v784_v0  ;;  %787 = vst [vmem:[%s5520_s23 + $0x680] sm:$0xff] %v786_v1  ;;  %v790_v3 = vld [vmem:[%s5524_s30 + $0xbb8] sm:$0xff]  ;;  %v792_v4 = vld [vmem:[%s5524_s30 + $0xc80] sm:$0xff] }
  0xb0   : >> { %789 = vst [vmem:[%s5520_s23 + $0x700] sm:$0xff] %v788_v2  ;;  %v794_v5 = vld [vmem:[%s5524_s30 + $0xd48] sm:$0xff]  ;;  %791 = vst [vmem:[%s5520_s23 + $0x780] sm:$0xff] %v790_v3  ;;  %v796_v6 = vld [vmem:[%s5524_s30 + $0xe10] sm:$0xff] }
  0xb1   : >> { %793 = vst [vmem:[%s5520_s23 + $0x800] sm:$0xff] %v792_v4  ;;  %795 = vst [vmem:[%s5520_s23 + $0x880] sm:$0xff] %v794_v5  ;;  %v798_v7 = vld [vmem:[%s5524_s30 + $0xed8] sm:$0xff]  ;;  %v800_v8 = vld [vmem:[%s5524_s30 + $0xfa0] sm:$0xff] }
  0xb2   : >> { %797 = vst [vmem:[%s5520_s23 + $0x900] sm:$0xff] %v796_v6  ;;  %799 = vst [vmem:[%s5520_s23 + $0x980] sm:$0xff] %v798_v7  ;;  %v802_v9 = vld [vmem:[%s5524_s30 + $0x1068] sm:$0xff]  ;;  %v804_v10 = vld [vmem:[%s5524_s30 + $0x1130] sm:$0xff] }
  0xb3   : >> { %801 = vst [vmem:[%s5520_s23 + $0xa00] sm:$0xff] %v800_v8  ;;  %v806_v11 = vld [vmem:[%s5524_s30 + $0x11f8] sm:$0xff]  ;;  %803 = vst [vmem:[%s5520_s23 + $0xa80] sm:$0xff] %v802_v9  ;;  %v808_v12 = vld [vmem:[%s5524_s30 + $0x12c0] sm:$0xff] }
  0xb4   : >> { %805 = vst [vmem:[%s5520_s23 + $0xb00] sm:$0xff] %v804_v10  ;;  %807 = vst [vmem:[%s5520_s23 + $0xb80] sm:$0xff] %v806_v11  ;;  %v810_v13 = vld [vmem:[%s5524_s30 + $0x1388] sm:$0xff]  ;;  %v812_v14 = vld [vmem:[%s5524_s30 + $0x1450] sm:$0xff]  ;;  %756 = sbr.rel (!%p753_p9) target bundleno = 168 (0xa8), region = 292 }
  0xb5   : >> { %809 = vst [vmem:[%s5520_s23 + $0xc00] sm:$0xff] %v808_v12  ;;  %811 = vst [vmem:[%s5520_s23 + $0xc80] sm:$0xff] %v810_v13  ;;  %v814_v15 = vld [vmem:[%s5524_s30 + $0x1518] sm:$0xff]  ;;  %v816_v16 = vld [vmem:[%s5524_s30 + $0x15e0] sm:$0xff] }
  0xb6   : >> { %813 = vst [vmem:[%s5520_s23 + $0xd00] sm:$0xff] %v812_v14  ;;  %v818_v17 = vld [vmem:[%s5524_s30 + $0x16a8] sm:$0xff]  ;;  %815 = vst [vmem:[%s5520_s23 + $0xd80] sm:$0xff] %v814_v15  ;;  %v820_v18 = vld [vmem:[%s5524_s30 + $0x1770] sm:$0xff] }
  0xb7   : >> { %817 = vst [vmem:[%s5520_s23 + $0xe00] sm:$0xff] %v816_v16  ;;  %819 = vst [vmem:[%s5520_s23 + $0xe80] sm:$0xff] %v818_v17  ;;  %v822_v19 = vld [vmem:[%s5524_s30 + $0x1838] sm:$0xff]  ;;  %v824_v20 = vld [vmem:[%s5524_s30 + $0x1900] sm:$0xff] }
  0xb8   : >> { %821 = vst [vmem:[%s5520_s23 + $0xf00] sm:$0xff] %v820_v18  ;;  %823 = vst [vmem:[%s5520_s23 + $0xf80] sm:$0xff] %v822_v19  ;;  %v826_v21 = vld [vmem:[%s5524_s30 + $0x19c8] sm:$0xff]  ;;  %v828_v22 = vld [vmem:[%s5524_s30 + $0x1a90] sm:$0xff] }
  0xb9   : >> { %825 = vst [vmem:[%s5520_s23 + $0x1000] sm:$0xff] %v824_v20  ;;  %v830_v23 = vld [vmem:[%s5524_s30 + $0x1b58] sm:$0xff]  ;;  %827 = vst [vmem:[%s5520_s23 + $0x1080] sm:$0xff] %v826_v21  ;;  %s9096_s30 = smov %s6287_s14 }
  0xba   : >> { %829 = vst [vmem:[%s5520_s23 + $0x1100] sm:$0xff] %v828_v22  ;;  %831 = vst [vmem:[%s5520_s23 + $0x1180] sm:$0xff] %v830_v23  ;;  %s9095_s23 = smov %s6290_s12 }
  0xbb PF: > { %s5598_s26 = smov 0  }
  0xbc   : > { %s6339_s29 = sshllo.u32 %s5598_s26, %s5686_s11 }
  0xbd   : > { %v848_v24 = vld [vmem:[%s6015_s6] sm:%s6339_s29]  ;;  %v850_v25 = vld [vmem:[%s6015_s6 + $0xc8] sm:%s6339_s29] }
  0xbe   : > { %849 = vst [vmem:[%s6018_s13] sm:%s6339_s29] %v848_v24  ;;  %851 = vst [vmem:[%s6018_s13 + $0x80] sm:%s6339_s29] %v850_v25 }
  0xbf   : > { %v852_v26 = vld [vmem:[%s6015_s6 + $0x190] sm:%s6339_s29]  ;;  %v854_v27 = vld [vmem:[%s6015_s6 + $0x258] sm:%s6339_s29] }
  0xc0   : > { %853 = vst [vmem:[%s6018_s13 + $0x100] sm:%s6339_s29] %v852_v26  ;;  %855 = vst [vmem:[%s6018_s13 + $0x180] sm:%s6339_s29] %v854_v27 }
  0xc1   : > { %v856_v28 = vld [vmem:[%s6015_s6 + $0x320] sm:%s6339_s29]  ;;  %v858_v29 = vld [vmem:[%s6015_s6 + $0x3e8] sm:%s6339_s29] }
  0xc2   : > { %857 = vst [vmem:[%s6018_s13 + $0x200] sm:%s6339_s29] %v856_v28  ;;  %859 = vst [vmem:[%s6018_s13 + $0x280] sm:%s6339_s29] %v858_v29 }
  0xc3   : > { %v860_v30 = vld [vmem:[%s6015_s6 + $0x4b0] sm:%s6339_s29]  ;;  %v862_v31 = vld [vmem:[%s6015_s6 + $0x578] sm:%s6339_s29] }
  0xc4   : > { %861 = vst [vmem:[%s6018_s13 + $0x300] sm:%s6339_s29] %v860_v30  ;;  %863 = vst [vmem:[%s6018_s13 + $0x380] sm:%s6339_s29] %v862_v31 }
  0xc5   : > { %v864_v32 = vld [vmem:[%s6015_s6 + $0x640] sm:%s6339_s29]  ;;  %v866_v33 = vld [vmem:[%s6015_s6 + $0x708] sm:%s6339_s29] }
  0xc6   : > { %865 = vst [vmem:[%s6018_s13 + $0x400] sm:%s6339_s29] %v864_v32  ;;  %867 = vst [vmem:[%s6018_s13 + $0x480] sm:%s6339_s29] %v866_v33 }
  0xc7   : > { %v868_v34 = vld [vmem:[%s6015_s6 + $0x7d0] sm:%s6339_s29]  ;;  %v870_v35 = vld [vmem:[%s6015_s6 + $0x898] sm:%s6339_s29] }
  0xc8   : > { %869 = vst [vmem:[%s6018_s13 + $0x500] sm:%s6339_s29] %v868_v34  ;;  %871 = vst [vmem:[%s6018_s13 + $0x580] sm:%s6339_s29] %v870_v35 }
  0xc9   : > { %v872_v36 = vld [vmem:[%s6015_s6 + $0x960] sm:%s6339_s29]  ;;  %v874_v37 = vld [vmem:[%s6015_s6 + $0xa28] sm:%s6339_s29] }
  0xca   : > { %873 = vst [vmem:[%s6018_s13 + $0x600] sm:%s6339_s29] %v872_v36  ;;  %875 = vst [vmem:[%s6018_s13 + $0x680] sm:%s6339_s29] %v874_v37 }
  0xcb   : > { %v876_v38 = vld [vmem:[%s6015_s6 + $0xaf0] sm:%s6339_s29]  ;;  %v878_v39 = vld [vmem:[%s6015_s6 + $0xbb8] sm:%s6339_s29] }
  0xcc   : > { %877 = vst [vmem:[%s6018_s13 + $0x700] sm:%s6339_s29] %v876_v38  ;;  %879 = vst [vmem:[%s6018_s13 + $0x780] sm:%s6339_s29] %v878_v39 }
  0xcd   : > { %v880_v40 = vld [vmem:[%s6015_s6 + $0xc80] sm:%s6339_s29]  ;;  %v882_v41 = vld [vmem:[%s6015_s6 + $0xd48] sm:%s6339_s29] }
  0xce   : > { %881 = vst [vmem:[%s6018_s13 + $0x800] sm:%s6339_s29] %v880_v40  ;;  %883 = vst [vmem:[%s6018_s13 + $0x880] sm:%s6339_s29] %v882_v41 }
  0xcf   : > { %v884_v42 = vld [vmem:[%s6015_s6 + $0xe10] sm:%s6339_s29]  ;;  %v886_v43 = vld [vmem:[%s6015_s6 + $0xed8] sm:%s6339_s29] }
  0xd0   : > { %885 = vst [vmem:[%s6018_s13 + $0x900] sm:%s6339_s29] %v884_v42  ;;  %887 = vst [vmem:[%s6018_s13 + $0x980] sm:%s6339_s29] %v886_v43 }
  0xd1   : > { %v888_v44 = vld [vmem:[%s6015_s6 + $0xfa0] sm:%s6339_s29]  ;;  %v890_v45 = vld [vmem:[%s6015_s6 + $0x1068] sm:%s6339_s29] }
  0xd2   : > { %889 = vst [vmem:[%s6018_s13 + $0xa00] sm:%s6339_s29] %v888_v44  ;;  %891 = vst [vmem:[%s6018_s13 + $0xa80] sm:%s6339_s29] %v890_v45 }
  0xd3   : > { %v892_v46 = vld [vmem:[%s6015_s6 + $0x1130] sm:%s6339_s29]  ;;  %v894_v47 = vld [vmem:[%s6015_s6 + $0x11f8] sm:%s6339_s29] }
  0xd4   : > { %893 = vst [vmem:[%s6018_s13 + $0xb00] sm:%s6339_s29] %v892_v46  ;;  %895 = vst [vmem:[%s6018_s13 + $0xb80] sm:%s6339_s29] %v894_v47 }
  0xd5   : > { %v896_v48 = vld [vmem:[%s6015_s6 + $0x12c0] sm:%s6339_s29]  ;;  %v898_v49 = vld [vmem:[%s6015_s6 + $0x1388] sm:%s6339_s29] }
  0xd6   : > { %897 = vst [vmem:[%s6018_s13 + $0xc00] sm:%s6339_s29] %v896_v48  ;;  %899 = vst [vmem:[%s6018_s13 + $0xc80] sm:%s6339_s29] %v898_v49 }
  0xd7   : > { %v900_v50 = vld [vmem:[%s6015_s6 + $0x1450] sm:%s6339_s29]  ;;  %v902_v51 = vld [vmem:[%s6015_s6 + $0x1518] sm:%s6339_s29] }
  0xd8   : > { %901 = vst [vmem:[%s6018_s13 + $0xd00] sm:%s6339_s29] %v900_v50  ;;  %903 = vst [vmem:[%s6018_s13 + $0xd80] sm:%s6339_s29] %v902_v51 }
  0xd9   : > { %v904_v52 = vld [vmem:[%s6015_s6 + $0x15e0] sm:%s6339_s29]  ;;  %v906_v53 = vld [vmem:[%s6015_s6 + $0x16a8] sm:%s6339_s29] }
  0xda   : > { %905 = vst [vmem:[%s6018_s13 + $0xe00] sm:%s6339_s29] %v904_v52  ;;  %907 = vst [vmem:[%s6018_s13 + $0xe80] sm:%s6339_s29] %v906_v53 }
  0xdb   : > { %v908_v54 = vld [vmem:[%s6015_s6 + $0x1770] sm:%s6339_s29]  ;;  %v910_v55 = vld [vmem:[%s6015_s6 + $0x1838] sm:%s6339_s29] }
  0xdc   : > { %909 = vst [vmem:[%s6018_s13 + $0xf00] sm:%s6339_s29] %v908_v54  ;;  %911 = vst [vmem:[%s6018_s13 + $0xf80] sm:%s6339_s29] %v910_v55 }
  0xdd   : > { %v912_v56 = vld [vmem:[%s6015_s6 + $0x1900] sm:%s6339_s29]  ;;  %v914_v57 = vld [vmem:[%s6015_s6 + $0x19c8] sm:%s6339_s29] }
  0xde   : > { %913 = vst [vmem:[%s6018_s13 + $0x1000] sm:%s6339_s29] %v912_v56  ;;  %915 = vst [vmem:[%s6018_s13 + $0x1080] sm:%s6339_s29] %v914_v57 }
  0xdf   : > { %v916_v58 = vld [vmem:[%s6015_s6 + $0x1a90] sm:%s6339_s29]  ;;  %v918_v59 = vld [vmem:[%s6015_s6 + $0x1b58] sm:%s6339_s29] }
  0xe0   : > { %917 = vst [vmem:[%s6018_s13 + $0x1100] sm:%s6339_s29] %v916_v58  ;;  %919 = vst [vmem:[%s6018_s13 + $0x1180] sm:%s6339_s29] %v918_v59 }
  0xe1 PF: > { %p4705_p10 = scmp.ge.u32.totalorder %s5680_s9, 8 }
  0xe2   : > { %s5599_s0 = smov (!%p4705_p10), 0  }
  0xe3   : > { %218 = sbr.rel (%p4705_p10) target bundleno = 264 (0x108), region = 36  ;;  %s6487_s20 = sshllo.u32 (!%p4705_p10), %s5599_s0, %s5680_s9 }
  0xe4   : > { %v228_v60 = vld [vmem:[%s5678_s7] sm:%s6487_s20] (!%p4705_p10)  ;;  %v230_v61 = vld [vmem:[%s5678_s7 + $0xc8] sm:%s6487_s20] (!%p4705_p10) }
  0xe5   : > { %229 = vst [vmem:[%s5682_s10] sm:%s6487_s20] (!%p4705_p10), %v228_v60  ;;  %231 = vst [vmem:[%s5682_s10 + $0x80] sm:%s6487_s20] (!%p4705_p10), %v230_v61 }
  0xe6   : > { %v232_v62 = vld [vmem:[%s5678_s7 + $0x190] sm:%s6487_s20] (!%p4705_p10)  ;;  %v234_v63 = vld [vmem:[%s5678_s7 + $0x258] sm:%s6487_s20] (!%p4705_p10) }
  0xe7   : > { %233 = vst [vmem:[%s5682_s10 + $0x100] sm:%s6487_s20] (!%p4705_p10), %v232_v62  ;;  %235 = vst [vmem:[%s5682_s10 + $0x180] sm:%s6487_s20] (!%p4705_p10), %v234_v63 }
  0xe8   : > { %v236_v0 = vld [vmem:[%s5678_s7 + $0x320] sm:%s6487_s20] (!%p4705_p10)  ;;  %v238_v1 = vld [vmem:[%s5678_s7 + $0x3e8] sm:%s6487_s20] (!%p4705_p10) }
  0xe9   : > { %237 = vst [vmem:[%s5682_s10 + $0x200] sm:%s6487_s20] (!%p4705_p10), %v236_v0  ;;  %239 = vst [vmem:[%s5682_s10 + $0x280] sm:%s6487_s20] (!%p4705_p10), %v238_v1 }
  0xea   : > { %v240_v2 = vld [vmem:[%s5678_s7 + $0x4b0] sm:%s6487_s20]  ;;  %v242_v3 = vld [vmem:[%s5678_s7 + $0x578] sm:%s6487_s20] }
  0xeb   : > { %241 = vst [vmem:[%s5682_s10 + $0x300] sm:%s6487_s20] %v240_v2  ;;  %243 = vst [vmem:[%s5682_s10 + $0x380] sm:%s6487_s20] %v242_v3 }
  0xec   : > { %v244_v4 = vld [vmem:[%s5678_s7 + $0x640] sm:%s6487_s20]  ;;  %v246_v5 = vld [vmem:[%s5678_s7 + $0x708] sm:%s6487_s20] }
  0xed   : > { %245 = vst [vmem:[%s5682_s10 + $0x400] sm:%s6487_s20] %v244_v4  ;;  %247 = vst [vmem:[%s5682_s10 + $0x480] sm:%s6487_s20] %v246_v5 }
  0xee   : > { %v248_v6 = vld [vmem:[%s5678_s7 + $0x7d0] sm:%s6487_s20]  ;;  %v250_v7 = vld [vmem:[%s5678_s7 + $0x898] sm:%s6487_s20] }
  0xef   : > { %249 = vst [vmem:[%s5682_s10 + $0x500] sm:%s6487_s20] %v248_v6  ;;  %251 = vst [vmem:[%s5682_s10 + $0x580] sm:%s6487_s20] %v250_v7 }
  0xf0   : > { %v252_v8 = vld [vmem:[%s5678_s7 + $0x960] sm:%s6487_s20]  ;;  %v254_v9 = vld [vmem:[%s5678_s7 + $0xa28] sm:%s6487_s20] }
  0xf1   : > { %253 = vst [vmem:[%s5682_s10 + $0x600] sm:%s6487_s20] %v252_v8  ;;  %255 = vst [vmem:[%s5682_s10 + $0x680] sm:%s6487_s20] %v254_v9 }
  0xf2   : > { %v256_v10 = vld [vmem:[%s5678_s7 + $0xaf0] sm:%s6487_s20]  ;;  %v258_v11 = vld [vmem:[%s5678_s7 + $0xbb8] sm:%s6487_s20] }
  0xf3   : > { %257 = vst [vmem:[%s5682_s10 + $0x700] sm:%s6487_s20] %v256_v10  ;;  %259 = vst [vmem:[%s5682_s10 + $0x780] sm:%s6487_s20] %v258_v11 }
  0xf4   : > { %v260_v12 = vld [vmem:[%s5678_s7 + $0xc80] sm:%s6487_s20]  ;;  %v262_v13 = vld [vmem:[%s5678_s7 + $0xd48] sm:%s6487_s20] }
  0xf5   : > { %261 = vst [vmem:[%s5682_s10 + $0x800] sm:%s6487_s20] %v260_v12  ;;  %263 = vst [vmem:[%s5682_s10 + $0x880] sm:%s6487_s20] %v262_v13 }
  0xf6   : > { %v264_v14 = vld [vmem:[%s5678_s7 + $0xe10] sm:%s6487_s20]  ;;  %v266_v15 = vld [vmem:[%s5678_s7 + $0xed8] sm:%s6487_s20] }
  0xf7   : > { %265 = vst [vmem:[%s5682_s10 + $0x900] sm:%s6487_s20] %v264_v14  ;;  %267 = vst [vmem:[%s5682_s10 + $0x980] sm:%s6487_s20] %v266_v15 }
  0xf8   : > { %v268_v16 = vld [vmem:[%s5678_s7 + $0xfa0] sm:%s6487_s20]  ;;  %v270_v17 = vld [vmem:[%s5678_s7 + $0x1068] sm:%s6487_s20] }
  0xf9   : > { %269 = vst [vmem:[%s5682_s10 + $0xa00] sm:%s6487_s20] %v268_v16  ;;  %271 = vst [vmem:[%s5682_s10 + $0xa80] sm:%s6487_s20] %v270_v17 }
  0xfa   : > { %v272_v18 = vld [vmem:[%s5678_s7 + $0x1130] sm:%s6487_s20]  ;;  %v274_v19 = vld [vmem:[%s5678_s7 + $0x11f8] sm:%s6487_s20] }
  0xfb   : > { %273 = vst [vmem:[%s5682_s10 + $0xb00] sm:%s6487_s20] %v272_v18  ;;  %275 = vst [vmem:[%s5682_s10 + $0xb80] sm:%s6487_s20] %v274_v19 }
  0xfc   : > { %v276_v20 = vld [vmem:[%s5678_s7 + $0x12c0] sm:%s6487_s20]  ;;  %v278_v21 = vld [vmem:[%s5678_s7 + $0x1388] sm:%s6487_s20] }
  0xfd   : > { %277 = vst [vmem:[%s5682_s10 + $0xc00] sm:%s6487_s20] %v276_v20  ;;  %279 = vst [vmem:[%s5682_s10 + $0xc80] sm:%s6487_s20] %v278_v21 }
  0xfe   : > { %v280_v22 = vld [vmem:[%s5678_s7 + $0x1450] sm:%s6487_s20]  ;;  %v282_v23 = vld [vmem:[%s5678_s7 + $0x1518] sm:%s6487_s20] }
  0xff   : > { %281 = vst [vmem:[%s5682_s10 + $0xd00] sm:%s6487_s20] %v280_v22  ;;  %283 = vst [vmem:[%s5682_s10 + $0xd80] sm:%s6487_s20] %v282_v23 }
 0x100   : > { %v284_v24 = vld [vmem:[%s5678_s7 + $0x15e0] sm:%s6487_s20]  ;;  %v286_v25 = vld [vmem:[%s5678_s7 + $0x16a8] sm:%s6487_s20] }
 0x101   : > { %285 = vst [vmem:[%s5682_s10 + $0xe00] sm:%s6487_s20] %v284_v24  ;;  %287 = vst [vmem:[%s5682_s10 + $0xe80] sm:%s6487_s20] %v286_v25 }
 0x102   : > { %v288_v26 = vld [vmem:[%s5678_s7 + $0x1770] sm:%s6487_s20]  ;;  %v290_v27 = vld [vmem:[%s5678_s7 + $0x1838] sm:%s6487_s20] }
 0x103   : > { %289 = vst [vmem:[%s5682_s10 + $0xf00] sm:%s6487_s20] %v288_v26  ;;  %291 = vst [vmem:[%s5682_s10 + $0xf80] sm:%s6487_s20] %v290_v27 }
 0x104   : > { %v292_v28 = vld [vmem:[%s5678_s7 + $0x1900] sm:%s6487_s20]  ;;  %v294_v29 = vld [vmem:[%s5678_s7 + $0x19c8] sm:%s6487_s20] }
 0x105   : > { %293 = vst [vmem:[%s5682_s10 + $0x1000] sm:%s6487_s20] %v292_v28  ;;  %295 = vst [vmem:[%s5682_s10 + $0x1080] sm:%s6487_s20] %v294_v29 }
 0x106   : > { %v296_v30 = vld [vmem:[%s5678_s7 + $0x1a90] sm:%s6487_s20]  ;;  %v298_v31 = vld [vmem:[%s5678_s7 + $0x1b58] sm:%s6487_s20] }
 0x107   : > { %297 = vst [vmem:[%s5682_s10 + $0x1100] sm:%s6487_s20] %v296_v30  ;;  %299 = vst [vmem:[%s5682_s10 + $0x1180] sm:%s6487_s20] %v298_v31 }
 0x108 PF: > { %p4706_p11 = scmp.ge.s32.totalorder %s5468_s19, 1  ;;  %p922_p12 = scmp.lt.s32.totalorder %s5468_s19, 3 }
 0x10a   : > { %p923_p13 = pnand %p4706_p11, %p922_p12 }
 0x10c   : > { %926 = sbr.rel (%p923_p13) target bundleno = 1372 (0x55c), region = 90 }
 0x113   : > { %s929_s9 = sand.u32 1, %s5452_s15   ;;  %v6639_v32 = vld [vmem:[%s9007_s1 + $0x4] ss:$12 sps:$4 sm:$0xff]   ;;  %vm1909_vm0 = vcmask 261120   ;;  %p3264_p0 = scmp.eq.s32.totalorder %s5460_s17, 0 }
 0x114   : > { %s4965_s7 = smul.u32 4608, %s929_s9  ;;  %1951 = vmatprep.mubr.bf16.mxu0 %v6639_v32  ;;  %2077 = vmatprep.mubr.bf16.mxu1 %v6639_v32  ;;  %vm3269_vm1 = vcmask (%p3264_p0), 7168  }
 0x115   : > { %s7338_s6 = smul.u32 384, %s929_s9 }
 0x116   : > { %s6645_s10 = scalar_lea.vmem [#allocation2], %s4965_s7 }
 0x117   : > { %v989_v33 = vld [vmem:[%s6645_s10 + $0x8] sm:$0xff]  ;;  %v991_v35 = vld [vmem:[%s6645_s10 + $0x18] sm:$0xff]  ;;  %v988_v38 = vld [vmem:[%s6645_s10] sm:$0xff]  ;;  %s7356_s15 = scalar_lea.vmem [#allocation3], %s7338_s6  }
 0x118   : > { %v1005_v34 = vld [vmem:[%s6645_s10 + $0x88] sm:$0xff]  ;;  %v1007_v37 = vld [vmem:[%s6645_s10 + $0x98] sm:$0xff]  ;;  %v1004_v39 = vld [vmem:[%s6645_s10 + $0x80] sm:$0xff] }
 0x119   : > { %v1565_v36 = vpack.c.bf16 %v1005_v34, %v989_v33  ;;  %v1567_v40 = vpack.c.bf16 %v1007_v37, %v991_v35  ;;  %v1564_v41 = vpack.c.bf16 %v1004_v39, %v988_v38  ;;  %v990_v42 = vld [vmem:[%s6645_s10 + $0x10] sm:$0xff]  ;;  %v1021_v44 = vld [vmem:[%s6645_s10 + $0x108] sm:$0xff]  ;;  %v1023_v47 = vld [vmem:[%s6645_s10 + $0x118] sm:$0xff] }
 0x11a   : > { %v1006_v43 = vld [vmem:[%s6645_s10 + $0x90] sm:$0xff]  ;;  %v1037_v46 = vld [vmem:[%s6645_s10 + $0x188] sm:$0xff]  ;;  %v1039_v48 = vld [vmem:[%s6645_s10 + $0x198] sm:$0xff] }
 0x11b   : > { %1919 = vmatprep.subr.bf16.mxu0 %v1565_v36  ;;  %v1566_v45 = vpack.c.bf16 %v1006_v43, %v990_v42  ;;  %2045 = vmatprep.subr.bf16.mxu1 %v1567_v40  ;;  %v1581_v49 = vpack.c.bf16 %v1037_v46, %v1021_v44  ;;  %v1583_v50 = vpack.c.bf16 %v1039_v48, %v1023_v47  ;;  %v1020_v51 = vld [vmem:[%s6645_s10 + $0x100] sm:$0xff]  ;;  %v1022_v53 = vld [vmem:[%s6645_s10 + $0x110] sm:$0xff]  ;;  %v1053_v56 = vld [vmem:[%s6645_s10 + $0x208] sm:$0xff] }
 0x11c   : > { %1920 = vmatpush1.bf16.msra.mxu0 %v1564_v41  ;;  %v1036_v52 = vld [vmem:[%s6645_s10 + $0x180] sm:$0xff]  ;;  %v1038_v55 = vld [vmem:[%s6645_s10 + $0x190] sm:$0xff]  ;;  %v1069_v57 = vld [vmem:[%s6645_s10 + $0x288] sm:$0xff] }
 0x11d   : > { %2046 = vmatpush1.bf16.msra.mxu1 %v1566_v45  ;;  %v1580_v54 = vpack.c.bf16 %v1036_v52, %v1020_v51  ;;  %1921 = vmatprep.subr.bf16.mxu0 %v1581_v49  ;;  %v1582_v58 = vpack.c.bf16 %v1038_v55, %v1022_v53  ;;  %v1597_v59 = vpack.c.bf16 %v1069_v57, %v1053_v56  ;;  %v1055_v60 = vld [vmem:[%s6645_s10 + $0x218] sm:$0xff]  ;;  %v1052_v62 = vld [vmem:[%s6645_s10 + $0x200] sm:$0xff]  ;;  %v1054_v1 = vld [vmem:[%s6645_s10 + $0x210] sm:$0xff] }
 0x11e   : > { %2047 = vmatprep.subr.bf16.mxu1 %v1583_v50  ;;  %v1071_v61 = vld [vmem:[%s6645_s10 + $0x298] sm:$0xff]  ;;  %v1068_v0 = vld [vmem:[%s6645_s10 + $0x280] sm:$0xff]  ;;  %v1070_v2 = vld [vmem:[%s6645_s10 + $0x290] sm:$0xff] }
 0x11f   : > { %v1599_v63 = vpack.c.bf16 %v1071_v61, %v1055_v60  ;;  %v1596_v3 = vpack.c.bf16 %v1068_v0, %v1052_v62  ;;  %v1085_v4 = vld [vmem:[%s6645_s10 + $0x308] sm:$0xff]  ;;  %v1087_v6 = vld [vmem:[%s6645_s10 + $0x318] sm:$0xff]  ;;  %v1598_v7 = vpack.c.bf16 %v1070_v2, %v1054_v1  ;;  %v1084_v10 = vld [vmem:[%s6645_s10 + $0x300] sm:$0xff] }
 0x120   : > { %1922 = vmatpush1.bf16.msra.mxu0 %v1580_v54  ;;  %v1101_v5 = vld [vmem:[%s6645_s10 + $0x388] sm:$0xff]  ;;  %v1103_v9 = vld [vmem:[%s6645_s10 + $0x398] sm:$0xff]  ;;  %v1100_v11 = vld [vmem:[%s6645_s10 + $0x380] sm:$0xff] }
 0x121   : > { %2048 = vmatpush1.bf16.msra.mxu1 %v1582_v58  ;;  %1923 = vmatprep.subr.bf16.mxu0 %v1597_v59  ;;  %v1613_v8 = vpack.c.bf16 %v1101_v5, %v1085_v4  ;;  %v1615_v12 = vpack.c.bf16 %v1103_v9, %v1087_v6  ;;  %v1086_v13 = vld [vmem:[%s6645_s10 + $0x310] sm:$0xff]  ;;  %v1117_v15 = vld [vmem:[%s6645_s10 + $0x408] sm:$0xff]  ;;  %v1119_v17 = vld [vmem:[%s6645_s10 + $0x418] sm:$0xff]  ;;  %v1612_v19 = vpack.c.bf16 %v1100_v11, %v1084_v10 }
 0x122   : > { %2049 = vmatprep.subr.bf16.mxu1 %v1599_v63  ;;  %v1102_v14 = vld [vmem:[%s6645_s10 + $0x390] sm:$0xff]  ;;  %v1133_v16 = vld [vmem:[%s6645_s10 + $0x488] sm:$0xff]  ;;  %v1135_v18 = vld [vmem:[%s6645_s10 + $0x498] sm:$0xff] }
 0x123   : > { %v1614_v20 = vpack.c.bf16 %v1102_v14, %v1086_v13  ;;  %v1629_v21 = vpack.c.bf16 %v1133_v16, %v1117_v15  ;;  %v1116_v22 = vld [vmem:[%s6645_s10 + $0x400] sm:$0xff]  ;;  %v1118_v24 = vld [vmem:[%s6645_s10 + $0x410] sm:$0xff]  ;;  %v1631_v25 = vpack.c.bf16 %v1135_v18, %v1119_v17  ;;  %v1149_v27 = vld [vmem:[%s6645_s10 + $0x508] sm:$0xff] }
 0x124   : > { %1924 = vmatpush1.bf16.msra.mxu0 %v1596_v3  ;;  %v1132_v23 = vld [vmem:[%s6645_s10 + $0x480] sm:$0xff]  ;;  %v1134_v26 = vld [vmem:[%s6645_s10 + $0x490] sm:$0xff]  ;;  %v1165_v28 = vld [vmem:[%s6645_s10 + $0x588] sm:$0xff] }
 0x125   : > { %2050 = vmatpush1.bf16.msra.mxu1 %v1598_v7  ;;  %1925 = vmatprep.subr.bf16.mxu0 %v1613_v8  ;;  %v1151_v29 = vld [vmem:[%s6645_s10 + $0x518] sm:$0xff]  ;;  %v1628_v31 = vpack.c.bf16 %v1132_v23, %v1116_v22  ;;  %v1630_v33 = vpack.c.bf16 %v1134_v26, %v1118_v24  ;;  %v1645_v34 = vpack.c.bf16 %v1165_v28, %v1149_v27  ;;  %v1148_v35 = vld [vmem:[%s6645_s10 + $0x500] sm:$0xff]  ;;  %v1150_v37 = vld [vmem:[%s6645_s10 + $0x510] sm:$0xff] }
 0x126   : > { %2051 = vmatprep.subr.bf16.mxu1 %v1615_v12  ;;  %v1167_v30 = vld [vmem:[%s6645_s10 + $0x598] sm:$0xff]  ;;  %v1164_v36 = vld [vmem:[%s6645_s10 + $0x580] sm:$0xff]  ;;  %v1166_v39 = vld [vmem:[%s6645_s10 + $0x590] sm:$0xff] }
 0x127   : > { %v1647_v38 = vpack.c.bf16 %v1167_v30, %v1151_v29  ;;  %v1181_v40 = vld [vmem:[%s6645_s10 + $0x608] sm:$0xff]  ;;  %v1183_v42 = vld [vmem:[%s6645_s10 + $0x618] sm:$0xff]  ;;  %v1644_v44 = vpack.c.bf16 %v1164_v36, %v1148_v35  ;;  %v1646_v45 = vpack.c.bf16 %v1166_v39, %v1150_v37  ;;  %v1180_v47 = vld [vmem:[%s6645_s10 + $0x600] sm:$0xff] }
 0x128   : > { %1926 = vmatpush1.bf16.msra.mxu0 %v1612_v19  ;;  %v1197_v41 = vld [vmem:[%s6645_s10 + $0x688] sm:$0xff]  ;;  %v1199_v43 = vld [vmem:[%s6645_s10 + $0x698] sm:$0xff]  ;;  %v1196_v48 = vld [vmem:[%s6645_s10 + $0x680] sm:$0xff] }
 0x129   : > { %2052 = vmatpush1.bf16.msra.mxu1 %v1614_v20  ;;  %1927 = vmatprep.subr.bf16.mxu0 %v1629_v21  ;;  %v1661_v46 = vpack.c.bf16 %v1197_v41, %v1181_v40  ;;  %v1182_v49 = vld [vmem:[%s6645_s10 + $0x610] sm:$0xff]  ;;  %v1663_v50 = vpack.c.bf16 %v1199_v43, %v1183_v42  ;;  %v1213_v52 = vld [vmem:[%s6645_s10 + $0x708] sm:$0xff]  ;;  %v1215_v54 = vld [vmem:[%s6645_s10 + $0x718] sm:$0xff]  ;;  %v1660_v56 = vpack.c.bf16 %v1196_v48, %v1180_v47 }
 0x12a   : > { %2053 = vmatprep.subr.bf16.mxu1 %v1631_v25  ;;  %v1198_v51 = vld [vmem:[%s6645_s10 + $0x690] sm:$0xff]  ;;  %v1229_v53 = vld [vmem:[%s6645_s10 + $0x788] sm:$0xff]  ;;  %v1231_v55 = vld [vmem:[%s6645_s10 + $0x798] sm:$0xff] }
 0x12b   : > { %v1662_v57 = vpack.c.bf16 %v1198_v51, %v1182_v49  ;;  %v1677_v58 = vpack.c.bf16 %v1229_v53, %v1213_v52  ;;  %v1212_v59 = vld [vmem:[%s6645_s10 + $0x700] sm:$0xff]  ;;  %v1214_v61 = vld [vmem:[%s6645_s10 + $0x710] sm:$0xff]  ;;  %v1679_v62 = vpack.c.bf16 %v1231_v55, %v1215_v54  ;;  %v1245_v0 = vld [vmem:[%s6645_s10 + $0x808] sm:$0xff] }
 0x12c   : > { %1928 = vmatpush1.bf16.msra.mxu0 %v1628_v31  ;;  %v1228_v60 = vld [vmem:[%s6645_s10 + $0x780] sm:$0xff]  ;;  %v1230_v63 = vld [vmem:[%s6645_s10 + $0x790] sm:$0xff]  ;;  %v1261_v1 = vld [vmem:[%s6645_s10 + $0x888] sm:$0xff] }
 0x12d   : > { %2054 = vmatpush1.bf16.msra.mxu1 %v1630_v33  ;;  %1929 = vmatprep.subr.bf16.mxu0 %v1645_v34  ;;  %v1247_v2 = vld [vmem:[%s6645_s10 + $0x818] sm:$0xff]  ;;  %v1676_v4 = vpack.c.bf16 %v1228_v60, %v1212_v59  ;;  %v1678_v5 = vpack.c.bf16 %v1230_v63, %v1214_v61  ;;  %v1693_v6 = vpack.c.bf16 %v1261_v1, %v1245_v0  ;;  %v1244_v7 = vld [vmem:[%s6645_s10 + $0x800] sm:$0xff]  ;;  %v1246_v9 = vld [vmem:[%s6645_s10 + $0x810] sm:$0xff] }
 0x12e   : > { %2055 = vmatprep.subr.bf16.mxu1 %v1647_v38  ;;  %v1263_v3 = vld [vmem:[%s6645_s10 + $0x898] sm:$0xff]  ;;  %v1260_v8 = vld [vmem:[%s6645_s10 + $0x880] sm:$0xff]  ;;  %v1262_v11 = vld [vmem:[%s6645_s10 + $0x890] sm:$0xff] }
 0x12f   : > { %v1695_v10 = vpack.c.bf16 %v1263_v3, %v1247_v2  ;;  %v1277_v12 = vld [vmem:[%s6645_s10 + $0x908] sm:$0xff]  ;;  %v1279_v14 = vld [vmem:[%s6645_s10 + $0x918] sm:$0xff]  ;;  %v1692_v16 = vpack.c.bf16 %v1260_v8, %v1244_v7  ;;  %v1694_v17 = vpack.c.bf16 %v1262_v11, %v1246_v9  ;;  %v1276_v19 = vld [vmem:[%s6645_s10 + $0x900] sm:$0xff] }
 0x130   : > { %1930 = vmatpush1.bf16.msra.mxu0 %v1644_v44  ;;  %v1293_v13 = vld [vmem:[%s6645_s10 + $0x988] sm:$0xff]  ;;  %v1295_v15 = vld [vmem:[%s6645_s10 + $0x998] sm:$0xff]  ;;  %v1292_v20 = vld [vmem:[%s6645_s10 + $0x980] sm:$0xff] }
 0x131   : > { %2056 = vmatpush1.bf16.msra.mxu1 %v1646_v45  ;;  %1931 = vmatprep.subr.bf16.mxu0 %v1661_v46  ;;  %v1709_v18 = vpack.c.bf16 %v1293_v13, %v1277_v12  ;;  %v1278_v21 = vld [vmem:[%s6645_s10 + $0x910] sm:$0xff]  ;;  %v1711_v22 = vpack.c.bf16 %v1295_v15, %v1279_v14  ;;  %v1309_v24 = vld [vmem:[%s6645_s10 + $0xa08] sm:$0xff]  ;;  %v1311_v26 = vld [vmem:[%s6645_s10 + $0xa18] sm:$0xff]  ;;  %v1708_v28 = vpack.c.bf16 %v1292_v20, %v1276_v19 }
 0x132   : > { %2057 = vmatprep.subr.bf16.mxu1 %v1663_v50  ;;  %v1294_v23 = vld [vmem:[%s6645_s10 + $0x990] sm:$0xff]  ;;  %v1325_v25 = vld [vmem:[%s6645_s10 + $0xa88] sm:$0xff]  ;;  %v1327_v27 = vld [vmem:[%s6645_s10 + $0xa98] sm:$0xff] }
 0x133   : > { %v1710_v29 = vpack.c.bf16 %v1294_v23, %v1278_v21  ;;  %v1725_v30 = vpack.c.bf16 %v1325_v25, %v1309_v24  ;;  %v1308_v31 = vld [vmem:[%s6645_s10 + $0xa00] sm:$0xff]  ;;  %v1310_v34 = vld [vmem:[%s6645_s10 + $0xa10] sm:$0xff]  ;;  %v1727_v35 = vpack.c.bf16 %v1327_v27, %v1311_v26  ;;  %v1341_v37 = vld [vmem:[%s6645_s10 + $0xb08] sm:$0xff] }
 0x134   : > { %1932 = vmatpush1.bf16.msra.mxu0 %v1660_v56  ;;  %v1324_v33 = vld [vmem:[%s6645_s10 + $0xa80] sm:$0xff]  ;;  %v1326_v36 = vld [vmem:[%s6645_s10 + $0xa90] sm:$0xff]  ;;  %v1357_v38 = vld [vmem:[%s6645_s10 + $0xb88] sm:$0xff] }
 0x135   : > { %2058 = vmatpush1.bf16.msra.mxu1 %v1662_v57  ;;  %1933 = vmatprep.subr.bf16.mxu0 %v1677_v58  ;;  %v1343_v39 = vld [vmem:[%s6645_s10 + $0xb18] sm:$0xff]  ;;  %v1724_v41 = vpack.c.bf16 %v1324_v33, %v1308_v31  ;;  %v1726_v42 = vpack.c.bf16 %v1326_v36, %v1310_v34  ;;  %v1741_v43 = vpack.c.bf16 %v1357_v38, %v1341_v37  ;;  %v1340_v44 = vld [vmem:[%s6645_s10 + $0xb00] sm:$0xff]  ;;  %v1342_v46 = vld [vmem:[%s6645_s10 + $0xb10] sm:$0xff] }
 0x136   : > { %2059 = vmatprep.subr.bf16.mxu1 %v1679_v62  ;;  %v1359_v40 = vld [vmem:[%s6645_s10 + $0xb98] sm:$0xff]  ;;  %v1356_v45 = vld [vmem:[%s6645_s10 + $0xb80] sm:$0xff]  ;;  %v1358_v48 = vld [vmem:[%s6645_s10 + $0xb90] sm:$0xff] }
 0x137   : > { %v1743_v47 = vpack.c.bf16 %v1359_v40, %v1343_v39  ;;  %v1373_v49 = vld [vmem:[%s6645_s10 + $0xc08] sm:$0xff]  ;;  %v1375_v51 = vld [vmem:[%s6645_s10 + $0xc18] sm:$0xff]  ;;  %v1740_v53 = vpack.c.bf16 %v1356_v45, %v1340_v44  ;;  %v1742_v54 = vpack.c.bf16 %v1358_v48, %v1342_v46  ;;  %v1372_v56 = vld [vmem:[%s6645_s10 + $0xc00] sm:$0xff] }
 0x138   : > { %1934 = vmatpush1.bf16.msra.mxu0 %v1676_v4  ;;  %v1389_v50 = vld [vmem:[%s6645_s10 + $0xc88] sm:$0xff]  ;;  %v1391_v52 = vld [vmem:[%s6645_s10 + $0xc98] sm:$0xff]  ;;  %v1388_v57 = vld [vmem:[%s6645_s10 + $0xc80] sm:$0xff] }
 0x139   : > { %2060 = vmatpush1.bf16.msra.mxu1 %v1678_v5  ;;  %1935 = vmatprep.subr.bf16.mxu0 %v1693_v6  ;;  %v1757_v55 = vpack.c.bf16 %v1389_v50, %v1373_v49  ;;  %v1374_v58 = vld [vmem:[%s6645_s10 + $0xc10] sm:$0xff]  ;;  %v1759_v59 = vpack.c.bf16 %v1391_v52, %v1375_v51  ;;  %v1405_v61 = vld [vmem:[%s6645_s10 + $0xd08] sm:$0xff]  ;;  %v1407_v63 = vld [vmem:[%s6645_s10 + $0xd18] sm:$0xff]  ;;  %v1756_v1 = vpack.c.bf16 %v1388_v57, %v1372_v56 }
 0x13a   : > { %2061 = vmatprep.subr.bf16.mxu1 %v1695_v10  ;;  %v1390_v60 = vld [vmem:[%s6645_s10 + $0xc90] sm:$0xff]  ;;  %v1421_v62 = vld [vmem:[%s6645_s10 + $0xd88] sm:$0xff]  ;;  %v1423_v0 = vld [vmem:[%s6645_s10 + $0xd98] sm:$0xff] }
 0x13b   : > { %v1404_v2 = vld [vmem:[%s6645_s10 + $0xd00] sm:$0xff]  ;;  %v1758_v4 = vpack.c.bf16 %v1390_v60, %v1374_v58  ;;  %v1773_v5 = vpack.c.bf16 %v1421_v62, %v1405_v61  ;;  %v1406_v6 = vld [vmem:[%s6645_s10 + $0xd10] sm:$0xff]  ;;  %v1775_v7 = vpack.c.bf16 %v1423_v0, %v1407_v63  ;;  %v1437_v9 = vld [vmem:[%s6645_s10 + $0xe08] sm:$0xff] }
 0x13c   : > { %1936 = vmatpush1.bf16.msra.mxu0 %v1692_v16  ;;  %v1420_v3 = vld [vmem:[%s6645_s10 + $0xd80] sm:$0xff]  ;;  %v1422_v8 = vld [vmem:[%s6645_s10 + $0xd90] sm:$0xff]  ;;  %v1453_v10 = vld [vmem:[%s6645_s10 + $0xe88] sm:$0xff] }
 0x13d   : > { %2062 = vmatpush1.bf16.msra.mxu1 %v1694_v17  ;;  %1937 = vmatprep.subr.bf16.mxu0 %v1709_v18  ;;  %v1439_v11 = vld [vmem:[%s6645_s10 + $0xe18] sm:$0xff]  ;;  %v1772_v13 = vpack.c.bf16 %v1420_v3, %v1404_v2  ;;  %v1774_v14 = vpack.c.bf16 %v1422_v8, %v1406_v6  ;;  %v1789_v15 = vpack.c.bf16 %v1453_v10, %v1437_v9  ;;  %v1436_v16 = vld [vmem:[%s6645_s10 + $0xe00] sm:$0xff]  ;;  %v1438_v18 = vld [vmem:[%s6645_s10 + $0xe10] sm:$0xff] }
 0x13e   : > { %2063 = vmatprep.subr.bf16.mxu1 %v1711_v22  ;;  %v1455_v12 = vld [vmem:[%s6645_s10 + $0xe98] sm:$0xff]  ;;  %v1452_v17 = vld [vmem:[%s6645_s10 + $0xe80] sm:$0xff]  ;;  %v1454_v20 = vld [vmem:[%s6645_s10 + $0xe90] sm:$0xff] }
 0x13f   : > { %v1791_v19 = vpack.c.bf16 %v1455_v12, %v1439_v11  ;;  %v1469_v21 = vld [vmem:[%s6645_s10 + $0xf08] sm:$0xff]  ;;  %v1471_v23 = vld [vmem:[%s6645_s10 + $0xf18] sm:$0xff]  ;;  %v1788_v25 = vpack.c.bf16 %v1452_v17, %v1436_v16  ;;  %v1790_v26 = vpack.c.bf16 %v1454_v20, %v1438_v18  ;;  %v1486_v33 = vld [vmem:[%s6645_s10 + $0xf90] sm:$0xff] }
 0x140   : > { %1938 = vmatpush1.bf16.msra.mxu0 %v1708_v28  ;;  %v1485_v22 = vld [vmem:[%s6645_s10 + $0xf88] sm:$0xff]  ;;  %v1487_v24 = vld [vmem:[%s6645_s10 + $0xf98] sm:$0xff]  ;;  %v1468_v28 = vld [vmem:[%s6645_s10 + $0xf00] sm:$0xff] }
 0x141   : > { %2064 = vmatpush1.bf16.msra.mxu1 %v1710_v29  ;;  %1939 = vmatprep.subr.bf16.mxu0 %v1725_v30  ;;  %v1805_v27 = vpack.c.bf16 %v1485_v22, %v1469_v21  ;;  %v1484_v29 = vld [vmem:[%s6645_s10 + $0xf80] sm:$0xff]  ;;  %v1470_v30 = vld [vmem:[%s6645_s10 + $0xf10] sm:$0xff]  ;;  %v1807_v31 = vpack.c.bf16 %v1487_v24, %v1471_v23  ;;  %v1501_v34 = vld [vmem:[%s6645_s10 + $0x1008] sm:$0xff] }
 0x142   : > { %2065 = vmatprep.subr.bf16.mxu1 %v1727_v35  ;;  %v1517_v35 = vld [vmem:[%s6645_s10 + $0x1088] sm:$0xff]  ;;  %v1503_v36 = vld [vmem:[%s6645_s10 + $0x1018] sm:$0xff]  ;;  %v1804_v38 = vpack.c.bf16 %v1484_v29, %v1468_v28  ;;  %v1806_v39 = vpack.c.bf16 %v1486_v33, %v1470_v30  ;;  %v1518_v45 = vld [vmem:[%s6645_s10 + $0x1090] sm:$0xff] }
 0x143   : > { %v1519_v37 = vld [vmem:[%s6645_s10 + $0x1098] sm:$0xff]  ;;  %v1821_v40 = vpack.c.bf16 %v1517_v35, %v1501_v34  ;;  %v6786_v46 = vld [vmem:[%s9007_s1] ss:$12 sps:$4 sm:$0xff]   ;;  %v1534_v56 = vld [vmem:[%s6645_s10 + $0x1110] sm:$0xff] }
 0x144   : > { %1940 = vmatpush1.bf16.msra.mxu0 %v1724_v41  ;;  %v1500_v41 = vld [vmem:[%s6645_s10 + $0x1000] sm:$0xff]  ;;  %v1823_v44 = vpack.c.bf16 %v1519_v37, %v1503_v36  ;;  %v1549_v48 = vld [vmem:[%s6645_s10 + $0x1188] sm:$0xff]  ;;  %v1535_v51 = vld [vmem:[%s6645_s10 + $0x1118] sm:$0xff] }
 0x145   : > { %2066 = vmatpush1.bf16.msra.mxu1 %v1726_v42  ;;  %1941 = vmatprep.subr.bf16.mxu0 %v1741_v43  ;;  %v1516_v42 = vld [vmem:[%s6645_s10 + $0x1080] sm:$0xff]  ;;  %v1502_v43 = vld [vmem:[%s6645_s10 + $0x1010] sm:$0xff]  ;;  %v6793_v50 = vld [vmem:[%s9007_s1 + $0x1c] ss:$12 sps:$4 sm:$0xff]  }
 0x146   : > { %2067 = vmatprep.subr.bf16.mxu1 %v1743_v47  ;;  %v1533_v47 = vld [vmem:[%s6645_s10 + $0x1108] sm:$0xff]  ;;  %v1820_v49 = vpack.c.bf16 %v1516_v42, %v1500_v41  ;;  %v1551_v52 = vld [vmem:[%s6645_s10 + $0x1198] sm:$0xff]  ;;  %v1550_v58 = vld [vmem:[%s6645_s10 + $0x1190] sm:$0xff] }
 0x147   : > { %v1837_v57 = vpack.c.bf16 %v1549_v48, %v1533_v47  ;;  %v1009_v60 = vld [vmem:[%s6645_s10 + $0xa8] sm:$0xff]  ;;  %v1839_v61 = vpack.c.bf16 %v1551_v52, %v1535_v51  ;;  %v995_v62 = vld [vmem:[%s6645_s10 + $0x38] sm:$0xff]  ;;  %v992_v8 = vld [vmem:[%s6645_s10 + $0x20] sm:$0xff] }
 0x148   : > { %1942 = vmatpush1.bf16.msra.mxu0 %v1740_v53  ;;  %v1822_v53 = vpack.c.bf16 %v1518_v45, %v1502_v43  ;;  %v1011_v63 = vld [vmem:[%s6645_s10 + $0xb8] sm:$0xff]  ;;  %v1008_v9 = vld [vmem:[%s6645_s10 + $0xa0] sm:$0xff]  ;;  %v994_v10 = vld [vmem:[%s6645_s10 + $0x30] sm:$0xff] }
 0x149   : > { %2068 = vmatpush1.bf16.msra.mxu1 %v1742_v54  ;;  %1943 = vmatprep.subr.bf16.mxu0 %v1757_v55  ;;  %v1532_v54 = vld [vmem:[%s6645_s10 + $0x1100] sm:$0xff]  ;;  %v1571_v3 = vpack.c.bf16 %v1011_v63, %v995_v62  ;;  %v6826_v6 = vld [vmem:[%s9007_s1 + $0x30] ss:$12 sps:$4 sm:$0xff]   ;;  %v1025_v12 = vld [vmem:[%s6645_s10 + $0x128] sm:$0xff]  ;;  %v1568_v17 = vpack.c.bf16 %v1008_v9, %v992_v8 }
 0x14a   : > { %2069 = vmatprep.subr.bf16.mxu1 %v1759_v59  ;;  %v1548_v55 = vld [vmem:[%s6645_s10 + $0x1180] sm:$0xff]  ;;  %v993_v59 = vld [vmem:[%s6645_s10 + $0x28] sm:$0xff]  ;;  %v1010_v11 = vld [vmem:[%s6645_s10 + $0xb0] sm:$0xff] }
 0x14b   : > { %v1836_v0 = vpack.c.bf16 %v1548_v55, %v1532_v54  ;;  %v1569_v2 = vpack.c.bf16 %v1009_v60, %v993_v59  ;;  %v1043_v16 = vld [vmem:[%s6645_s10 + $0x1b8] sm:$0xff]  ;;  %v1570_v18 = vpack.c.bf16 %v1010_v11, %v994_v10  ;;  %v1024_v20 = vld [vmem:[%s6645_s10 + $0x120] sm:$0xff]  ;;  %v1026_v22 = vld [vmem:[%s6645_s10 + $0x130] sm:$0xff] }
 0x14c   : > { %1944 = vmatpush1.bf16.msra.mxu0 %v1756_v1  ;;  %v1838_v1 = vpack.c.bf16 %v1550_v58, %v1534_v56  ;;  %v1040_v21 = vld [vmem:[%s6645_s10 + $0x1a0] sm:$0xff]  ;;  %v1042_v24 = vld [vmem:[%s6645_s10 + $0x1b0] sm:$0xff]  ;;  %v1075_v28 = vld [vmem:[%s6645_s10 + $0x2b8] sm:$0xff] }
 0x14d   : > { %2070 = vmatpush1.bf16.msra.mxu1 %v1758_v4  ;;  %1945 = vmatprep.subr.bf16.mxu0 %v1773_v5  ;;  %v6812_v4 = vld [vmem:[%s9007_s1 + $0x18] ss:$12 sps:$4 sm:$0xff]   ;;  %v6817_v5 = vld [vmem:[%s9007_s1 + $0x34] ss:$12 sps:$4 sm:$0xff]   ;;  %v1584_v29 = vpack.c.bf16 %v1040_v21, %v1024_v20  ;;  %v1586_v30 = vpack.c.bf16 %v1042_v24, %v1026_v22  ;;  %v1137_v54 = vld [vmem:[%s6645_s10 + $0x4a8] sm:$0xff] }
 0x14e   : > { %2071 = vmatprep.subr.bf16.mxu1 %v1775_v7  ;;  %v5600_v7 = vmov 0   ;;  %v1056_v33 = vld [vmem:[%s6645_s10 + $0x220] sm:$0xff]  ;;  %v1058_v35 = vld [vmem:[%s6645_s10 + $0x230] sm:$0xff]  ;;  %v1091_v41 = vld [vmem:[%s6645_s10 + $0x338] sm:$0xff] }
 0x14f   : > { %v1072_v34 = vld [vmem:[%s6645_s10 + $0x2a0] sm:$0xff]  ;;  %v1074_v37 = vld [vmem:[%s6645_s10 + $0x2b0] sm:$0xff]  ;;  %v1107_v42 = vld [vmem:[%s6645_s10 + $0x3b8] sm:$0xff] }
 0x150   : > { %1946 = vmatpush1.bf16.msra.mxu0 %v1772_v13  ;;  %v1041_v13 = vld [vmem:[%s6645_s10 + $0x1a8] sm:$0xff]  ;;  %v1600_v43 = vpack.c.bf16 %v1072_v34, %v1056_v33  ;;  %v1088_v47 = vld [vmem:[%s6645_s10 + $0x320] sm:$0xff]  ;;  %v1619_v51 = vpack.c.bf16 %v1107_v42, %v1091_v41  ;;  %v1106_v52 = vld [vmem:[%s6645_s10 + $0x3b0] sm:$0xff] }
 0x151   : > { %2072 = vmatpush1.bf16.msra.mxu1 %v1774_v14  ;;  %1947 = vmatprep.subr.bf16.mxu0 %v1789_v15  ;;  %v6841_v14 = vld [vmem:[%s9007_s1 + $0x8] ss:$12 sps:$4 sm:$0xff]   ;;  %v1027_v15 = vld [vmem:[%s6645_s10 + $0x138] sm:$0xff]  ;;  %v1104_v48 = vld [vmem:[%s6645_s10 + $0x3a0] sm:$0xff] }
 0x152   : > { %2073 = vmatprep.subr.bf16.mxu1 %v1791_v19  ;;  %v1585_v19 = vpack.c.bf16 %v1041_v13, %v1025_v12  ;;  %v1587_v23 = vpack.c.bf16 %v1043_v16, %v1027_v15  ;;  %v1123_v55 = vld [vmem:[%s6645_s10 + $0x438] sm:$0xff]  ;;  %v1120_v60 = vld [vmem:[%s6645_s10 + $0x420] sm:$0xff]  ;;  %v1122_v62 = vld [vmem:[%s6645_s10 + $0x430] sm:$0xff] }
 0x153   : > { %v1139_v56 = vld [vmem:[%s6645_s10 + $0x4b8] sm:$0xff]  ;;  %v1152_v13 = vld [vmem:[%s6645_s10 + $0x520] sm:$0xff]  ;;  %v1154_v16 = vld [vmem:[%s6645_s10 + $0x530] sm:$0xff] }
 0x154   : > { %1948 = vmatpush1.bf16.msra.mxu0 %v1788_v25  ;;  %v1057_v25 = vld [vmem:[%s6645_s10 + $0x228] sm:$0xff]  ;;  %v1635_v63 = vpack.c.bf16 %v1139_v56, %v1123_v55  ;;  %v1155_v8 = vld [vmem:[%s6645_s10 + $0x538] sm:$0xff]  ;;  %v1168_v15 = vld [vmem:[%s6645_s10 + $0x5a0] sm:$0xff] }
 0x155   : > { %2074 = vmatpush1.bf16.msra.mxu1 %v1790_v26  ;;  %1949 = vmatprep.subr.bf16.mxu0 %v1805_v27  ;;  %v1073_v26 = vld [vmem:[%s6645_s10 + $0x2a8] sm:$0xff]  ;;  %v1059_v27 = vld [vmem:[%s6645_s10 + $0x238] sm:$0xff]  ;;  %v1232_v41 = vld [vmem:[%s6645_s10 + $0x7a0] sm:$0xff] }
 0x156   : > { %2075 = vmatprep.subr.bf16.mxu1 %v1807_v31  ;;  %v1601_v31 = vpack.c.bf16 %v1073_v26, %v1057_v25  ;;  %v1603_v36 = vpack.c.bf16 %v1075_v28, %v1059_v27  ;;  %v1171_v9 = vld [vmem:[%s6645_s10 + $0x5b8] sm:$0xff]  ;;  %v1201_v20 = vld [vmem:[%s6645_s10 + $0x6a8] sm:$0xff]  ;;  %v1184_v26 = vld [vmem:[%s6645_s10 + $0x620] sm:$0xff] }
 0x157   : > { %v1187_v21 = vld [vmem:[%s6645_s10 + $0x638] sm:$0xff]  ;;  %v1200_v27 = vld [vmem:[%s6645_s10 + $0x6a0] sm:$0xff]  ;;  %v1186_v28 = vld [vmem:[%s6645_s10 + $0x630] sm:$0xff] }
 0x158   : > { %1950 = vmatpush1.bf16.msra.mxu0 %v1804_v38  ;;  %v1089_v38 = vld [vmem:[%s6645_s10 + $0x328] sm:$0xff]  ;;  %v1203_v22 = vld [vmem:[%s6645_s10 + $0x6b8] sm:$0xff]  ;;  %v1218_v42 = vld [vmem:[%s6645_s10 + $0x730] sm:$0xff] }
 0x159   : > { %2076 = vmatpush1.bf16.msra.mxu1 %v1806_v39  ;;  %1982 = vmatprep.subr.bf16.mxu0 %v1821_v40  ;;  %v1105_v39 = vld [vmem:[%s6645_s10 + $0x3a8] sm:$0xff]  ;;  %v1219_v34 = vld [vmem:[%s6645_s10 + $0x738] sm:$0xff]  ;;  %v1250_v55 = vld [vmem:[%s6645_s10 + $0x830] sm:$0xff] }
 0x15a   : > { %2108 = vmatprep.subr.bf16.mxu1 %v1823_v44  ;;  %v6868_v40 = vld [vmem:[%s9007_s1 + $0x20] ss:$12 sps:$4 sm:$0xff]   ;;  %v1602_v44 = vpack.c.bf16 %v1074_v37, %v1058_v35  ;;  %v1617_v45 = vpack.c.bf16 %v1105_v39, %v1089_v38  ;;  %v1235_v35 = vld [vmem:[%s6645_s10 + $0x7b8] sm:$0xff] }
 0x15b   : > { %1952 = vmatmul.mubr.bf16.vlgmr.msra.gmra.mrb[0].mxu0 %v6786_v46  ;;  %v1233_v33 = vld [vmem:[%s6645_s10 + $0x7a8] sm:$0xff]  ;;  %v1216_v39 = vld [vmem:[%s6645_s10 + $0x720] sm:$0xff] }
 0x15c   : > { %2078 = vmatmul.mubr.bf16.vlgmr.msra.gmra.mrb[0].mxu1 %v6786_v46  ;;  %1983 = vmatpush1.bf16.msra.mxu0 %v1820_v49  ;;  %v1090_v49 = vld [vmem:[%s6645_s10 + $0x330] sm:$0xff] }
 0x15d   : > { %2109 = vmatpush1.bf16.msra.mxu1 %v1822_v53  ;;  %1961 = vmatprep.mubr.bf16.mxu0 %v6793_v50  ;;  %v1121_v53 = vld [vmem:[%s6645_s10 + $0x428] sm:$0xff]  ;;  %v1618_v58 = vpack.c.bf16 %v1106_v52, %v1090_v49  ;;  %v1680_v49 = vpack.c.bf16 %v1232_v41, %v1216_v39  ;;  %v1379_v39 = vld [vmem:[%s6645_s10 + $0xc38] sm:$0xff] }
 0x15e   : > { %2087 = vmatprep.mubr.bf16.mxu1 %v6793_v50  ;;  %1984 = vmatprep.subr.bf16.mxu0 %v1837_v57  ;;  %v1616_v57 = vpack.c.bf16 %v1104_v48, %v1088_v47  ;;  %v1633_v59 = vpack.c.bf16 %v1137_v54, %v1121_v53  ;;  %v1251_v47 = vld [vmem:[%s6645_s10 + $0x838] sm:$0xff]  ;;  %v1248_v53 = vld [vmem:[%s6645_s10 + $0x820] sm:$0xff] }
 0x15f   : > { %2110 = vmatprep.subr.bf16.mxu1 %v1839_v61  ;;  %v1136_v61 = vld [vmem:[%s6645_s10 + $0x4a0] sm:$0xff]  ;;  %v1267_v48 = vld [vmem:[%s6645_s10 + $0x8b8] sm:$0xff] }
 0x160   : > { %1985 = vmatpush1.bf16.msra.mxu0 %v1836_v0  ;;  %v1138_v0 = vld [vmem:[%s6645_s10 + $0x4b0] sm:$0xff]  ;;  %v1632_v10 = vpack.c.bf16 %v1136_v61, %v1120_v60  ;;  %v1264_v54 = vld [vmem:[%s6645_s10 + $0x8a0] sm:$0xff]  ;;  %v1699_v56 = vpack.c.bf16 %v1267_v48, %v1251_v47  ;;  %v1283_v60 = vld [vmem:[%s6645_s10 + $0x938] sm:$0xff] }
 0x161   : > { %2111 = vmatpush1.bf16.msra.mxu1 %v1838_v1  ;;  %2171 = vmatprep.subr.bf16.mxu0 %v1569_v2  ;;  %v1153_v1 = vld [vmem:[%s6645_s10 + $0x528] sm:$0xff]  ;;  %v1634_v11 = vpack.c.bf16 %v1138_v0, %v1122_v62  ;;  %v1299_v61 = vld [vmem:[%s6645_s10 + $0x9b8] sm:$0xff]  ;;  %v1696_v62 = vpack.c.bf16 %v1264_v54, %v1248_v53  ;;  %v1378_v47 = vld [vmem:[%s6645_s10 + $0xc30] sm:$0xff] }
 0x162   : > { %2297 = vmatprep.subr.bf16.mxu1 %v1571_v3  ;;  %v1169_v2 = vld [vmem:[%s6645_s10 + $0x5a8] sm:$0xff]  ;;  %v6895_v3 = vld [vmem:[%s9007_s1 + $0x38] ss:$12 sps:$4 sm:$0xff]  }
 0x163   : > { %1962 = vmatmul.mubr.bf16.gmra.mrb[4].mxu0 %v6812_v4  ;;  %v1649_v12 = vpack.c.bf16 %v1169_v2, %v1153_v1  ;;  %v1280_v1 = vld [vmem:[%s6645_s10 + $0x920] sm:$0xff]  ;;  %v1395_v41 = vld [vmem:[%s6645_s10 + $0xcb8] sm:$0xff] }
 0x164   : > { %2088 = vmatmul.mubr.bf16.gmra.mrb[4].mxu1 %v6812_v4  ;;  %1971 = vmatprep.mubr.bf16.mxu0 %v6817_v5  ;;  %v1296_v2 = vld [vmem:[%s6645_s10 + $0x9a0] sm:$0xff]  ;;  %v1763_v48 = vpack.c.bf16 %v1395_v41, %v1379_v39  ;;  %v1411_v53 = vld [vmem:[%s6645_s10 + $0xd38] sm:$0xff]  ;;  %v1506_v41 = vld [vmem:[%s6645_s10 + $0x1030] sm:$0xff] }
 0x165   : > { %2097 = vmatprep.mubr.bf16.mxu1 %v6817_v5  ;;  %v1427_v54 = vld [vmem:[%s6645_s10 + $0xdb8] sm:$0xff] }
 0x16b   : > { %1972 = vmatmul.mubr.bf16.gmra.mrb[8].mxu0 %v6826_v6 }
 0x16c   : > { %2098 = vmatmul.mubr.bf16.gmra.mrb[8].mxu1 %v6826_v6  ;;  %2014 = vmatprep.mubr.bf16.mxu0 %v5600_v7 }
 0x16d   : > { %2140 = vmatprep.mubr.bf16.mxu1 %v5600_v7 }
 0x173   : > { %4716 = vmatmul.mubr.msk.bf16.vlgmr.msra.gmra.mrb[0].mxu0 %vm1909_vm0, %v6841_v14 }
 0x174   : > { %4719 = vmatmul.mubr.msk.bf16.vlgmr.msra.gmra.mrb[0].mxu1 %vm1909_vm0, %v6841_v14  ;;  %2172 = vmatpush1.bf16.msra.mxu0 %v1568_v17  ;;  %v1651_v17 = vpack.c.bf16 %v1171_v9, %v1155_v8  ;;  %v1282_v8 = vld [vmem:[%s6645_s10 + $0x930] sm:$0xff]  ;;  %v1715_v9 = vpack.c.bf16 %v1299_v61, %v1283_v60  ;;  %v1779_v61 = vpack.c.bf16 %v1427_v54, %v1411_v53 }
 0x175   : > { %2298 = vmatpush1.bf16.msra.mxu1 %v1570_v18  ;;  %2173 = vmatprep.subr.bf16.mxu0 %v1585_v19  ;;  %v1170_v18 = vld [vmem:[%s6645_s10 + $0x5b0] sm:$0xff]  ;;  %v1185_v19 = vld [vmem:[%s6645_s10 + $0x628] sm:$0xff] }
 0x176   : > { %2299 = vmatprep.subr.bf16.mxu1 %v1587_v23  ;;  %2024 = vmatprep.mubr.bf16.mxu0 %v5600_v7  ;;  %v1648_v23 = vpack.c.bf16 %v1168_v15, %v1152_v13  ;;  %v1650_v24 = vpack.c.bf16 %v1170_v18, %v1154_v16  ;;  %v1665_v25 = vpack.c.bf16 %v1201_v20, %v1185_v19  ;;  %v1315_v13 = vld [vmem:[%s6645_s10 + $0xa38] sm:$0xff]  ;;  %v1312_v19 = vld [vmem:[%s6645_s10 + $0xa20] sm:$0xff]  ;;  %v1410_v60 = vld [vmem:[%s6645_s10 + $0xd30] sm:$0xff] }
 0x177   : > { %2150 = vmatprep.mubr.bf16.mxu1 %v5600_v7  ;;  %v1331_v15 = vld [vmem:[%s6645_s10 + $0xab8] sm:$0xff]  ;;  %v1712_v16 = vpack.c.bf16 %v1296_v2, %v1280_v1  ;;  %v1328_v20 = vld [vmem:[%s6645_s10 + $0xaa0] sm:$0xff]  ;;  %v1554_v54 = vld [vmem:[%s6645_s10 + $0x11b0] sm:$0xff] }
 0x178   : > { %2174 = vmatpush1.bf16.msra.mxu0 %v1584_v29  ;;  %v1667_v29 = vpack.c.bf16 %v1203_v22, %v1187_v21  ;;  %v1314_v21 = vld [vmem:[%s6645_s10 + $0xa30] sm:$0xff]  ;;  %v1731_v22 = vpack.c.bf16 %v1331_v15, %v1315_v13  ;;  %v1443_v1 = vld [vmem:[%s6645_s10 + $0xe38] sm:$0xff] }
 0x179   : > { %2300 = vmatpush1.bf16.msra.mxu1 %v1586_v30  ;;  %2175 = vmatprep.subr.bf16.mxu0 %v1601_v31  ;;  %v1202_v30 = vld [vmem:[%s6645_s10 + $0x6b0] sm:$0xff]  ;;  %v1217_v31 = vld [vmem:[%s6645_s10 + $0x728] sm:$0xff]  ;;  %v1459_v2 = vld [vmem:[%s6645_s10 + $0xeb8] sm:$0xff] }
 0x17a   : > { %2301 = vmatprep.subr.bf16.mxu1 %v1603_v36  ;;  %v1664_v36 = vpack.c.bf16 %v1200_v27, %v1184_v26  ;;  %v1666_v37 = vpack.c.bf16 %v1202_v30, %v1186_v28  ;;  %v1681_v38 = vpack.c.bf16 %v1233_v33, %v1217_v31  ;;  %v1347_v26 = vld [vmem:[%s6645_s10 + $0xb38] sm:$0xff]  ;;  %v1728_v28 = vpack.c.bf16 %v1328_v20, %v1312_v19  ;;  %v1344_v31 = vld [vmem:[%s6645_s10 + $0xb20] sm:$0xff]  ;;  %v1442_v13 = vld [vmem:[%s6645_s10 + $0xe30] sm:$0xff] }
 0x17b   : > { %4717 = vmatmul.mubr.msk.bf16.gmra.mrb[4].mxu0 %vm1909_vm0, %v6868_v40  ;;  %v1363_v27 = vld [vmem:[%s6645_s10 + $0xbb8] sm:$0xff]  ;;  %v1360_v33 = vld [vmem:[%s6645_s10 + $0xba0] sm:$0xff]  ;;  %v1795_v15 = vpack.c.bf16 %v1459_v2, %v1443_v1  ;;  %v1045_v1 = vld [vmem:[%s6645_s10 + $0x1c8] sm:$0xff] }
 0x17c   : > { %4720 = vmatmul.mubr.msk.bf16.gmra.mrb[4].mxu1 %vm1909_vm0, %v6868_v40  ;;  %2176 = vmatpush1.bf16.msra.mxu0 %v1600_v43  ;;  %v1683_v43 = vpack.c.bf16 %v1235_v35, %v1219_v34  ;;  %v1346_v34 = vld [vmem:[%s6645_s10 + $0xb30] sm:$0xff]  ;;  %v1747_v35 = vpack.c.bf16 %v1363_v27, %v1347_v26  ;;  %v1475_v19 = vld [vmem:[%s6645_s10 + $0xf38] sm:$0xff] }
 0x17d   : > { %2302 = vmatpush1.bf16.msra.mxu1 %v1602_v44  ;;  %2177 = vmatprep.subr.bf16.mxu0 %v1617_v45  ;;  %v1234_v44 = vld [vmem:[%s6645_s10 + $0x7b0] sm:$0xff]  ;;  %v1249_v45 = vld [vmem:[%s6645_s10 + $0x828] sm:$0xff]  ;;  %v1491_v20 = vld [vmem:[%s6645_s10 + $0xfb8] sm:$0xff] }
 0x17e   : > { %2303 = vmatprep.subr.bf16.mxu1 %v1619_v51  ;;  %2034 = vmatprep.mubr.bf16.mxu0 %v5600_v7  ;;  %v1682_v51 = vpack.c.bf16 %v1234_v44, %v1218_v42  ;;  %v1744_v42 = vpack.c.bf16 %v1360_v33, %v1344_v31  ;;  %v1474_v26 = vld [vmem:[%s6645_s10 + $0xf30] sm:$0xff]  ;;  %v1811_v27 = vpack.c.bf16 %v1491_v20, %v1475_v19  ;;  %v1507_v31 = vld [vmem:[%s6645_s10 + $0x1038] sm:$0xff] }
 0x17f   : > { %2160 = vmatprep.mubr.bf16.mxu1 %v5600_v7  ;;  %v1523_v33 = vld [vmem:[%s6645_s10 + $0x10b8] sm:$0xff] }
 0x180   : > { %2178 = vmatpush1.bf16.msra.mxu0 %v1616_v57  ;;  %v1266_v57 = vld [vmem:[%s6645_s10 + $0x8b0] sm:$0xff]  ;;  %v1827_v39 = vpack.c.bf16 %v1523_v33, %v1507_v31  ;;  %v1031_v2 = vld [vmem:[%s6645_s10 + $0x158] sm:$0xff] }
 0x181   : > { %2304 = vmatpush1.bf16.msra.mxu1 %v1618_v58  ;;  %2179 = vmatprep.subr.bf16.mxu0 %v1633_v59  ;;  %v1281_v58 = vld [vmem:[%s6645_s10 + $0x928] sm:$0xff]  ;;  %v1063_v19 = vld [vmem:[%s6645_s10 + $0x258] sm:$0xff] }
 0x182   : > { %2305 = vmatprep.subr.bf16.mxu1 %v1635_v63  ;;  %v1297_v59 = vld [vmem:[%s6645_s10 + $0x9a8] sm:$0xff]  ;;  %v1698_v63 = vpack.c.bf16 %v1266_v57, %v1250_v55  ;;  %v1079_v20 = vld [vmem:[%s6645_s10 + $0x2d8] sm:$0xff] }
 0x183   : > { %4718 = vmatmul.mubr.msk.bf16.gmra.mrb[8].mxu0 %vm1909_vm0, %v6895_v3  ;;  %v1713_v0 = vpack.c.bf16 %v1297_v59, %v1281_v58  ;;  %v1408_v58 = vld [vmem:[%s6645_s10 + $0xd20] sm:$0xff]  ;;  %v1111_v31 = vld [vmem:[%s6645_s10 + $0x3d8] sm:$0xff] }
 0x184   : > { %4721 = vmatmul.mubr.msk.bf16.gmra.mrb[8].mxu1 %vm1909_vm0, %v6895_v3  ;;  %2180 = vmatpush1.bf16.msra.mxu0 %v1632_v10  ;;  %v1298_v10 = vld [vmem:[%s6645_s10 + $0x9b0] sm:$0xff]  ;;  %v1424_v59 = vld [vmem:[%s6645_s10 + $0xda0] sm:$0xff] }
 0x185   : > { %2306 = vmatpush1.bf16.msra.mxu1 %v1634_v11  ;;  %2181 = vmatprep.subr.bf16.mxu0 %v1649_v12  ;;  %v1313_v11 = vld [vmem:[%s6645_s10 + $0xa28] sm:$0xff] }
 0x186   : > { %2307 = vmatprep.subr.bf16.mxu1 %v1651_v17  ;;  %2203 = vmatprep.mubr.bf16.mxu0 %v6639_v32  ;;  %v1329_v12 = vld [vmem:[%s6645_s10 + $0xaa8] sm:$0xff]  ;;  %v1714_v17 = vpack.c.bf16 %v1298_v10, %v1282_v8  ;;  %v1776_v8 = vpack.c.bf16 %v1424_v59, %v1408_v58  ;;  %v999_v58 = vld [vmem:[%s6645_s10 + $0x58] sm:$0xff] }
 0x187   : > { %2329 = vmatprep.mubr.bf16.mxu1 %v6639_v32  ;;  %v1265_v32 = vld [vmem:[%s6645_s10 + $0x8a8] sm:$0xff]  ;;  %v1729_v18 = vpack.c.bf16 %v1329_v12, %v1313_v11  ;;  %v1440_v11 = vld [vmem:[%s6645_s10 + $0xe20] sm:$0xff]  ;;  %v1015_v59 = vld [vmem:[%s6645_s10 + $0xd8] sm:$0xff] }
 0x188   : > { %2182 = vmatpush1.bf16.msra.mxu0 %v1648_v23  ;;  %v1697_v52 = vpack.c.bf16 %v1265_v32, %v1249_v45  ;;  %v1330_v23 = vld [vmem:[%s6645_s10 + $0xab0] sm:$0xff]  ;;  %v1376_v45 = vld [vmem:[%s6645_s10 + $0xc20] sm:$0xff] }
 0x189   : > { %2308 = vmatpush1.bf16.msra.mxu1 %v1650_v24  ;;  %2183 = vmatprep.subr.bf16.mxu0 %v1665_v25  ;;  %v1345_v24 = vld [vmem:[%s6645_s10 + $0xb28] sm:$0xff]  ;;  %v1392_v32 = vld [vmem:[%s6645_s10 + $0xca0] sm:$0xff] }
 0x18a   : > { %2309 = vmatprep.subr.bf16.mxu1 %v1667_v29  ;;  %v1361_v25 = vld [vmem:[%s6645_s10 + $0xba8] sm:$0xff]  ;;  %v1730_v29 = vpack.c.bf16 %v1330_v23, %v1314_v21  ;;  %v1760_v55 = vpack.c.bf16 %v1392_v32, %v1376_v45  ;;  %v1456_v12 = vld [vmem:[%s6645_s10 + $0xea0] sm:$0xff]  ;;  %v1539_v32 = vld [vmem:[%s6645_s10 + $0x1138] sm:$0xff] }
 0x18b   : > { %v1745_v30 = vpack.c.bf16 %v1361_v25, %v1345_v24  ;;  %v1792_v21 = vpack.c.bf16 %v1456_v12, %v1440_v11  ;;  %v1472_v24 = vld [vmem:[%s6645_s10 + $0xf20] sm:$0xff] }
 0x18c   : > { %2184 = vmatpush1.bf16.msra.mxu0 %v1664_v36  ;;  %v1362_v36 = vld [vmem:[%s6645_s10 + $0xbb0] sm:$0xff]  ;;  %v1488_v25 = vld [vmem:[%s6645_s10 + $0xfa0] sm:$0xff] }
 0x18d   : > { %2310 = vmatpush1.bf16.msra.mxu1 %v1666_v37  ;;  %2185 = vmatprep.subr.bf16.mxu0 %v1681_v38  ;;  %v1377_v37 = vld [vmem:[%s6645_s10 + $0xc28] sm:$0xff]  ;;  %v1028_v11 = vld [vmem:[%s6645_s10 + $0x140] sm:$0xff] }
 0x18e   : > { %2311 = vmatprep.subr.bf16.mxu1 %v1683_v43  ;;  %v1393_v38 = vld [vmem:[%s6645_s10 + $0xca8] sm:$0xff]  ;;  %v1746_v43 = vpack.c.bf16 %v1362_v36, %v1346_v34  ;;  %v1808_v34 = vpack.c.bf16 %v1488_v25, %v1472_v24  ;;  %v1044_v12 = vld [vmem:[%s6645_s10 + $0x1c0] sm:$0xff] }
 0x18f   : > { %v1761_v44 = vpack.c.bf16 %v1393_v38, %v1377_v37  ;;  %v1504_v37 = vld [vmem:[%s6645_s10 + $0x1020] sm:$0xff] }
 0x190   : > { %2186 = vmatpush1.bf16.msra.mxu0 %v1680_v49  ;;  %v1394_v49 = vld [vmem:[%s6645_s10 + $0xcb0] sm:$0xff]  ;;  %v1520_v38 = vld [vmem:[%s6645_s10 + $0x10a0] sm:$0xff] }
 0x191   : > { %2312 = vmatpush1.bf16.msra.mxu1 %v1682_v51  ;;  %2187 = vmatprep.subr.bf16.mxu0 %v1697_v52  ;;  %v1409_v51 = vld [vmem:[%s6645_s10 + $0xd28] sm:$0xff]  ;;  %v1824_v45 = vpack.c.bf16 %v1520_v38, %v1504_v37  ;;  %v1060_v24 = vld [vmem:[%s6645_s10 + $0x240] sm:$0xff]  ;;  %v1094_v38 = vld [vmem:[%s6645_s10 + $0x350] sm:$0xff] }
 0x192   : > { %2313 = vmatprep.subr.bf16.mxu1 %v1699_v56  ;;  %v1425_v52 = vld [vmem:[%s6645_s10 + $0xda8] sm:$0xff]  ;;  %v1762_v56 = vpack.c.bf16 %v1394_v49, %v1378_v47  ;;  %v1555_v47 = vld [vmem:[%s6645_s10 + $0x11b8] sm:$0xff]  ;;  %v1536_v49 = vld [vmem:[%s6645_s10 + $0x1120] sm:$0xff] }
 0x193   : > { %v1777_v57 = vpack.c.bf16 %v1425_v52, %v1409_v51  ;;  %v1552_v51 = vld [vmem:[%s6645_s10 + $0x11a0] sm:$0xff]  ;;  %v1538_v52 = vld [vmem:[%s6645_s10 + $0x1130] sm:$0xff] }
 0x194   : > { %2188 = vmatpush1.bf16.msra.mxu0 %v1696_v62  ;;  %v1426_v62 = vld [vmem:[%s6645_s10 + $0xdb0] sm:$0xff]  ;;  %v1076_v25 = vld [vmem:[%s6645_s10 + $0x2c0] sm:$0xff] }
 0x195   : > { %2314 = vmatpush1.bf16.msra.mxu1 %v1698_v63  ;;  %2189 = vmatprep.subr.bf16.mxu0 %v1713_v0  ;;  %v1441_v63 = vld [vmem:[%s6645_s10 + $0xe28] sm:$0xff]  ;;  %v1604_v33 = vpack.c.bf16 %v1076_v25, %v1060_v24  ;;  %v1108_v37 = vld [vmem:[%s6645_s10 + $0x3c0] sm:$0xff]  ;;  %v1222_v24 = vld [vmem:[%s6645_s10 + $0x750] sm:$0xff] }
 0x196   : > { %2315 = vmatprep.subr.bf16.mxu1 %v1715_v9  ;;  %v1457_v0 = vld [vmem:[%s6645_s10 + $0xea8] sm:$0xff]  ;;  %v1778_v9 = vpack.c.bf16 %v1426_v62, %v1410_v60  ;;  %v1840_v60 = vpack.c.bf16 %v1552_v51, %v1536_v49  ;;  %v1124_v49 = vld [vmem:[%s6645_s10 + $0x440] sm:$0xff] }
 0x197   : > { %v1793_v10 = vpack.c.bf16 %v1457_v0, %v1441_v63  ;;  %v1575_v63 = vpack.c.bf16 %v1015_v59, %v999_v58  ;;  %v1014_v0 = vld [vmem:[%s6645_s10 + $0xd0] sm:$0xff]  ;;  %v1140_v51 = vld [vmem:[%s6645_s10 + $0x4c0] sm:$0xff] }
 0x198   : > { %2190 = vmatpush1.bf16.msra.mxu0 %v1712_v16  ;;  %v1458_v16 = vld [vmem:[%s6645_s10 + $0xeb0] sm:$0xff]  ;;  %v1636_v58 = vpack.c.bf16 %v1140_v51, %v1124_v49 }
 0x199   : > { %2316 = vmatpush1.bf16.msra.mxu1 %v1714_v17  ;;  %2191 = vmatprep.subr.bf16.mxu0 %v1729_v18  ;;  %v1473_v17 = vld [vmem:[%s6645_s10 + $0xf28] sm:$0xff]  ;;  %v1286_v49 = vld [vmem:[%s6645_s10 + $0x950] sm:$0xff] }
 0x19a   : > { %2317 = vmatprep.subr.bf16.mxu1 %v1731_v22  ;;  %v1489_v18 = vld [vmem:[%s6645_s10 + $0xfa8] sm:$0xff]  ;;  %v1794_v22 = vpack.c.bf16 %v1458_v16, %v1442_v13  ;;  %v1030_v13 = vld [vmem:[%s6645_s10 + $0x150] sm:$0xff] }
 0x19b   : > { %v1809_v23 = vpack.c.bf16 %v1489_v18, %v1473_v17  ;;  %v1046_v16 = vld [vmem:[%s6645_s10 + $0x1d0] sm:$0xff]  ;;  %v1061_v17 = vld [vmem:[%s6645_s10 + $0x248] sm:$0xff] }
 0x19c   : > { %2192 = vmatpush1.bf16.msra.mxu0 %v1728_v28  ;;  %v1490_v28 = vld [vmem:[%s6645_s10 + $0xfb0] sm:$0xff]  ;;  %v1077_v18 = vld [vmem:[%s6645_s10 + $0x2c8] sm:$0xff] }
 0x19d   : > { %2318 = vmatpush1.bf16.msra.mxu1 %v1730_v29  ;;  %2193 = vmatprep.subr.bf16.mxu0 %v1745_v30  ;;  %v1505_v29 = vld [vmem:[%s6645_s10 + $0x1028] sm:$0xff] }
 0x19e   : > { %2319 = vmatprep.subr.bf16.mxu1 %v1747_v35  ;;  %v1521_v30 = vld [vmem:[%s6645_s10 + $0x10a8] sm:$0xff]  ;;  %v1810_v35 = vpack.c.bf16 %v1490_v28, %v1474_v26  ;;  %v1062_v26 = vld [vmem:[%s6645_s10 + $0x250] sm:$0xff] }
 0x19f   : > { %v1825_v36 = vpack.c.bf16 %v1521_v30, %v1505_v29  ;;  %v1078_v28 = vld [vmem:[%s6645_s10 + $0x2d0] sm:$0xff]  ;;  %v1109_v29 = vld [vmem:[%s6645_s10 + $0x3c8] sm:$0xff]  ;;  %v1095_v30 = vld [vmem:[%s6645_s10 + $0x358] sm:$0xff] }
 0x1a0   : > { %2194 = vmatpush1.bf16.msra.mxu0 %v1744_v42  ;;  %v1522_v42 = vld [vmem:[%s6645_s10 + $0x10b0] sm:$0xff] }
 0x1a1   : > { %2320 = vmatpush1.bf16.msra.mxu1 %v1746_v43  ;;  %2195 = vmatprep.subr.bf16.mxu0 %v1761_v44  ;;  %v1537_v43 = vld [vmem:[%s6645_s10 + $0x1128] sm:$0xff] }
 0x1a2   : > { %2321 = vmatprep.subr.bf16.mxu1 %v1763_v48  ;;  %v1553_v44 = vld [vmem:[%s6645_s10 + $0x11a8] sm:$0xff]  ;;  %v1826_v48 = vpack.c.bf16 %v1522_v42, %v1506_v41  ;;  %v1110_v41 = vld [vmem:[%s6645_s10 + $0x3d0] sm:$0xff] }
 0x1a3   : > { %v1841_v53 = vpack.c.bf16 %v1553_v44, %v1537_v43  ;;  %v1125_v42 = vld [vmem:[%s6645_s10 + $0x448] sm:$0xff]  ;;  %v1127_v44 = vld [vmem:[%s6645_s10 + $0x458] sm:$0xff] }
 0x1a4   : > { %2196 = vmatpush1.bf16.msra.mxu0 %v1760_v55  ;;  %v997_v55 = vld [vmem:[%s6645_s10 + $0x48] sm:$0xff] }
 0x1a5   : > { %2322 = vmatpush1.bf16.msra.mxu1 %v1762_v56  ;;  %2197 = vmatprep.subr.bf16.mxu0 %v1777_v57  ;;  %v1013_v56 = vld [vmem:[%s6645_s10 + $0xc8] sm:$0xff]  ;;  %v1843_v57 = vpack.c.bf16 %v1555_v47, %v1539_v32  ;;  %v1622_v47 = vpack.c.bf16 %v1110_v41, %v1094_v38  ;;  %v1270_v38 = vld [vmem:[%s6645_s10 + $0x8d0] sm:$0xff] }
 0x1a6   : > { %2323 = vmatprep.subr.bf16.mxu1 %v1779_v61  ;;  %v1842_v61 = vpack.c.bf16 %v1554_v54, %v1538_v52  ;;  %v1573_v62 = vpack.c.bf16 %v1013_v56, %v997_v55  ;;  %v1141_v43 = vld [vmem:[%s6645_s10 + $0x4c8] sm:$0xff]  ;;  %v1126_v52 = vld [vmem:[%s6645_s10 + $0x450] sm:$0xff]  ;;  %v1159_v56 = vld [vmem:[%s6645_s10 + $0x558] sm:$0xff] }
 0x1a7   : > { %v1142_v54 = vld [vmem:[%s6645_s10 + $0x4d0] sm:$0xff]  ;;  %v1173_v55 = vld [vmem:[%s6645_s10 + $0x5c8] sm:$0xff] }
 0x1a8   : > { %2198 = vmatpush1.bf16.msra.mxu0 %v1776_v8  ;;  %v1047_v8 = vld [vmem:[%s6645_s10 + $0x1d8] sm:$0xff]  ;;  %v1638_v59 = vpack.c.bf16 %v1142_v54, %v1126_v52  ;;  %v1301_v41 = vld [vmem:[%s6645_s10 + $0x9c8] sm:$0xff]  ;;  %v1302_v52 = vld [vmem:[%s6645_s10 + $0x9d0] sm:$0xff] }
 0x1a9   : > { %2324 = vmatpush1.bf16.msra.mxu1 %v1778_v9  ;;  %2199 = vmatprep.subr.bf16.mxu0 %v1793_v10  ;;  %v1333_v54 = vld [vmem:[%s6645_s10 + $0xac8] sm:$0xff] }
 0x1aa   : > { %2325 = vmatprep.subr.bf16.mxu1 %v1795_v15  ;;  %v1591_v15 = vpack.c.bf16 %v1047_v8, %v1031_v2 }
 0x1ac   : > { %2200 = vmatpush1.bf16.msra.mxu0 %v1792_v21  ;;  %v1588_v21 = vpack.c.bf16 %v1044_v12, %v1028_v11  ;;  %v1190_v11 = vld [vmem:[%s6645_s10 + $0x650] sm:$0xff] }
 0x1ad   : > { %2326 = vmatpush1.bf16.msra.mxu1 %v1794_v22  ;;  %2201 = vmatprep.subr.bf16.mxu0 %v1809_v23  ;;  %v1590_v22 = vpack.c.bf16 %v1046_v16, %v1030_v13  ;;  %v1605_v23 = vpack.c.bf16 %v1077_v18, %v1061_v17  ;;  %v1206_v13 = vld [vmem:[%s6645_s10 + $0x6d0] sm:$0xff]  ;;  %v1237_v16 = vld [vmem:[%s6645_s10 + $0x7c8] sm:$0xff]  ;;  %v1223_v17 = vld [vmem:[%s6645_s10 + $0x758] sm:$0xff] }
 0x1ae   : > { %2327 = vmatprep.subr.bf16.mxu1 %v1811_v27  ;;  %v1607_v27 = vpack.c.bf16 %v1079_v20, %v1063_v19  ;;  %v1239_v18 = vld [vmem:[%s6645_s10 + $0x7d8] sm:$0xff]  ;;  %v1670_v20 = vpack.c.bf16 %v1206_v13, %v1190_v11  ;;  %v1366_v11 = vld [vmem:[%s6645_s10 + $0xbd0] sm:$0xff]  ;;  %v1397_v13 = vld [vmem:[%s6645_s10 + $0xcc8] sm:$0xff] }
 0x1af   : > { %v1687_v25 = vpack.c.bf16 %v1239_v18, %v1223_v17 }
 0x1b0   : > { %2202 = vmatpush1.bf16.msra.mxu0 %v1808_v34  ;;  %v1606_v34 = vpack.c.bf16 %v1078_v28, %v1062_v26  ;;  %v1238_v26 = vld [vmem:[%s6645_s10 + $0x7d0] sm:$0xff]  ;;  %v1269_v28 = vld [vmem:[%s6645_s10 + $0x8c8] sm:$0xff] }
 0x1b1   : > { %2328 = vmatpush1.bf16.msra.mxu1 %v1810_v35  ;;  %2234 = vmatprep.subr.bf16.mxu0 %v1825_v36  ;;  %v1092_v36 = vld [vmem:[%s6645_s10 + $0x340] sm:$0xff] }
 0x1b2   : > { %2360 = vmatprep.subr.bf16.mxu1 %v1827_v39  ;;  %v1623_v39 = vpack.c.bf16 %v1111_v31, %v1095_v30  ;;  %v1620_v32 = vpack.c.bf16 %v1108_v37, %v1092_v36  ;;  %v1686_v31 = vpack.c.bf16 %v1238_v26, %v1222_v24  ;;  %v1254_v36 = vld [vmem:[%s6645_s10 + $0x850] sm:$0xff]  ;;  %v1429_v26 = vld [vmem:[%s6645_s10 + $0xdc8] sm:$0xff] }
 0x1b3   : > { %2204 = vmatmul.mubr.bf16.vlgmr.msra.gmra.mrb[12].mxu0 %v6786_v46  ;;  %v1398_v24 = vld [vmem:[%s6645_s10 + $0xcd0] sm:$0xff] }
 0x1b4   : > { %2330 = vmatmul.mubr.bf16.vlgmr.msra.gmra.mrb[12].mxu1 %v6786_v46  ;;  %2235 = vmatpush1.bf16.msra.mxu0 %v1824_v45  ;;  %v996_v46 = vld [vmem:[%s6645_s10 + $0x40] sm:$0xff]  ;;  %v1143_v45 = vld [vmem:[%s6645_s10 + $0x4d8] sm:$0xff] }
 0x1b5   : > { %2361 = vmatpush1.bf16.msra.mxu1 %v1826_v48  ;;  %2213 = vmatprep.mubr.bf16.mxu0 %v6793_v50  ;;  %v1637_v48 = vpack.c.bf16 %v1141_v43, %v1125_v42  ;;  %v1287_v42 = vld [vmem:[%s6645_s10 + $0x958] sm:$0xff] }
 0x1b6   : > { %2339 = vmatprep.mubr.bf16.mxu1 %v6793_v50  ;;  %2236 = vmatprep.subr.bf16.mxu0 %v1841_v53  ;;  %v1012_v50 = vld [vmem:[%s6645_s10 + $0xc0] sm:$0xff]  ;;  %v1639_v53 = vpack.c.bf16 %v1143_v45, %v1127_v44  ;;  %v1303_v43 = vld [vmem:[%s6645_s10 + $0x9d8] sm:$0xff]  ;;  %v1702_v45 = vpack.c.bf16 %v1270_v38, %v1254_v36  ;;  %v1430_v36 = vld [vmem:[%s6645_s10 + $0xdd0] sm:$0xff] }
 0x1b7   : > { %2362 = vmatprep.subr.bf16.mxu1 %v1843_v57  ;;  %v1572_v9 = vpack.c.bf16 %v1012_v50, %v996_v46  ;;  %v1175_v57 = vld [vmem:[%s6645_s10 + $0x5d8] sm:$0xff]  ;;  %v1174_v50 = vld [vmem:[%s6645_s10 + $0x5d0] sm:$0xff]  ;;  %v1719_v51 = vpack.c.bf16 %v1303_v43, %v1287_v42  ;;  %v1461_v38 = vld [vmem:[%s6645_s10 + $0xec8] sm:$0xff] }
 0x1b8   : > { %2237 = vmatpush1.bf16.msra.mxu0 %v1840_v60  ;;  %v1655_v46 = vpack.c.bf16 %v1175_v57, %v1159_v56  ;;  %v1718_v57 = vpack.c.bf16 %v1302_v52, %v1286_v49  ;;  %v1462_v49 = vld [vmem:[%s6645_s10 + $0xed0] sm:$0xff]  ;;  %v1493_v52 = vld [vmem:[%s6645_s10 + $0xfc8] sm:$0xff] }
 0x1b9   : > { %2363 = vmatpush1.bf16.msra.mxu1 %v1842_v61  ;;  %2423 = vmatprep.subr.bf16.mxu0 %v1573_v62  ;;  %v1156_v61 = vld [vmem:[%s6645_s10 + $0x540] sm:$0xff] }
 0x1ba   : > { %2549 = vmatprep.subr.bf16.mxu1 %v1575_v63  ;;  %v1172_v62 = vld [vmem:[%s6645_s10 + $0x5c0] sm:$0xff]  ;;  %v1158_v63 = vld [vmem:[%s6645_s10 + $0x550] sm:$0xff] }
 0x1bb   : > { %2214 = vmatmul.mubr.bf16.gmra.mrb[16].mxu0 %v6812_v4  ;;  %v1652_v2 = vpack.c.bf16 %v1172_v62, %v1156_v61  ;;  %v1654_v8 = vpack.c.bf16 %v1174_v50, %v1158_v63  ;;  %v1318_v61 = vld [vmem:[%s6645_s10 + $0xa50] sm:$0xff]  ;;  %v1365_v50 = vld [vmem:[%s6645_s10 + $0xbc8] sm:$0xff] }
 0x1bc   : > { %2340 = vmatmul.mubr.bf16.gmra.mrb[16].mxu1 %v6812_v4  ;;  %2223 = vmatprep.mubr.bf16.mxu0 %v6817_v5  ;;  %v998_v4 = vld [vmem:[%s6645_s10 + $0x50] sm:$0xff] }
 0x1bd   : > { %2349 = vmatprep.mubr.bf16.mxu1 %v6817_v5  ;;  %v1029_v5 = vld [vmem:[%s6645_s10 + $0x148] sm:$0xff]  ;;  %v1334_v63 = vld [vmem:[%s6645_s10 + $0xad0] sm:$0xff] }
 0x1be   : > { %v1589_v10 = vpack.c.bf16 %v1045_v1, %v1029_v5  ;;  %v1191_v5 = vld [vmem:[%s6645_s10 + $0x658] sm:$0xff] }
 0x1bf   : > { %v1207_v1 = vld [vmem:[%s6645_s10 + $0x6d8] sm:$0xff] }
 0x1c0   : > { %v1671_v12 = vpack.c.bf16 %v1207_v1, %v1191_v5  ;;  %v1734_v1 = vpack.c.bf16 %v1334_v63, %v1318_v61  ;;  %v1494_v61 = vld [vmem:[%s6645_s10 + $0xfd0] sm:$0xff]  ;;  %v1525_v63 = vld [vmem:[%s6645_s10 + $0x10c8] sm:$0xff] }
 0x1c3   : > { %2224 = vmatmul.mubr.bf16.gmra.mrb[20].mxu0 %v6826_v6 }
 0x1c4   : > { %2350 = vmatmul.mubr.bf16.gmra.mrb[20].mxu1 %v6826_v6  ;;  %2266 = vmatprep.mubr.bf16.mxu0 %v5600_v7  ;;  %v1574_v6 = vpack.c.bf16 %v1014_v0, %v998_v4  ;;  %v1189_v4 = vld [vmem:[%s6645_s10 + $0x648] sm:$0xff] }
 0x1c5   : > { %2392 = vmatprep.mubr.bf16.mxu1 %v5600_v7  ;;  %v1205_v0 = vld [vmem:[%s6645_s10 + $0x6c8] sm:$0xff] }
 0x1cb   : > { %4722 = vmatmul.mubr.msk.bf16.vlgmr.msra.gmra.mrb[12].mxu0 %vm1909_vm0, %v6841_v14 }
 0x1cc   : > { %4725 = vmatmul.mubr.msk.bf16.vlgmr.msra.gmra.mrb[12].mxu1 %vm1909_vm0, %v6841_v14  ;;  %2424 = vmatpush1.bf16.msra.mxu0 %v1572_v9  ;;  %v1093_v14 = vld [vmem:[%s6645_s10 + $0x348] sm:$0xff]  ;;  %v1669_v9 = vpack.c.bf16 %v1205_v0, %v1189_v4  ;;  %v1351_v4 = vld [vmem:[%s6645_s10 + $0xb58] sm:$0xff] }
 0x1cd   : > { %2550 = vmatpush1.bf16.msra.mxu1 %v1574_v6  ;;  %2425 = vmatprep.subr.bf16.mxu0 %v1589_v10  ;;  %v1621_v35 = vpack.c.bf16 %v1109_v29, %v1093_v14  ;;  %v1188_v6 = vld [vmem:[%s6645_s10 + $0x640] sm:$0xff]  ;;  %v1255_v14 = vld [vmem:[%s6645_s10 + $0x858] sm:$0xff] }
 0x1ce   : > { %2551 = vmatprep.subr.bf16.mxu1 %v1591_v15  ;;  %2276 = vmatprep.mubr.bf16.mxu0 %v5600_v7  ;;  %v1204_v10 = vld [vmem:[%s6645_s10 + $0x6c0] sm:$0xff]  ;;  %v1221_v15 = vld [vmem:[%s6645_s10 + $0x748] sm:$0xff]  ;;  %v1271_v29 = vld [vmem:[%s6645_s10 + $0x8d8] sm:$0xff] }
 0x1cf   : > { %2402 = vmatprep.mubr.bf16.mxu1 %v5600_v7  ;;  %v1668_v19 = vpack.c.bf16 %v1204_v10, %v1188_v6  ;;  %v1703_v37 = vpack.c.bf16 %v1271_v29, %v1255_v14  ;;  %v1367_v0 = vld [vmem:[%s6645_s10 + $0xbd8] sm:$0xff]  ;;  %v1350_v6 = vld [vmem:[%s6645_s10 + $0xb50] sm:$0xff] }
 0x1d0   : > { %2426 = vmatpush1.bf16.msra.mxu0 %v1588_v21  ;;  %v1685_v21 = vpack.c.bf16 %v1237_v16, %v1221_v15  ;;  %v1751_v10 = vpack.c.bf16 %v1367_v0, %v1351_v4  ;;  %v1383_v15 = vld [vmem:[%s6645_s10 + $0xc58] sm:$0xff]  ;;  %v1750_v18 = vpack.c.bf16 %v1366_v11, %v1350_v6  ;;  %v1526_v6 = vld [vmem:[%s6645_s10 + $0x10d0] sm:$0xff]  ;;  %v1557_v11 = vld [vmem:[%s6645_s10 + $0x11c8] sm:$0xff] }
 0x1d1   : > { %2552 = vmatpush1.bf16.msra.mxu1 %v1590_v22  ;;  %2427 = vmatprep.subr.bf16.mxu0 %v1605_v23  ;;  %v1220_v22 = vld [vmem:[%s6645_s10 + $0x740] sm:$0xff]  ;;  %v1399_v16 = vld [vmem:[%s6645_s10 + $0xcd8] sm:$0xff] }
 0x1d2   : > { %2553 = vmatprep.subr.bf16.mxu1 %v1607_v27  ;;  %v1236_v23 = vld [vmem:[%s6645_s10 + $0x7c0] sm:$0xff]  ;;  %v1253_v27 = vld [vmem:[%s6645_s10 + $0x848] sm:$0xff] }
 0x1d3   : > { %4723 = vmatmul.mubr.msk.bf16.gmra.mrb[16].mxu0 %vm1909_vm0, %v6868_v40  ;;  %v1684_v30 = vpack.c.bf16 %v1236_v23, %v1220_v22  ;;  %v1382_v22 = vld [vmem:[%s6645_s10 + $0xc50] sm:$0xff]  ;;  %v1767_v23 = vpack.c.bf16 %v1399_v16, %v1383_v15  ;;  %v1559_v15 = vld [vmem:[%s6645_s10 + $0x11d8] sm:$0xff] }
 0x1d4   : > { %4726 = vmatmul.mubr.msk.bf16.gmra.mrb[16].mxu1 %vm1909_vm0, %v6868_v40  ;;  %2428 = vmatpush1.bf16.msra.mxu0 %v1604_v33  ;;  %v1157_v40 = vld [vmem:[%s6645_s10 + $0x548] sm:$0xff]  ;;  %v1701_v33 = vpack.c.bf16 %v1269_v28, %v1253_v27  ;;  %v1415_v27 = vld [vmem:[%s6645_s10 + $0xd58] sm:$0xff]  ;;  %v1766_v29 = vpack.c.bf16 %v1398_v24, %v1382_v22 }
 0x1d5   : > { %2554 = vmatpush1.bf16.msra.mxu1 %v1606_v34  ;;  %2429 = vmatprep.subr.bf16.mxu0 %v1621_v35  ;;  %v1653_v60 = vpack.c.bf16 %v1173_v55, %v1157_v40  ;;  %v1252_v34 = vld [vmem:[%s6645_s10 + $0x840] sm:$0xff]  ;;  %v1319_v40 = vld [vmem:[%s6645_s10 + $0xa58] sm:$0xff]  ;;  %v1001_v22 = vld [vmem:[%s6645_s10 + $0x68] sm:$0xff] }
 0x1d6   : > { %2555 = vmatprep.subr.bf16.mxu1 %v1623_v39  ;;  %2286 = vmatprep.mubr.bf16.mxu0 %v5600_v7  ;;  %v1268_v35 = vld [vmem:[%s6645_s10 + $0x8c0] sm:$0xff]  ;;  %v1285_v39 = vld [vmem:[%s6645_s10 + $0x948] sm:$0xff]  ;;  %v1335_v55 = vld [vmem:[%s6645_s10 + $0xad8] sm:$0xff] }
 0x1d7   : > { %2412 = vmatprep.mubr.bf16.mxu1 %v5600_v7  ;;  %v1700_v44 = vpack.c.bf16 %v1268_v35, %v1252_v34  ;;  %v1735_v62 = vpack.c.bf16 %v1335_v55, %v1319_v40  ;;  %v1431_v28 = vld [vmem:[%s6645_s10 + $0xdd8] sm:$0xff]  ;;  %v1414_v34 = vld [vmem:[%s6645_s10 + $0xd50] sm:$0xff]  ;;  %v7189_v24 = vld [vmem:[%s9007_s1] ss:$12 sps:$4 sm:$0xff]  }
 0x1d8   : > { %2430 = vmatpush1.bf16.msra.mxu0 %v1620_v32  ;;  %v1717_v32 = vpack.c.bf16 %v1301_v41, %v1285_v39  ;;  %v1783_v35 = vpack.c.bf16 %v1431_v28, %v1415_v27  ;;  %v1447_v39 = vld [vmem:[%s6645_s10 + $0xe58] sm:$0xff]  ;;  %v1782_v43 = vpack.c.bf16 %v1430_v36, %v1414_v34  ;;  %v7212_v34 = vld [vmem:[%s9007_s1 + $0x34] ss:$12 sps:$4 sm:$0xff]  }
 0x1d9   : > { %2556 = vmatpush1.bf16.msra.mxu1 %v1622_v47  ;;  %2431 = vmatprep.subr.bf16.mxu0 %v1637_v48  ;;  %v1284_v47 = vld [vmem:[%s6645_s10 + $0x940] sm:$0xff]  ;;  %v1463_v41 = vld [vmem:[%s6645_s10 + $0xed8] sm:$0xff] }
 0x1da   : > { %2557 = vmatprep.subr.bf16.mxu1 %v1639_v53  ;;  %v1300_v48 = vld [vmem:[%s6645_s10 + $0x9c0] sm:$0xff]  ;;  %v1317_v53 = vld [vmem:[%s6645_s10 + $0xa48] sm:$0xff]  ;;  %v1019_v27 = vld [vmem:[%s6645_s10 + $0xf8] sm:$0xff] }
 0x1db   : > { %4724 = vmatmul.mubr.msk.bf16.gmra.mrb[20].mxu0 %vm1909_vm0, %v6895_v3  ;;  %v1716_v56 = vpack.c.bf16 %v1300_v48, %v1284_v47  ;;  %v1446_v47 = vld [vmem:[%s6645_s10 + $0xe50] sm:$0xff]  ;;  %v1799_v48 = vpack.c.bf16 %v1463_v41, %v1447_v39  ;;  %v1000_v36 = vld [vmem:[%s6645_s10 + $0x60] sm:$0xff]  ;;  %v1033_v41 = vld [vmem:[%s6645_s10 + $0x168] sm:$0xff] }
 0x1dc   : > { %4727 = vmatmul.mubr.msk.bf16.gmra.mrb[20].mxu1 %vm1909_vm0, %v6895_v3  ;;  %2432 = vmatpush1.bf16.msra.mxu0 %v1636_v58  ;;  %v7094_v3 = vld [vmem:[%s9007_s1 + $0x4] ss:$12 sps:$4 sm:$0xff]   ;;  %v1733_v58 = vpack.c.bf16 %v1333_v54, %v1317_v53  ;;  %v1479_v53 = vld [vmem:[%s6645_s10 + $0xf58] sm:$0xff]  ;;  %v1798_v55 = vpack.c.bf16 %v1462_v49, %v1446_v47 }
 0x1dd   : > { %2558 = vmatpush1.bf16.msra.mxu1 %v1638_v59  ;;  %2433 = vmatprep.subr.bf16.mxu0 %v1653_v60  ;;  %v1316_v59 = vld [vmem:[%s6645_s10 + $0xa40] sm:$0xff]  ;;  %v1495_v54 = vld [vmem:[%s6645_s10 + $0xfd8] sm:$0xff]  ;;  %v1018_v39 = vld [vmem:[%s6645_s10 + $0xf0] sm:$0xff] }
 0x1de   : > { %2559 = vmatprep.subr.bf16.mxu1 %v1655_v46  ;;  %2455 = vmatprep.mubr.bf16.mxu0 %v7094_v3  ;;  %v1332_v60 = vld [vmem:[%s6645_s10 + $0xac0] sm:$0xff]  ;;  %v1349_v46 = vld [vmem:[%s6645_s10 + $0xb48] sm:$0xff] }
 0x1df   : > { %2581 = vmatprep.mubr.bf16.mxu1 %v7094_v3  ;;  %v1732_v5 = vpack.c.bf16 %v1332_v60, %v1316_v59  ;;  %v1478_v59 = vld [vmem:[%s6645_s10 + $0xf50] sm:$0xff]  ;;  %v1815_v60 = vpack.c.bf16 %v1495_v54, %v1479_v53  ;;  %v1048_v49 = vld [vmem:[%s6645_s10 + $0x1e0] sm:$0xff]  ;;  %v1065_v54 = vld [vmem:[%s6645_s10 + $0x268] sm:$0xff] }
 0x1e0   : > { %2434 = vmatpush1.bf16.msra.mxu0 %v1652_v2  ;;  %v1749_v2 = vpack.c.bf16 %v1365_v50, %v1349_v46  ;;  %v1511_v46 = vld [vmem:[%s6645_s10 + $0x1058] sm:$0xff]  ;;  %v1814_v0 = vpack.c.bf16 %v1494_v61, %v1478_v59  ;;  %v1050_v53 = vld [vmem:[%s6645_s10 + $0x1f0] sm:$0xff]  ;;  %v1064_v61 = vld [vmem:[%s6645_s10 + $0x260] sm:$0xff] }
 0x1e1   : > { %2560 = vmatpush1.bf16.msra.mxu1 %v1654_v8  ;;  %2435 = vmatprep.subr.bf16.mxu0 %v1669_v9  ;;  %v1348_v8 = vld [vmem:[%s6645_s10 + $0xb40] sm:$0xff]  ;;  %v1527_v50 = vld [vmem:[%s6645_s10 + $0x10d8] sm:$0xff] }
 0x1e2   : > { %2561 = vmatprep.subr.bf16.mxu1 %v1671_v12  ;;  %v1364_v9 = vld [vmem:[%s6645_s10 + $0xbc0] sm:$0xff]  ;;  %v1381_v12 = vld [vmem:[%s6645_s10 + $0xc48] sm:$0xff] }
 0x1e3   : > { %v1748_v17 = vpack.c.bf16 %v1364_v9, %v1348_v8  ;;  %v1831_v8 = vpack.c.bf16 %v1527_v50, %v1511_v46  ;;  %v1510_v9 = vld [vmem:[%s6645_s10 + $0x1050] sm:$0xff] }
 0x1e4   : > { %2436 = vmatpush1.bf16.msra.mxu0 %v1668_v19  ;;  %v1765_v19 = vpack.c.bf16 %v1397_v13, %v1381_v12  ;;  %v1543_v13 = vld [vmem:[%s6645_s10 + $0x1158] sm:$0xff]  ;;  %v1830_v16 = vpack.c.bf16 %v1526_v6, %v1510_v9  ;;  %v1082_v50 = vld [vmem:[%s6645_s10 + $0x2f0] sm:$0xff]  ;;  %v1096_v6 = vld [vmem:[%s6645_s10 + $0x360] sm:$0xff] }
 0x1e5   : > { %2562 = vmatpush1.bf16.msra.mxu1 %v1670_v20  ;;  %2437 = vmatprep.subr.bf16.mxu0 %v1685_v21  ;;  %v1380_v20 = vld [vmem:[%s6645_s10 + $0xc40] sm:$0xff] }
 0x1e6   : > { %2563 = vmatprep.subr.bf16.mxu1 %v1687_v25  ;;  %v1396_v21 = vld [vmem:[%s6645_s10 + $0xcc0] sm:$0xff]  ;;  %v1413_v25 = vld [vmem:[%s6645_s10 + $0xd48] sm:$0xff] }
 0x1e7   : > { %v1764_v14 = vpack.c.bf16 %v1396_v21, %v1380_v20  ;;  %v1558_v21 = vld [vmem:[%s6645_s10 + $0x11d0] sm:$0xff] }
 0x1e8   : > { %2438 = vmatpush1.bf16.msra.mxu0 %v1684_v30  ;;  %v1781_v30 = vpack.c.bf16 %v1429_v26, %v1413_v25  ;;  %v1847_v25 = vpack.c.bf16 %v1559_v15, %v1543_v13  ;;  %v1003_v26 = vld [vmem:[%s6645_s10 + $0x78] sm:$0xff]  ;;  %v1114_v13 = vld [vmem:[%s6645_s10 + $0x3f0] sm:$0xff]  ;;  %v1129_v15 = vld [vmem:[%s6645_s10 + $0x468] sm:$0xff] }
 0x1e9   : > { %2564 = vmatpush1.bf16.msra.mxu1 %v1686_v31  ;;  %2439 = vmatprep.subr.bf16.mxu0 %v1701_v33  ;;  %v1412_v31 = vld [vmem:[%s6645_s10 + $0xd40] sm:$0xff] }
 0x1ea   : > { %2565 = vmatprep.subr.bf16.mxu1 %v1703_v37  ;;  %v1428_v33 = vld [vmem:[%s6645_s10 + $0xdc0] sm:$0xff]  ;;  %v1445_v37 = vld [vmem:[%s6645_s10 + $0xe48] sm:$0xff] }
 0x1eb   : > { %v1780_v42 = vpack.c.bf16 %v1428_v33, %v1412_v31  ;;  %v1579_v31 = vpack.c.bf16 %v1019_v27, %v1003_v26  ;;  %v7205_v33 = vld [vmem:[%s9007_s1 + $0x18] ss:$12 sps:$4 sm:$0xff]   ;;  %v1130_v26 = vld [vmem:[%s6645_s10 + $0x470] sm:$0xff] }
 0x1ec   : > { %2440 = vmatpush1.bf16.msra.mxu0 %v1700_v44  ;;  %v1797_v44 = vpack.c.bf16 %v1461_v38, %v1445_v37  ;;  %v1016_v37 = vld [vmem:[%s6645_s10 + $0xe0] sm:$0xff]  ;;  %v1002_v38 = vld [vmem:[%s6645_s10 + $0x70] sm:$0xff] }
 0x1ed   : > { %2566 = vmatpush1.bf16.msra.mxu1 %v1702_v45  ;;  %2441 = vmatprep.subr.bf16.mxu0 %v1717_v32  ;;  %v1444_v45 = vld [vmem:[%s6645_s10 + $0xe40] sm:$0xff] }
 0x1ee   : > { %2567 = vmatprep.subr.bf16.mxu1 %v1719_v51  ;;  %v1460_v32 = vld [vmem:[%s6645_s10 + $0xec0] sm:$0xff]  ;;  %v1477_v51 = vld [vmem:[%s6645_s10 + $0xf48] sm:$0xff] }
 0x1ef   : > { %v1796_v40 = vpack.c.bf16 %v1460_v32, %v1444_v45  ;;  %v1576_v45 = vpack.c.bf16 %v1016_v37, %v1000_v36  ;;  %v1578_v32 = vpack.c.bf16 %v1018_v39, %v1002_v38  ;;  %v1179_v36 = vld [vmem:[%s6645_s10 + $0x5f8] sm:$0xff] }
 0x1f0   : > { %2442 = vmatpush1.bf16.msra.mxu0 %v1716_v56  ;;  %v1813_v56 = vpack.c.bf16 %v1493_v52, %v1477_v51  ;;  %v1034_v51 = vld [vmem:[%s6645_s10 + $0x170] sm:$0xff] }
 0x1f1   : > { %2568 = vmatpush1.bf16.msra.mxu1 %v1718_v57  ;;  %2443 = vmatprep.subr.bf16.mxu0 %v1733_v58  ;;  %v1476_v57 = vld [vmem:[%s6645_s10 + $0xf40] sm:$0xff]  ;;  %v1594_v59 = vpack.c.bf16 %v1050_v53, %v1034_v51  ;;  %v1211_v51 = vld [vmem:[%s6645_s10 + $0x6f8] sm:$0xff] }
 0x1f2   : > { %2569 = vmatprep.subr.bf16.mxu1 %v1735_v62  ;;  %v1492_v58 = vld [vmem:[%s6645_s10 + $0xfc0] sm:$0xff]  ;;  %v1509_v62 = vld [vmem:[%s6645_s10 + $0x1048] sm:$0xff] }
 0x1f3   : > { %v1812_v4 = vpack.c.bf16 %v1492_v58, %v1476_v57  ;;  %v1083_v57 = vld [vmem:[%s6645_s10 + $0x2f8] sm:$0xff] }
 0x1f4   : > { %2444 = vmatpush1.bf16.msra.mxu0 %v1732_v5  ;;  %v1829_v5 = vpack.c.bf16 %v1525_v63, %v1509_v62  ;;  %v1080_v62 = vld [vmem:[%s6645_s10 + $0x2e0] sm:$0xff]  ;;  %v1066_v63 = vld [vmem:[%s6645_s10 + $0x270] sm:$0xff] }
 0x1f5   : > { %2570 = vmatpush1.bf16.msra.mxu1 %v1734_v1  ;;  %2445 = vmatprep.subr.bf16.mxu0 %v1749_v2  ;;  %v1508_v1 = vld [vmem:[%s6645_s10 + $0x1040] sm:$0xff] }
 0x1f6   : > { %2571 = vmatprep.subr.bf16.mxu1 %v1751_v10  ;;  %v1524_v2 = vld [vmem:[%s6645_s10 + $0x10c0] sm:$0xff]  ;;  %v1541_v10 = vld [vmem:[%s6645_s10 + $0x1148] sm:$0xff] }
 0x1f7   : > { %v1828_v12 = vpack.c.bf16 %v1524_v2, %v1508_v1  ;;  %v1845_v20 = vpack.c.bf16 %v1557_v11, %v1541_v10  ;;  %v1115_v1 = vld [vmem:[%s6645_s10 + $0x3f8] sm:$0xff]  ;;  %v1608_v2 = vpack.c.bf16 %v1080_v62, %v1064_v61  ;;  %v1112_v10 = vld [vmem:[%s6645_s10 + $0x3e0] sm:$0xff]  ;;  %v1098_v11 = vld [vmem:[%s6645_s10 + $0x370] sm:$0xff] }
 0x1f8   : > { %2446 = vmatpush1.bf16.msra.mxu0 %v1748_v17  ;;  %v1540_v17 = vld [vmem:[%s6645_s10 + $0x1140] sm:$0xff]  ;;  %v1241_v61 = vld [vmem:[%s6645_s10 + $0x7e8] sm:$0xff]  ;;  %v1227_v62 = vld [vmem:[%s6645_s10 + $0x778] sm:$0xff] }
 0x1f9   : > { %2572 = vmatpush1.bf16.msra.mxu1 %v1750_v18  ;;  %2447 = vmatprep.subr.bf16.mxu0 %v1765_v19  ;;  %v1556_v18 = vld [vmem:[%s6645_s10 + $0x11c0] sm:$0xff]  ;;  %v1542_v19 = vld [vmem:[%s6645_s10 + $0x1150] sm:$0xff] }
 0x1fa   : > { %2573 = vmatprep.subr.bf16.mxu1 %v1767_v23  ;;  %v1017_v23 = vld [vmem:[%s6645_s10 + $0xe8] sm:$0xff]  ;;  %v1844_v28 = vpack.c.bf16 %v1556_v18, %v1540_v17  ;;  %v1131_v18 = vld [vmem:[%s6645_s10 + $0x478] sm:$0xff] }
 0x1fb   : > { %v7269_v17 = vld [vmem:[%s9007_s1 + $0x20] ss:$12 sps:$4 sm:$0xff]  }
 0x1fc   : > { %2448 = vmatpush1.bf16.msra.mxu0 %v1764_v14  ;;  %v7198_v14 = vld [vmem:[%s9007_s1 + $0x1c] ss:$12 sps:$4 sm:$0xff]  }
 0x1fd   : > { %2574 = vmatpush1.bf16.msra.mxu1 %v1766_v29  ;;  %2449 = vmatprep.subr.bf16.mxu0 %v1781_v30  ;;  %v1846_v29 = vpack.c.bf16 %v1558_v21, %v1542_v19  ;;  %v1577_v30 = vpack.c.bf16 %v1017_v23, %v1001_v22  ;;  %v1147_v19 = vld [vmem:[%s6645_s10 + $0x4f8] sm:$0xff]  ;;  %v1626_v21 = vpack.c.bf16 %v1114_v13, %v1098_v11  ;;  %v1128_v23 = vld [vmem:[%s6645_s10 + $0x460] sm:$0xff] }
 0x1fe   : > { %2575 = vmatprep.subr.bf16.mxu1 %v1783_v35  ;;  %v7219_v35 = vld [vmem:[%s9007_s1 + $0x30] ss:$12 sps:$4 sm:$0xff]   ;;  %v1643_v27 = vpack.c.bf16 %v1147_v19, %v1131_v18 }
 0x1ff   : > { %v1258_v18 = vld [vmem:[%s6645_s10 + $0x870] sm:$0xff] }
 0x200   : > { %2450 = vmatpush1.bf16.msra.mxu0 %v1780_v42  ;;  %v1049_v42 = vld [vmem:[%s6645_s10 + $0x1e8] sm:$0xff] }
 0x201   : > { %2576 = vmatpush1.bf16.msra.mxu1 %v1782_v43  ;;  %2451 = vmatprep.subr.bf16.mxu0 %v1797_v44  ;;  %v1035_v43 = vld [vmem:[%s6645_s10 + $0x178] sm:$0xff]  ;;  %v1593_v47 = vpack.c.bf16 %v1049_v42, %v1033_v41  ;;  %v1160_v41 = vld [vmem:[%s6645_s10 + $0x560] sm:$0xff] }
 0x202   : > { %2577 = vmatprep.subr.bf16.mxu1 %v1799_v48  ;;  %v1051_v44 = vld [vmem:[%s6645_s10 + $0x1f8] sm:$0xff]  ;;  %v1032_v48 = vld [vmem:[%s6645_s10 + $0x160] sm:$0xff] }
 0x203   : > { %v1595_v52 = vpack.c.bf16 %v1051_v44, %v1035_v43  ;;  %v1592_v58 = vpack.c.bf16 %v1048_v49, %v1032_v48  ;;  %v1176_v42 = vld [vmem:[%s6645_s10 + $0x5e0] sm:$0xff]  ;;  %v1162_v43 = vld [vmem:[%s6645_s10 + $0x570] sm:$0xff]  ;;  %v1195_v49 = vld [vmem:[%s6645_s10 + $0x678] sm:$0xff] }
 0x204   : > { %2452 = vmatpush1.bf16.msra.mxu0 %v1796_v40  ;;  %v1081_v40 = vld [vmem:[%s6645_s10 + $0x2e8] sm:$0xff]  ;;  %v7296_v48 = vld [vmem:[%s9007_s1 + $0x38] ss:$12 sps:$4 sm:$0xff]  }
 0x205   : > { %2578 = vmatpush1.bf16.msra.mxu1 %v1798_v55  ;;  %2453 = vmatprep.subr.bf16.mxu0 %v1813_v56  ;;  %v7242_v55 = vld [vmem:[%s9007_s1 + $0x8] ss:$12 sps:$4 sm:$0xff]   ;;  %v1067_v56 = vld [vmem:[%s6645_s10 + $0x278] sm:$0xff] }
 0x206   : > { %2579 = vmatprep.subr.bf16.mxu1 %v1815_v60  ;;  %v1609_v60 = vpack.c.bf16 %v1081_v40, %v1065_v54  ;;  %v1611_v46 = vpack.c.bf16 %v1083_v57, %v1067_v56  ;;  %v1192_v40 = vld [vmem:[%s6645_s10 + $0x660] sm:$0xff]  ;;  %v1194_v57 = vld [vmem:[%s6645_s10 + $0x670] sm:$0xff] }
 0x207   : > { %v1208_v56 = vld [vmem:[%s6645_s10 + $0x6e0] sm:$0xff] }
 0x208   : > { %2454 = vmatpush1.bf16.msra.mxu0 %v1812_v4  ;;  %v1097_v4 = vld [vmem:[%s6645_s10 + $0x368] sm:$0xff] }
 0x209   : > { %2580 = vmatpush1.bf16.msra.mxu1 %v1814_v0  ;;  %2486 = vmatprep.subr.bf16.mxu0 %v1829_v5  ;;  %v1113_v0 = vld [vmem:[%s6645_s10 + $0x3e8] sm:$0xff]  ;;  %v1099_v5 = vld [vmem:[%s6645_s10 + $0x378] sm:$0xff] }
 0x20a   : > { %2612 = vmatprep.subr.bf16.mxu1 %v1831_v8  ;;  %v1610_v8 = vpack.c.bf16 %v1082_v50, %v1066_v63  ;;  %v1625_v9 = vpack.c.bf16 %v1113_v0, %v1097_v4  ;;  %v1243_v63 = vld [vmem:[%s6645_s10 + $0x7f8] sm:$0xff]  ;;  %v1224_v0 = vld [vmem:[%s6645_s10 + $0x760] sm:$0xff] }
 0x20b   : > { %2456 = vmatmul.mubr.bf16.vlgmr.msra.gmra.mrb[24].mxu0 %v7189_v24 }
 0x20c   : > { %2582 = vmatmul.mubr.bf16.vlgmr.msra.gmra.mrb[24].mxu1 %v7189_v24  ;;  %2487 = vmatpush1.bf16.msra.mxu0 %v1828_v12  ;;  %v1627_v12 = vpack.c.bf16 %v1115_v1, %v1099_v5  ;;  %v1240_v5 = vld [vmem:[%s6645_s10 + $0x7e0] sm:$0xff]  ;;  %v1226_v1 = vld [vmem:[%s6645_s10 + $0x770] sm:$0xff] }
 0x20d   : > { %2613 = vmatpush1.bf16.msra.mxu1 %v1830_v16  ;;  %2465 = vmatprep.mubr.bf16.mxu0 %v7198_v14  ;;  %v1145_v16 = vld [vmem:[%s6645_s10 + $0x4e8] sm:$0xff]  ;;  %v1688_v11 = vpack.c.bf16 %v1240_v5, %v1224_v0 }
 0x20e   : > { %2591 = vmatprep.mubr.bf16.mxu1 %v7198_v14  ;;  %2488 = vmatprep.subr.bf16.mxu0 %v1845_v20  ;;  %v1624_v20 = vpack.c.bf16 %v1112_v10, %v1096_v6  ;;  %v1641_v22 = vpack.c.bf16 %v1145_v16, %v1129_v15  ;;  %v1259_v6 = vld [vmem:[%s6645_s10 + $0x878] sm:$0xff]  ;;  %v1256_v15 = vld [vmem:[%s6645_s10 + $0x860] sm:$0xff] }
 0x20f   : > { %2614 = vmatprep.subr.bf16.mxu1 %v1847_v25  ;;  %v1144_v25 = vld [vmem:[%s6645_s10 + $0x4e0] sm:$0xff]  ;;  %v1275_v10 = vld [vmem:[%s6645_s10 + $0x8f8] sm:$0xff] }
 0x210   : > { %2489 = vmatpush1.bf16.msra.mxu0 %v1844_v28  ;;  %v1146_v28 = vld [vmem:[%s6645_s10 + $0x4f0] sm:$0xff]  ;;  %v1640_v37 = vpack.c.bf16 %v1144_v25, %v1128_v23  ;;  %v1272_v16 = vld [vmem:[%s6645_s10 + $0x8e0] sm:$0xff]  ;;  %v1707_v19 = vpack.c.bf16 %v1275_v10, %v1259_v6  ;;  %v1291_v23 = vld [vmem:[%s6645_s10 + $0x978] sm:$0xff] }
 0x211   : > { %2615 = vmatpush1.bf16.msra.mxu1 %v1846_v29  ;;  %2675 = vmatprep.subr.bf16.mxu0 %v1577_v30  ;;  %v1161_v29 = vld [vmem:[%s6645_s10 + $0x568] sm:$0xff]  ;;  %v1642_v38 = vpack.c.bf16 %v1146_v28, %v1130_v26  ;;  %v1307_v25 = vld [vmem:[%s6645_s10 + $0x9f8] sm:$0xff]  ;;  %v1704_v26 = vpack.c.bf16 %v1272_v16, %v1256_v15 }
 0x212   : > { %2801 = vmatprep.subr.bf16.mxu1 %v1579_v31  ;;  %v1177_v30 = vld [vmem:[%s6645_s10 + $0x5e8] sm:$0xff]  ;;  %v1163_v31 = vld [vmem:[%s6645_s10 + $0x578] sm:$0xff] }
 0x213   : > { %2466 = vmatmul.mubr.bf16.gmra.mrb[28].mxu0 %v7205_v33  ;;  %v1657_v39 = vpack.c.bf16 %v1177_v30, %v1161_v29  ;;  %v1659_v44 = vpack.c.bf16 %v1179_v36, %v1163_v31  ;;  %v1288_v29 = vld [vmem:[%s6645_s10 + $0x960] sm:$0xff]  ;;  %v1290_v31 = vld [vmem:[%s6645_s10 + $0x970] sm:$0xff]  ;;  %v1723_v36 = vpack.c.bf16 %v1307_v25, %v1291_v23  ;;  %v1385_v15 = vld [vmem:[%s6645_s10 + $0xc68] sm:$0xff] }
 0x214   : > { %2592 = vmatmul.mubr.bf16.gmra.mrb[28].mxu1 %v7205_v33  ;;  %2475 = vmatprep.mubr.bf16.mxu0 %v7212_v34  ;;  %v1304_v30 = vld [vmem:[%s6645_s10 + $0x9e0] sm:$0xff]  ;;  %v1401_v16 = vld [vmem:[%s6645_s10 + $0xce8] sm:$0xff] }
 0x215   : > { %2601 = vmatprep.mubr.bf16.mxu1 %v7212_v34  ;;  %v1384_v23 = vld [vmem:[%s6645_s10 + $0xc60] sm:$0xff] }
 0x21b   : > { %2476 = vmatmul.mubr.bf16.gmra.mrb[32].mxu0 %v7219_v35 }
 0x21c   : > { %2602 = vmatmul.mubr.bf16.gmra.mrb[32].mxu1 %v7219_v35  ;;  %2518 = vmatprep.mubr.bf16.mxu0 %v5600_v7 }
 0x21d   : > { %2644 = vmatprep.mubr.bf16.mxu1 %v5600_v7 }
 0x223   : > { %4728 = vmatmul.mubr.msk.bf16.vlgmr.msra.gmra.mrb[24].mxu0 %vm1909_vm0, %v7242_v55 }
 0x224   : > { %4731 = vmatmul.mubr.msk.bf16.vlgmr.msra.gmra.mrb[24].mxu1 %vm1909_vm0, %v7242_v55  ;;  %2676 = vmatpush1.bf16.msra.mxu0 %v1576_v45  ;;  %v1178_v45 = vld [vmem:[%s6645_s10 + $0x5f0] sm:$0xff] }
 0x225   : > { %2802 = vmatpush1.bf16.msra.mxu1 %v1578_v32  ;;  %2677 = vmatprep.subr.bf16.mxu0 %v1593_v47  ;;  %v1193_v32 = vld [vmem:[%s6645_s10 + $0x668] sm:$0xff]  ;;  %v1658_v53 = vpack.c.bf16 %v1178_v45, %v1162_v43  ;;  %v1720_v43 = vpack.c.bf16 %v1304_v30, %v1288_v29  ;;  %v1402_v29 = vld [vmem:[%s6645_s10 + $0xcf0] sm:$0xff] }
 0x226   : > { %2803 = vmatprep.subr.bf16.mxu1 %v1595_v52  ;;  %2528 = vmatprep.mubr.bf16.mxu0 %v5600_v7  ;;  %v1209_v47 = vld [vmem:[%s6645_s10 + $0x6e8] sm:$0xff]  ;;  %v1656_v52 = vpack.c.bf16 %v1176_v42, %v1160_v41  ;;  %v1323_v41 = vld [vmem:[%s6645_s10 + $0xa78] sm:$0xff] }
 0x227   : > { %2654 = vmatprep.mubr.bf16.mxu1 %v5600_v7  ;;  %v1673_v54 = vpack.c.bf16 %v1209_v47, %v1193_v32  ;;  %v1339_v42 = vld [vmem:[%s6645_s10 + $0xaf8] sm:$0xff]  ;;  %v1336_v47 = vld [vmem:[%s6645_s10 + $0xae0] sm:$0xff] }
 0x228   : > { %2678 = vmatpush1.bf16.msra.mxu0 %v1592_v58  ;;  %v1675_v58 = vpack.c.bf16 %v1211_v51, %v1195_v49  ;;  %v1322_v49 = vld [vmem:[%s6645_s10 + $0xa70] sm:$0xff] }
 0x229   : > { %2804 = vmatpush1.bf16.msra.mxu1 %v1594_v59  ;;  %2679 = vmatprep.subr.bf16.mxu0 %v1609_v60  ;;  %v1210_v59 = vld [vmem:[%s6645_s10 + $0x6f0] sm:$0xff]  ;;  %v1225_v60 = vld [vmem:[%s6645_s10 + $0x768] sm:$0xff] }
 0x22a   : > { %2805 = vmatprep.subr.bf16.mxu1 %v1611_v46  ;;  %v1672_v46 = vpack.c.bf16 %v1208_v56, %v1192_v40  ;;  %v1674_v50 = vpack.c.bf16 %v1210_v59, %v1194_v57  ;;  %v1689_v4 = vpack.c.bf16 %v1241_v61, %v1225_v60  ;;  %v1338_v51 = vld [vmem:[%s6645_s10 + $0xaf0] sm:$0xff]  ;;  %v1369_v40 = vld [vmem:[%s6645_s10 + $0xbe8] sm:$0xff]  ;;  %v1371_v59 = vld [vmem:[%s6645_s10 + $0xbf8] sm:$0xff] }
 0x22b   : > { %4729 = vmatmul.mubr.msk.bf16.gmra.mrb[28].mxu0 %vm1909_vm0, %v7269_v17 }
 0x22c   : > { %4732 = vmatmul.mubr.msk.bf16.gmra.mrb[28].mxu1 %vm1909_vm0, %v7269_v17  ;;  %2680 = vmatpush1.bf16.msra.mxu0 %v1608_v2  ;;  %v1691_v2 = vpack.c.bf16 %v1243_v63, %v1227_v62 }
 0x22d   : > { %2806 = vmatpush1.bf16.msra.mxu1 %v1610_v8  ;;  %2681 = vmatprep.subr.bf16.mxu0 %v1625_v9  ;;  %v1242_v8 = vld [vmem:[%s6645_s10 + $0x7f0] sm:$0xff]  ;;  %v1257_v9 = vld [vmem:[%s6645_s10 + $0x868] sm:$0xff] }
 0x22e   : > { %2807 = vmatprep.subr.bf16.mxu1 %v1627_v12  ;;  %2538 = vmatprep.mubr.bf16.mxu0 %v5600_v7  ;;  %v1690_v12 = vpack.c.bf16 %v1242_v8, %v1226_v1  ;;  %v1368_v8 = vld [vmem:[%s6645_s10 + $0xbe0] sm:$0xff] }
 0x22f   : > { %2664 = vmatprep.mubr.bf16.mxu1 %v5600_v7 }
 0x230   : > { %2682 = vmatpush1.bf16.msra.mxu0 %v1624_v20  ;;  %v1274_v20 = vld [vmem:[%s6645_s10 + $0x8f0] sm:$0xff] }
 0x231   : > { %2808 = vmatpush1.bf16.msra.mxu1 %v1626_v21  ;;  %2683 = vmatprep.subr.bf16.mxu0 %v1641_v22  ;;  %v1289_v21 = vld [vmem:[%s6645_s10 + $0x968] sm:$0xff] }
 0x232   : > { %2809 = vmatprep.subr.bf16.mxu1 %v1643_v27  ;;  %v1305_v22 = vld [vmem:[%s6645_s10 + $0x9e8] sm:$0xff]  ;;  %v1706_v27 = vpack.c.bf16 %v1274_v20, %v1258_v18  ;;  %v1387_v20 = vld [vmem:[%s6645_s10 + $0xc78] sm:$0xff] }
 0x233   : > { %4730 = vmatmul.mubr.msk.bf16.gmra.mrb[32].mxu0 %vm1909_vm0, %v7296_v48  ;;  %v1721_v28 = vpack.c.bf16 %v1305_v22, %v1289_v21  ;;  %v1403_v21 = vld [vmem:[%s6645_s10 + $0xcf8] sm:$0xff] }
 0x234   : > { %4733 = vmatmul.mubr.msk.bf16.gmra.mrb[32].mxu1 %vm1909_vm0, %v7296_v48  ;;  %2684 = vmatpush1.bf16.msra.mxu0 %v1640_v37  ;;  %v1306_v37 = vld [vmem:[%s6645_s10 + $0x9f0] sm:$0xff] }
 0x235   : > { %2810 = vmatpush1.bf16.msra.mxu1 %v1642_v38  ;;  %2685 = vmatprep.subr.bf16.mxu0 %v1657_v39  ;;  %v1321_v38 = vld [vmem:[%s6645_s10 + $0xa68] sm:$0xff]  ;;  %v1722_v45 = vpack.c.bf16 %v1306_v37, %v1290_v31  ;;  %v1771_v31 = vpack.c.bf16 %v1403_v21, %v1387_v20 }
 0x236   : > { %2811 = vmatprep.subr.bf16.mxu1 %v1659_v44  ;;  %2707 = vmatprep.mubr.bf16.mxu0 %v7094_v3  ;;  %v1337_v39 = vld [vmem:[%s6645_s10 + $0xae8] sm:$0xff]  ;;  %v1320_v44 = vld [vmem:[%s6645_s10 + $0xa60] sm:$0xff] }
 0x237   : > { %2833 = vmatprep.mubr.bf16.mxu1 %v7094_v3  ;;  %v1273_v3 = vld [vmem:[%s6645_s10 + $0x8e8] sm:$0xff]  ;;  %v1737_v32 = vpack.c.bf16 %v1337_v39, %v1321_v38  ;;  %v1736_v63 = vpack.c.bf16 %v1336_v47, %v1320_v44 }
 0x238   : > { %2686 = vmatpush1.bf16.msra.mxu0 %v1656_v52  ;;  %v1705_v13 = vpack.c.bf16 %v1273_v3, %v1257_v9  ;;  %v1354_v9 = vld [vmem:[%s6645_s10 + $0xb70] sm:$0xff]  ;;  %v1433_v37 = vld [vmem:[%s6645_s10 + $0xde8] sm:$0xff] }
 0x239   : > { %2812 = vmatpush1.bf16.msra.mxu1 %v1658_v53  ;;  %2687 = vmatprep.subr.bf16.mxu0 %v1673_v54  ;;  %v1739_v53 = vpack.c.bf16 %v1339_v42, %v1323_v41  ;;  %v1353_v54 = vld [vmem:[%s6645_s10 + $0xb68] sm:$0xff]  ;;  %v1419_v41 = vld [vmem:[%s6645_s10 + $0xd78] sm:$0xff] }
 0x23a   : > { %2813 = vmatprep.subr.bf16.mxu1 %v1675_v58  ;;  %v1355_v58 = vld [vmem:[%s6645_s10 + $0xb78] sm:$0xff]  ;;  %v1753_v1 = vpack.c.bf16 %v1369_v40, %v1353_v54  ;;  %v1416_v40 = vld [vmem:[%s6645_s10 + $0xd60] sm:$0xff]  ;;  %v1481_v20 = vld [vmem:[%s6645_s10 + $0xf68] sm:$0xff] }
 0x23b   : > { %v1435_v42 = vld [vmem:[%s6645_s10 + $0xdf8] sm:$0xff]  ;;  %v1497_v21 = vld [vmem:[%s6645_s10 + $0xfe8] sm:$0xff] }
 0x23c   : > { %2688 = vmatpush1.bf16.msra.mxu0 %v1672_v46  ;;  %v1738_v46 = vpack.c.bf16 %v1338_v51, %v1322_v49 }
 0x23d   : > { %2814 = vmatpush1.bf16.msra.mxu1 %v1674_v50  ;;  %2689 = vmatprep.subr.bf16.mxu0 %v1689_v4 }
 0x23e   : > { %2815 = vmatprep.subr.bf16.mxu1 %v1691_v2  ;;  %v1352_v2 = vld [vmem:[%s6645_s10 + $0xb60] sm:$0xff] }
 0x23f   : > { %v1752_v22 = vpack.c.bf16 %v1368_v8, %v1352_v2  ;;  %v1467_v2 = vld [vmem:[%s6645_s10 + $0xef8] sm:$0xff] }
 0x240   : > { %2690 = vmatpush1.bf16.msra.mxu0 %v1688_v11 }
 0x241   : > { %2816 = vmatpush1.bf16.msra.mxu1 %v1690_v12  ;;  %2691 = vmatprep.subr.bf16.mxu0 %v1705_v13  ;;  %v1755_v12 = vpack.c.bf16 %v1371_v59, %v1355_v58  ;;  %v1370_v13 = vld [vmem:[%s6645_s10 + $0xbf0] sm:$0xff] }
 0x242   : > { %2817 = vmatprep.subr.bf16.mxu1 %v1707_v19  ;;  %v1754_v25 = vpack.c.bf16 %v1370_v13, %v1354_v9  ;;  %v1448_v9 = vld [vmem:[%s6645_s10 + $0xe60] sm:$0xff]  ;;  %v1450_v13 = vld [vmem:[%s6645_s10 + $0xe70] sm:$0xff] }
 0x244   : > { %2692 = vmatpush1.bf16.msra.mxu0 %v1704_v26  ;;  %v1769_v26 = vpack.c.bf16 %v1401_v16, %v1385_v15  ;;  %v1466_v15 = vld [vmem:[%s6645_s10 + $0xef0] sm:$0xff] }
 0x245   : > { %2818 = vmatpush1.bf16.msra.mxu1 %v1706_v27  ;;  %2693 = vmatprep.subr.bf16.mxu0 %v1721_v28  ;;  %v1400_v27 = vld [vmem:[%s6645_s10 + $0xce0] sm:$0xff]  ;;  %v1386_v28 = vld [vmem:[%s6645_s10 + $0xc70] sm:$0xff] }
 0x246   : > { %2819 = vmatprep.subr.bf16.mxu1 %v1723_v36  ;;  %v2016_v52 = vpop.f32.mrb[0].mxu0  ;;  %v1417_v36 = vld [vmem:[%s6645_s10 + $0xd68] sm:$0xff]  ;;  %v1770_v47 = vpack.c.bf16 %v1402_v29, %v1386_v28 }
 0x247   : > { %v2142_v56 = vpop.f32.mrb[0].mxu1  ;;  %v2018_v57 = vpop.f32.mrb[1].mxu0  ;;  %v1785_v54 = vpack.c.bf16 %v1433_v37, %v1417_v36 }
 0x248   : > { %2694 = vmatpush1.bf16.msra.mxu0 %v1720_v43  ;;  %v4818_v60 = vpack.c.bf16 %v2018_v57, %v2016_v52  ;;  %v2144_v61 = vpop.f32.mrb[1].mxu1  ;;  %v2020_v62 = vpop.f32.mrb[2].mxu0 }
 0x249   : > { %2820 = vmatpush1.bf16.msra.mxu1 %v1722_v45  ;;  %v4819_v50 = vpack.c.bf16 %v2144_v61, %v2142_v56  ;;  %v7350_v4 = vpack.c.bf16 %v2020_v62, %v2016_v52  ;;  %v2146_v0 = vpop.f32.mrb[2].mxu1  ;;  %2695 = vmatprep.subr.bf16.mxu0 %v1737_v32  ;;  %v2022_v5 = vpop.f32.mrb[3].mxu0  ;;  %v1768_v32 = vpack.c.bf16 %v1400_v27, %v1384_v23 }
 0x24a   : > { %3215 = vst [vmem:[%s7356_s15] sm:$0xff] %v4818_v60  ;;  %v7359_v3 = vpack.c.bf16 %v2146_v0, %v2142_v56  ;;  %2821 = vmatprep.subr.bf16.mxu1 %v1739_v53  ;;  %v7361_v6 = vpack.c.bf16 %v2022_v5, %v2018_v57  ;;  %v4826_v10 = vpack.c.bf16 %v2022_v5, %v2020_v62  ;;  %v2148_v11 = vpop.f32.mrb[3].mxu1  ;;  %v1432_v56 = vld [vmem:[%s6645_s10 + $0xde0] sm:$0xff]  ;;  %v1418_v57 = vld [vmem:[%s6645_s10 + $0xd70] sm:$0xff] }
 0x24b   : > { %3216 = vst [vmem:[%s7356_s15 + $0x8] sm:$0xff] %v4819_v50  ;;  %v7367_v18 = vpack.c.bf16 %v2148_v11, %v2144_v61  ;;  %v4827_v19 = vpack.c.bf16 %v2148_v11, %v2146_v0  ;;  %v1787_v62 = vpack.c.bf16 %v1435_v42, %v1419_v41  ;;  %v1465_v50 = vld [vmem:[%s6645_s10 + $0xee8] sm:$0xff]  ;;  %v1784_v8 = vpack.c.bf16 %v1432_v56, %v1416_v40  ;;  %v1480_v42 = vld [vmem:[%s6645_s10 + $0xf60] sm:$0xff] }
 0x24c   : > { %3223 = vst [vmem:[%s7356_s15 + $0x40] sm:$0xff] %v4826_v10  ;;  %2696 = vmatpush1.bf16.msra.mxu0 %v1736_v63  ;;  %v1434_v63 = vld [vmem:[%s6645_s10 + $0xdf0] sm:$0xff]  ;;  %v1817_v41 = vpack.c.bf16 %v1497_v21, %v1481_v20  ;;  %v1529_v40 = vld [vmem:[%s6645_s10 + $0x10e8] sm:$0xff] }
 0x24d   : > { %3224 = vst [vmem:[%s7356_s15 + $0x48] sm:$0xff] %v4827_v19  ;;  %2822 = vmatpush1.bf16.msra.mxu1 %v1738_v46  ;;  %2697 = vmatprep.subr.bf16.mxu0 %v1753_v1  ;;  %v1449_v46 = vld [vmem:[%s6645_s10 + $0xe68] sm:$0xff]  ;;  %v1451_v1 = vld [vmem:[%s6645_s10 + $0xe78] sm:$0xff]  ;;  %v1786_v10 = vpack.c.bf16 %v1434_v63, %v1418_v57  ;;  %v1546_v21 = vld [vmem:[%s6645_s10 + $0x1170] sm:$0xff] }
 0x24e   : > { %2823 = vmatprep.subr.bf16.mxu1 %v1755_v12  ;;  %v2026_v30 = vpop.f32.mrb[4].mxu0  ;;  %v1801_v11 = vpack.c.bf16 %v1465_v50, %v1449_v46  ;;  %v1464_v12 = vld [vmem:[%s6645_s10 + $0xee0] sm:$0xff]  ;;  %v1803_v19 = vpack.c.bf16 %v1467_v2, %v1451_v1  ;;  %v1514_v2 = vld [vmem:[%s6645_s10 + $0x1070] sm:$0xff] }
 0x24f   : > { %v2152_v38 = vpop.f32.mrb[4].mxu1  ;;  %v2028_v39 = vpop.f32.mrb[5].mxu0  ;;  %v1512_v50 = vld [vmem:[%s6645_s10 + $0x1060] sm:$0xff] }
 0x250   : > { %2698 = vmatpush1.bf16.msra.mxu0 %v1752_v22  ;;  %v4834_v43 = vpack.c.bf16 %v2028_v39, %v2026_v30  ;;  %v2154_v44 = vpop.f32.mrb[5].mxu1  ;;  %v2030_v45 = vpop.f32.mrb[6].mxu0 }
 0x251   : > { %2824 = vmatpush1.bf16.msra.mxu1 %v1754_v25  ;;  %v4835_v49 = vpack.c.bf16 %v2154_v44, %v2152_v38  ;;  %v7381_v51 = vpack.c.bf16 %v2030_v45, %v2026_v30  ;;  %v2156_v52 = vpop.f32.mrb[6].mxu1  ;;  %2699 = vmatprep.subr.bf16.mxu0 %v1769_v26  ;;  %v2032_v53 = vpop.f32.mrb[7].mxu0  ;;  %v1483_v25 = vld [vmem:[%s6645_s10 + $0xf78] sm:$0xff]  ;;  %v1800_v30 = vpack.c.bf16 %v1464_v12, %v1448_v9  ;;  %v1545_v9 = vld [vmem:[%s6645_s10 + $0x1168] sm:$0xff] }
 0x252   : > { %3231 = vst [vmem:[%s7356_s15 + $0x80] sm:$0xff] %v4834_v43  ;;  %v7387_v58 = vpack.c.bf16 %v2156_v52, %v2152_v38  ;;  %2825 = vmatprep.subr.bf16.mxu1 %v1771_v31  ;;  %v7389_v59 = vpack.c.bf16 %v2032_v53, %v2028_v39  ;;  %v4842_v60 = vpack.c.bf16 %v2032_v53, %v2030_v45  ;;  %v2158_v61 = vpop.f32.mrb[7].mxu1  ;;  %v1499_v26 = vld [vmem:[%s6645_s10 + $0xff8] sm:$0xff]  ;;  %v1496_v43 = vld [vmem:[%s6645_s10 + $0xfe0] sm:$0xff]  ;;  %v1498_v53 = vld [vmem:[%s6645_s10 + $0xff0] sm:$0xff] }
 0x253   : > { %3232 = vst [vmem:[%s7356_s15 + $0x88] sm:$0xff] %v4835_v49  ;;  %v7395_v0 = vpack.c.bf16 %v2158_v61, %v2154_v44  ;;  %v4843_v5 = vpack.c.bf16 %v2158_v61, %v2156_v52  ;;  %v1802_v31 = vpack.c.bf16 %v1466_v15, %v1450_v13  ;;  %v1482_v44 = vld [vmem:[%s6645_s10 + $0xf70] sm:$0xff]  ;;  %v1819_v52 = vpack.c.bf16 %v1499_v26, %v1483_v25  ;;  %v1531_v61 = vld [vmem:[%s6645_s10 + $0x10f8] sm:$0xff] }
 0x254   : > { %3239 = vst [vmem:[%s7356_s15 + $0xc0] sm:$0xff] %v4842_v60  ;;  %2700 = vmatpush1.bf16.msra.mxu0 %v1768_v32  ;;  %v1515_v60 = vld [vmem:[%s6645_s10 + $0x1078] sm:$0xff]  ;;  %v1818_v63 = vpack.c.bf16 %v1498_v53, %v1482_v44 }
 0x255   : > { %3240 = vst [vmem:[%s7356_s15 + $0xc8] sm:$0xff] %v4843_v5  ;;  %2826 = vmatpush1.bf16.msra.mxu1 %v1770_v47  ;;  %2701 = vmatprep.subr.bf16.mxu0 %v1785_v54  ;;  %v1513_v54 = vld [vmem:[%s6645_s10 + $0x1068] sm:$0xff]  ;;  %v1528_v5 = vld [vmem:[%s6645_s10 + $0x10e0] sm:$0xff]  ;;  %v1835_v1 = vpack.c.bf16 %v1531_v61, %v1515_v60  ;;  %v1547_v12 = vld [vmem:[%s6645_s10 + $0x1178] sm:$0xff] }
 0x256   : > { %2827 = vmatprep.subr.bf16.mxu1 %v1787_v62  ;;  %v2036_v16 = vpop.f32.mrb[8].mxu0  ;;  %v1816_v62 = vpack.c.bf16 %v1496_v43, %v1480_v42  ;;  %v1833_v46 = vpack.c.bf16 %v1529_v40, %v1513_v54  ;;  %v1563_v13 = vld [vmem:[%s6645_s10 + $0x11f8] sm:$0xff] }
 0x257   : > { %v2162_v22 = vpop.f32.mrb[8].mxu1  ;;  %v2038_v23 = vpop.f32.mrb[9].mxu0 }
 0x258   : > { %2702 = vmatpush1.bf16.msra.mxu0 %v1784_v8  ;;  %v4850_v27 = vpack.c.bf16 %v2038_v23, %v2036_v16  ;;  %v2164_v28 = vpop.f32.mrb[9].mxu1  ;;  %v2040_v29 = vpop.f32.mrb[10].mxu0  ;;  %v1530_v8 = vld [vmem:[%s6645_s10 + $0x10f0] sm:$0xff] }
 0x259   : > { %2828 = vmatpush1.bf16.msra.mxu1 %v1786_v10  ;;  %v4851_v36 = vpack.c.bf16 %v2164_v28, %v2162_v22  ;;  %v7409_v37 = vpack.c.bf16 %v2040_v29, %v2036_v16  ;;  %v2166_v38 = vpop.f32.mrb[10].mxu1  ;;  %2703 = vmatprep.subr.bf16.mxu0 %v1801_v11  ;;  %v2042_v39 = vpop.f32.mrb[11].mxu0  ;;  %v1561_v10 = vld [vmem:[%s6645_s10 + $0x11e8] sm:$0xff]  ;;  %v1832_v11 = vpack.c.bf16 %v1528_v5, %v1512_v50  ;;  %v1544_v16 = vld [vmem:[%s6645_s10 + $0x1160] sm:$0xff] }
 0x25a   : > { %3247 = vst [vmem:[%s7356_s15 + $0x100] sm:$0xff] %v4850_v27  ;;  %v7415_v45 = vpack.c.bf16 %v2166_v38, %v2162_v22  ;;  %2829 = vmatprep.subr.bf16.mxu1 %v1803_v19  ;;  %v7417_v32 = vpack.c.bf16 %v2042_v39, %v2038_v23  ;;  %v4858_v47 = vpack.c.bf16 %v2042_v39, %v2040_v29  ;;  %v2168_v49 = vpop.f32.mrb[11].mxu1  ;;  %v1560_v19 = vld [vmem:[%s6645_s10 + $0x11e0] sm:$0xff]  ;;  %v1562_v22 = vld [vmem:[%s6645_s10 + $0x11f0] sm:$0xff] }
 0x25b   : > { %9098 = vst [vmem:[#allocation5_spill] sm:$0xff] %v7409_v37  ;;  %3248 = vst [vmem:[%s7356_s15 + $0x108] sm:$0xff] %v4851_v36  ;;  %v7423_v56 = vpack.c.bf16 %v2168_v49, %v2164_v28  ;;  %v4859_v57 = vpack.c.bf16 %v2168_v49, %v2166_v38  ;;  %v1834_v15 = vpack.c.bf16 %v1530_v8, %v1514_v2 }
 0x25c   : > { %9099 = vst [vmem:[#allocation6_spill] sm:$0xff] %v7415_v45  ;;  %9100 = vst [vmem:[#allocation7_spill] sm:$0xff] %v7417_v32  ;;  %2704 = vmatpush1.bf16.msra.mxu0 %v1800_v30  ;;  %v1849_v20 = vpack.c.bf16 %v1561_v10, %v1545_v9  ;;  %v1851_v23 = vpack.c.bf16 %v1563_v13, %v1547_v12  ;;  %v1848_v25 = vpack.c.bf16 %v1560_v19, %v1544_v16 }
 0x25d   : > { %9101 = vst [vmem:[#allocation8_spill] sm:$0xff] %v7423_v56  ;;  %3255 = vst [vmem:[%s7356_s15 + $0x140] sm:$0xff] %v4858_v47  ;;  %2830 = vmatpush1.bf16.msra.mxu1 %v1802_v31  ;;  %2705 = vmatprep.subr.bf16.mxu0 %v1817_v41  ;;  %v1850_v26 = vpack.c.bf16 %v1562_v22, %v1546_v21 }
 0x25e   : > { %3256 = vst [vmem:[%s7356_s15 + $0x148] sm:$0xff] %v4859_v57  ;;  %2831 = vmatprep.subr.bf16.mxu1 %v1819_v52 }
 0x260   : > { %2706 = vmatpush1.bf16.msra.mxu0 %v1816_v62 }
 0x261   : > { %2832 = vmatpush1.bf16.msra.mxu1 %v1818_v63  ;;  %2738 = vmatprep.subr.bf16.mxu0 %v1833_v46 }
 0x262   : > { %2864 = vmatprep.subr.bf16.mxu1 %v1835_v1 }
 0x263   : > { %2708 = vmatmul.mubr.bf16.vlgmr.msra.gmra.mrb[36].mxu0 %v7189_v24 }
 0x264   : > { %2834 = vmatmul.mubr.bf16.vlgmr.msra.gmra.mrb[36].mxu1 %v7189_v24  ;;  %2739 = vmatpush1.bf16.msra.mxu0 %v1832_v11 }
 0x265   : > { %2865 = vmatpush1.bf16.msra.mxu1 %v1834_v15  ;;  %2717 = vmatprep.mubr.bf16.mxu0 %v7198_v14 }
 0x266   : > { %2843 = vmatprep.mubr.bf16.mxu1 %v7198_v14  ;;  %2740 = vmatprep.subr.bf16.mxu0 %v1849_v20 }
 0x267   : > { %2866 = vmatprep.subr.bf16.mxu1 %v1851_v23 }
 0x268   : > { %2741 = vmatpush1.bf16.msra.mxu0 %v1848_v25 }
 0x269   : > { %2867 = vmatpush1.bf16.msra.mxu1 %v1850_v26 }
 0x26b   : > { %2718 = vmatmul.mubr.bf16.gmra.mrb[40].mxu0 %v7205_v33 }
 0x26c   : > { %2844 = vmatmul.mubr.bf16.gmra.mrb[40].mxu1 %v7205_v33  ;;  %2727 = vmatprep.mubr.bf16.mxu0 %v7212_v34 }
 0x26d   : > { %2853 = vmatprep.mubr.bf16.mxu1 %v7212_v34 }
 0x273   : > { %2728 = vmatmul.mubr.bf16.gmra.mrb[44].mxu0 %v7219_v35 }
 0x274   : > { %2854 = vmatmul.mubr.bf16.gmra.mrb[44].mxu1 %v7219_v35  ;;  %2770 = vmatprep.mubr.bf16.mxu0 %v5600_v7 }
 0x275   : > { %2896 = vmatprep.mubr.bf16.mxu1 %v5600_v7 }
 0x27b   : > { %4734 = vmatmul.mubr.msk.bf16.vlgmr.msra.gmra.mrb[36].mxu0 %vm1909_vm0, %v7242_v55 }
 0x27c   : > { %4737 = vmatmul.mubr.msk.bf16.vlgmr.msra.gmra.mrb[36].mxu1 %vm1909_vm0, %v7242_v55  ;;  %2780 = vmatprep.mubr.bf16.mxu0 %v5600_v7 }
 0x27d   : > { %2906 = vmatprep.mubr.bf16.mxu1 %v5600_v7 }
 0x283   : > { %4735 = vmatmul.mubr.msk.bf16.gmra.mrb[40].mxu0 %vm1909_vm0, %v7269_v17 }
 0x284   : > { %4738 = vmatmul.mubr.msk.bf16.gmra.mrb[40].mxu1 %vm1909_vm0, %v7269_v17  ;;  %2790 = vmatprep.mubr.bf16.mxu0 %v5600_v7 }
 0x285   : > { %2916 = vmatprep.mubr.bf16.mxu1 %v5600_v7 }
 0x28b   : > { %4736 = vmatmul.mubr.msk.bf16.gmra.mrb[44].mxu0 %vm1909_vm0, %v7296_v48 }
 0x28c   : > { %4739 = vmatmul.mubr.msk.bf16.gmra.mrb[44].mxu1 %vm1909_vm0, %v7296_v48 }
 0x29e   : > { %v2268_v24 = vpop.f32.mrb[12].mxu0 }
 0x29f   : > { %v2394_v14 = vpop.f32.mrb[12].mxu1  ;;  %v2270_v33 = vpop.f32.mrb[13].mxu0 }
 0x2a0   : > { %v4820_v34 = vpack.c.bf16 %v2270_v33, %v2268_v24  ;;  %v2396_v35 = vpop.f32.mrb[13].mxu1  ;;  %v2272_v55 = vpop.f32.mrb[14].mxu0 }
 0x2a1   : > { %v4821_v17 = vpack.c.bf16 %v2396_v35, %v2394_v14  ;;  %v7469_v27 = vpack.c.bf16 %v2272_v55, %v2268_v24  ;;  %v2398_v28 = vpop.f32.mrb[14].mxu1  ;;  %v2274_v7 = vpop.f32.mrb[15].mxu0 }
 0x2a2   : > { %3217 = vst [vmem:[%s7356_s15 + $0x10] sm:$0xff] %v4820_v34  ;;  %v7472_v29 = vpack.c.bf16 %v2398_v28, %v2394_v14  ;;  %v7474_v30 = vpack.c.bf16 %v2274_v7, %v2270_v33  ;;  %v4828_v48 = vpack.c.bf16 %v2274_v7, %v2272_v55  ;;  %v2400_v31 = vpop.f32.mrb[15].mxu1 }
 0x2a3   : > { %3218 = vst [vmem:[%s7356_s15 + $0x18] sm:$0xff] %v4821_v17  ;;  %v7477_v36 = vpack.c.bf16 %v2400_v31, %v2396_v35  ;;  %v4829_v38 = vpack.c.bf16 %v2400_v31, %v2398_v28 }
 0x2a4   : > { %3225 = vst [vmem:[%s7356_s15 + $0x50] sm:$0xff] %v4828_v48 }
 0x2a5   : > { %3226 = vst [vmem:[%s7356_s15 + $0x58] sm:$0xff] %v4829_v38 }
 0x2a6   : > { %v2278_v39 = vpop.f32.mrb[16].mxu0 }
 0x2a7   : > { %v2404_v41 = vpop.f32.mrb[16].mxu1  ;;  %v2280_v42 = vpop.f32.mrb[17].mxu0 }
 0x2a8   : > { %v4836_v43 = vpack.c.bf16 %v2280_v42, %v2278_v39  ;;  %v2406_v44 = vpop.f32.mrb[17].mxu1  ;;  %v2282_v47 = vpop.f32.mrb[18].mxu0 }
 0x2a9   : > { %v4837_v49 = vpack.c.bf16 %v2406_v44, %v2404_v41  ;;  %v7481_v52 = vpack.c.bf16 %v2282_v47, %v2278_v39  ;;  %v2408_v53 = vpop.f32.mrb[18].mxu1  ;;  %v2284_v54 = vpop.f32.mrb[19].mxu0 }
 0x2aa   : > { %3233 = vst [vmem:[%s7356_s15 + $0x90] sm:$0xff] %v4836_v43  ;;  %v7484_v40 = vpack.c.bf16 %v2408_v53, %v2404_v41  ;;  %v7486_v57 = vpack.c.bf16 %v2284_v54, %v2280_v42  ;;  %v4844_v60 = vpack.c.bf16 %v2284_v54, %v2282_v47  ;;  %v2410_v61 = vpop.f32.mrb[19].mxu1 }
 0x2ab   : > { %9102 = vst [vmem:[#allocation9_spill] sm:$0xff] %v7481_v52  ;;  %3234 = vst [vmem:[%s7356_s15 + $0x98] sm:$0xff] %v4837_v49  ;;  %v7489_v62 = vpack.c.bf16 %v2410_v61, %v2406_v44  ;;  %v4845_v63 = vpack.c.bf16 %v2410_v61, %v2408_v53 }
 0x2ac   : > { %9103 = vst [vmem:[#allocation10_spill] sm:$0xff] %v7484_v40  ;;  %9104 = vst [vmem:[#allocation11_spill] sm:$0xff] %v7486_v57 }
 0x2ad   : > { %9105 = vst [vmem:[#allocation12_spill] sm:$0xff] %v7489_v62  ;;  %3241 = vst [vmem:[%s7356_s15 + $0xd0] sm:$0xff] %v4844_v60 }
 0x2ae   : > { %3242 = vst [vmem:[%s7356_s15 + $0xd8] sm:$0xff] %v4845_v63  ;;  %v2288_v46 = vpop.f32.mrb[20].mxu0 }
 0x2af   : > { %v2414_v50 = vpop.f32.mrb[20].mxu1  ;;  %v2290_v5 = vpop.f32.mrb[21].mxu0 }
 0x2b0   : > { %v4852_v1 = vpack.c.bf16 %v2290_v5, %v2288_v46  ;;  %v2416_v2 = vpop.f32.mrb[21].mxu1  ;;  %v2292_v8 = vpop.f32.mrb[22].mxu0 }
 0x2b1   : > { %v4853_v9 = vpack.c.bf16 %v2416_v2, %v2414_v50  ;;  %v7493_v10 = vpack.c.bf16 %v2292_v8, %v2288_v46  ;;  %v2418_v11 = vpop.f32.mrb[22].mxu1  ;;  %v2294_v12 = vpop.f32.mrb[23].mxu0 }
 0x2b2   : > { %3249 = vst [vmem:[%s7356_s15 + $0x110] sm:$0xff] %v4852_v1  ;;  %v7496_v13 = vpack.c.bf16 %v2418_v11, %v2414_v50  ;;  %v7498_v15 = vpack.c.bf16 %v2294_v12, %v2290_v5  ;;  %v4860_v16 = vpack.c.bf16 %v2294_v12, %v2292_v8  ;;  %v2420_v19 = vpop.f32.mrb[23].mxu1 }
 0x2b3   : > { %9106 = vst [vmem:[#allocation13_spill] sm:$0xff] %v7493_v10  ;;  %3250 = vst [vmem:[%s7356_s15 + $0x118] sm:$0xff] %v4853_v9  ;;  %v7501_v20 = vpack.c.bf16 %v2420_v19, %v2416_v2  ;;  %v4861_v21 = vpack.c.bf16 %v2420_v19, %v2418_v11 }
 0x2b4   : > { %9107 = vst [vmem:[#allocation14_spill] sm:$0xff] %v7496_v13  ;;  %9108 = vst [vmem:[#allocation15_spill] sm:$0xff] %v7498_v15 }
 0x2b5   : > { %9109 = vst [vmem:[#allocation16_spill] sm:$0xff] %v7501_v20  ;;  %3257 = vst [vmem:[%s7356_s15 + $0x150] sm:$0xff] %v4860_v16 }
 0x2b6   : > { %3258 = vst [vmem:[%s7356_s15 + $0x158] sm:$0xff] %v4861_v21 }
 0x2f6   : > { %v2520_v22 = vpop.f32.mrb[24].mxu0 }
 0x2f7   : > { %v2646_v23 = vpop.f32.mrb[24].mxu1  ;;  %v2522_v25 = vpop.f32.mrb[25].mxu0 }
 0x2f8   : > { %v4822_v26 = vpack.c.bf16 %v2522_v25, %v2520_v22  ;;  %v2648_v24 = vpop.f32.mrb[25].mxu1  ;;  %v2524_v14 = vpop.f32.mrb[26].mxu0 }
 0x2f9   : > { %v4823_v33 = vpack.c.bf16 %v2648_v24, %v2646_v23  ;;  %v7506_v34 = vpack.c.bf16 %v2524_v14, %v2520_v22  ;;  %v2650_v35 = vpop.f32.mrb[26].mxu1  ;;  %v2526_v55 = vpop.f32.mrb[27].mxu0 }
 0x2fa   : > { %3219 = vst [vmem:[%s7356_s15 + $0x20] sm:$0xff] %v4822_v26  ;;  %v7509_v17 = vpack.c.bf16 %v2650_v35, %v2646_v23  ;;  %v7511_v28 = vpack.c.bf16 %v2526_v55, %v2522_v25  ;;  %v4830_v7 = vpack.c.bf16 %v2526_v55, %v2524_v14  ;;  %v2652_v48 = vpop.f32.mrb[27].mxu1 }
 0x2fb   : > { %9110 = vst [vmem:[#allocation17_spill] sm:$0xff] %v7506_v34  ;;  %3220 = vst [vmem:[%s7356_s15 + $0x28] sm:$0xff] %v4823_v33  ;;  %v7514_v31 = vpack.c.bf16 %v2652_v48, %v2648_v24  ;;  %v4831_v38 = vpack.c.bf16 %v2652_v48, %v2650_v35 }
 0x2fc   : > { %9111 = vst [vmem:[#allocation18_spill] sm:$0xff] %v7509_v17  ;;  %3227 = vst [vmem:[%s7356_s15 + $0x60] sm:$0xff] %v4830_v7 }
 0x2fd   : > { %9112 = vst [vmem:[#allocation19_spill] sm:$0xff] %v7514_v31  ;;  %3228 = vst [vmem:[%s7356_s15 + $0x68] sm:$0xff] %v4831_v38 }
 0x2fe   : > { %v2530_v39 = vpop.f32.mrb[28].mxu0 }
 0x2ff   : > { %v2656_v41 = vpop.f32.mrb[28].mxu1  ;;  %v2532_v42 = vpop.f32.mrb[29].mxu0 }
 0x300   : > { %v4838_v43 = vpack.c.bf16 %v2532_v42, %v2530_v39  ;;  %v2658_v44 = vpop.f32.mrb[29].mxu1  ;;  %v2534_v47 = vpop.f32.mrb[30].mxu0 }
 0x301   : > { %v4839_v49 = vpack.c.bf16 %v2658_v44, %v2656_v41  ;;  %v7518_v53 = vpack.c.bf16 %v2534_v47, %v2530_v39  ;;  %v2660_v54 = vpop.f32.mrb[30].mxu1  ;;  %v2536_v60 = vpop.f32.mrb[31].mxu0 }
 0x302   : > { %3235 = vst [vmem:[%s7356_s15 + $0xa0] sm:$0xff] %v4838_v43  ;;  %v7521_v61 = vpack.c.bf16 %v2660_v54, %v2656_v41  ;;  %v7523_v63 = vpack.c.bf16 %v2536_v60, %v2532_v42  ;;  %v4846_v46 = vpack.c.bf16 %v2536_v60, %v2534_v47  ;;  %v2662_v50 = vpop.f32.mrb[31].mxu1 }
 0x303   : > { %9113 = vst [vmem:[#allocation20_spill] sm:$0xff] %v7518_v53  ;;  %3236 = vst [vmem:[%s7356_s15 + $0xa8] sm:$0xff] %v4839_v49  ;;  %v7526_v5 = vpack.c.bf16 %v2662_v50, %v2658_v44  ;;  %v4847_v1 = vpack.c.bf16 %v2662_v50, %v2660_v54 }
 0x304   : > { %9114 = vst [vmem:[#allocation21_spill] sm:$0xff] %v7521_v61  ;;  %9115 = vst [vmem:[#allocation22_spill] sm:$0xff] %v7523_v63 }
 0x305   : > { %9116 = vst [vmem:[#allocation23_spill] sm:$0xff] %v7526_v5  ;;  %3243 = vst [vmem:[%s7356_s15 + $0xe0] sm:$0xff] %v4846_v46 }
 0x306   : > { %3244 = vst [vmem:[%s7356_s15 + $0xe8] sm:$0xff] %v4847_v1  ;;  %v2540_v2 = vpop.f32.mrb[32].mxu0 }
 0x307   : > { %v2666_v8 = vpop.f32.mrb[32].mxu1  ;;  %v2542_v9 = vpop.f32.mrb[33].mxu0 }
 0x308   : > { %v4854_v11 = vpack.c.bf16 %v2542_v9, %v2540_v2  ;;  %v2668_v12 = vpop.f32.mrb[33].mxu1  ;;  %v2544_v16 = vpop.f32.mrb[34].mxu0 }
 0x309   : > { %v4855_v19 = vpack.c.bf16 %v2668_v12, %v2666_v8  ;;  %v7530_v21 = vpack.c.bf16 %v2544_v16, %v2540_v2  ;;  %v2670_v22 = vpop.f32.mrb[34].mxu1  ;;  %v2546_v23 = vpop.f32.mrb[35].mxu0 }
 0x30a   : > { %3251 = vst [vmem:[%s7356_s15 + $0x120] sm:$0xff] %v4854_v11  ;;  %v7533_v25 = vpack.c.bf16 %v2670_v22, %v2666_v8  ;;  %v7535_v26 = vpack.c.bf16 %v2546_v23, %v2542_v9  ;;  %v4862_v24 = vpack.c.bf16 %v2546_v23, %v2544_v16  ;;  %v2672_v14 = vpop.f32.mrb[35].mxu1 }
 0x30b   : > { %9117 = vst [vmem:[#allocation24_spill] sm:$0xff] %v7530_v21  ;;  %3252 = vst [vmem:[%s7356_s15 + $0x128] sm:$0xff] %v4855_v19  ;;  %v7538_v33 = vpack.c.bf16 %v2672_v14, %v2668_v12  ;;  %v4863_v35 = vpack.c.bf16 %v2672_v14, %v2670_v22 }
 0x30c   : > { %9118 = vst [vmem:[#allocation25_spill] sm:$0xff] %v7533_v25  ;;  %9119 = vst [vmem:[#allocation26_spill] sm:$0xff] %v7535_v26 }
 0x30d   : > { %9120 = vst [vmem:[#allocation27_spill] sm:$0xff] %v7538_v33  ;;  %3259 = vst [vmem:[%s7356_s15 + $0x160] sm:$0xff] %v4862_v24 }
 0x30e   : > { %3260 = vst [vmem:[%s7356_s15 + $0x168] sm:$0xff] %v4863_v35 }
 0x34e   : > { %v2772_v55 = vpop.f32.mrb[36].mxu0 }
 0x34f   : > { %v2898_v7 = vpop.f32.mrb[36].mxu1  ;;  %v2774_v48 = vpop.f32.mrb[37].mxu0 }
 0x350   : > { %v4824_v38 = vpack.c.bf16 %v2774_v48, %v2772_v55  ;;  %v2900_v39 = vpop.f32.mrb[37].mxu1  ;;  %v2776_v41 = vpop.f32.mrb[38].mxu0 }
 0x351   : > { %v4825_v42 = vpack.c.bf16 %v2900_v39, %v2898_v7  ;;  %v7542_v43 = vpack.c.bf16 %v2776_v41, %v2772_v55  ;;  %v2902_v44 = vpop.f32.mrb[38].mxu1  ;;  %v2778_v47 = vpop.f32.mrb[39].mxu0 }
 0x352   : > { %3221 = vst [vmem:[%s7356_s15 + $0x30] sm:$0xff] %v4824_v38  ;;  %v7545_v49 = vpack.c.bf16 %v2902_v44, %v2898_v7  ;;  %v7547_v54 = vpack.c.bf16 %v2778_v47, %v2774_v48  ;;  %v4832_v60 = vpack.c.bf16 %v2778_v47, %v2776_v41  ;;  %v2904_v46 = vpop.f32.mrb[39].mxu1 }
 0x353   : > { %9121 = vst [vmem:[#allocation28_spill] sm:$0xff] %v7542_v43  ;;  %3222 = vst [vmem:[%s7356_s15 + $0x38] sm:$0xff] %v4825_v42  ;;  %v7550_v50 = vpack.c.bf16 %v2904_v46, %v2900_v39  ;;  %v4833_v1 = vpack.c.bf16 %v2904_v46, %v2902_v44 }
 0x354   : > { %9122 = vst [vmem:[#allocation29_spill] sm:$0xff] %v7547_v54  ;;  %3229 = vst [vmem:[%s7356_s15 + $0x70] sm:$0xff] %v4832_v60 }
 0x355   : > { %3230 = vst [vmem:[%s7356_s15 + $0x78] sm:$0xff] %v4833_v1 }
 0x356   : > { %v2782_v2 = vpop.f32.mrb[40].mxu0 }
 0x357   : > { %v2908_v8 = vpop.f32.mrb[40].mxu1  ;;  %v2784_v9 = vpop.f32.mrb[41].mxu0 }
 0x358   : > { %v4840_v11 = vpack.c.bf16 %v2784_v9, %v2782_v2  ;;  %v2910_v12 = vpop.f32.mrb[41].mxu1  ;;  %v2786_v16 = vpop.f32.mrb[42].mxu0 }
 0x359   : > { %v4841_v19 = vpack.c.bf16 %v2910_v12, %v2908_v8  ;;  %v7554_v22 = vpack.c.bf16 %v2786_v16, %v2782_v2  ;;  %v2912_v23 = vpop.f32.mrb[42].mxu1  ;;  %v2788_v24 = vpop.f32.mrb[43].mxu0 }
 0x35a   : > { %3237 = vst [vmem:[%s7356_s15 + $0xb0] sm:$0xff] %v4840_v11  ;;  %v7557_v14 = vpack.c.bf16 %v2912_v23, %v2908_v8  ;;  %v7559_v35 = vpack.c.bf16 %v2788_v24, %v2784_v9  ;;  %v4848_v55 = vpack.c.bf16 %v2788_v24, %v2786_v16  ;;  %v2914_v7 = vpop.f32.mrb[43].mxu1  ;;  %v5601_v24 = vmov (%p3264_p0), 0.0  }
 0x35b   : > { %9123 = vst [vmem:[#allocation30_spill] sm:$0xff] %v7554_v22  ;;  %3238 = vst [vmem:[%s7356_s15 + $0xb8] sm:$0xff] %v4841_v19  ;;  %v7562_v48 = vpack.c.bf16 %v2914_v7, %v2910_v12  ;;  %v4849_v38 = vpack.c.bf16 %v2914_v7, %v2912_v23 }
 0x35c   : > { %9124 = vst [vmem:[#allocation31_spill] sm:$0xff] %v7557_v14  ;;  %9125 = vst [vmem:[#allocation32_spill] sm:$0xff] %v7559_v35 }
 0x35d   : > { %9126 = vst [vmem:[#allocation33_spill] sm:$0xff] %v7562_v48  ;;  %3245 = vst [vmem:[%s7356_s15 + $0xf0] sm:$0xff] %v4848_v55 }
 0x35e   : > { %3246 = vst [vmem:[%s7356_s15 + $0xf8] sm:$0xff] %v4849_v38  ;;  %v2792_v39 = vpop.f32.mrb[44].mxu0  ;;  %3270 = vst.msk [vmem:[%s9009_s3] sm:$0xff] (%p3264_p0), %vm3269_vm1, %v5601_v24 }
 0x35f   : > { %v2918_v41 = vpop.f32.mrb[44].mxu1  ;;  %v2794_v42 = vpop.f32.mrb[45].mxu0  ;;  %3271 = vst.msk [vmem:[%s9009_s3 + $0x8] sm:$0xff] (%p3264_p0), %vm3269_vm1, %v5601_v24  ;;  %3272 = vst.msk [vmem:[%s9009_s3 + $0x10] sm:$0xff] (%p3264_p0), %vm3269_vm1, %v5601_v24 }
 0x360   : > { %v4856_v44 = vpack.c.bf16 %v2794_v42, %v2792_v39  ;;  %v2920_v47 = vpop.f32.mrb[45].mxu1  ;;  %v2796_v60 = vpop.f32.mrb[46].mxu0  ;;  %3268 = sbr.rel (!%p3264_p0) target bundleno = 873 (0x369), region = 98  ;;  %3273 = vst.msk [vmem:[%s9009_s3 + $0x18] sm:$0xff] (%p3264_p0), %vm3269_vm1, %v5601_v24  ;;  %3274 = vst.msk [vmem:[%s9009_s3 + $0x20] sm:$0xff] (%p3264_p0), %vm3269_vm1, %v5601_v24 }
 0x361   : > { %v4857_v46 = vpack.c.bf16 %v2920_v47, %v2918_v41  ;;  %v7566_v1 = vpack.c.bf16 %v2796_v60, %v2792_v39  ;;  %v2922_v2 = vpop.f32.mrb[46].mxu1  ;;  %v2798_v8 = vpop.f32.mrb[47].mxu0  ;;  %3275 = vst.msk [vmem:[%s9009_s3 + $0x28] sm:$0xff] (%p3264_p0), %vm3269_vm1, %v5601_v24  ;;  %3276 = vst.msk [vmem:[%s9010_s4] sm:$0xff] (%p3264_p0), %vm3269_vm1, %v5601_v24 }
 0x362   : > { %3253 = vst [vmem:[%s7356_s15 + $0x130] sm:$0xff] %v4856_v44  ;;  %v7569_v9 = vpack.c.bf16 %v2922_v2, %v2918_v41  ;;  %v7571_v11 = vpack.c.bf16 %v2798_v8, %v2794_v42  ;;  %v4864_v12 = vpack.c.bf16 %v2798_v8, %v2796_v60  ;;  %v2924_v16 = vpop.f32.mrb[47].mxu1  ;;  %3277 = vst.msk [vmem:[%s9010_s4 + $0x8] sm:$0xff] (%p3264_p0), %vm3269_vm1, %v5601_v24 }
 0x363   : > { %9127 = vst [vmem:[#allocation34_spill] sm:$0xff] %v7566_v1  ;;  %3254 = vst [vmem:[%s7356_s15 + $0x138] sm:$0xff] %v4857_v46  ;;  %v7574_v19 = vpack.c.bf16 %v2924_v16, %v2920_v47  ;;  %v4865_v23 = vpack.c.bf16 %v2924_v16, %v2922_v2 }
 0x364   : > { %9128 = vst [vmem:[#allocation35_spill] sm:$0xff] %v7569_v9  ;;  %9129 = vst [vmem:[#allocation36_spill] sm:$0xff] %v7571_v11 }
 0x365   : > { %9130 = vst [vmem:[#allocation37_spill] sm:$0xff] %v7574_v19  ;;  %3261 = vst [vmem:[%s7356_s15 + $0x170] sm:$0xff] %v4864_v12 }
 0x366   : > { %3262 = vst [vmem:[%s7356_s15 + $0x178] sm:$0xff] %v4865_v23  ;;  %3278 = vst.msk [vmem:[%s9010_s4 + $0x10] sm:$0xff] (%p3264_p0), %vm3269_vm1, %v5601_v24 }
 0x367   : > { %3279 = vst.msk [vmem:[%s9010_s4 + $0x18] sm:$0xff] %vm3269_vm1, %v5601_v24  ;;  %3280 = vst.msk [vmem:[%s9010_s4 + $0x20] sm:$0xff] %vm3269_vm1, %v5601_v24 }
 0x368   : > { %3281 = vst.msk [vmem:[%s9010_s4 + $0x28] sm:$0xff] %vm3269_vm1, %v5601_v24 }
 0x369 PF: > { %v3285_v55 = vlaneseq  ;;  %s4789_s28 = sshll.u32 %s5460_s17, 11  ;;  %v3352_v38 = vunpack.c.l.bf16 %v7381_v51  ;;  %v3353_v41 = vunpack.c.l.bf16 %v7389_v59  ;;  %v3354_v42 = vunpack.c.l.bf16 %v7387_v58  ;;  %s4790_s26 = sshll.u32 (%p5664_p6), %s5460_s17, 4 }
 0x36a   : > { %s3302_s21 = ssub.s32 3136, %s4789_s28  ;;  %v3355_v44 = vunpack.c.l.bf16 %v7395_v0  ;;  %v3356_v60 = vunpack.c.l.bf16 %v7481_v52  ;;  %v3357_v46 = vunpack.c.l.bf16 %v7486_v57  ;;  %v3358_v2 = vunpack.c.l.bf16 %v7484_v40  ;;  %s4867_s29 = sshll.u32 (%p5664_p6), %s5460_s17, 6 }
 0x36b   : > { %v3286_v7 = vand.u32 127, %v3285_v55  ;;  %v3303_v47 = vstv %s3302_s21  ;;  %v3359_v12 = vunpack.c.l.bf16 %v7489_v62  ;;  %v3360_v16 = vunpack.c.l.bf16 %v7518_v53  ;;  %s3901_s0 = ssub.s32 (%p5664_p6), 25, %s4790_s26  ;;  %s8510_s6 = scalar_lea.vmem (%p5664_p6), %s9008_s2, %s4867_s29  }
 0x36c   : > { %v3361_v23 = vunpack.c.l.bf16 %v7523_v63  ;;  %v3362_v55 = vunpack.c.l.bf16 %v7521_v61  ;;  %v3363_v19 = vunpack.c.l.bf16 %v7526_v5  ;;  %v3364_v9 = vunpack.c.l.bf16 %v7554_v22  ;;  %p3902_p1 = scmp.lt.s32.totalorder (%p5664_p6), %s3901_s0, 16 }
 0x36d   : > { %v3287_v39 = vadd.s32 128, %v3286_v7  ;;  %v3288_v8 = vadd.s32 256, %v3286_v7  ;;  %v3289_v24 = vadd.s32 384, %v3286_v7  ;;  %v3290_v11 = vadd.s32 512, %v3286_v7 }
 0x36e   : > { %v3291_v1 = vadd.s32 640, %v3286_v7  ;;  %vm7630_vm2 = vcmp.lt.s32.totalorder %v3286_v7, %v3303_v47  ;;  %v3292_v26 = vadd.s32 768, %v3286_v7  ;;  %v3293_v21 = vadd.s32 896, %v3286_v7 }
 0x36f   : > { %vm7634_vm3 = vcmp.lt.s32.totalorder %v3287_v39, %v3303_v47  ;;  %v3294_v20 = vadd.s32 1024, %v3286_v7  ;;  %v3295_v13 = vadd.s32 1152, %v3286_v7  ;;  %v3296_v15 = vadd.s32 1280, %v3286_v7 }
 0x370   : > { %v3297_v10 = vadd.s32 1408, %v3286_v7  ;;  %v3298_v56 = vadd.s32 1536, %v3286_v7  ;;  %vm7638_vm4 = vcmp.lt.s32.totalorder %v3288_v8, %v3303_v47  ;;  %v3299_v32 = vadd.s32 1664, %v3286_v7 }
 0x371   : > { %v3300_v37 = vadd.s32 1792, %v3286_v7  ;;  %v3480_v22 = vsel %vm7630_vm2, %v3352_v38, 0.0  ;;  %v3481_v39 = vsel %vm7634_vm3, %v3353_v41, 0.0  ;;  %v3301_v5 = vadd.s32 1920, %v3286_v7 }
 0x372   : > { %vm7646_vm5 = vcmp.lt.s32.totalorder %v3289_v24, %v3303_v47  ;;  %vm7650_vm6 = vcmp.lt.s32.totalorder %v3290_v11, %v3303_v47  ;;  %vm7654_vm7 = vcmp.lt.s32.totalorder %v3291_v1, %v3303_v47  ;;  %vm7658_vm8 = vcmp.lt.s32.totalorder %v3292_v26, %v3303_v47 }
 0x373   : > { %vm7662_vm9 = vcmp.lt.s32.totalorder %v3293_v21, %v3303_v47  ;;  %vm7666_vm10 = vcmp.lt.s32.totalorder %v3294_v20, %v3303_v47  ;;  %v3482_v11 = vsel %vm7638_vm4, %v3354_v42, 0.0  ;;  %vm7672_vm11 = vcmp.lt.s32.totalorder %v3295_v13, %v3303_v47 }
 0x374   : > { %vm7676_vm12 = vcmp.lt.s32.totalorder %v3296_v15, %v3303_v47  ;;  %vm7680_vm13 = vcmp.lt.s32.totalorder %v3297_v10, %v3303_v47  ;;  %v3584_v41 = vadd.f32 %v3481_v39, %v3480_v22  ;;  %vm7684_vm14 = vcmp.lt.s32.totalorder %v3298_v56, %v3303_v47 }
 0x375   : > { %vm7688_vm15 = vcmp.lt.s32.totalorder %v3299_v32, %v3303_v47  ;;  %v3365_v13 = vunpack.c.l.bf16 %v7559_v35  ;;  %v3483_v15 = vsel %vm7646_vm5, %v3355_v44, 0.0  ;;  %vm7695_vm0 = vcmp.lt.s32.totalorder %v3300_v37, %v3303_v47 }
 0x376   : > { %v3366_v10 = vunpack.c.l.bf16 %v7557_v14  ;;  %v3367_v56 = vunpack.c.l.bf16 %v7562_v48  ;;  %v3585_v62 = vadd.f32 %v3584_v41, %v3482_v11  ;;  %vm7701_vm1 = vcmp.lt.s32.totalorder %v3301_v5, %v3303_v47 }
 0x377   : > { %v3484_v32 = vsel %vm7650_vm6, %v3356_v60, 0.0  ;;  %v3485_v35 = vsel %vm7654_vm7, %v3357_v46, 0.0  ;;  %v3486_v37 = vsel %vm7658_vm8, %v3358_v2, 0.0  ;;  %v3487_v44 = vsel %vm7662_vm9, %v3359_v12, 0.0 }
 0x378   : > { %v3488_v48 = vsel %vm7666_vm10, %v3360_v16, 0.0  ;;  %v3489_v5 = vsel %vm7672_vm11, %v3361_v23, 0.0  ;;  %v3586_v47 = vadd.f32 %v3585_v62, %v3483_v15  ;;  %v3490_v41 = vsel %vm7676_vm12, %v3362_v55, 0.0 }
 0x379   : > { %v3491_v60 = vsel %vm7680_vm13, %v3363_v19, 0.0  ;;  %v7723_v46 = vsel %vm7684_vm14, %v3364_v9, 0.0  ;;  %v7727_v2 = vsel %vm7688_vm15, %v3365_v13, 0.0  ;;  %v7731_v12 = vsel %vm7695_vm0, %v3366_v10, 0.0 }
 0x37a   : > { %9163 = vst [vmem:[#allocation38_spill] sm:$0xff] %v7731_v12  ;;  %v7735_v62 = vsel %vm7701_vm1, %v3367_v56, 0.0  ;;  %v3587_v16 = vadd.f32 %v3586_v47, %v3484_v32  ;;  %v7737_v23 = vmul.f32 %v3480_v22, %v3480_v22  ;;  %v7739_v19 = vmul.f32 %v3481_v39, %v3481_v39 }
 0x37b   : > { %9164 = vst [vmem:[#allocation39_spill] sm:$0xff] %v7735_v62  ;;  %v7741_v55 = vmul.f32 %v3482_v11, %v3482_v11  ;;  %v3320_v9 = vunpack.c.l.bf16 %v7350_v4  ;;  %v3321_v13 = vunpack.c.l.bf16 %v7361_v6  ;;  %v7745_v57 = vmul.f32 %v3483_v15, %v3483_v15 }
 0x37c   : > { %9165 = vst [vmem:[#allocation40_spill] sm:$0xff] %v7737_v23  ;;  %9166 = vst [vmem:[#allocation41_spill] sm:$0xff] %v7739_v19  ;;  %v3588_v14 = vadd.f32 %v3587_v16, %v3485_v35  ;;  %v7747_v10 = vmul.f32 %v3484_v32, %v3484_v32  ;;  %v7749_v52 = vmul.f32 %v3485_v35, %v3485_v35  ;;  %v3322_v39 = vunpack.c.l.bf16 %v7359_v3 }
 0x37d   : > { %9167 = vst [vmem:[#allocation42_spill] sm:$0xff] %v7741_v55  ;;  %9168 = vst [vmem:[#allocation43_spill] sm:$0xff] %v7745_v57  ;;  %v7751_v56 = vmul.f32 %v3486_v37, %v3486_v37  ;;  %v7753_v47 = vmul.f32 %v3487_v44, %v3487_v44  ;;  %v7755_v22 = vmul.f32 %v3488_v48, %v3488_v48  ;;  %v3323_v35 = vunpack.c.l.bf16 %v7367_v18 }
 0x37e   : > { %9169 = vst [vmem:[#allocation44_spill] sm:$0xff] %v7747_v10  ;;  %9170 = vst [vmem:[#allocation45_spill] sm:$0xff] %v7749_v52  ;;  %v3589_v11 = vadd.f32 %v3588_v14, %v3486_v37  ;;  %v7758_v55 = vmul.f32 %v3489_v5, %v3489_v5  ;;  %v7760_v19 = vmul.f32 %v3490_v41, %v3490_v41  ;;  %v3448_v32 = vsel %vm7630_vm2, %v3320_v9, 0.0 }
 0x37f   : > { %9171 = vst [vmem:[#allocation46_spill] sm:$0xff] %v7751_v56  ;;  %9172 = vst [vmem:[#allocation47_spill] sm:$0xff] %v7753_v47  ;;  %v7762_v16 = vmul.f32 %v3491_v60, %v3491_v60  ;;  %v7766_v15 = vmul.f32 %v7723_v46, %v7723_v46  ;;  %v7775_v14 = vmul.f32 %v7727_v2, %v7727_v2  ;;  %v3324_v37 = vunpack.c.l.bf16 %v7469_v27 }
 0x380   : > { %9173 = vst [vmem:[#allocation48_spill] sm:$0xff] %v7755_v22  ;;  %9174 = vst [vmem:[#allocation49_spill] sm:$0xff] %v7758_v55  ;;  %v3449_v22 = vsel %vm7634_vm3, %v3321_v13, 0.0  ;;  %v3590_v47 = vadd.f32 %v3589_v11, %v3487_v44  ;;  %v3328_v55 = vunpack.c.l.bf16 %v7506_v34  ;;  %v3450_v9 = vsel %vm7638_vm4, %v3322_v39, 0.0 }
 0x381   : > { %9175 = vst [vmem:[#allocation50_spill] sm:$0xff] %v7760_v19  ;;  %9176 = vst [vmem:[#allocation51_spill] sm:$0xff] %v7762_v16  ;;  %v3325_v16 = vunpack.c.l.bf16 %v7474_v30  ;;  %v3326_v19 = vunpack.c.l.bf16 %v7472_v29  ;;  %v3329_v44 = vunpack.c.l.bf16 %v7511_v28  ;;  %v3330_v13 = vunpack.c.l.bf16 %v7509_v17 }
 0x382   : > { %9177 = vst [vmem:[#allocation52_spill] sm:$0xff] %v7766_v15  ;;  %9178 = vst [vmem:[#allocation53_spill] sm:$0xff] %v7775_v14  ;;  %v3327_v15 = vunpack.c.l.bf16 %v7477_v36  ;;  %v3591_v56 = vadd.f32 %v3590_v47, %v3488_v48  ;;  %v3550_v11 = vadd.f32 %v3449_v22, %v3448_v32  ;;  %v3331_v14 = vunpack.c.l.bf16 %v7514_v31 }
 0x383   : > { %v3332_v52 = vunpack.c.l.bf16 %v7542_v43  ;;  %v3333_v10 = vunpack.c.l.bf16 %v7547_v54  ;;  %v3451_v57 = vsel %vm7646_vm5, %v3323_v35, 0.0  ;;  %v3334_v34 = vunpack.c.l.bf16 %v7545_v49 }
 0x384   : > { %v3592_v23 = vadd.f32 %v3591_v56, %v3489_v5  ;;  %v3335_v39 = vunpack.c.l.bf16 %v7550_v50  ;;  %v3551_v48 = vadd.f32 %v3550_v11, %v3450_v9  ;;  %v3452_v47 = vsel %vm7650_vm6, %v3324_v37, 0.0 }
 0x385   : > { %v3453_v17 = vsel %vm7654_vm7, %v3325_v16, 0.0  ;;  %v3454_v43 = vsel %vm7658_vm8, %v3326_v19, 0.0  ;;  %v3455_v54 = vsel %vm7662_vm9, %v3327_v15, 0.0  ;;  %v3456_v5 = vsel %vm7666_vm10, %v3328_v55, 0.0 }
 0x386   : > { %v3593_v31 = vadd.f32 %v3592_v23, %v3490_v41  ;;  %v3457_v56 = vsel %vm7672_vm11, %v3329_v44, 0.0  ;;  %v3552_v35 = vadd.f32 %v3551_v48, %v3451_v57  ;;  %v3458_v37 = vsel %vm7676_vm12, %v3330_v13, 0.0 }
 0x387   : > { %v3459_v16 = vsel %vm7680_vm13, %v3331_v14, 0.0  ;;  %v7811_v19 = vsel %vm7684_vm14, %v3332_v52, 0.0  ;;  %v7815_v41 = vsel %vm7688_vm15, %v3333_v10, 0.0  ;;  %v7819_v55 = vsel %vm7695_vm0, %v3334_v34, 0.0 }
 0x388   : > { %v3594_v23 = vadd.f32 %v3593_v31, %v3491_v60  ;;  %v7823_v15 = vsel %vm7701_vm1, %v3335_v39, 0.0  ;;  %v3553_v44 = vadd.f32 %v3552_v35, %v3452_v47  ;;  %v7825_v13 = vmul.f32 %v3448_v32, %v3448_v32 }
 0x389   : > { %v7827_v14 = vmul.f32 %v3449_v22, %v3449_v22  ;;  %v7829_v52 = vmul.f32 %v3450_v9, %v3450_v9  ;;  %v7831_v11 = vmul.f32 %v3451_v57, %v3451_v57  ;;  %v7834_v60 = vmul.f32 %v3452_v47, %v3452_v47 }
 0x38a   : > { %9179 = vst [vmem:[#allocation54_spill] sm:$0xff] %v7825_v13  ;;  %v3595_v10 = vadd.f32 %v3594_v23, %v7723_v46  ;;  %v3554_v31 = vadd.f32 %v3553_v44, %v3453_v17  ;;  %v7836_v34 = vmul.f32 %v3453_v17, %v3453_v17  ;;  %v7838_v48 = vmul.f32 %v3454_v43, %v3454_v43  ;;  %v9251_v13 = vld [vmem:[#allocation34_spill] sm:$0xff] }
 0x38b   : > { %9180 = vst [vmem:[#allocation55_spill] sm:$0xff] %v7827_v14  ;;  %9181 = vst [vmem:[#allocation56_spill] sm:$0xff] %v7829_v52  ;;  %v7840_v39 = vmul.f32 %v3455_v54, %v3455_v54  ;;  %v3368_v32 = vunpack.c.h.bf16 %v7381_v51  ;;  %v3369_v22 = vunpack.c.h.bf16 %v7389_v59  ;;  %v7845_v57 = vmul.f32 %v3456_v5, %v3456_v5 }
 0x38c   : > { %9182 = vst [vmem:[#allocation57_spill] sm:$0xff] %v7831_v11  ;;  %9183 = vst [vmem:[#allocation58_spill] sm:$0xff] %v7834_v60  ;;  %v3596_v9 = vadd.f32 %v3595_v10, %v7727_v2  ;;  %v3555_v35 = vadd.f32 %v3554_v31, %v3454_v43  ;;  %v7847_v11 = vmul.f32 %v3457_v56, %v3457_v56  ;;  %v3370_v23 = vunpack.c.h.bf16 %v7387_v58 }
 0x38d   : > { %9184 = vst [vmem:[#allocation59_spill] sm:$0xff] %v7836_v34  ;;  %9185 = vst [vmem:[#allocation60_spill] sm:$0xff] %v7838_v48  ;;  %v7849_v46 = vmul.f32 %v3458_v37, %v3458_v37  ;;  %v7851_v47 = vmul.f32 %v3459_v16, %v3459_v16  ;;  %v7855_v17 = vmul.f32 %v7811_v19, %v7811_v19  ;;  %v3371_v10 = vunpack.c.h.bf16 %v7395_v0  ;;  %v9201_v0 = vld [vmem:[#allocation20_spill] sm:$0xff] }
 0x38e   : > { %9186 = vst [vmem:[#allocation61_spill] sm:$0xff] %v7840_v39  ;;  %9187 = vst [vmem:[#allocation62_spill] sm:$0xff] %v7845_v57  ;;  %v3597_v51 = vadd.f32 %v3596_v9, %v7731_v12  ;;  %v3556_v59 = vadd.f32 %v3555_v35, %v3455_v54  ;;  %v7861_v43 = vmul.f32 %v7815_v41, %v7815_v41  ;;  %v7874_v58 = vsel %vm7630_vm2, %v3368_v32, 0.0  ;;  %v9197_v35 = vld [vmem:[#allocation9_spill] sm:$0xff]  ;;  %v9203_v57 = vld [vmem:[#allocation22_spill] sm:$0xff] }
 0x38f   : > { %9188 = vst [vmem:[#allocation63_spill] sm:$0xff] %v7847_v11  ;;  %9189 = vst [vmem:[#allocation64_spill] sm:$0xff] %v7849_v46  ;;  %v7865_v2 = vmul.f32 %v7819_v55, %v7819_v55  ;;  %v7869_v44 = vmul.f32 %v7823_v15, %v7823_v15  ;;  %v7878_v54 = vsel %vm7634_vm3, %v3369_v22, 0.0  ;;  %v3372_v12 = vunpack.c.h.bf16 %v9197_v35 }
 0x390   : > { %9190 = vst [vmem:[#allocation65_spill] sm:$0xff] %v7851_v47  ;;  %9191 = vst [vmem:[#allocation66_spill] sm:$0xff] %v7855_v17  ;;  %v3598_v31 = vadd.f32 %v3597_v51, %v7735_v62  ;;  %v3557_v9 = vadd.f32 %v3556_v59, %v3456_v5  ;;  %v9199_v17 = vld [vmem:[#allocation10_spill] sm:$0xff]  ;;  %v3376_v11 = vunpack.c.h.bf16 %v9201_v0  ;;  %v7888_v32 = vsel %vm7638_vm4, %v3370_v23, 0.0  ;;  %v9204_v51 = vld [vmem:[#allocation21_spill] sm:$0xff] }
 0x391   : > { %9192 = vst [vmem:[#allocation67_spill] sm:$0xff] %v7861_v43  ;;  %9193 = vst [vmem:[#allocation68_spill] sm:$0xff] %v7865_v2  ;;  %v9198_v2 = vld [vmem:[#allocation11_spill] sm:$0xff]  ;;  %v3374_v47 = vunpack.c.h.bf16 %v9199_v17  ;;  %v3377_v39 = vunpack.c.h.bf16 %v9203_v57  ;;  %v3378_v5 = vunpack.c.h.bf16 %v9204_v51  ;;  %v3601_v59 = vadd.f32 %v7878_v54, %v7874_v58  ;;  %v9206_v17 = vld [vmem:[#allocation30_spill] sm:$0xff] }
 0x392   : > { %9194 = vst [vmem:[#allocation69_spill] sm:$0xff] %v7869_v44  ;;  %9195 = vst [vmem:[#allocation70_spill] sm:$0xff] %v7874_v58  ;;  %v3373_v43 = vunpack.c.h.bf16 %v9198_v2  ;;  %v9200_v44 = vld [vmem:[#allocation12_spill] sm:$0xff]  ;;  %3599 = vadd.xlane.f32.xlu1 %v3598_v31  ;;  %v3558_v22 = vadd.f32 %v3557_v9, %v3457_v56  ;;  %v9205_v2 = vld [vmem:[#allocation23_spill] sm:$0xff]  ;;  %v3380_v62 = vunpack.c.h.bf16 %v9206_v17  ;;  %v7899_v0 = vsel %vm7646_vm5, %v3371_v10, 0.0 }
 0x393   : > { %9196 = vst [vmem:[#allocation71_spill] sm:$0xff] %v7878_v54  ;;  %v3375_v46 = vunpack.c.h.bf16 %v9200_v44  ;;  %9202 = vst [vmem:[#allocation9_spill] sm:$0xff] %v7888_v32  ;;  %v3379_v35 = vunpack.c.h.bf16 %v9205_v2  ;;  %v9207_v44 = vld [vmem:[#allocation32_spill] sm:$0xff]  ;;  %v9209_v31 = vld [vmem:[#allocation31_spill] sm:$0xff]  ;;  %v3602_v51 = vadd.f32 %v3601_v59, %v7888_v32  ;;  %v7906_v34 = vsel %vm7650_vm6, %v3372_v12, 0.0 }
 0x394   : > { %v3381_v48 = vunpack.c.h.bf16 %v9207_v44  ;;  %9208 = vst [vmem:[#allocation11_spill] sm:$0xff] %v7899_v0  ;;  %v3559_v23 = vadd.f32 %v3558_v22, %v3458_v37  ;;  %v3382_v56 = vunpack.c.h.bf16 %v9209_v31  ;;  %v9210_v9 = vld [vmem:[#allocation33_spill] sm:$0xff]  ;;  %9211 = vst [vmem:[#allocation10_spill] sm:$0xff] %v7906_v34  ;;  %v7910_v2 = vsel %vm7654_vm7, %v3373_v43, 0.0  ;;  %v9245_v32 = vld [vmem:[#allocation16_spill] sm:$0xff] }
 0x395   : > { %v3383_v57 = vunpack.c.h.bf16 %v9210_v9  ;;  %9212 = vst [vmem:[#allocation12_spill] sm:$0xff] %v7910_v2  ;;  %v7914_v17 = vsel %vm7658_vm8, %v3374_v47, 0.0  ;;  %v7918_v37 = vsel %vm7662_vm9, %v3375_v46, 0.0  ;;  %v3603_v22 = vadd.f32 %v3602_v51, %v7899_v0  ;;  %v9224_v51 = vld [vmem:[#allocation17_spill] sm:$0xff]  ;;  %v9246_v54 = vld [vmem:[#allocation24_spill] sm:$0xff] }
 0x396   : > { %9213 = vst [vmem:[#allocation20_spill] sm:$0xff] %v7914_v17  ;;  %9214 = vst [vmem:[#allocation22_spill] sm:$0xff] %v7918_v37  ;;  %v3560_v10 = vadd.f32 %v3559_v23, %v3459_v16  ;;  %v3336_v59 = vunpack.c.h.bf16 %v7350_v4  ;;  %v3337_v12 = vunpack.c.h.bf16 %v7361_v6  ;;  %v7925_v44 = vsel %vm7666_vm10, %v3376_v11, 0.0 }
 0x397   : > { %9215 = vst [vmem:[#allocation21_spill] sm:$0xff] %v7925_v44  ;;  %v7929_v43 = vsel %vm7672_vm11, %v3377_v39, 0.0  ;;  %v7933_v47 = vsel %vm7676_vm12, %v3378_v5, 0.0  ;;  %v7937_v16 = vsel %vm7680_vm13, %v3379_v35, 0.0  ;;  %v7942_v6 = vsel %vm7684_vm14, %v3380_v62, 0.0 }
 0x398   : > { %9216 = vst [vmem:[#allocation23_spill] sm:$0xff] %v7929_v43  ;;  %9217 = vst [vmem:[#allocation30_spill] sm:$0xff] %v7933_v47  ;;  %v3561_v4 = vadd.f32 %v3560_v10, %v7811_v19  ;;  %v3604_v11 = vadd.f32 %v3603_v22, %v7906_v34  ;;  %v3338_v46 = vunpack.c.h.bf16 %v7359_v3  ;;  %v7948_v39 = vsel %vm7688_vm15, %v3381_v48, 0.0 }
 0x399   : > { %9218 = vst [vmem:[#allocation32_spill] sm:$0xff] %v7937_v16  ;;  %9219 = vst [vmem:[#allocation31_spill] sm:$0xff] %v7942_v6  ;;  %v7952_v5 = vsel %vm7695_vm0, %v3382_v56, 0.0  ;;  %v7956_v35 = vsel %vm7701_vm1, %v3383_v57, 0.0  ;;  %v3339_v19 = vunpack.c.h.bf16 %v7367_v18  ;;  %v7963_v3 = vsel %vm7630_vm2, %v3336_v59, 0.0 }
 0x39a   : > { %9220 = vst [vmem:[#allocation33_spill] sm:$0xff] %v7948_v39  ;;  %9221 = vst [vmem:[#allocation72_spill] sm:$0xff] %v7952_v5  ;;  %v3562_v62 = vadd.f32 %v3561_v4, %v7815_v41  ;;  %v3605_v23 = vadd.f32 %v3604_v11, %v7910_v2  ;;  %v7967_v48 = vsel %vm7634_vm3, %v3337_v12, 0.0  ;;  %v3340_v31 = vunpack.c.h.bf16 %v7469_v27  ;;  %v9226_v12 = vld [vmem:[#allocation18_spill] sm:$0xff]  ;;  %v9227_v4 = vld [vmem:[#allocation19_spill] sm:$0xff] }
 0x39b   : > { %9222 = vst [vmem:[#allocation73_spill] sm:$0xff] %v7963_v3  ;;  %9223 = vst [vmem:[#allocation74_spill] sm:$0xff] %v7967_v48  ;;  %v3341_v56 = vunpack.c.h.bf16 %v7474_v30  ;;  %v3342_v9 = vunpack.c.h.bf16 %v7472_v29  ;;  %v3343_v18 = vunpack.c.h.bf16 %v7477_v36  ;;  %v3344_v10 = vunpack.c.h.bf16 %v9224_v51  ;;  %v9228_v11 = vld [vmem:[#allocation28_spill] sm:$0xff]  ;;  %v9243_v2 = vld [vmem:[#allocation15_spill] sm:$0xff] }
 0x39c   : > { %v3563_v41 = vadd.f32 %v3562_v62, %v7819_v55  ;;  %v3606_v57 = vadd.f32 %v3605_v23, %v7914_v17  ;;  %v7978_v22 = vsel %vm7638_vm4, %v3338_v46, 0.0  ;;  %v3345_v59 = vunpack.c.h.bf16 %v7511_v28  ;;  %v9230_v46 = vld [vmem:[#allocation29_spill] sm:$0xff] }
 0x39d   : > { %9225 = vst [vmem:[#allocation17_spill] sm:$0xff] %v7978_v22  ;;  %v3346_v27 = vunpack.c.h.bf16 %v9226_v12  ;;  %v3347_v30 = vunpack.c.h.bf16 %v9227_v4  ;;  %v3567_v29 = vadd.f32 %v7967_v48, %v7963_v3  ;;  %v3348_v62 = vunpack.c.h.bf16 %v9228_v11 }
 0x39e   : > { %v3564_v36 = vadd.f32 %v3563_v41, %v7823_v15  ;;  %v3607_v55 = vadd.f32 %v3606_v57, %v7918_v37  ;;  %v7990_v23 = vsel %vm7646_vm5, %v3339_v19, 0.0  ;;  %v3349_v51 = vunpack.c.h.bf16 %v9230_v46  ;;  %v9235_v57 = vld [vmem:[#allocation5_spill] sm:$0xff] }
 0x39f   : > { %9229 = vst [vmem:[#allocation18_spill] sm:$0xff] %v7990_v23  ;;  %v3350_v28 = vunpack.c.h.bf16 %v7545_v49  ;;  %v3351_v12 = vunpack.c.h.bf16 %v7550_v50  ;;  %v3568_v4 = vadd.f32 %v3567_v29, %v7978_v22  ;;  %v7999_v15 = vsel %vm7650_vm6, %v3340_v31, 0.0 }
 0x3a0   : > { %3565 = vadd.xlane.f32.xlu0 %v3564_v36  ;;  %v3608_v17 = vadd.f32 %v3607_v55, %v7925_v44  ;;  %9231 = vst [vmem:[#allocation19_spill] sm:$0xff] %v7999_v15  ;;  %v8003_v41 = vsel %vm7654_vm7, %v3341_v56, 0.0  ;;  %v8007_v19 = vsel %vm7658_vm8, %v3342_v9, 0.0  ;;  %v8011_v49 = vsel %vm7662_vm9, %v3343_v18, 0.0  ;;  %v9236_v36 = vld [vmem:[#allocation7_spill] sm:$0xff]  ;;  %v9239_v44 = vld [vmem:[#allocation8_spill] sm:$0xff] }
 0x3a1   : > { %9232 = vst [vmem:[#allocation28_spill] sm:$0xff] %v8003_v41  ;;  %9233 = vst [vmem:[#allocation29_spill] sm:$0xff] %v8007_v19  ;;  %v3569_v50 = vadd.f32 %v3568_v4, %v7990_v23  ;;  %v3400_v29 = vunpack.c.h.bf16 %v9235_v57  ;;  %v3401_v55 = vunpack.c.h.bf16 %v9236_v36  ;;  %v8019_v56 = vsel %vm7666_vm10, %v3344_v10, 0.0  ;;  %v9237_v10 = vld [vmem:[#allocation6_spill] sm:$0xff] }
 0x3a2   : > { %9234 = vst [vmem:[#allocation75_spill] sm:$0xff] %v8011_v49  ;;  %v3609_v31 = vadd.f32 %v3608_v17, %v7929_v43  ;;  %v8023_v9 = vsel %vm7672_vm11, %v3345_v59, 0.0  ;;  %v8027_v18 = vsel %vm7676_vm12, %v3346_v27, 0.0  ;;  %v8031_v11 = vsel %vm7680_vm13, %v3347_v30, 0.0  ;;  %v9256_v61 = vld [vmem:[#allocation74_spill] sm:$0xff] }
 0x3a3   : > { %v8035_v46 = vsel %vm7684_vm14, %v3348_v62, 0.0  ;;  %v3570_v17 = vadd.f32 %v3569_v50, %v7999_v15  ;;  %v3402_v4 = vunpack.c.h.bf16 %v9237_v10  ;;  %v8042_v59 = vsel %vm7688_vm15, %v3349_v51, 0.0 }
 0x3a4   : > { %v3610_v43 = vadd.f32 %v3609_v31, %v7933_v47  ;;  %v8046_v27 = vsel %vm7695_vm0, %v3350_v28, 0.0  ;;  %v8050_v30 = vsel %vm7701_vm1, %v3351_v12, 0.0  ;;  %v3403_v50 = vunpack.c.h.bf16 %v9239_v44  ;;  %v9242_v28 = vld [vmem:[#allocation13_spill] sm:$0xff]  ;;  %v9244_v12 = vld [vmem:[#allocation14_spill] sm:$0xff] }
 0x3a5   : > { %9238 = vst [vmem:[#allocation5_spill] sm:$0xff] %v8050_v30  ;;  %v3571_v62 = vadd.f32 %v3570_v17, %v8003_v41  ;;  %v8056_v37 = vsel %vm7630_vm2, %v3400_v29, 0.0  ;;  %v8060_v51 = vsel %vm7634_vm3, %v3401_v55, 0.0  ;;  %v3404_v47 = vunpack.c.h.bf16 %v9242_v28  ;;  %v9248_v41 = vld [vmem:[#allocation26_spill] sm:$0xff]  ;;  %v9253_v30 = vld [vmem:[#allocation35_spill] sm:$0xff] }
 0x3a6   : > { %9240 = vst [vmem:[#allocation7_spill] sm:$0xff] %v8056_v37  ;;  %9241 = vst [vmem:[#allocation6_spill] sm:$0xff] %v8060_v51  ;;  %v3611_v31 = vadd.f32 %v3610_v43, %v7937_v16  ;;  %v3405_v34 = vunpack.c.h.bf16 %v9243_v2  ;;  %v3406_v0 = vunpack.c.h.bf16 %v9244_v12  ;;  %v3407_v60 = vunpack.c.h.bf16 %v9245_v32  ;;  %v9249_v16 = vld [vmem:[#allocation25_spill] sm:$0xff] }
 0x3a7   : > { %v3572_v17 = vadd.f32 %v3571_v62, %v8007_v19  ;;  %v3408_v58 = vunpack.c.h.bf16 %v9246_v54  ;;  %v8071_v29 = vsel %vm7638_vm4, %v3402_v4, 0.0  ;;  %v3409_v43 = vunpack.c.h.bf16 %v9248_v41  ;;  %v9250_v62 = vld [vmem:[#allocation27_spill] sm:$0xff] }
 0x3a8   : > { %9247 = vst [vmem:[#allocation8_spill] sm:$0xff] %v8071_v29  ;;  %v3612_v55 = vadd.f32 %v3611_v31, %v7942_v6  ;;  %v3410_v52 = vunpack.c.h.bf16 %v9249_v16  ;;  %v3635_v15 = vadd.f32 %v8060_v51, %v8056_v37  ;;  %v3411_v19 = vunpack.c.h.bf16 %v9250_v62  ;;  %v9252_v31 = vld [vmem:[#allocation36_spill] sm:$0xff]  ;;  %v9254_v37 = vld [vmem:[#allocation37_spill] sm:$0xff] }
 0x3a9   : > { %v3573_v14 = vadd.f32 %v3572_v17, %v8011_v49  ;;  %v3412_v23 = vunpack.c.h.bf16 %v9251_v13  ;;  %v8083_v22 = vsel %vm7646_vm5, %v3403_v50, 0.0  ;;  %v3413_v6 = vunpack.c.h.bf16 %v9252_v31 }
 0x3aa   : > { %v3613_v4 = vadd.f32 %v3612_v55, %v7948_v39  ;;  %v3414_v48 = vunpack.c.h.bf16 %v9253_v30  ;;  %v3636_v3 = vadd.f32 %v3635_v15, %v8071_v29  ;;  %v3415_v17 = vunpack.c.h.bf16 %v9254_v37 }
 0x3ab   : > { %v3574_v51 = vadd.f32 %v3573_v14, %v8019_v56  ;;  %v8093_v49 = vsel %vm7650_vm6, %v3404_v47, 0.0  ;;  %v8097_v50 = vsel %vm7654_vm7, %v3405_v34, 0.0  ;;  %v8102_v39 = vsel %vm7658_vm8, %v3406_v0, 0.0 }
 0x3ac   : > { %v3614_v55 = vadd.f32 %v3613_v4, %v7952_v5  ;;  %v8106_v15 = vsel %vm7662_vm9, %v3407_v60, 0.0  ;;  %v3637_v14 = vadd.f32 %v3636_v3, %v8083_v22  ;;  %v8112_v47 = vsel %vm7666_vm10, %v3408_v58, 0.0 }
 0x3ad   : > { %v3575_v29 = vadd.f32 %v3574_v51, %v8023_v9  ;;  %v3384_v34 = vunpack.c.l.bf16 %v9235_v57  ;;  %v3385_v4 = vunpack.c.l.bf16 %v9236_v36  ;;  %v8119_v0 = vsel %vm7672_vm11, %v3409_v43, 0.0 }
 0x3ae   : > { %v3615_v5 = vadd.f32 %v3614_v55, %v7956_v35  ;;  %v8123_v60 = vsel %vm7676_vm12, %v3410_v52, 0.0  ;;  %v3638_v3 = vadd.f32 %v3637_v14, %v8093_v49  ;;  %v8129_v58 = vsel %vm7680_vm13, %v3411_v19, 0.0 }
 0x3af   : > { %v3576_v51 = vadd.f32 %v3575_v29, %v8027_v18  ;;  %v8133_v57 = vsel %vm7684_vm14, %v3412_v23, 0.0  ;;  %v3386_v36 = vunpack.c.l.bf16 %v9237_v10  ;;  %v8138_v43 = vsel %vm7688_vm15, %v3413_v6, 0.0 }
 0x3b0   : > { %3616 = vadd.xlane.f32.xlu1 %v3615_v5  ;;  %v8142_v52 = vsel %vm7695_vm0, %v3414_v48, 0.0  ;;  %v8146_v29 = vsel %vm7701_vm1, %v3415_v17, 0.0  ;;  %v3639_v19 = vadd.f32 %v3638_v3, %v8097_v50  ;;  %v3387_v55 = vunpack.c.l.bf16 %v9239_v44 }
 0x3b1   : > { %v3577_v23 = vadd.f32 %v3576_v51, %v8031_v11  ;;  %v8153_v5 = vsel %vm7630_vm2, %v3384_v34, 0.0  ;;  %v8157_v6 = vsel %vm7634_vm3, %v3385_v4, 0.0  ;;  %v3388_v10 = vunpack.c.l.bf16 %v9242_v28 }
 0x3b2   : > { %v3640_v48 = vadd.f32 %v3639_v19, %v8102_v39  ;;  %v3389_v17 = vunpack.c.l.bf16 %v9243_v2  ;;  %v3390_v14 = vunpack.c.l.bf16 %v9244_v12  ;;  %v3391_v44 = vunpack.c.l.bf16 %v9245_v32 }
 0x3b3   : > { %v3578_v3 = vadd.f32 %v3577_v23, %v8035_v46  ;;  %v3392_v33 = vunpack.c.l.bf16 %v9246_v54  ;;  %v8168_v34 = vsel %vm7638_vm4, %v3386_v36, 0.0  ;;  %v3393_v4 = vunpack.c.l.bf16 %v9248_v41 }
 0x3b4   : > { %v3641_v25 = vadd.f32 %v3640_v48, %v8106_v15  ;;  %v3394_v28 = vunpack.c.l.bf16 %v9249_v16  ;;  %v3618_v2 = vadd.f32 %v8157_v6, %v8153_v5  ;;  %v3395_v51 = vunpack.c.l.bf16 %v9250_v62  ;;  %v9255_v62 = vld [vmem:[#allocation73_spill] sm:$0xff] }
 0x3b5   : > { %v3579_v12 = vadd.f32 %v3578_v3, %v8042_v59  ;;  %v3396_v32 = vunpack.c.l.bf16 %v9251_v13  ;;  %v8180_v45 = vsel %vm7646_vm5, %v3387_v55, 0.0  ;;  %v3397_v36 = vunpack.c.l.bf16 %v9252_v31 }
 0x3b6   : > { %v3642_v54 = vadd.f32 %v3641_v25, %v8112_v47  ;;  %v3398_v41 = vunpack.c.l.bf16 %v9253_v30  ;;  %v3619_v16 = vadd.f32 %v3618_v2, %v8168_v34  ;;  %v8189_v23 = vsel %vm7650_vm6, %v3388_v10, 0.0  ;;  %v9257_v25 = vld [vmem:[#allocation5_spill] sm:$0xff] }
 0x3b7   : > { %v3580_v19 = vadd.f32 %v3579_v12, %v8046_v27  ;;  %v3687_v13 = vmul.f32 %v9255_v62, %v9255_v62  ;;  %v3688_v55 = vmul.f32 %v9256_v61, %v9256_v61  ;;  %v3399_v31 = vunpack.c.l.bf16 %v9254_v37  ;;  %v9258_v12 = vld [vmem:[#allocation17_spill] sm:$0xff]  ;;  %v9261_v62 = vld [vmem:[#allocation55_spill] sm:$0xff] }
 0x3b8   : > { %v3643_v48 = vadd.f32 %v3642_v54, %v8119_v0  ;;  %v8199_v30 = vsel %vm7654_vm7, %v3389_v17, 0.0  ;;  %v3620_v3 = vadd.f32 %v3619_v16, %v8180_v45  ;;  %v8205_v10 = vsel %vm7658_vm8, %v3390_v14, 0.0  ;;  %v9259_v14 = vld [vmem:[#allocation18_spill] sm:$0xff] }
 0x3b9   : > { %v3581_v63 = vadd.f32 %v3580_v19, %v9257_v25  ;;  %v8209_v2 = vsel %vm7662_vm9, %v3391_v44, 0.0  ;;  %v3689_v54 = vmul.f32 %v9258_v12, %v9258_v12  ;;  %v8216_v8 = vsel %vm7666_vm10, %v3392_v33, 0.0  ;;  %v9260_v19 = vld [vmem:[#allocation54_spill] sm:$0xff] }
 0x3ba   : > { %v3644_v37 = vadd.f32 %v3643_v48, %v8123_v60  ;;  %v8220_v17 = vsel %vm7672_vm11, %v3393_v4, 0.0  ;;  %v3621_v53 = vadd.f32 %v3620_v3, %v8189_v23  ;;  %v8225_v38 = vsel %vm7676_vm12, %v3394_v28, 0.0  ;;  %v9263_v48 = vld [vmem:[#allocation56_spill] sm:$0xff] }
 0x3bb   : > { %3582 = vadd.xlane.f32.xlu0 %v3581_v63  ;;  %v3690_v44 = vmul.f32 %v9259_v14, %v9259_v14  ;;  %v3784_v16 = vadd.f32 %v3688_v55, %v3687_v13  ;;  %v3767_v7 = vadd.f32 %v9261_v62, %v9260_v19  ;;  %v8234_v1 = vsel %vm7680_vm13, %v3395_v51, 0.0  ;;  %v9262_v13 = vld [vmem:[#allocation19_spill] sm:$0xff]  ;;  %v9268_v19 = vld [vmem:[#allocation29_spill] sm:$0xff] }
 0x3bc   : > { %v3645_v33 = vadd.f32 %v3644_v37, %v8129_v58  ;;  %v8238_v4 = vsel %vm7684_vm14, %v3396_v32, 0.0  ;;  %v3622_v26 = vadd.f32 %v3621_v53, %v8199_v30  ;;  %v8243_v28 = vsel %vm7688_vm15, %v3397_v36, 0.0  ;;  %v9264_v32 = vld [vmem:[#allocation28_spill] sm:$0xff]  ;;  %v9265_v36 = vld [vmem:[#allocation57_spill] sm:$0xff]  ;;  %v9266_v37 = vld [vmem:[#allocation70_spill] sm:$0xff] }
 0x3bd   : > { %v3691_v61 = vmul.f32 %v9262_v13, %v9262_v13  ;;  %v3785_v55 = vadd.f32 %v3784_v16, %v3689_v54  ;;  %v3768_v3 = vadd.f32 %v3767_v7, %v9263_v48  ;;  %v8251_v51 = vsel %vm7695_vm0, %v3398_v41, 0.0  ;;  %v9267_v54 = vld [vmem:[#allocation71_spill] sm:$0xff] }
 0x3be   : > { %v3646_v21 = vadd.f32 %v3645_v33, %v8133_v57  ;;  %v3623_v20 = vadd.f32 %v3622_v26, %v8205_v10  ;;  %v3692_v63 = vmul.f32 %v9264_v32, %v9264_v32  ;;  %v3719_v53 = vmul.f32 %v9266_v37, %v9266_v37  ;;  %v9270_v26 = vld [vmem:[#allocation58_spill] sm:$0xff] }
 0x3bf   : > { %v3786_v24 = vadd.f32 %v3785_v55, %v3690_v44  ;;  %v3769_v12 = vadd.f32 %v3768_v3, %v9265_v36  ;;  %v3720_v14 = vmul.f32 %v9267_v54, %v9267_v54  ;;  %v8264_v42 = vsel %vm7701_vm1, %v3399_v31, 0.0  ;;  %v9269_v44 = vld [vmem:[#allocation75_spill] sm:$0xff]  ;;  %v9271_v55 = vld [vmem:[#allocation9_spill] sm:$0xff] }
 0x3c0   : > { %v3647_v16 = vadd.f32 %v3646_v21, %v8138_v43  ;;  %v3624_v41 = vadd.f32 %v3623_v20, %v8209_v2  ;;  %v3693_v62 = vmul.f32 %v9268_v19, %v9268_v19  ;;  %v3694_v7 = vmul.f32 %v9269_v44, %v9269_v44  ;;  %v9272_v21 = vld [vmem:[#allocation11_spill] sm:$0xff] }
 0x3c1   : > { %v3787_v33 = vadd.f32 %v3786_v24, %v3691_v61  ;;  %v3770_v13 = vadd.f32 %v3769_v12, %v9270_v26  ;;  %v3721_v48 = vmul.f32 %v9271_v55, %v9271_v55  ;;  %v3695_v31 = vmul.f32 %v8019_v56, %v8019_v56  ;;  %v9273_v36 = vld [vmem:[#allocation59_spill] sm:$0xff]  ;;  %v9274_v61 = vld [vmem:[#allocation40_spill] sm:$0xff]  ;;  %v9275_v24 = vld [vmem:[#allocation41_spill] sm:$0xff] }
 0x3c2   : > { %v3648_v3 = vadd.f32 %v3647_v16, %v8142_v52  ;;  %v3625_v40 = vadd.f32 %v3624_v41, %v8216_v8  ;;  %v3722_v20 = vmul.f32 %v9272_v21, %v9272_v21  ;;  %v3818_v54 = vadd.f32 %v3720_v14, %v3719_v53  ;;  %v9276_v41 = vld [vmem:[#allocation10_spill] sm:$0xff]  ;;  %v9277_v55 = vld [vmem:[#allocation60_spill] sm:$0xff] }
 0x3c3   : > { %v3788_v32 = vadd.f32 %v3787_v33, %v3692_v63  ;;  %v3771_v37 = vadd.f32 %v3770_v13, %v9273_v36  ;;  %v3801_v12 = vadd.f32 %v9275_v24, %v9274_v61  ;;  %v3696_v16 = vmul.f32 %v8023_v9, %v8023_v9  ;;  %v9278_v33 = vld [vmem:[#allocation42_spill] sm:$0xff]  ;;  %v9280_v61 = vld [vmem:[#allocation61_spill] sm:$0xff] }
 0x3c4   : > { %v3649_v19 = vadd.f32 %v3648_v3, %v8146_v29  ;;  %v3626_v44 = vadd.f32 %v3625_v40, %v8220_v17  ;;  %v3723_v56 = vmul.f32 %v9276_v41, %v9276_v41  ;;  %v3819_v63 = vadd.f32 %v3818_v54, %v3721_v48  ;;  %v9279_v40 = vld [vmem:[#allocation12_spill] sm:$0xff] }
 0x3c5   : > { %v3789_v26 = vadd.f32 %v3788_v32, %v3693_v62  ;;  %v3772_v21 = vadd.f32 %v3771_v37, %v9277_v55  ;;  %v3802_v13 = vadd.f32 %v3801_v12, %v9278_v33  ;;  %v3697_v14 = vmul.f32 %v8027_v18, %v8027_v18  ;;  %v9281_v37 = vld [vmem:[#allocation43_spill] sm:$0xff]  ;;  %v9282_v12 = vld [vmem:[#allocation20_spill] sm:$0xff] }
 0x3c6   : > { %3650 = vadd.xlane.f32.xlu1 %v3649_v19  ;;  %v3627_v53 = vadd.f32 %v3626_v44, %v8225_v38  ;;  %v3698_v3 = vmul.f32 %v8031_v11, %v8031_v11  ;;  %v3724_v9 = vmul.f32 %v9279_v40, %v9279_v40  ;;  %v3820_v32 = vadd.f32 %v3819_v63, %v3722_v20  ;;  %v9283_v44 = vld [vmem:[#allocation62_spill] sm:$0xff]  ;;  %v9286_v33 = vld [vmem:[#allocation7_spill] sm:$0xff] }
 0x3c7   : > { %v3790_v36 = vadd.f32 %v3789_v26, %v3694_v7  ;;  %v3773_v62 = vadd.f32 %v3772_v21, %v9280_v61  ;;  %v3803_v48 = vadd.f32 %v3802_v13, %v9281_v37  ;;  %v3699_v24 = vmul.f32 %v8035_v46, %v8035_v46  ;;  %v9284_v26 = vld [vmem:[#allocation44_spill] sm:$0xff]  ;;  %v9285_v21 = vld [vmem:[#allocation22_spill] sm:$0xff]  ;;  %v9288_v40 = vld [vmem:[#allocation63_spill] sm:$0xff] }
 0x3c8   : > { %v3628_v54 = vadd.f32 %v3627_v53, %v8234_v1  ;;  %v3700_v18 = vmul.f32 %v8042_v59, %v8042_v59  ;;  %v3725_v11 = vmul.f32 %v9282_v12, %v9282_v12  ;;  %v3821_v7 = vadd.f32 %v3820_v32, %v3723_v56  ;;  %v9287_v13 = vld [vmem:[#allocation6_spill] sm:$0xff]  ;;  %v9290_v37 = vld [vmem:[#allocation21_spill] sm:$0xff] }
 0x3c9   : > { %v3791_v19 = vadd.f32 %v3790_v36, %v3695_v31  ;;  %v3774_v41 = vadd.f32 %v3773_v62, %v9283_v44  ;;  %v3804_v55 = vadd.f32 %v3803_v48, %v9284_v26  ;;  %v3726_v63 = vmul.f32 %v9285_v21, %v9285_v21  ;;  %v9289_v36 = vld [vmem:[#allocation45_spill] sm:$0xff]  ;;  %v9292_v26 = vld [vmem:[#allocation64_spill] sm:$0xff] }
 0x3ca   : > { %v3629_v20 = vadd.f32 %v3628_v54, %v8238_v4  ;;  %v3751_v46 = vmul.f32 %v9286_v33, %v9286_v33  ;;  %v3752_v59 = vmul.f32 %v9287_v13, %v9287_v13  ;;  %v3822_v31 = vadd.f32 %v3821_v7, %v3724_v9  ;;  %v9291_v54 = vld [vmem:[#allocation8_spill] sm:$0xff]  ;;  %v9294_v7 = vld [vmem:[#allocation23_spill] sm:$0xff]  ;;  %v9295_v13 = vld [vmem:[#allocation65_spill] sm:$0xff] }
 0x3cb   : > { %v3792_v53 = vadd.f32 %v3791_v19, %v3696_v16  ;;  %v3775_v61 = vadd.f32 %v3774_v41, %v9288_v40  ;;  %v3805_v62 = vadd.f32 %v3804_v55, %v9289_v36  ;;  %v3701_v32 = vmul.f32 %v8046_v27, %v8046_v27  ;;  %v9293_v19 = vld [vmem:[#allocation46_spill] sm:$0xff] }
 0x3cc   : > { %v3630_v56 = vadd.f32 %v3629_v20, %v8243_v28  ;;  %v3727_v48 = vmul.f32 %v9290_v37, %v9290_v37  ;;  %v3753_v12 = vmul.f32 %v9291_v54, %v9291_v54  ;;  %v3823_v16 = vadd.f32 %v3822_v31, %v3725_v11  ;;  %v9296_v37 = vld [vmem:[#allocation47_spill] sm:$0xff]  ;;  %v9297_v11 = vld [vmem:[#allocation30_spill] sm:$0xff] }
 0x3cd   : > { %v3793_v44 = vadd.f32 %v3792_v53, %v3697_v14  ;;  %v3776_v21 = vadd.f32 %v3775_v61, %v9292_v26  ;;  %v3806_v41 = vadd.f32 %v3805_v62, %v9293_v19  ;;  %v3728_v55 = vmul.f32 %v9294_v7, %v9294_v7  ;;  %v9298_v54 = vld [vmem:[#allocation66_spill] sm:$0xff] }
 0x3ce   : > { %v3631_v9 = vadd.f32 %v3630_v56, %v8251_v51  ;;  %v3754_v27 = vmul.f32 %v8083_v22, %v8083_v22  ;;  %v3852_v20 = vadd.f32 %v3752_v59, %v3751_v46  ;;  %v3824_v36 = vadd.f32 %v3823_v16, %v3726_v63  ;;  %v9299_v46 = vld [vmem:[#allocation48_spill] sm:$0xff] }
 0x3cf   : > { %v3794_v33 = vadd.f32 %v3793_v44, %v3698_v3  ;;  %v3777_v40 = vadd.f32 %v3776_v21, %v9295_v13  ;;  %v3807_v14 = vadd.f32 %v3806_v41, %v9296_v37  ;;  %v3729_v61 = vmul.f32 %v9297_v11, %v9297_v11  ;;  %v9300_v59 = vld [vmem:[#allocation32_spill] sm:$0xff]  ;;  %v9302_v41 = vld [vmem:[#allocation49_spill] sm:$0xff] }
 0x3d0   : > { %v3632_v53 = vadd.f32 %v3631_v9, %v8264_v42  ;;  %v3755_v31 = vmul.f32 %v8093_v49, %v8093_v49  ;;  %v3853_v62 = vadd.f32 %v3852_v20, %v3753_v12  ;;  %v3825_v22 = vadd.f32 %v3824_v36, %v3727_v48  ;;  %v9301_v49 = vld [vmem:[#allocation67_spill] sm:$0xff]  ;;  %v9304_v20 = vld [vmem:[#allocation33_spill] sm:$0xff]  ;;  %v9305_v36 = vld [vmem:[#allocation68_spill] sm:$0xff] }
 0x3d1   : > { %v3795_v56 = vadd.f32 %v3794_v33, %v3699_v24  ;;  %v3778_v26 = vadd.f32 %v3777_v40, %v9298_v54  ;;  %v3808_v3 = vadd.f32 %v3807_v14, %v9299_v46  ;;  %v3702_v63 = vmul.f32 %v9257_v25, %v9257_v25  ;;  %v9303_v48 = vld [vmem:[#allocation31_spill] sm:$0xff] }
 0x3d2   : > { %3633 = vadd.xlane.f32.xlu0 %v3632_v53  ;;  %v3730_v44 = vmul.f32 %v9300_v59, %v9300_v59  ;;  %v3756_v21 = vmul.f32 %v8097_v50, %v8097_v50  ;;  %v3854_v16 = vadd.f32 %v3853_v62, %v3754_v27  ;;  %v3826_v24 = vadd.f32 %v3825_v22, %v3728_v55 }
 0x3d3   : > { %v3796_v19 = vadd.f32 %v3795_v56, %v3700_v18  ;;  %v3779_v12 = vadd.f32 %v3778_v26, %v9301_v49  ;;  %v3809_v9 = vadd.f32 %v3808_v3, %v9302_v41  ;;  %v3731_v7 = vmul.f32 %v9303_v48, %v9303_v48  ;;  %v9306_v18 = vld [vmem:[#allocation50_spill] sm:$0xff]  ;;  %v9307_v56 = vld [vmem:[#allocation69_spill] sm:$0xff] }
 0x3d4   : > { %v3732_v33 = vmul.f32 %v9304_v20, %v9304_v20  ;;  %v3757_v25 = vmul.f32 %v8102_v39, %v8102_v39  ;;  %v3855_v13 = vadd.f32 %v3854_v16, %v3755_v31  ;;  %v3827_v27 = vadd.f32 %v3826_v24, %v3729_v61  ;;  %v9309_v26 = vld [vmem:[#allocation38_spill] sm:$0xff]  ;;  %v9313_v24 = vld [vmem:[#allocation53_spill] sm:$0xff] }
 0x3d5   : > { %v3797_v40 = vadd.f32 %v3796_v19, %v3701_v32  ;;  %v3780_v50 = vadd.f32 %v3779_v12, %v9305_v36  ;;  %v3810_v37 = vadd.f32 %v3809_v9, %v9306_v18  ;;  %v3758_v55 = vmul.f32 %v8106_v15, %v8106_v15  ;;  %v9308_v32 = vld [vmem:[#allocation51_spill] sm:$0xff] }
 0x3d6   : > { %v3856_v14 = vadd.f32 %v3855_v13, %v3756_v21  ;;  %v3735_v53 = vmul.f32 %v8153_v5, %v8153_v5  ;;  %v3736_v11 = vmul.f32 %v8157_v6, %v8157_v6  ;;  %v3828_v31 = vadd.f32 %v3827_v27, %v3730_v44  ;;  %v9310_v5 = vld [vmem:[#allocation72_spill] sm:$0xff]  ;;  %v9312_v19 = vld [vmem:[#allocation39_spill] sm:$0xff] }
 0x3d7   : > { %v3798_v62 = vadd.f32 %v3797_v40, %v3702_v63  ;;  %v3781_v39 = vadd.f32 %v3780_v50, %v9307_v56  ;;  %v3811_v54 = vadd.f32 %v3810_v37, %v9308_v32  ;;  %v3717_v61 = vmul.f32 %v9309_v26, %v9309_v26  ;;  %v9311_v63 = vld [vmem:[#allocation52_spill] sm:$0xff] }
 0x3d8   : > { %v3759_v22 = vmul.f32 %v8112_v47, %v8112_v47  ;;  %v3857_v15 = vadd.f32 %v3856_v14, %v3757_v25  ;;  %v3737_v46 = vmul.f32 %v8168_v34, %v8168_v34  ;;  %v3733_v6 = vmul.f32 %v9310_v5, %v9310_v5 }
 0x3d9   : > { %3799 = vadd.xlane.f32.xlu1 %v3798_v62  ;;  %3782 = vadd.xlane.f32.xlu0 %v3781_v39  ;;  %v3829_v3 = vadd.f32 %v3828_v31, %v3731_v7  ;;  %v3812_v59 = vadd.f32 %v3811_v54, %v9311_v63  ;;  %v3760_v44 = vmul.f32 %v8119_v0, %v8119_v0  ;;  %vm3658_vm2 = vcmask 7168  }
 0x3da   : > { %v3858_v21 = vadd.f32 %v3857_v15, %v3758_v55  ;;  %v3738_v16 = vmul.f32 %v8180_v45, %v8180_v45  ;;  %v3835_v47 = vadd.f32 %v3736_v11, %v3735_v53  ;;  %v3718_v49 = vmul.f32 %v9312_v19, %v9312_v19 }
 0x3db   : > { %v3734_v34 = vmul.f32 %v7956_v35, %v7956_v35  ;;  %v3830_v12 = vadd.f32 %v3829_v3, %v3732_v33  ;;  %v3813_v41 = vadd.f32 %v3812_v59, %v9313_v24  ;;  %v3761_v9 = vmul.f32 %v8123_v60, %v8123_v60  ;;  %v3545_v59 = vld [vmem:[%s9009_s3 + $0x8] sm:$0xff] }
 0x3dc   : > { %v3859_v48 = vadd.f32 %v3858_v21, %v3759_v22  ;;  %v3739_v0 = vmul.f32 %v8189_v23, %v8189_v23  ;;  %v3836_v7 = vadd.f32 %v3835_v47, %v3737_v46  ;;  %v3762_v25 = vmul.f32 %v8129_v58, %v8129_v58  ;;  %v3666_v24 = vld [vmem:[%s9010_s4 + $0x8] sm:$0xff] }
 0x3dd   : > { %v3831_v20 = vadd.f32 %v3830_v12, %v3733_v6  ;;  %v3814_v45 = vadd.f32 %v3813_v41, %v3717_v61  ;;  %v3740_v35 = vmul.f32 %v8199_v30, %v8199_v30  ;;  %v3763_v60 = vmul.f32 %v8133_v57, %v8133_v57  ;;  %v3547_v6 = vld [vmem:[%s9009_s3 + $0x18] sm:$0xff]  ;;  %v3665_v41 = vld [vmem:[%s9010_s4] sm:$0xff] }
 0x3de   : > { %v3860_v13 = vadd.f32 %v3859_v48, %v3760_v44  ;;  %v3837_v33 = vadd.f32 %v3836_v7, %v3738_v16  ;;  %v3741_v23 = vmul.f32 %v8205_v10, %v8205_v10  ;;  %v3764_v58 = vmul.f32 %v8138_v43, %v8138_v43  ;;  %v3549_v16 = vld [vmem:[%s9009_s3 + $0x28] sm:$0xff] }
 0x3df   : > { %v3832_v40 = vadd.f32 %v3831_v20, %v3734_v34  ;;  %v3815_v36 = vadd.f32 %v3814_v45, %v3718_v49  ;;  %v3742_v30 = vmul.f32 %v8209_v2, %v8209_v2  ;;  %v3765_v55 = vmul.f32 %v8142_v52, %v8142_v52  ;;  %v3548_v49 = vld [vmem:[%s9009_s3 + $0x20] sm:$0xff]  ;;  %v3668_v20 = vld [vmem:[%s9010_s4 + $0x18] sm:$0xff]  ;;  %v3667_v45 = vld [vmem:[%s9010_s4 + $0x10] sm:$0xff] }
 0x3e0   : > { %v3861_v50 = vadd.f32 %v3860_v13, %v3761_v9  ;;  %v3838_v27 = vadd.f32 %v3837_v33, %v3739_v0  ;;  %v3743_v57 = vmul.f32 %v8216_v8, %v8216_v8  ;;  %v3766_v10 = vmul.f32 %v8146_v29, %v8146_v29 }
 0x3e1   : > { %3833 = vadd.xlane.f32.xlu1 %v3832_v40  ;;  %3816 = vadd.xlane.f32.xlu0 %v3815_v36  ;;  %v3744_v43 = vmul.f32 %v8220_v17, %v8220_v17  ;;  %v3745_v2 = vmul.f32 %v8225_v38, %v8225_v38  ;;  %v3746_v52 = vmul.f32 %v8234_v1, %v8234_v1  ;;  %v3670_v40 = vld [vmem:[%s9010_s4 + $0x28] sm:$0xff] }
 0x3e2   : > { %v3862_v18 = vadd.f32 %v3861_v50, %v3762_v25  ;;  %v3839_v37 = vadd.f32 %v3838_v27, %v3740_v35  ;;  %v3747_v8 = vmul.f32 %v8238_v4, %v8238_v4  ;;  %v3748_v54 = vmul.f32 %v8243_v28, %v8243_v28  ;;  %v3546_v4 = vld [vmem:[%s9009_s3 + $0x10] sm:$0xff]  ;;  %v3544_v28 = vld [vmem:[%s9009_s3] sm:$0xff] }
 0x3e3   : > { %v3749_v26 = vmul.f32 %v8251_v51, %v8251_v51  ;;  %v3750_v38 = vmul.f32 %v8264_v42, %v8264_v42  ;;  %v3669_v50 = vld [vmem:[%s9010_s4 + $0x20] sm:$0xff] }
 0x3e4   : > { %v3863_v14 = vadd.f32 %v3862_v18, %v3763_v60  ;;  %v3840_v53 = vadd.f32 %v3839_v37, %v3741_v23 }
 0x3e6   : > { %v3864_v11 = vadd.f32 %v3863_v14, %v3764_v58  ;;  %v3841_v62 = vadd.f32 %v3840_v53, %v3742_v30 }
 0x3e8   : > { %v3865_v56 = vadd.f32 %v3864_v11, %v3765_v55  ;;  %v3842_v39 = vadd.f32 %v3841_v62, %v3743_v57 }
 0x3ea   : > { %v3866_v31 = vadd.f32 %v3865_v56, %v3766_v10  ;;  %v3843_v32 = vadd.f32 %v3842_v39, %v3744_v43 }
 0x3ec   : > { %3867 = vadd.xlane.f32.xlu1 %v3866_v31  ;;  %v3844_v29 = vadd.f32 %v3843_v32, %v3745_v2 }
 0x3ee   : > { %v3845_v17 = vadd.f32 %v3844_v29, %v3746_v52 }
 0x3f0   : > { %v3846_v61 = vadd.f32 %v3845_v17, %v3747_v8 }
 0x3f2   : > { %v3847_v22 = vadd.f32 %v3846_v61, %v3748_v54 }
 0x3f4   : > { %v3848_v15 = vadd.f32 %v3847_v22, %v3749_v26 }
 0x3f6   : > { %v3849_v1 = vadd.f32 %v3848_v15, %v3750_v38 }
 0x3f8   : > { %3850 = vadd.xlane.f32.xlu0 %v3849_v1 }
 0x41f   : > { %v3600_v46 = vpop.xlane.xlu1 %3599 }
 0x420   : > { %v3654_v5 = vadd.f32 %v3600_v46, %v3546_v4 }
 0x422   : > { %3661 = vst.msk [vmem:[%s9009_s3 + $0x10] sm:$0xff] %vm3658_vm2, %v3654_v5 }
 0x42d   : > { %v3566_v51 = vpop.xlane.xlu0 %3565 }
 0x42e   : > { %v3652_v42 = vadd.f32 %v3566_v51, %v3544_v28 }
 0x430   : > { %3659 = vst.msk [vmem:[%s9009_s3] sm:$0xff] %vm3658_vm2, %v3652_v42 }
 0x43d   : > { %v3617_v3 = vpop.xlane.xlu1 %3616 }
 0x43e   : > { %v3655_v63 = vadd.f32 %v3617_v3, %v3547_v6 }
 0x440   : > { %3662 = vst.msk [vmem:[%s9009_s3 + $0x18] sm:$0xff] %vm3658_vm2, %v3655_v63 }
 0x448   : > { %v3583_v44 = vpop.xlane.xlu0 %3582 }
 0x449   : > { %v3653_v21 = vadd.f32 %v3583_v44, %v3545_v59 }
 0x44b   : > { %3660 = vst.msk [vmem:[%s9009_s3 + $0x8] sm:$0xff] %vm3658_vm2, %v3653_v21 }
 0x453   : > { %v3651_v47 = vpop.xlane.xlu1 %3650 }
 0x454   : > { %v3657_v19 = vadd.f32 %v3651_v47, %v3549_v16 }
 0x456   : > { %3664 = vst.msk [vmem:[%s9009_s3 + $0x28] sm:$0xff] %vm3658_vm2, %v3657_v19 }
 0x45f   : > { %v3634_v34 = vpop.xlane.xlu0 %3633 }
 0x460   : > { %v3656_v12 = vadd.f32 %v3634_v34, %v3548_v49 }
 0x462   : > { %3663 = vst.msk [vmem:[%s9009_s3 + $0x20] sm:$0xff] %vm3658_vm2, %v3656_v12 }
 0x466   : > { %v3800_v9 = vpop.xlane.xlu1 %3799  ;;  %v3783_v48 = vpop.xlane.xlu0 %3782 }
 0x467   : > { %v3870_v0 = vadd.f32 %v3800_v9, %v3666_v24  ;;  %v3869_v7 = vadd.f32 %v3783_v48, %v3665_v41 }
 0x469   : > { %3876 = vst.msk [vmem:[%s9010_s4 + $0x8] sm:$0xff] %vm3658_vm2, %v3870_v0  ;;  %3875 = vst.msk [vmem:[%s9010_s4] sm:$0xff] %vm3658_vm2, %v3869_v7 }
 0x46e   : > { %v3834_v25 = vpop.xlane.xlu1 %3833  ;;  %v3817_v13 = vpop.xlane.xlu0 %3816 }
 0x46f   : > { %v3872_v35 = vadd.f32 %v3834_v25, %v3668_v20  ;;  %v3871_v33 = vadd.f32 %v3817_v13, %v3667_v45 }
 0x471   : > { %3878 = vst.msk [vmem:[%s9010_s4 + $0x18] sm:$0xff] %vm3658_vm2, %v3872_v35  ;;  %3877 = vst.msk [vmem:[%s9010_s4 + $0x10] sm:$0xff] %vm3658_vm2, %v3871_v33 }
 0x479   : > { %v3868_v36 = vpop.xlane.xlu1 %3867 }
 0x47a   : > { %v3874_v60 = vadd.f32 %v3868_v36, %v3670_v40 }
 0x47c   : > { %3880 = vst.msk [vmem:[%s9010_s4 + $0x28] sm:$0xff] %vm3658_vm2, %v3874_v60 }
 0x482   : > { %3897 = sbr.rel (!%p5664_p6) target bundleno = 1372 (0x55c), region = 102 }
 0x485   : > { %v3851_v23 = vpop.xlane.xlu0 %3850 }
 0x486   : > { %v3873_v27 = vadd.f32 %v3851_v23, %v3669_v50 }
 0x488   : > { %3879 = vst.msk [vmem:[%s9010_s4 + $0x20] sm:$0xff] %vm3658_vm2, %v3873_v27 }
 0x489   : > { %s9350_s0 = smov (!%p3902_p1, %s3901_s0), 16 }
 0x48a   : > { %s3904_s9 = smul.u32 384, %s9350_s0  ;;  %s8512_s10 = sshll.u32 %s9350_s0, 2 }
 0x48c   : > { %p4794_p2 = scmp.eq.s32.totalorder %s3904_s9, 0 }
 0x48d   : > { %p3914_p3 = scmp.lt.u32.totalorder (!%p4794_p2), %s8512_s10, 8 }
 0x48e   : > { %3913 = sbr.rel (%p4794_p2) target bundleno = 1372 (0x55c), region = 106 }
 0x495   : > { %3917 = sbr.rel (%p3914_p3) target bundleno = 1362 (0x552), region = 110  ;;  %s8516_s24 = sand.u32 (!%p3914_p3), 7, %s8512_s10  }
 0x496   : > { %p3943_p6 = scmp.eq.s32.totalorder (!%p3914_p3), %s8516_s24, 0  ;;  %p4795_p4 = scmp.ne.s32.totalorder (!%p3914_p3), %s8516_s24, 0 }
 0x49c   : > { %3946 = sbr.rel (%p4795_p4) target bundleno = 1266 (0x4f2), region = 125  ;;  %s3947_s17 = sshrl.u32 (!%p4795_p4), %s8512_s10, 3 }
 0x49d   : > { %5292 = sdivrem.u32 (!%p4795_p4), %s3947_s17, 12 }
 0x4a6   : > { %s8523_s7 = spop.drf %5292 }
 0x4a7   : > { %p4796_p5 = scmp.le.s32.totalorder %s8523_s7, 0 }
 0x4a8   : > { %s9314_s13 = smov (!%p4796_p5), %s8510_s6  ;;  %s9315_s28 = smov (!%p4796_p5), %s7356_s15 }
 0x4a9   : > { %4582 = sbr.rel (%p4796_p5) target bundleno = 1237 (0x4d5), region = 297  ;;  %s8532_s21 = smov (!%p4796_p5), 0  }
 0x4aa   : > { %s8534_s23 = smov (!%p4796_p5), 0  }
 0x4b0 LB: >> { %v3961_v58 = vld [vmem:[%s5540_s28] sm:$0xff]  ;;  %v3963_v18 = vld [vmem:[%s5540_s28 + $0x8] sm:$0xff]  ;;  %v3965_v30 = vld [vmem:[%s5540_s28 + $0x10] sm:$0xff]  ;;  %s4105_s30 = sadd.s32 1, %s5544_s21  ;;  %s3955_s23 = sadd.s32 1, %s5548_s23   ;;  %s5548_s23 = sphi %s8534_s23, %s3955_s23   ;;  %s5544_s21 = sphi %s8532_s21, %s9319_s21   ;;  %s5540_s28 = sphi %s9315_s28, %s9318_s28   ;;  %s5536_s13 = sphi %s9314_s13, %s9317_s13  }
 0x4b1   : >> { %3962 = vst [vmem:[%s5536_s13] sm:$0xff] %v3961_v58  ;;  %3964 = vst [vmem:[%s5536_s13 + $0x8] sm:$0xff] %v3963_v18  ;;  %v3967_v37 = vld [vmem:[%s5540_s28 + $0x18] sm:$0xff]  ;;  %v3969_v55 = vld [vmem:[%s5540_s28 + $0x20] sm:$0xff]  ;;  %p8556_p7 = scmp.ge.s32.totalorder %s4105_s30, %s8523_s7  ;;  %p3954_p8 = scmp.ge.s32.totalorder %s3955_s23, %s8523_s7 }
 0x4b2   : >> { %3966 = vst [vmem:[%s5536_s13 + $0x10] sm:$0xff] %v3965_v30  ;;  %v3971_v14 = vld [vmem:[%s5540_s28 + $0x28] sm:$0xff]  ;;  %3968 = vst [vmem:[%s5536_s13 + $0x18] sm:$0xff] %v3967_v37  ;;  %v3973_v57 = vld [vmem:[%s5540_s28 + $0x30] sm:$0xff] }
 0x4b3   : >> { %3970 = vst [vmem:[%s5536_s13 + $0x20] sm:$0xff] %v3969_v55  ;;  %3972 = vst [vmem:[%s5536_s13 + $0x28] sm:$0xff] %v3971_v14  ;;  %v3975_v53 = vld [vmem:[%s5540_s28 + $0x38] sm:$0xff]  ;;  %v3977_v10 = vld [vmem:[%s5540_s28 + $0x40] sm:$0xff]  ;;  %s9352_s30 = smov (%p8556_p7, %s4105_s30), 0 }
 0x4b4   : >> { %3974 = vst [vmem:[%s5536_s13 + $0x30] sm:$0xff] %v3973_v57  ;;  %3976 = vst [vmem:[%s5536_s13 + $0x38] sm:$0xff] %v3975_v53  ;;  %v3979_v11 = vld [vmem:[%s5540_s28 + $0x48] sm:$0xff]  ;;  %v3981_v43 = vld [vmem:[%s5540_s28 + $0x50] sm:$0xff]  ;;  %s4108_s27 = smul.u32 96, %s9352_s30  ;;  %s9319_s21 = smov %s9352_s30 }
 0x4b5   : >> { %3978 = vst [vmem:[%s5536_s13 + $0x40] sm:$0xff] %v3977_v10  ;;  %v3983_v62 = vld [vmem:[%s5540_s28 + $0x58] sm:$0xff]  ;;  %3986 = vst [vmem:[%s5536_s13 + $0x64] sm:$0xff] %v3977_v10  ;;  %v3993_v56 = vld [vmem:[%s5540_s28 + $0x60] sm:$0xff] }
 0x4b6   : >> { %3980 = vst [vmem:[%s5536_s13 + $0x48] sm:$0xff] %v3979_v11  ;;  %3982 = vst [vmem:[%s5536_s13 + $0x50] sm:$0xff] %v3981_v43  ;;  %v3995_v2 = vld [vmem:[%s5540_s28 + $0x68] sm:$0xff]  ;;  %v3997_v39 = vld [vmem:[%s5540_s28 + $0x70] sm:$0xff]  ;;  %s8610_s5 = scalar_lea.vmem %s7356_s15, %s4108_s27 [#allocation3]   ;;  %s8613_s22 = scalar_lea.vmem %s8510_s6, %s4108_s27  }
 0x4b7   : >> { %3984 = vst [vmem:[%s5536_s13 + $0x58] sm:$0xff] %v3983_v62  ;;  %3988 = vst [vmem:[%s5536_s13 + $0x6c] sm:$0xff] %v3979_v11  ;;  %v3999_v31 = vld [vmem:[%s5540_s28 + $0x78] sm:$0xff]  ;;  %v4001_v52 = vld [vmem:[%s5540_s28 + $0x80] sm:$0xff] }
 0x4b8   : >> { %3990 = vst [vmem:[%s5536_s13 + $0x74] sm:$0xff] %v3981_v43  ;;  %3992 = vst [vmem:[%s5536_s13 + $0x7c] sm:$0xff] %v3983_v62  ;;  %v4003_v32 = vld [vmem:[%s5540_s28 + $0x88] sm:$0xff]  ;;  %v4005_v8 = vld [vmem:[%s5540_s28 + $0x90] sm:$0xff] }
 0x4b9   : >> { %3994 = vst [vmem:[%s5536_s13 + $0x84] sm:$0xff] %v3993_v56  ;;  %3996 = vst [vmem:[%s5536_s13 + $0x8c] sm:$0xff] %v3995_v2  ;;  %v4007_v29 = vld [vmem:[%s5540_s28 + $0x98] sm:$0xff]  ;;  %v4017_v54 = vld [vmem:[%s5540_s28 + $0xa0] sm:$0xff] }
 0x4ba   : >> { %3998 = vst [vmem:[%s5536_s13 + $0x94] sm:$0xff] %v3997_v39  ;;  %4000 = vst [vmem:[%s5536_s13 + $0x9c] sm:$0xff] %v3999_v31  ;;  %v4019_v17 = vld [vmem:[%s5540_s28 + $0xa8] sm:$0xff]  ;;  %v4021_v26 = vld [vmem:[%s5540_s28 + $0xb0] sm:$0xff] }
 0x4bb   : >> { %4002 = vst [vmem:[%s5536_s13 + $0xa4] sm:$0xff] %v4001_v52  ;;  %4004 = vst [vmem:[%s5536_s13 + $0xac] sm:$0xff] %v4003_v32  ;;  %v4023_v61 = vld [vmem:[%s5540_s28 + $0xb8] sm:$0xff]  ;;  %v4025_v38 = vld [vmem:[%s5540_s28 + $0xc0] sm:$0xff] }
 0x4bc   : >> { %4010 = vst [vmem:[%s5536_s13 + $0xc8] sm:$0xff] %v4001_v52  ;;  %4012 = vst [vmem:[%s5536_s13 + $0xd0] sm:$0xff] %v4003_v32  ;;  %v4027_v22 = vld [vmem:[%s5540_s28 + $0xc8] sm:$0xff]  ;;  %v4029_v15 = vld [vmem:[%s5540_s28 + $0xd0] sm:$0xff] }
 0x4bd   : >> { %4006 = vst [vmem:[%s5536_s13 + $0xb4] sm:$0xff] %v4005_v8  ;;  %4008 = vst [vmem:[%s5536_s13 + $0xbc] sm:$0xff] %v4007_v29  ;;  %v4031_v1 = vld [vmem:[%s5540_s28 + $0xd8] sm:$0xff]  ;;  %v4041_v4 = vld [vmem:[%s5540_s28 + $0xe0] sm:$0xff] }
 0x4be   : >> { %4014 = vst [vmem:[%s5536_s13 + $0xd8] sm:$0xff] %v4005_v8  ;;  %4016 = vst [vmem:[%s5536_s13 + $0xe0] sm:$0xff] %v4007_v29  ;;  %v4043_v46 = vld [vmem:[%s5540_s28 + $0xe8] sm:$0xff]  ;;  %v4045_v5 = vld [vmem:[%s5540_s28 + $0xf0] sm:$0xff] }
 0x4bf   : >> { %4018 = vst [vmem:[%s5536_s13 + $0xe8] sm:$0xff] %v4017_v54  ;;  %4020 = vst [vmem:[%s5536_s13 + $0xf0] sm:$0xff] %v4019_v17  ;;  %v4047_v28 = vld [vmem:[%s5540_s28 + $0xf8] sm:$0xff]  ;;  %v4049_v51 = vld [vmem:[%s5540_s28 + $0x100] sm:$0xff] }
 0x4c0   : >> { %4022 = vst [vmem:[%s5536_s13 + $0xf8] sm:$0xff] %v4021_v26  ;;  %4024 = vst [vmem:[%s5536_s13 + $0x100] sm:$0xff] %v4023_v61  ;;  %v4051_v42 = vld [vmem:[%s5540_s28 + $0x108] sm:$0xff]  ;;  %v4053_v6 = vld [vmem:[%s5540_s28 + $0x110] sm:$0xff] }
 0x4c1   : >> { %4026 = vst [vmem:[%s5536_s13 + $0x108] sm:$0xff] %v4025_v38  ;;  %4028 = vst [vmem:[%s5536_s13 + $0x110] sm:$0xff] %v4027_v22  ;;  %v4055_v3 = vld [vmem:[%s5540_s28 + $0x118] sm:$0xff]  ;;  %v4065_v63 = vld [vmem:[%s5540_s28 + $0x120] sm:$0xff] }
 0x4c2   : >> { %4030 = vst [vmem:[%s5536_s13 + $0x118] sm:$0xff] %v4029_v15  ;;  %4034 = vst [vmem:[%s5536_s13 + $0x12c] sm:$0xff] %v4025_v38  ;;  %v4067_v59 = vld [vmem:[%s5540_s28 + $0x128] sm:$0xff]  ;;  %v4069_v44 = vld [vmem:[%s5540_s28 + $0x130] sm:$0xff] }
 0x4c3   : >> { %4036 = vst [vmem:[%s5536_s13 + $0x134] sm:$0xff] %v4027_v22  ;;  %4038 = vst [vmem:[%s5536_s13 + $0x13c] sm:$0xff] %v4029_v15  ;;  %v4071_v21 = vld [vmem:[%s5540_s28 + $0x138] sm:$0xff]  ;;  %v4073_v16 = vld [vmem:[%s5540_s28 + $0x140] sm:$0xff] }
 0x4c4   : >> { %4032 = vst [vmem:[%s5536_s13 + $0x120] sm:$0xff] %v4031_v1  ;;  %4040 = vst [vmem:[%s5536_s13 + $0x144] sm:$0xff] %v4031_v1  ;;  %v4075_v47 = vld [vmem:[%s5540_s28 + $0x148] sm:$0xff]  ;;  %v4077_v19 = vld [vmem:[%s5540_s28 + $0x150] sm:$0xff] }
 0x4c5   : >> { %4042 = vst [vmem:[%s5536_s13 + $0x14c] sm:$0xff] %v4041_v4  ;;  %4044 = vst [vmem:[%s5536_s13 + $0x154] sm:$0xff] %v4043_v46  ;;  %v4079_v49 = vld [vmem:[%s5540_s28 + $0x158] sm:$0xff]  ;;  %v4089_v34 = vld [vmem:[%s5540_s28 + $0x160] sm:$0xff] }
 0x4c6   : >> { %4046 = vst [vmem:[%s5536_s13 + $0x15c] sm:$0xff] %v4045_v5  ;;  %4048 = vst [vmem:[%s5536_s13 + $0x164] sm:$0xff] %v4047_v28  ;;  %v4091_v12 = vld [vmem:[%s5540_s28 + $0x168] sm:$0xff]  ;;  %v4093_v24 = vld [vmem:[%s5540_s28 + $0x170] sm:$0xff] }
 0x4c7   : >> { %4050 = vst [vmem:[%s5536_s13 + $0x16c] sm:$0xff] %v4049_v51  ;;  %4058 = vst [vmem:[%s5536_s13 + $0x190] sm:$0xff] %v4049_v51  ;;  %v4095_v41 = vld [vmem:[%s5540_s28 + $0x178] sm:$0xff]  ;;  %v4097_v9 = vld [vmem:[%s5540_s28 + $0x180] sm:$0xff] }
 0x4c8   : >> { %4052 = vst [vmem:[%s5536_s13 + $0x174] sm:$0xff] %v4051_v42  ;;  %4054 = vst [vmem:[%s5536_s13 + $0x17c] sm:$0xff] %v4053_v6  ;;  %v4099_v48 = vld [vmem:[%s5540_s28 + $0x188] sm:$0xff]  ;;  %v4101_v0 = vld [vmem:[%s5540_s28 + $0x190] sm:$0xff] }
 0x4c9   : >> { %4056 = vst [vmem:[%s5536_s13 + $0x184] sm:$0xff] %v4055_v3  ;;  %4060 = vst [vmem:[%s5536_s13 + $0x198] sm:$0xff] %v4051_v42  ;;  %v4103_v7 = vld [vmem:[%s5540_s28 + $0x198] sm:$0xff]  ;;  %s9318_s28 = smov %s8610_s5 }
 0x4ca   : >> { %4062 = vst [vmem:[%s5536_s13 + $0x1a0] sm:$0xff] %v4053_v6  ;;  %4064 = vst [vmem:[%s5536_s13 + $0x1a8] sm:$0xff] %v4055_v3 }
 0x4cb   : >> { %4066 = vst [vmem:[%s5536_s13 + $0x1b0] sm:$0xff] %v4065_v63  ;;  %4068 = vst [vmem:[%s5536_s13 + $0x1b8] sm:$0xff] %v4067_v59 }
 0x4cc   : >> { %4070 = vst [vmem:[%s5536_s13 + $0x1c0] sm:$0xff] %v4069_v44  ;;  %4072 = vst [vmem:[%s5536_s13 + $0x1c8] sm:$0xff] %v4071_v21 }
 0x4cd   : >> { %4074 = vst [vmem:[%s5536_s13 + $0x1d0] sm:$0xff] %v4073_v16  ;;  %4076 = vst [vmem:[%s5536_s13 + $0x1d8] sm:$0xff] %v4075_v47 }
 0x4ce   : >> { %4082 = vst [vmem:[%s5536_s13 + $0x1f4] sm:$0xff] %v4073_v16  ;;  %4084 = vst [vmem:[%s5536_s13 + $0x1fc] sm:$0xff] %v4075_v47  ;;  %3957 = sbr.rel (!%p3954_p8) target bundleno = 1200 (0x4b0), region = 303 }
 0x4cf   : >> { %4078 = vst [vmem:[%s5536_s13 + $0x1e0] sm:$0xff] %v4077_v19  ;;  %4080 = vst [vmem:[%s5536_s13 + $0x1e8] sm:$0xff] %v4079_v49 }
 0x4d0   : >> { %4086 = vst [vmem:[%s5536_s13 + $0x204] sm:$0xff] %v4077_v19  ;;  %4088 = vst [vmem:[%s5536_s13 + $0x20c] sm:$0xff] %v4079_v49 }
 0x4d1   : >> { %4090 = vst [vmem:[%s5536_s13 + $0x214] sm:$0xff] %v4089_v34  ;;  %4092 = vst [vmem:[%s5536_s13 + $0x21c] sm:$0xff] %v4091_v12 }
 0x4d2   : >> { %4094 = vst [vmem:[%s5536_s13 + $0x224] sm:$0xff] %v4093_v24  ;;  %4096 = vst [vmem:[%s5536_s13 + $0x22c] sm:$0xff] %v4095_v41 }
 0x4d3   : >> { %4098 = vst [vmem:[%s5536_s13 + $0x234] sm:$0xff] %v4097_v9  ;;  %4100 = vst [vmem:[%s5536_s13 + $0x23c] sm:$0xff] %v4099_v48 }
 0x4d4   : >> { %4102 = vst [vmem:[%s5536_s13 + $0x244] sm:$0xff] %v4101_v0  ;;  %4104 = vst [vmem:[%s5536_s13 + $0x24c] sm:$0xff] %v4103_v7  ;;  %s9317_s13 = smov %s8613_s22 }
 0x4d5 PF: > { %5294 = sdivrem.u32 %s3947_s17, 12 }
 0x4d6   : > { %s4797_s14 = smul.u32 1536, %s8523_s7 }
 0x4d8   : > { %s4116_s12 = sshra.s32 %s4797_s14, 4 }
 0x4d9   : > { %s8703_s26 = scalar_lea.vmem %s7356_s15, %s4116_s12 [#allocation3]   ;;  %s8706_s29 = scalar_lea.vmem %s8510_s6, %s4116_s12  }
 0x4de   : > { %s8708_s0 = spop.drf %5294 }
 0x4df   : > { %p4799_p9 = scmp.le.s32.totalorder %s8708_s0, 0 }
 0x4e0   : > { %s9320_s20 = smov (!%p4799_p9), %s8706_s29  ;;  %s9321_s11 = smov (!%p4799_p9), %s8703_s26 }
 0x4e1   : > { %4596 = sbr.rel (%p4799_p9) target bundleno = 1266 (0x4f2), region = 308  ;;  %s8717_s9 = smov (!%p4799_p9), 0  }
 0x4e2   : > { %s8719_s17 = smov (!%p4799_p9), 0  }
 0x4e8 LB: >> { %v4132_v20 = vld [vmem:[%s5556_s11] sm:$0xff]  ;;  %s4144_s7 = sadd.s32 1, %s5560_s9  ;;  %s4126_s17 = sadd.s32 1, %s5564_s17   ;;  %s5564_s17 = sphi %s8719_s17, %s4126_s17   ;;  %s5560_s9 = sphi %s8717_s9, %s9322_s9   ;;  %s5556_s11 = sphi %s9321_s11, %s4149_s11   ;;  %s5552_s20 = sphi %s9320_s20, %s4150_s20  }
 0x4e9   : >> { %v4134_v45 = vld [vmem:[%s5556_s11 + $0x40] sm:$0xff]  ;;  %4133 = vst [vmem:[%s5552_s20] sm:$0xff] %v4132_v20  ;;  %p4145_p10 = scmp.ge.s32.totalorder %s4144_s7, %s8708_s0  ;;  %p4125_p11 = scmp.ge.s32.totalorder %s4126_s17, %s8708_s0 }
 0x4ea   : >> { %v4136_v25 = vld [vmem:[%s5556_s11 + $0x80] sm:$0xff]  ;;  %4135 = vst [vmem:[%s5552_s20 + $0x64] sm:$0xff] %v4134_v45 }
 0x4eb   : >> { %4137 = vst [vmem:[%s5552_s20 + $0xc8] sm:$0xff] %v4136_v25  ;;  %v4138_v13 = vld [vmem:[%s5556_s11 + $0xc0] sm:$0xff]  ;;  %s9354_s7 = smov (%p4145_p10, %s4144_s7), 0  ;;  %4128 = sbr.rel (!%p4125_p11) target bundleno = 1256 (0x4e8), region = 314 }
 0x4ec   : >> { %v4140_v35 = vld [vmem:[%s5556_s11 + $0x100] sm:$0xff]  ;;  %4139 = vst [vmem:[%s5552_s20 + $0x12c] sm:$0xff] %v4138_v13  ;;  %s4800_s13 = sshll.u32 %s9354_s7, 3  ;;  %s9322_s9 = smov %s9354_s7 }
 0x4ed   : >> { %v4142_v33 = vld [vmem:[%s5556_s11 + $0x140] sm:$0xff]  ;;  %4141 = vst [vmem:[%s5552_s20 + $0x190] sm:$0xff] %v4140_v35  ;;  %s4149_s11 = scalar_lea.vmem %s8703_s26, %s4800_s13 [#allocation3]  }
 0x4ee   : >> { %4143 = vst [vmem:[%s5552_s20 + $0x1f4] sm:$0xff] %v4142_v33  ;;  %s4150_s20 = scalar_lea.vmem %s8706_s29, %s4800_s13  }
 0x4f2 PF: > { %4153 = sbr.rel (%p3943_p6) target bundleno = 1362 (0x552), region = 143  ;;  %s4155_s28 = ssub.s32 (!%p3943_p6), %s8512_s10, %s8516_s24 }
 0x4f3   : > { %s4159_s21 = sshrl.u32 (!%p3943_p6), %s8512_s10, 3  ;;  %s8743_s23 = scalar_lea.vmem (!%p3943_p6), %s7356_s15, %s4155_s28 [#allocation3] }
 0x4f4   : > { %s8746_s30 = scalar_lea.vmem (!%p3943_p6), %s8510_s6, %s4155_s28  ;;  %5296 = sdivrem.u32 (!%p3943_p6), %s4159_s21, 12 }
 0x4fd   : > { %s8750_s8 = spop.drf %5296 }
 0x4fe   : > { %p4802_p12 = scmp.le.s32.totalorder %s8750_s8, 0 }
 0x4ff   : > { %s9323_s27 = smov (!%p4802_p12), %s8510_s6  ;;  %s9324_s5 = smov (!%p4802_p12), %s7356_s15 }
 0x500   : > { %4610 = sbr.rel (%p4802_p12) target bundleno = 1324 (0x52c), region = 319  ;;  %s8759_s22 = smov (!%p4802_p12), 0  }
 0x501   : > { %s8761_s14 = smov (!%p4802_p12), 0  }
 0x507 LB: >> { %v4173_v40 = vld [vmem:[%s5572_s5] sm:$0xff]  ;;  %v4175_v36 = vld [vmem:[%s5572_s5 + $0x8] sm:$0xff]  ;;  %v4177_v60 = vld [vmem:[%s5572_s5 + $0x10] sm:$0xff]  ;;  %s4317_s12 = sadd.s32 1, %s5576_s22  ;;  %s4167_s14 = sadd.s32 1, %s5580_s14   ;;  %s5580_s14 = sphi %s8761_s14, %s4167_s14   ;;  %s5576_s22 = sphi %s8759_s22, %s9328_s22   ;;  %s5572_s5 = sphi %s9324_s5, %s9327_s5   ;;  %s5568_s27 = sphi %s9323_s27, %s9326_s27  }
 0x508   : >> { %4174 = vst [vmem:[%s5568_s27] sm:$0xff] %v4173_v40  ;;  %4176 = vst [vmem:[%s5568_s27 + $0x8] sm:$0xff] %v4175_v36  ;;  %v4179_v50 = vld [vmem:[%s5572_s5 + $0x18] sm:$0xff]  ;;  %v4181_v23 = vld [vmem:[%s5572_s5 + $0x20] sm:$0xff]  ;;  %p8783_p13 = scmp.ge.s32.totalorder %s4317_s12, %s8750_s8  ;;  %p4166_p0 = scmp.ge.s32.totalorder %s4167_s14, %s8750_s8 }
 0x509   : >> { %4178 = vst [vmem:[%s5568_s27 + $0x10] sm:$0xff] %v4177_v60  ;;  %v4183_v27 = vld [vmem:[%s5572_s5 + $0x28] sm:$0xff]  ;;  %4180 = vst [vmem:[%s5568_s27 + $0x18] sm:$0xff] %v4179_v50  ;;  %v4185_v58 = vld [vmem:[%s5572_s5 + $0x30] sm:$0xff] }
 0x50a   : >> { %4182 = vst [vmem:[%s5568_s27 + $0x20] sm:$0xff] %v4181_v23  ;;  %4184 = vst [vmem:[%s5568_s27 + $0x28] sm:$0xff] %v4183_v27  ;;  %v4187_v18 = vld [vmem:[%s5572_s5 + $0x38] sm:$0xff]  ;;  %v4189_v30 = vld [vmem:[%s5572_s5 + $0x40] sm:$0xff]  ;;  %s9356_s12 = smov (%p8783_p13, %s4317_s12), 0 }
 0x50b   : >> { %4186 = vst [vmem:[%s5568_s27 + $0x30] sm:$0xff] %v4185_v58  ;;  %4188 = vst [vmem:[%s5568_s27 + $0x38] sm:$0xff] %v4187_v18  ;;  %v4191_v37 = vld [vmem:[%s5572_s5 + $0x48] sm:$0xff]  ;;  %v4193_v55 = vld [vmem:[%s5572_s5 + $0x50] sm:$0xff]  ;;  %s4320_s29 = smul.u32 96, %s9356_s12  ;;  %s9328_s22 = smov %s9356_s12 }
 0x50c   : >> { %4190 = vst [vmem:[%s5568_s27 + $0x40] sm:$0xff] %v4189_v30  ;;  %v4195_v14 = vld [vmem:[%s5572_s5 + $0x58] sm:$0xff]  ;;  %4198 = vst [vmem:[%s5568_s27 + $0x64] sm:$0xff] %v4189_v30  ;;  %v4205_v57 = vld [vmem:[%s5572_s5 + $0x60] sm:$0xff] }
 0x50d   : >> { %4192 = vst [vmem:[%s5568_s27 + $0x48] sm:$0xff] %v4191_v37  ;;  %4194 = vst [vmem:[%s5568_s27 + $0x50] sm:$0xff] %v4193_v55  ;;  %v4207_v53 = vld [vmem:[%s5572_s5 + $0x68] sm:$0xff]  ;;  %v4209_v10 = vld [vmem:[%s5572_s5 + $0x70] sm:$0xff]  ;;  %s8837_s0 = scalar_lea.vmem %s7356_s15, %s4320_s29 [#allocation3]   ;;  %s8840_s20 = scalar_lea.vmem %s8510_s6, %s4320_s29  }
 0x50e   : >> { %4196 = vst [vmem:[%s5568_s27 + $0x58] sm:$0xff] %v4195_v14  ;;  %4200 = vst [vmem:[%s5568_s27 + $0x6c] sm:$0xff] %v4191_v37  ;;  %v4211_v11 = vld [vmem:[%s5572_s5 + $0x78] sm:$0xff]  ;;  %v4213_v43 = vld [vmem:[%s5572_s5 + $0x80] sm:$0xff] }
 0x50f   : >> { %4202 = vst [vmem:[%s5568_s27 + $0x74] sm:$0xff] %v4193_v55  ;;  %4204 = vst [vmem:[%s5568_s27 + $0x7c] sm:$0xff] %v4195_v14  ;;  %v4215_v62 = vld [vmem:[%s5572_s5 + $0x88] sm:$0xff]  ;;  %v4217_v56 = vld [vmem:[%s5572_s5 + $0x90] sm:$0xff] }
 0x510   : >> { %4206 = vst [vmem:[%s5568_s27 + $0x84] sm:$0xff] %v4205_v57  ;;  %4208 = vst [vmem:[%s5568_s27 + $0x8c] sm:$0xff] %v4207_v53  ;;  %v4219_v2 = vld [vmem:[%s5572_s5 + $0x98] sm:$0xff]  ;;  %v4229_v39 = vld [vmem:[%s5572_s5 + $0xa0] sm:$0xff] }
 0x511   : >> { %4210 = vst [vmem:[%s5568_s27 + $0x94] sm:$0xff] %v4209_v10  ;;  %4212 = vst [vmem:[%s5568_s27 + $0x9c] sm:$0xff] %v4211_v11  ;;  %v4231_v31 = vld [vmem:[%s5572_s5 + $0xa8] sm:$0xff]  ;;  %v4233_v52 = vld [vmem:[%s5572_s5 + $0xb0] sm:$0xff] }
 0x512   : >> { %4214 = vst [vmem:[%s5568_s27 + $0xa4] sm:$0xff] %v4213_v43  ;;  %4216 = vst [vmem:[%s5568_s27 + $0xac] sm:$0xff] %v4215_v62  ;;  %v4235_v32 = vld [vmem:[%s5572_s5 + $0xb8] sm:$0xff]  ;;  %v4237_v8 = vld [vmem:[%s5572_s5 + $0xc0] sm:$0xff] }
 0x513   : >> { %4222 = vst [vmem:[%s5568_s27 + $0xc8] sm:$0xff] %v4213_v43  ;;  %4224 = vst [vmem:[%s5568_s27 + $0xd0] sm:$0xff] %v4215_v62  ;;  %v4239_v29 = vld [vmem:[%s5572_s5 + $0xc8] sm:$0xff]  ;;  %v4241_v54 = vld [vmem:[%s5572_s5 + $0xd0] sm:$0xff] }
 0x514   : >> { %4218 = vst [vmem:[%s5568_s27 + $0xb4] sm:$0xff] %v4217_v56  ;;  %4220 = vst [vmem:[%s5568_s27 + $0xbc] sm:$0xff] %v4219_v2  ;;  %v4243_v17 = vld [vmem:[%s5572_s5 + $0xd8] sm:$0xff]  ;;  %v4253_v26 = vld [vmem:[%s5572_s5 + $0xe0] sm:$0xff] }
 0x515   : >> { %4226 = vst [vmem:[%s5568_s27 + $0xd8] sm:$0xff] %v4217_v56  ;;  %4228 = vst [vmem:[%s5568_s27 + $0xe0] sm:$0xff] %v4219_v2  ;;  %v4255_v61 = vld [vmem:[%s5572_s5 + $0xe8] sm:$0xff]  ;;  %v4257_v38 = vld [vmem:[%s5572_s5 + $0xf0] sm:$0xff] }
 0x516   : >> { %4230 = vst [vmem:[%s5568_s27 + $0xe8] sm:$0xff] %v4229_v39  ;;  %4232 = vst [vmem:[%s5568_s27 + $0xf0] sm:$0xff] %v4231_v31  ;;  %v4259_v22 = vld [vmem:[%s5572_s5 + $0xf8] sm:$0xff]  ;;  %v4261_v15 = vld [vmem:[%s5572_s5 + $0x100] sm:$0xff] }
 0x517   : >> { %4234 = vst [vmem:[%s5568_s27 + $0xf8] sm:$0xff] %v4233_v52  ;;  %4236 = vst [vmem:[%s5568_s27 + $0x100] sm:$0xff] %v4235_v32  ;;  %v4263_v1 = vld [vmem:[%s5572_s5 + $0x108] sm:$0xff]  ;;  %v4265_v4 = vld [vmem:[%s5572_s5 + $0x110] sm:$0xff] }
 0x518   : >> { %4238 = vst [vmem:[%s5568_s27 + $0x108] sm:$0xff] %v4237_v8  ;;  %4240 = vst [vmem:[%s5568_s27 + $0x110] sm:$0xff] %v4239_v29  ;;  %v4267_v46 = vld [vmem:[%s5572_s5 + $0x118] sm:$0xff]  ;;  %v4277_v5 = vld [vmem:[%s5572_s5 + $0x120] sm:$0xff] }
 0x519   : >> { %4242 = vst [vmem:[%s5568_s27 + $0x118] sm:$0xff] %v4241_v54  ;;  %4246 = vst [vmem:[%s5568_s27 + $0x12c] sm:$0xff] %v4237_v8  ;;  %v4279_v28 = vld [vmem:[%s5572_s5 + $0x128] sm:$0xff]  ;;  %v4281_v51 = vld [vmem:[%s5572_s5 + $0x130] sm:$0xff] }
 0x51a   : >> { %4248 = vst [vmem:[%s5568_s27 + $0x134] sm:$0xff] %v4239_v29  ;;  %4250 = vst [vmem:[%s5568_s27 + $0x13c] sm:$0xff] %v4241_v54  ;;  %v4283_v42 = vld [vmem:[%s5572_s5 + $0x138] sm:$0xff]  ;;  %v4285_v6 = vld [vmem:[%s5572_s5 + $0x140] sm:$0xff] }
 0x51b   : >> { %4244 = vst [vmem:[%s5568_s27 + $0x120] sm:$0xff] %v4243_v17  ;;  %4252 = vst [vmem:[%s5568_s27 + $0x144] sm:$0xff] %v4243_v17  ;;  %v4287_v3 = vld [vmem:[%s5572_s5 + $0x148] sm:$0xff]  ;;  %v4289_v63 = vld [vmem:[%s5572_s5 + $0x150] sm:$0xff] }
 0x51c   : >> { %4254 = vst [vmem:[%s5568_s27 + $0x14c] sm:$0xff] %v4253_v26  ;;  %4256 = vst [vmem:[%s5568_s27 + $0x154] sm:$0xff] %v4255_v61  ;;  %v4291_v59 = vld [vmem:[%s5572_s5 + $0x158] sm:$0xff]  ;;  %v4301_v44 = vld [vmem:[%s5572_s5 + $0x160] sm:$0xff] }
 0x51d   : >> { %4258 = vst [vmem:[%s5568_s27 + $0x15c] sm:$0xff] %v4257_v38  ;;  %4260 = vst [vmem:[%s5568_s27 + $0x164] sm:$0xff] %v4259_v22  ;;  %v4303_v21 = vld [vmem:[%s5572_s5 + $0x168] sm:$0xff]  ;;  %v4305_v16 = vld [vmem:[%s5572_s5 + $0x170] sm:$0xff] }
 0x51e   : >> { %4262 = vst [vmem:[%s5568_s27 + $0x16c] sm:$0xff] %v4261_v15  ;;  %4270 = vst [vmem:[%s5568_s27 + $0x190] sm:$0xff] %v4261_v15  ;;  %v4307_v47 = vld [vmem:[%s5572_s5 + $0x178] sm:$0xff]  ;;  %v4309_v19 = vld [vmem:[%s5572_s5 + $0x180] sm:$0xff] }
 0x51f   : >> { %4264 = vst [vmem:[%s5568_s27 + $0x174] sm:$0xff] %v4263_v1  ;;  %4266 = vst [vmem:[%s5568_s27 + $0x17c] sm:$0xff] %v4265_v4  ;;  %v4311_v49 = vld [vmem:[%s5572_s5 + $0x188] sm:$0xff]  ;;  %v4313_v34 = vld [vmem:[%s5572_s5 + $0x190] sm:$0xff] }
 0x520   : >> { %4268 = vst [vmem:[%s5568_s27 + $0x184] sm:$0xff] %v4267_v46  ;;  %4272 = vst [vmem:[%s5568_s27 + $0x198] sm:$0xff] %v4263_v1  ;;  %v4315_v12 = vld [vmem:[%s5572_s5 + $0x198] sm:$0xff]  ;;  %s9327_s5 = smov %s8837_s0 }
 0x521   : >> { %4274 = vst [vmem:[%s5568_s27 + $0x1a0] sm:$0xff] %v4265_v4  ;;  %4276 = vst [vmem:[%s5568_s27 + $0x1a8] sm:$0xff] %v4267_v46 }
 0x522   : >> { %4278 = vst [vmem:[%s5568_s27 + $0x1b0] sm:$0xff] %v4277_v5  ;;  %4280 = vst [vmem:[%s5568_s27 + $0x1b8] sm:$0xff] %v4279_v28 }
 0x523   : >> { %4282 = vst [vmem:[%s5568_s27 + $0x1c0] sm:$0xff] %v4281_v51  ;;  %4284 = vst [vmem:[%s5568_s27 + $0x1c8] sm:$0xff] %v4283_v42 }
 0x524   : >> { %4286 = vst [vmem:[%s5568_s27 + $0x1d0] sm:$0xff] %v4285_v6  ;;  %4288 = vst [vmem:[%s5568_s27 + $0x1d8] sm:$0xff] %v4287_v3 }
 0x525   : >> { %4294 = vst [vmem:[%s5568_s27 + $0x1f4] sm:$0xff] %v4285_v6  ;;  %4296 = vst [vmem:[%s5568_s27 + $0x1fc] sm:$0xff] %v4287_v3  ;;  %4169 = sbr.rel (!%p4166_p0) target bundleno = 1287 (0x507), region = 325 }
 0x526   : >> { %4290 = vst [vmem:[%s5568_s27 + $0x1e0] sm:$0xff] %v4289_v63  ;;  %4292 = vst [vmem:[%s5568_s27 + $0x1e8] sm:$0xff] %v4291_v59 }
 0x527   : >> { %4298 = vst [vmem:[%s5568_s27 + $0x204] sm:$0xff] %v4289_v63  ;;  %4300 = vst [vmem:[%s5568_s27 + $0x20c] sm:$0xff] %v4291_v59 }
 0x528   : >> { %4302 = vst [vmem:[%s5568_s27 + $0x214] sm:$0xff] %v4301_v44  ;;  %4304 = vst [vmem:[%s5568_s27 + $0x21c] sm:$0xff] %v4303_v21 }
 0x529   : >> { %4306 = vst [vmem:[%s5568_s27 + $0x224] sm:$0xff] %v4305_v16  ;;  %4308 = vst [vmem:[%s5568_s27 + $0x22c] sm:$0xff] %v4307_v47 }
 0x52a   : >> { %4310 = vst [vmem:[%s5568_s27 + $0x234] sm:$0xff] %v4309_v19  ;;  %4312 = vst [vmem:[%s5568_s27 + $0x23c] sm:$0xff] %v4311_v49 }
 0x52b   : >> { %4314 = vst [vmem:[%s5568_s27 + $0x244] sm:$0xff] %v4313_v34  ;;  %4316 = vst [vmem:[%s5568_s27 + $0x24c] sm:$0xff] %v4315_v12  ;;  %s9326_s27 = smov %s8840_s20 }
 0x52c PF: > { %5298 = sdivrem.u32 %s4159_s21, 12 }
 0x52d   : > { %s4803_s11 = smul.u32 1536, %s8750_s8 }
 0x52f   : > { %s4328_s9 = sshra.s32 %s4803_s11, 4 }
 0x530   : > { %s8930_s17 = scalar_lea.vmem %s7356_s15, %s4328_s9 [#allocation3]   ;;  %s8933_s7 = scalar_lea.vmem %s8510_s6, %s4328_s9  }
 0x535   : > { %s8935_s13 = spop.drf %5298 }
 0x536   : > { %p4805_p1 = scmp.le.s32.totalorder %s8935_s13, 0 }
 0x537   : > { %s9329_s28 = smov (!%p4805_p1), %s8933_s7  ;;  %s9330_s27 = smov (!%p4805_p1), %s8930_s17 }
 0x538   : > { %4624 = sbr.rel (%p4805_p1) target bundleno = 1353 (0x549), region = 330  ;;  %s8944_s5 = smov (!%p4805_p1), 0  }
 0x539   : > { %s8946_s21 = smov (!%p4805_p1), 0  }
 0x53f LB: >> { %v4344_v24 = vld [vmem:[%s5588_s27] sm:$0xff]  ;;  %s4356_s8 = sadd.s32 1, %s5592_s5  ;;  %s4338_s21 = sadd.s32 1, %s5596_s21   ;;  %s5596_s21 = sphi %s8946_s21, %s4338_s21   ;;  %s5592_s5 = sphi %s8944_s5, %s9331_s5   ;;  %s5588_s27 = sphi %s9330_s27, %s4361_s27   ;;  %s5584_s28 = sphi %s9329_s28, %s4362_s28  }
 0x540   : >> { %v4346_v41 = vld [vmem:[%s5588_s27 + $0x40] sm:$0xff]  ;;  %4345 = vst [vmem:[%s5584_s28] sm:$0xff] %v4344_v24  ;;  %p4357_p2 = scmp.ge.s32.totalorder %s4356_s8, %s8935_s13  ;;  %p4337_p3 = scmp.ge.s32.totalorder %s4338_s21, %s8935_s13 }
 0x541   : >> { %v4348_v9 = vld [vmem:[%s5588_s27 + $0x80] sm:$0xff]  ;;  %4347 = vst [vmem:[%s5584_s28 + $0x64] sm:$0xff] %v4346_v41 }
 0x542   : >> { %4349 = vst [vmem:[%s5584_s28 + $0xc8] sm:$0xff] %v4348_v9  ;;  %v4350_v48 = vld [vmem:[%s5588_s27 + $0xc0] sm:$0xff]  ;;  %s9358_s8 = smov (%p4357_p2, %s4356_s8), 0  ;;  %4340 = sbr.rel (!%p4337_p3) target bundleno = 1343 (0x53f), region = 336 }
 0x543   : >> { %v4352_v0 = vld [vmem:[%s5588_s27 + $0x100] sm:$0xff]  ;;  %4351 = vst [vmem:[%s5584_s28 + $0x12c] sm:$0xff] %v4350_v48  ;;  %s4806_s22 = sshll.u32 %s9358_s8, 3  ;;  %s9331_s5 = smov %s9358_s8 }
 0x544   : >> { %v4354_v7 = vld [vmem:[%s5588_s27 + $0x140] sm:$0xff]  ;;  %4353 = vst [vmem:[%s5584_s28 + $0x190] sm:$0xff] %v4352_v0  ;;  %s4361_s27 = scalar_lea.vmem %s8930_s17, %s4806_s22 [#allocation3]  }
 0x545   : >> { %4355 = vst [vmem:[%s5584_s28 + $0x1f4] sm:$0xff] %v4354_v7  ;;  %s4362_s28 = scalar_lea.vmem %s8933_s7, %s4806_s22  }
 0x549 PF: > { %s5602_s14 = smov 0  }
 0x54a   : > { %s4363_s12 = sshllo.u32 %s5602_s14, %s8516_s24 }
 0x54b   : > { %v4372_v20 = vld [vmem:[%s8743_s23] sm:%s4363_s12] }
 0x54c   : > { %v4374_v45 = vld [vmem:[%s8743_s23 + $0x40] sm:%s4363_s12]  ;;  %4373 = vst [vmem:[%s8746_s30] sm:%s4363_s12] %v4372_v20 }
 0x54d   : > { %4375 = vst [vmem:[%s8746_s30 + $0x64] sm:%s4363_s12] %v4374_v45  ;;  %v4376_v25 = vld [vmem:[%s8743_s23 + $0x80] sm:%s4363_s12] }
 0x54e   : > { %v4378_v13 = vld [vmem:[%s8743_s23 + $0xc0] sm:%s4363_s12]  ;;  %4377 = vst [vmem:[%s8746_s30 + $0xc8] sm:%s4363_s12] %v4376_v25 }
 0x54f   : > { %4379 = vst [vmem:[%s8746_s30 + $0x12c] sm:%s4363_s12] %v4378_v13  ;;  %v4380_v35 = vld [vmem:[%s8743_s23 + $0x100] sm:%s4363_s12] }
 0x550   : > { %v4382_v33 = vld [vmem:[%s8743_s23 + $0x140] sm:%s4363_s12]  ;;  %4381 = vst [vmem:[%s8746_s30 + $0x190] sm:%s4363_s12] %v4380_v35 }
 0x551   : > { %4383 = vst [vmem:[%s8746_s30 + $0x1f4] sm:%s4363_s12] %v4382_v33 }
 0x552 PF: > { %p4808_p6 = scmp.ge.u32.totalorder %s8512_s10, 8 }
 0x553   : > { %s5603_s26 = smov (!%p4808_p6), 0  }
 0x554   : > { %3920 = sbr.rel (%p4808_p6) target bundleno = 1372 (0x55c), region = 114  ;;  %s3921_s24 = sshllo.u32 (!%p4808_p6), %s5603_s26, %s8512_s10 }
 0x555   : > { %v3930_v40 = vld [vmem:[%s7356_s15] sm:%s3921_s24] (!%p4808_p6) }
 0x556   : > { %v3932_v36 = vld [vmem:[%s7356_s15 + $0x40] sm:%s3921_s24] (!%p4808_p6)  ;;  %3931 = vst [vmem:[%s8510_s6] sm:%s3921_s24] (!%p4808_p6), %v3930_v40 }
 0x557   : > { %3933 = vst [vmem:[%s8510_s6 + $0x64] sm:%s3921_s24] (!%p4808_p6), %v3932_v36  ;;  %v3934_v60 = vld [vmem:[%s7356_s15 + $0x80] sm:%s3921_s24] (!%p4808_p6) }
 0x558   : > { %v3936_v50 = vld [vmem:[%s7356_s15 + $0xc0] sm:%s3921_s24] (!%p4808_p6)  ;;  %3935 = vst [vmem:[%s8510_s6 + $0xc8] sm:%s3921_s24] (!%p4808_p6), %v3934_v60 }
 0x559   : > { %3937 = vst [vmem:[%s8510_s6 + $0x12c] sm:%s3921_s24] (!%p4808_p6), %v3936_v50  ;;  %v3938_v23 = vld [vmem:[%s7356_s15 + $0x100] sm:%s3921_s24] (!%p4808_p6) }
 0x55a   : > { %v3940_v27 = vld [vmem:[%s7356_s15 + $0x140] sm:%s3921_s24] (!%p4808_p6)  ;;  %3939 = vst [vmem:[%s8510_s6 + $0x190] sm:%s3921_s24] (!%p4808_p6), %v3938_v23 }
 0x55b   : > { %3941 = vst [vmem:[%s8510_s6 + $0x1f4] sm:%s3921_s24] %v3940_v27 }
 0x55c PF: > { %s15_s19 = sadd.s32 1, %s5468_s19   ;;  %s9332_s10 = sld [smem:[#allocation4_spill]] }
 0x55d   : > { %p12_p4 = scmp.ge.s32.totalorder %s15_s19, 4   ;;  %s9333_s15 = smov %s5456_s16 }
 0x55e   : > { %s9334_s16 = smov %s5669_s25  ;;  %s9335_s17 = smov %s5464_s18 }
 0x55f   :  { %14 = sbr.rel (!%p12_p4) target bundleno = 5 (0x5), region = 347 }
 0x562   : > { %s9336_s18 = smov %s9332_s10 }

</bundles_post_ra>
